<compile_context>
chip_gen: v7x
topology: tpu7x:2x2x1
jax: 0.10.0
libtpu: 0.0.40
codegen_flags: <defaults>
</compile_context>

<pallas_src>
import functools

import jax
import jax.numpy as jnp
from jax.experimental import pallas as pl
from jax.experimental.pallas import tpu as pltpu


def _full_spec(shape):
    # Whole-array VMEM block (grid=() -> a single program instance).
    return pl.BlockSpec(shape, lambda: tuple(0 for _ in shape))


# ----------------------------------------------------------------------------
# Fused kernel: one rectified-flow training-loss forward + EMA(W1, W2)
#   x_t   = noise + t * (data - noise)
#   h     = relu(x_t @ W1 + b1 + t * wt)      (additive time conditioning)
#   pred  = h @ W2 + b2
#   loss  = mean((pred - flow)^2) over the *real* batch rows
#   ema_W <- decay * ema_W + (1 - decay) * W
# ----------------------------------------------------------------------------
def rf_step_kernel(data_ref, noise_ref, t_ref,
                   w1_ref, b1_ref, wt_ref, w2_ref, b2_ref,
                   ema_w1_ref, ema_w2_ref,
                   loss_ref, pred_ref, ema_w1_out_ref, ema_w2_out_ref,
                   *, valid_rows, ema_decay):
    data = data_ref[...]            # (M, D) f32, rows >= valid_rows are zero pad
    noise = noise_ref[...]          # (M, D) f32
    t = t_ref[...]                  # (M, 1) f32, broadcasts over D / H

    flow = data - noise             # target velocity (f32)
    x_t = noise + t * flow          # linear interpolation at time t

    w1 = w1_ref[...]                # (D, H) f32 master weights
    w2 = w2_ref[...]                # (H, D) f32

    # --- velocity MLP: bf16 MXU matmuls with f32 accumulation ----------------
    h = jnp.dot(x_t.astype(jnp.bfloat16), w1.astype(jnp.bfloat16),
                preferred_element_type=jnp.float32)
    h = jnp.maximum(h + b1_ref[...] + t * wt_ref[...], 0.0)

    pred = jnp.dot(h.astype(jnp.bfloat16), w2.astype(jnp.bfloat16),
                   preferred_element_type=jnp.float32)
    pred = pred + b2_ref[...]
    pred_ref[...] = pred

    # --- masked MSE over the real batch rows only (f32) ----------------------
    diff = pred - flow
    sq = diff * diff
    m_rows, d_cols = sq.shape
    if valid_rows < m_rows:         # trace-time branch: no masking when no pad
        row = jax.lax.broadcasted_iota(jnp.int32, sq.shape, 0)
        sq = jnp.where(row < valid_rows, sq, 0.0)
    denom = float(valid_rows) * float(d_cols)
    loss_ref[0, 0] = jnp.sum(sq) * (1.0 / denom)     # SMEM scalar output

    # --- fused EMA update (ema_model.update()); W1/W2 already in VMEM --------
    ema_w1_out_ref[...] = ema_w1_ref[...] * ema_decay + w1 * (1.0 - ema_decay)
    ema_w2_out_ref[...] = ema_w2_ref[...] * ema_decay + w2 * (1.0 - ema_decay)


def rectified_flow_train_step(data_flat, noise_flat, t, params, ema_params,
                              *, ema_decay=0.999, row_pad=16):
    B, D = data_flat.shape
    H = params["w1"].shape[1]

    # Pad batch rows up to the bf16 sublane edge (multiple of 16). Padded rows
    # are zero and are masked out of the loss inside the kernel, so the loss is
    # still the exact mean over the real batch.
    M = ((B + row_pad - 1) // row_pad) * row_pad
    pad = M - B
    if pad:
        data_p = jnp.pad(data_flat, ((0, pad), (0, 0)))
        noise_p = jnp.pad(noise_flat, ((0, pad), (0, 0)))
        t_p = jnp.pad(t, ((0, pad), (0, 0)))
    else:
        data_p, noise_p, t_p = data_flat, noise_flat, t

    kernel = functools.partial(rf_step_kernel, valid_rows=B, ema_decay=ema_decay)

    loss, pred, new_ema_w1, new_ema_w2 = pl.pallas_call(
        kernel,
        out_shape=(
            jax.ShapeDtypeStruct((1, 1), jnp.float32),   # loss (SMEM scalar)
            jax.ShapeDtypeStruct((M, D), jnp.float32),   # pred (incl. pad rows)
            jax.ShapeDtypeStruct((D, H), jnp.float32),   # new ema W1
            jax.ShapeDtypeStruct((H, D), jnp.float32),   # new ema W2
        ),
        grid=(),
        in_specs=[
            _full_spec((M, D)),   # data
            _full_spec((M, D)),   # noise
            _full_spec((M, 1)),   # t
            _full_spec((D, H)),   # W1
            _full_spec((1, H)),   # b1
            _full_spec((1, H)),   # wt
            _full_spec((H, D)),   # W2
            _full_spec((1, D)),   # b2
            _full_spec((D, H)),   # ema W1
            _full_spec((H, D)),   # ema W2
        ],
        out_specs=(
            pl.BlockSpec(memory_space=pltpu.MemorySpace.SMEM),   # scalar loss
            _full_spec((M, D)),
            _full_spec((D, H)),
            _full_spec((H, D)),
        ),
        input_output_aliases={8: 2, 9: 3},   # EMA buffers updated in place
        compiler_params=pltpu.CompilerParams(
            vmem_limit_bytes=32 * 1024 * 1024),
    )(data_p, noise_p, t_p,
      params["w1"], params["b1"], params["wt"], params["w2"], params["b2"],
      ema_params["w1"], ema_params["w2"])

    return loss[0, 0], pred[:B], new_ema_w1, new_ema_w2


# ----------------------------------------------------------------------------
# Trainer-style forward: one training step's loss forward + EMA update
# ----------------------------------------------------------------------------
def trainer_step(data_nchw, noise_nchw, t, params, ema_params):
    B, C, Hs, Ws = data_nchw.shape
    D = C * Hs * Ws
    data_flat = data_nchw.reshape(B, D)
    noise_flat = noise_nchw.reshape(B, D)

    loss, pred_flat, new_ema_w1, new_ema_w2 = rectified_flow_train_step(
        data_flat, noise_flat, t, params, ema_params)

    pred = pred_flat.reshape(B, C, Hs, Ws)
    return loss, pred, {"w1": new_ema_w1, "w2": new_ema_w2}


# ----------------------------------------------------------------------------
# Pure-JAX reference (same bf16-matmul / f32-accumulation recipe) for checking
# ----------------------------------------------------------------------------
def _reference(data_flat, noise_flat, t, params, ema_params, ema_decay=0.999):
    flow = data_flat - noise_flat
    x_t = noise_flat + t * flow
    h = jnp.dot(x_t.astype(jnp.bfloat16), params["w1"].astype(jnp.bfloat16),
                preferred_element_type=jnp.float32)
    h = jnp.maximum(h + params["b1"] + t * params["wt"], 0.0)
    pred = jnp.dot(h.astype(jnp.bfloat16), params["w2"].astype(jnp.bfloat16),
                   preferred_element_type=jnp.float32) + params["b2"]
    loss = jnp.mean((pred - flow) ** 2)
    ema_w1 = ema_params["w1"] * ema_decay + params["w1"] * (1.0 - ema_decay)
    ema_w2 = ema_params["w2"] * ema_decay + params["w2"] * (1.0 - ema_decay)
    return loss, pred, ema_w1, ema_w2


if __name__ == "__main__":
    key = jax.random.PRNGKey(0)

    # Small shapes consistent with an image-training setup.
    B, C, Hs, Ws = 8, 4, 16, 16          # batch, channels, spatial
    D = C * Hs * Ws                      # 1024 flattened features
    HID = 256                            # hidden width (v6e/v7x MXU edge)

    k_data, k_noise, k_t, k_w1, k_w2 = jax.random.split(key, 5)

    data = jax.random.uniform(k_data, (B, C, Hs, Ws), dtype=jnp.float32)   # "images"
    noise = jax.random.normal(k_noise, (B, C, Hs, Ws), dtype=jnp.float32)  # x0 noise
    t = jax.random.uniform(k_t, (B, 1), dtype=jnp.float32)                 # times

    # Deterministic synthetic velocity-predictor parameters (f32 masters).
    params = dict(
        w1=jax.random.normal(k_w1, (D, HID), dtype=jnp.float32) * 0.02,
        b1=jnp.zeros((1, HID), dtype=jnp.float32),
        wt=jnp.full((1, HID), 0.1, dtype=jnp.float32),
        w2=jax.random.normal(k_w2, (HID, D), dtype=jnp.float32) * 0.02,
        b2=jnp.zeros((1, D), dtype=jnp.float32),
    )
    ema_params = dict(w1=params["w1"] * 0.5, w2=params["w2"] * 0.5)

    loss, pred, new_ema = trainer_step(data, noise, t, params, ema_params)
    jax.block_until_ready((loss, pred, new_ema["w1"], new_ema["w2"]))

    ref_loss, ref_pred, ref_ema_w1, ref_ema_w2 = _reference(
        data.reshape(B, D), noise.reshape(B, D), t, params, ema_params)

    assert pred.shape == (B, C, Hs, Ws)
    assert new_ema["w1"].shape == (D, HID) and new_ema["w2"].shape == (HID, D)
    assert jnp.isfinite(loss)
    assert jnp.allclose(loss, ref_loss, rtol=1e-2, atol=1e-3)
    assert jnp.allclose(pred.reshape(B, D), ref_pred, rtol=1e-2, atol=1e-2)
    assert jnp.allclose(new_ema["w1"], ref_ema_w1, atol=1e-6)
    assert jnp.allclose(new_ema["w2"], ref_ema_w2, atol=1e-6)

    print("KERNEL_OK")
</pallas_src>

<mosaic_0001>
module attributes {stable_mosaic.version = 11 : i64} {
  func.func @rf_step_kernel(%arg0: memref<16x1024xf32, #tpu.memory_space<vmem>>, %arg1: memref<16x1024xf32, #tpu.memory_space<vmem>>, %arg2: memref<16x1xf32, #tpu.memory_space<vmem>>, %arg3: memref<1024x256xf32, #tpu.memory_space<vmem>>, %arg4: memref<1x256xf32, #tpu.memory_space<vmem>>, %arg5: memref<1x256xf32, #tpu.memory_space<vmem>>, %arg6: memref<256x1024xf32, #tpu.memory_space<vmem>>, %arg7: memref<1x1024xf32, #tpu.memory_space<vmem>>, %arg8: memref<1024x256xf32, #tpu.memory_space<vmem>>, %arg9: memref<256x1024xf32, #tpu.memory_space<vmem>>, %arg10: memref<1x1xf32, #tpu.memory_space<smem>>, %arg11: memref<16x1024xf32, #tpu.memory_space<vmem>>, %arg12: memref<1024x256xf32, #tpu.memory_space<vmem>>, %arg13: memref<256x1024xf32, #tpu.memory_space<vmem>>) attributes {dimension_semantics = [], scalar_prefetch = 0 : i64, scratch_operands = 0 : i64, tpu.core_type = #tpu.core_type<tc>} {
    %c0 = arith.constant 0 : index
    %c0_0 = arith.constant 0 : index
    %0 = vector.load %arg0[%c0, %c0_0] : memref<16x1024xf32, #tpu.memory_space<vmem>>, vector<16x1024xf32>
    %c0_1 = arith.constant 0 : index
    %c0_2 = arith.constant 0 : index
    %1 = vector.load %arg1[%c0_1, %c0_2] : memref<16x1024xf32, #tpu.memory_space<vmem>>, vector<16x1024xf32>
    %c0_3 = arith.constant 0 : index
    %c0_4 = arith.constant 0 : index
    %2 = vector.load %arg2[%c0_3, %c0_4] : memref<16x1xf32, #tpu.memory_space<vmem>>, vector<16x1xf32>
    %3 = arith.subf %0, %1 : vector<16x1024xf32>
    %4 = vector.broadcast %2 : vector<16x1xf32> to vector<16x1024xf32>
    %5 = arith.mulf %4, %3 : vector<16x1024xf32>
    %6 = arith.addf %1, %5 : vector<16x1024xf32>
    %c0_5 = arith.constant 0 : index
    %c0_6 = arith.constant 0 : index
    %7 = vector.load %arg3[%c0_5, %c0_6] : memref<1024x256xf32, #tpu.memory_space<vmem>>, vector<1024x256xf32>
    %c0_7 = arith.constant 0 : index
    %c0_8 = arith.constant 0 : index
    %8 = vector.load %arg6[%c0_7, %c0_8] : memref<256x1024xf32, #tpu.memory_space<vmem>>, vector<256x1024xf32>
    %9 = arith.truncf %6 : vector<16x1024xf32> to vector<16x1024xbf16>
    %10 = arith.truncf %7 : vector<1024x256xf32> to vector<1024x256xbf16>
    %cst = arith.constant dense<0.000000e+00> : vector<16x256xf32>
    %11 = tpu.matmul %9, %10, %cst {dimension_numbers = #tpu.dot_dimension_numbers<[1], [0], [0], [1], [0, 0, 1, 1], [], []>} : vector<16x1024xbf16>, vector<1024x256xbf16>, vector<16x256xf32> -> vector<16x256xf32>
    %c0_9 = arith.constant 0 : index
    %c0_10 = arith.constant 0 : index
    %12 = vector.load %arg4[%c0_9, %c0_10] : memref<1x256xf32, #tpu.memory_space<vmem>>, vector<1x256xf32>
    %13 = vector.broadcast %12 : vector<1x256xf32> to vector<16x256xf32>
    %14 = arith.addf %11, %13 : vector<16x256xf32>
    %c0_11 = arith.constant 0 : index
    %c0_12 = arith.constant 0 : index
    %15 = vector.load %arg5[%c0_11, %c0_12] : memref<1x256xf32, #tpu.memory_space<vmem>>, vector<1x256xf32>
    %16 = vector.broadcast %2 : vector<16x1xf32> to vector<16x256xf32>
    %17 = vector.broadcast %15 : vector<1x256xf32> to vector<16x256xf32>
    %18 = arith.mulf %16, %17 : vector<16x256xf32>
    %19 = arith.addf %14, %18 : vector<16x256xf32>
    %cst_13 = arith.constant 0.000000e+00 : f32
    %20 = vector.broadcast %cst_13 : f32 to vector<16x256xf32>
    %21 = arith.maximumf %19, %20 : vector<16x256xf32>
    %22 = arith.truncf %21 : vector<16x256xf32> to vector<16x256xbf16>
    %23 = arith.truncf %8 : vector<256x1024xf32> to vector<256x1024xbf16>
    %cst_14 = arith.constant dense<0.000000e+00> : vector<16x1024xf32>
    %24 = tpu.matmul %22, %23, %cst_14 {dimension_numbers = #tpu.dot_dimension_numbers<[1], [0], [0], [1], [0, 0, 1, 1], [], []>} : vector<16x256xbf16>, vector<256x1024xbf16>, vector<16x1024xf32> -> vector<16x1024xf32>
    %c0_15 = arith.constant 0 : index
    %c0_16 = arith.constant 0 : index
    %25 = vector.load %arg7[%c0_15, %c0_16] : memref<1x1024xf32, #tpu.memory_space<vmem>>, vector<1x1024xf32>
    %26 = vector.broadcast %25 : vector<1x1024xf32> to vector<16x1024xf32>
    %27 = arith.addf %24, %26 : vector<16x1024xf32>
    %c0_17 = arith.constant 0 : index
    %c0_18 = arith.constant 0 : index
    %28 = vector.load %arg11[%c0_17, %c0_18] : memref<16x1024xf32, #tpu.memory_space<vmem>>, vector<16x1024xf32>
    tpu.vector_store %arg11[%c0_17, %c0_18], %27 {strides = array<i32>} : memref<16x1024xf32, #tpu.memory_space<vmem>>, vector<16x1024xf32>,
    %29 = arith.subf %27, %3 : vector<16x1024xf32>
    %30 = arith.mulf %29, %29 : vector<16x1024xf32>
    %31 = tpu.iota {dimensions = array<i32: 0>} : vector<16x1024xi32>
    %c8_i32 = arith.constant 8 : i32
    %32 = vector.broadcast %c8_i32 : i32 to vector<16x1024xi32>
    %33 = arith.cmpi slt, %31, %32 : vector<16x1024xi32>
    %cst_19 = arith.constant 0.000000e+00 : f32
    %34 = vector.broadcast %cst_19 : f32 to vector<16x1024xf32>
    %35 = arith.select %33, %30, %34 : vector<16x1024xi1>, vector<16x1024xf32>
    %36 = vector.shape_cast %35 : vector<16x1024xf32> to vector<1x16x1024xf32>
    %cst_20 = arith.constant dense<0.000000e+00> : vector<1xf32>
    %37 = vector.multi_reduction <add>, %36, %cst_20 [1, 2] : vector<1x16x1024xf32> to vector<1xf32>
    %38 = vector.shape_cast %37 : vector<1xf32> to vector<1x1x1xf32>
    %39 = vector.extract %38[0, 0, 0] : f32 from vector<1x1x1xf32>
    %cst_21 = arith.constant 1.22070313E-4 : f32
    %40 = arith.mulf %39, %cst_21 : f32
    %c0_22 = arith.constant 0 : index
    %c0_23 = arith.constant 0 : index
    %41 = memref.load %arg10[%c0_22, %c0_23] : memref<1x1xf32, #tpu.memory_space<smem>>
    memref.store %40, %arg10[%c0_22, %c0_23] : memref<1x1xf32, #tpu.memory_space<smem>>
    %c0_24 = arith.constant 0 : index
    %c0_25 = arith.constant 0 : index
    %42 = vector.load %arg8[%c0_24, %c0_25] : memref<1024x256xf32, #tpu.memory_space<vmem>>, vector<1024x256xf32>
    %cst_26 = arith.constant 9.990000e-01 : f32
    %43 = vector.broadcast %cst_26 : f32 to vector<1024x256xf32>
    %44 = arith.mulf %42, %43 : vector<1024x256xf32>
    %cst_27 = arith.constant 1.000000e-03 : f32
    %45 = vector.broadcast %cst_27 : f32 to vector<1024x256xf32>
    %46 = arith.mulf %7, %45 : vector<1024x256xf32>
    %47 = arith.addf %44, %46 : vector<1024x256xf32>
    %c0_28 = arith.constant 0 : index
    %c0_29 = arith.constant 0 : index
    %48 = vector.load %arg12[%c0_28, %c0_29] : memref<1024x256xf32, #tpu.memory_space<vmem>>, vector<1024x256xf32>
    tpu.vector_store %arg12[%c0_28, %c0_29], %47 {strides = array<i32>} : memref<1024x256xf32, #tpu.memory_space<vmem>>, vector<1024x256xf32>,
    %c0_30 = arith.constant 0 : index
    %c0_31 = arith.constant 0 : index
    %49 = vector.load %arg9[%c0_30, %c0_31] : memref<256x1024xf32, #tpu.memory_space<vmem>>, vector<256x1024xf32>
    %cst_32 = arith.constant 9.990000e-01 : f32
    %50 = vector.broadcast %cst_32 : f32 to vector<256x1024xf32>
    %51 = arith.mulf %49, %50 : vector<256x1024xf32>
    %cst_33 = arith.constant 1.000000e-03 : f32
    %52 = vector.broadcast %cst_33 : f32 to vector<256x1024xf32>
    %53 = arith.mulf %8, %52 : vector<256x1024xf32>
    %54 = arith.addf %51, %53 : vector<256x1024xf32>
    %c0_34 = arith.constant 0 : index
    %c0_35 = arith.constant 0 : index
    %55 = vector.load %arg13[%c0_34, %c0_35] : memref<256x1024xf32, #tpu.memory_space<vmem>>, vector<256x1024xf32>
    tpu.vector_store %arg13[%c0_34, %c0_35], %54 {strides = array<i32>} : memref<256x1024xf32, #tpu.memory_space<vmem>>, vector<256x1024xf32>,
    return
  }
}

</mosaic_0001>

<bundles_post_ra>
// kernel: tpu_custom_call.1
= control target key start
LH: loop header
LB: loop body
LE: loop exit
PB: predicated region body
PF: predicated region fallthrough
CT: control target
= control target key end

     0   :  { %19 = vsyncpa [#allocation3], 0  ;;  %s8272_s0 = inlined_call_operand.vmem [shape: f32[16,1024], index: 0, kind: input, shape index: {}]   ;;  %s8273_s1 = inlined_call_operand.vmem [shape: f32[16,1024], index: 1, kind: input, shape index: {}]   ;;  %s8274_s2 = inlined_call_operand.vmem [shape: f32[16,1], index: 2, kind: input, shape index: {}]   ;;  %s8275_s3 = inlined_call_operand.vmem [shape: f32[1024,256], index: 3, kind: input, shape index: {}]   ;;  %s8276_s4 = inlined_call_operand.vmem [shape: f32[1,256], index: 4, kind: input, shape index: {}]   ;;  %s8277_s5 = inlined_call_operand.vmem [shape: f32[1,256], index: 5, kind: input, shape index: {}]   ;;  %s8278_s6 = inlined_call_operand.vmem [shape: f32[256,1024], index: 6, kind: input, shape index: {}]   ;;  %s8279_s7 = inlined_call_operand.vmem [shape: f32[1,1024], index: 7, kind: input, shape index: {}]   ;;  %s8280_s8 = inlined_call_operand.hbm [shape: f32[1024,256], index: 8, kind: input, shape index: {}, may-alias: {8,12}]   ;;  %s8281_s9 = inlined_call_operand.hbm [shape: f32[256,1024], index: 9, kind: input, shape index: {}, may-alias: {9,13}]   ;;  %s8282_s10 = inlined_call_operand.hbm [shape: f32[1,1], index: 10, kind: output, shape index: {0}]   ;;  %s8283_s11 = inlined_call_operand.hbm [shape: f32[16,1024], index: 11, kind: output, shape index: {1}]   ;;  %s8284_s12 = inlined_call_operand.hbm [shape: f32[1024,256], index: 12, kind: output, shape index: {2}, may-alias: {8,12}]   ;;  %s8285_s13 = inlined_call_operand.hbm [shape: f32[256,1024], index: 13, kind: output, shape index: {3}, may-alias: {9,13}]  }
   0x1   :  { %20 = vsyncpa [#allocation7], 0 }
   0x2   :  { %21 = vsyncpa [#allocation5], 0 }
   0x3   :  { %22 = vsyncpa [#allocation4], 0 }
   0x4   :  { %23 = vsyncpa [#allocation11], 0  ;;  %s4240_s25 = smov [#allocation2]   ;;  %s4110_s29 = scalar_lea.hbm %s8280_s8, 32768 }
   0x5   :  { %s45_s26 = sshll.u32 %s4240_s25, 4  ;;  %p4111_p0 = scmp.ne.s32.totalorder %s8280_s8, %s4110_s29  ;;  %s46_s26 = int_to_ptr.vmem [resolvable:$true] %s45_s26 }
   0x6   :  { %p4114_p1 = scmp.lt.u32.totalorder %s4110_s29, %s8280_s8 }
   0x8   :  { %p4116_p2 = pnand %p4114_p1, %p4111_p0 }
   0xa   :  { %4119 = shalt.err (!%p4116_p2)
}
   0xb   :  { %s4120_s17 = scalar_lea.vmem %s46_s26, 32768  ;;  %p4125_p4 = scmp.lt.s32.totalorder %s46_s26, %s46_s26 }
   0xc   :  { %p4121_p3 = scmp.ne.s32.totalorder %s46_s26, %s4120_s17  ;;  %p4126_p5 = scmp.lt.s32.totalorder %s4120_s17, %s4120_s17 }
   0xe   :  { %p4127_p6 = por %p4126_p5, %p4125_p4 }
  0x10   :  { %p4128_p7 = pnand %p4127_p6, %p4121_p3 }
  0x12   :  { %4131 = shalt.err (!%p4128_p7)
}
  0x13   :  { %s4241_s18 = smov 256   ;;  %s4242_s19 = smov 16  }
  0x14   :  { %51 = dma.hbm_to_vmem [thread:$0]  %s8280_s8, 32768, %s46_s26, [#allocation3], %s4241_s18, %s4241_s18, %s4242_s19  }
  0x15   :  { %s4243_s22 = smov [#allocation6]   ;;  %s4132_s27 = scalar_lea.hbm %s8281_s9, 32768 }
  0x16   :  { %s57_s23 = sshll.u32 %s4243_s22, 4  ;;  %p4133_p8 = scmp.ne.s32.totalorder %s8281_s9, %s4132_s27  ;;  %s58_s23 = int_to_ptr.vmem [resolvable:$true] %s57_s23 }
  0x17   :  { %p4136_p9 = scmp.lt.u32.totalorder %s4132_s27, %s8281_s9 }
  0x19   :  { %p4138_p10 = pnand %p4136_p9, %p4133_p8 }
  0x1b   :  { %4141 = shalt.err (!%p4138_p10)
}
  0x1c   :  { %s4142_s15 = scalar_lea.vmem %s58_s23, 32768  ;;  %p4147_p12 = scmp.lt.s32.totalorder %s58_s23, %s58_s23 }
  0x1d   :  { %p4143_p11 = scmp.ne.s32.totalorder %s58_s23, %s4142_s15  ;;  %p4148_p13 = scmp.lt.s32.totalorder %s4142_s15, %s4142_s15 }
  0x1f   :  { %p4149_p0 = por %p4148_p13, %p4147_p12 }
  0x21   :  { %p4150_p1 = pnand %p4149_p0, %p4143_p11 }
  0x23   :  { %4153 = shalt.err (!%p4150_p1)
}
  0x24   :  { %s4244_s8 = smov 1024   ;;  %s4245_s26 = smov 64  }
  0x25   :  { %63 = dma.hbm_to_vmem [thread:$0]  %s8281_s9, 32768, %s58_s23, [#allocation7], %s4244_s8, %s4244_s8, %s4245_s26  }
  0x26   :  { %4230 = dma.done.wait [#allocation3], 32768  }
  0x27   :  { %4231 = vsyncadd [#allocation3], 4294934528 }
  0x28   :  { %4232 = dma.done.wait [#allocation7], 32768  }
  0x29   :  { %4233 = vsyncadd [#allocation7], 4294934528  ;;  %v4246_v0 = vmov 0   ;;  %v102_v1 = vld [vmem:[%s8274_s2] sm:$0xff]  ;;  %v103_v2 = vld [vmem:[%s8274_s2 + $0x8] sm:$0xff] }
  0x2a   :  { %4109 = vset.pattern.permute.xlu0 %v4246_v0  ;;  %v163_v3 = vld [vmem:[%s8275_s3 + $0x8] sm:$0xff]  ;;  %v165_v4 = vld [vmem:[%s8275_s3 + $0x18] sm:$0xff]  ;;  %v162_v12 = vld [vmem:[%s8275_s3] sm:$0xff] }
  0x2b   :  { %122 = vperm.xlu0 %4109, %v102_v1   ;;  %v1459_v5 = vld [vmem:[#allocation2 + $0x8] sm:$0xff]  ;;  %v1461_v6 = vld [vmem:[#allocation2 + $0x18] sm:$0xff]  ;;  %v1971_v7 = vmul.f32 0.001, %v163_v3  ;;  %v683_v8 = vpack.c.bf16 %v165_v4, %v163_v3  ;;  %v1973_v11 = vmul.f32 0.001, %v165_v4 }
  0x2c   :  { %v1715_v9 = vmul.f32 0.999, %v1459_v5  ;;  %v1717_v10 = vmul.f32 0.999, %v1461_v6  ;;  %v164_v13 = vld [vmem:[%s8275_s3 + $0x10] sm:$0xff]  ;;  %v1458_v14 = vld [vmem:[#allocation2] sm:$0xff] }
  0x2d   :  { %822 = vmatprep.subr.bf16.mxu0 %v683_v8  ;;  %v682_v17 = vpack.c.bf16 %v164_v13, %v162_v12  ;;  %v1460_v18 = vld [vmem:[#allocation2 + $0x10] sm:$0xff]  ;;  %v1714_v19 = vmul.f32 0.999, %v1458_v14  ;;  %v167_v20 = vld [vmem:[%s8275_s3 + $0x28] sm:$0xff]  ;;  %v169_v21 = vld [vmem:[%s8275_s3 + $0x38] sm:$0xff] }
  0x2e   :  { %v2227_v15 = vadd.f32 %v1971_v7, %v1715_v9  ;;  %v2229_v16 = vadd.f32 %v1973_v11, %v1717_v10  ;;  %v1716_v22 = vmul.f32 0.999, %v1460_v18  ;;  %v1970_v23 = vmul.f32 0.001, %v162_v12  ;;  %v1463_v26 = vld [vmem:[#allocation2 + $0x28] sm:$0xff]  ;;  %v1465_v27 = vld [vmem:[#allocation2 + $0x38] sm:$0xff] }
  0x2f   :  { %127 = vperm.xlu0 %4109, %v103_v2   ;;  %v1972_v24 = vmul.f32 0.001, %v164_v13  ;;  %v685_v25 = vpack.c.bf16 %v169_v21, %v167_v20  ;;  %823 = vmatpush1.bf16.msra.mxu0 %v682_v17  ;;  %v1975_v28 = vmul.f32 0.001, %v167_v20  ;;  %v1977_v29 = vmul.f32 0.001, %v169_v21 }
  0x30   :  { %2483 = vst [vmem:[#allocation10 + $0x8] sm:$0xff] %v2227_v15  ;;  %2485 = vst [vmem:[#allocation10 + $0x18] sm:$0xff] %v2229_v16  ;;  %v2226_v30 = vadd.f32 %v1970_v23, %v1714_v19  ;;  %v1719_v32 = vmul.f32 0.999, %v1463_v26  ;;  %v1721_v33 = vmul.f32 0.999, %v1465_v27 }
  0x31   :  { %v2228_v31 = vadd.f32 %v1972_v24, %v1716_v22  ;;  %824 = vmatprep.subr.bf16.mxu0 %v685_v25  ;;  %v166_v34 = vld [vmem:[%s8275_s3 + $0x20] sm:$0xff]  ;;  %v168_v35 = vld [vmem:[%s8275_s3 + $0x30] sm:$0xff]  ;;  %v171_v45 = vld [vmem:[%s8275_s3 + $0x48] sm:$0xff] }
  0x32   :  { %v684_v36 = vpack.c.bf16 %v168_v35, %v166_v34  ;;  %v1462_v37 = vld [vmem:[#allocation2 + $0x20] sm:$0xff]  ;;  %v1464_v38 = vld [vmem:[#allocation2 + $0x30] sm:$0xff]  ;;  %v1974_v39 = vmul.f32 0.001, %v166_v34  ;;  %v1976_v40 = vmul.f32 0.001, %v168_v35  ;;  %v2231_v41 = vadd.f32 %v1975_v28, %v1719_v32 }
  0x33   :  { %2482 = vst [vmem:[#allocation10] sm:$0xff] %v2226_v30  ;;  %2484 = vst [vmem:[#allocation10 + $0x10] sm:$0xff] %v2228_v31  ;;  %v2233_v42 = vadd.f32 %v1977_v29, %v1721_v33  ;;  %v1718_v43 = vmul.f32 0.999, %v1462_v37  ;;  %v1720_v44 = vmul.f32 0.999, %v1464_v38 }
  0x34   :  { %v173_v46 = vld [vmem:[%s8275_s3 + $0x58] sm:$0xff]  ;;  %825 = vmatpush1.bf16.msra.mxu0 %v684_v36  ;;  %v1467_v48 = vld [vmem:[#allocation2 + $0x48] sm:$0xff]  ;;  %v1979_v50 = vmul.f32 0.001, %v171_v45  ;;  %2487 = vst [vmem:[#allocation10 + $0x28] sm:$0xff] %v2231_v41  ;;  %v170_v56 = vld [vmem:[%s8275_s3 + $0x40] sm:$0xff] }
  0x35   :  { %v687_v47 = vpack.c.bf16 %v173_v46, %v171_v45  ;;  %v1469_v49 = vld [vmem:[#allocation2 + $0x58] sm:$0xff]  ;;  %v1981_v51 = vmul.f32 0.001, %v173_v46  ;;  %2489 = vst [vmem:[#allocation10 + $0x38] sm:$0xff] %v2233_v42  ;;  %v2230_v52 = vadd.f32 %v1974_v39, %v1718_v43  ;;  %v2232_v53 = vadd.f32 %v1976_v40, %v1720_v44  ;;  %v172_v57 = vld [vmem:[%s8275_s3 + $0x50] sm:$0xff]  ;;  %v1466_v59 = vld [vmem:[#allocation2 + $0x40] sm:$0xff] }
  0x36   :  { %v1723_v54 = vmul.f32 0.999, %v1467_v48  ;;  %v1725_v55 = vmul.f32 0.999, %v1469_v49  ;;  %v686_v58 = vpack.c.bf16 %v172_v57, %v170_v56  ;;  %v1468_v60 = vld [vmem:[#allocation2 + $0x50] sm:$0xff]  ;;  %v175_v3 = vld [vmem:[%s8275_s3 + $0x68] sm:$0xff] }
  0x37   :  { %826 = vmatprep.subr.bf16.mxu0 %v687_v47  ;;  %v1978_v61 = vmul.f32 0.001, %v170_v56  ;;  %v1980_v62 = vmul.f32 0.001, %v172_v57  ;;  %2486 = vst [vmem:[#allocation10 + $0x20] sm:$0xff] %v2230_v52  ;;  %2488 = vst [vmem:[#allocation10 + $0x30] sm:$0xff] %v2232_v53 }
  0x38   :  { %v2235_v63 = vadd.f32 %v1979_v50, %v1723_v54  ;;  %v2237_v0 = vadd.f32 %v1981_v51, %v1725_v55  ;;  %v1722_v1 = vmul.f32 0.999, %v1466_v59  ;;  %v1724_v2 = vmul.f32 0.999, %v1468_v60  ;;  %v177_v4 = vld [vmem:[%s8275_s3 + $0x78] sm:$0xff]  ;;  %827 = vmatpush1.bf16.msra.mxu0 %v686_v58  ;;  %v1471_v6 = vld [vmem:[#allocation2 + $0x68] sm:$0xff] }
  0x39   :  { %v689_v5 = vpack.c.bf16 %v177_v4, %v175_v3  ;;  %v1473_v7 = vld [vmem:[#allocation2 + $0x78] sm:$0xff]  ;;  %v1983_v8 = vmul.f32 0.001, %v175_v3  ;;  %v1985_v9 = vmul.f32 0.001, %v177_v4  ;;  %v174_v14 = vld [vmem:[%s8275_s3 + $0x60] sm:$0xff] }
  0x3a   :  { %2491 = vst [vmem:[#allocation10 + $0x48] sm:$0xff] %v2235_v63  ;;  %2493 = vst [vmem:[#allocation10 + $0x58] sm:$0xff] %v2237_v0  ;;  %v2234_v10 = vadd.f32 %v1978_v61, %v1722_v1  ;;  %v2236_v11 = vadd.f32 %v1980_v62, %v1724_v2  ;;  %v1727_v12 = vmul.f32 0.999, %v1471_v6  ;;  %v1729_v13 = vmul.f32 0.999, %v1473_v7 }
  0x3b   :  { %v176_v15 = vld [vmem:[%s8275_s3 + $0x70] sm:$0xff]  ;;  %828 = vmatprep.subr.bf16.mxu0 %v689_v5  ;;  %v1470_v17 = vld [vmem:[#allocation2 + $0x60] sm:$0xff]  ;;  %v1982_v19 = vmul.f32 0.001, %v174_v14  ;;  %v179_v25 = vld [vmem:[%s8275_s3 + $0x88] sm:$0xff] }
  0x3c   :  { %v688_v16 = vpack.c.bf16 %v176_v15, %v174_v14  ;;  %v1472_v18 = vld [vmem:[#allocation2 + $0x70] sm:$0xff]  ;;  %v1984_v20 = vmul.f32 0.001, %v176_v15  ;;  %2490 = vst [vmem:[#allocation10 + $0x40] sm:$0xff] %v2234_v10  ;;  %2492 = vst [vmem:[#allocation10 + $0x50] sm:$0xff] %v2236_v11  ;;  %v2239_v21 = vadd.f32 %v1983_v8, %v1727_v12  ;;  %v2241_v22 = vadd.f32 %v1985_v9, %v1729_v13  ;;  %v181_v26 = vld [vmem:[%s8275_s3 + $0x98] sm:$0xff] }
  0x3d   :  { %v1726_v23 = vmul.f32 0.999, %v1470_v17  ;;  %v1728_v24 = vmul.f32 0.999, %v1472_v18  ;;  %v691_v27 = vpack.c.bf16 %v181_v26, %v179_v25  ;;  %v1475_v28 = vld [vmem:[#allocation2 + $0x88] sm:$0xff]  ;;  %v1477_v29 = vld [vmem:[#allocation2 + $0x98] sm:$0xff] }
  0x3e   :  { %829 = vmatpush1.bf16.msra.mxu0 %v688_v16  ;;  %v1987_v30 = vmul.f32 0.001, %v179_v25  ;;  %v1989_v31 = vmul.f32 0.001, %v181_v26  ;;  %2495 = vst [vmem:[#allocation10 + $0x68] sm:$0xff] %v2239_v21  ;;  %2497 = vst [vmem:[#allocation10 + $0x78] sm:$0xff] %v2241_v22 }
  0x3f   :  { %v2238_v32 = vadd.f32 %v1982_v19, %v1726_v23  ;;  %v2240_v33 = vadd.f32 %v1984_v20, %v1728_v24  ;;  %v1731_v34 = vmul.f32 0.999, %v1475_v28  ;;  %v1733_v35 = vmul.f32 0.999, %v1477_v29  ;;  %v178_v36 = vld [vmem:[%s8275_s3 + $0x80] sm:$0xff]  ;;  %v180_v37 = vld [vmem:[%s8275_s3 + $0x90] sm:$0xff]  ;;  %830 = vmatprep.subr.bf16.mxu0 %v691_v27 }
  0x40   :  { %v690_v38 = vpack.c.bf16 %v180_v37, %v178_v36  ;;  %v1474_v39 = vld [vmem:[#allocation2 + $0x80] sm:$0xff]  ;;  %v1476_v40 = vld [vmem:[#allocation2 + $0x90] sm:$0xff]  ;;  %v1986_v41 = vmul.f32 0.001, %v178_v36  ;;  %v1988_v42 = vmul.f32 0.001, %v180_v37 }
  0x41   :  { %2494 = vst [vmem:[#allocation10 + $0x60] sm:$0xff] %v2238_v32  ;;  %2496 = vst [vmem:[#allocation10 + $0x70] sm:$0xff] %v2240_v33  ;;  %v2243_v43 = vadd.f32 %v1987_v30, %v1731_v34  ;;  %v2245_v44 = vadd.f32 %v1989_v31, %v1733_v35  ;;  %v1730_v45 = vmul.f32 0.999, %v1474_v39  ;;  %v1732_v46 = vmul.f32 0.999, %v1476_v40 }
  0x42   :  { %v183_v47 = vld [vmem:[%s8275_s3 + $0xa8] sm:$0xff]  ;;  %v185_v48 = vld [vmem:[%s8275_s3 + $0xb8] sm:$0xff]  ;;  %831 = vmatpush1.bf16.msra.mxu0 %v690_v38  ;;  %v182_v58 = vld [vmem:[%s8275_s3 + $0xa0] sm:$0xff] }
  0x43   :  { %v693_v49 = vpack.c.bf16 %v185_v48, %v183_v47  ;;  %v1479_v50 = vld [vmem:[#allocation2 + $0xa8] sm:$0xff]  ;;  %v1481_v51 = vld [vmem:[#allocation2 + $0xb8] sm:$0xff]  ;;  %v1991_v52 = vmul.f32 0.001, %v183_v47  ;;  %v1993_v53 = vmul.f32 0.001, %v185_v48  ;;  %v2242_v54 = vadd.f32 %v1986_v41, %v1730_v45 }
  0x44   :  { %2499 = vst [vmem:[#allocation10 + $0x88] sm:$0xff] %v2243_v43  ;;  %2501 = vst [vmem:[#allocation10 + $0x98] sm:$0xff] %v2245_v44  ;;  %v2244_v55 = vadd.f32 %v1988_v42, %v1732_v46  ;;  %v1735_v56 = vmul.f32 0.999, %v1479_v50  ;;  %v1737_v57 = vmul.f32 0.999, %v1481_v51 }
  0x45   :  { %v184_v59 = vld [vmem:[%s8275_s3 + $0xb0] sm:$0xff]  ;;  %832 = vmatprep.subr.bf16.mxu0 %v693_v49  ;;  %v1478_v61 = vld [vmem:[#allocation2 + $0xa0] sm:$0xff]  ;;  %v1990_v63 = vmul.f32 0.001, %v182_v58  ;;  %2498 = vst [vmem:[#allocation10 + $0x80] sm:$0xff] %v2242_v54  ;;  %v187_v5 = vld [vmem:[%s8275_s3 + $0xc8] sm:$0xff] }
  0x46   :  { %v692_v60 = vpack.c.bf16 %v184_v59, %v182_v58  ;;  %v1480_v62 = vld [vmem:[#allocation2 + $0xb0] sm:$0xff]  ;;  %v1992_v0 = vmul.f32 0.001, %v184_v59  ;;  %2500 = vst [vmem:[#allocation10 + $0x90] sm:$0xff] %v2244_v55  ;;  %v2247_v1 = vadd.f32 %v1991_v52, %v1735_v56  ;;  %v2249_v2 = vadd.f32 %v1993_v53, %v1737_v57  ;;  %v189_v6 = vld [vmem:[%s8275_s3 + $0xd8] sm:$0xff]  ;;  %v1483_v8 = vld [vmem:[#allocation2 + $0xc8] sm:$0xff] }
  0x47   :  { %v1734_v3 = vmul.f32 0.999, %v1478_v61  ;;  %v1736_v4 = vmul.f32 0.999, %v1480_v62  ;;  %v695_v7 = vpack.c.bf16 %v189_v6, %v187_v5  ;;  %v1485_v9 = vld [vmem:[#allocation2 + $0xd8] sm:$0xff]  ;;  %v186_v16 = vld [vmem:[%s8275_s3 + $0xc0] sm:$0xff] }
  0x48   :  { %833 = vmatpush1.bf16.msra.mxu0 %v692_v60  ;;  %v1995_v10 = vmul.f32 0.001, %v187_v5  ;;  %v1997_v11 = vmul.f32 0.001, %v189_v6  ;;  %2503 = vst [vmem:[#allocation10 + $0xa8] sm:$0xff] %v2247_v1  ;;  %2505 = vst [vmem:[#allocation10 + $0xb8] sm:$0xff] %v2249_v2 }
  0x49   :  { %v2246_v12 = vadd.f32 %v1990_v63, %v1734_v3  ;;  %v2248_v13 = vadd.f32 %v1992_v0, %v1736_v4  ;;  %v1739_v14 = vmul.f32 0.999, %v1483_v8  ;;  %v1741_v15 = vmul.f32 0.999, %v1485_v9  ;;  %v188_v17 = vld [vmem:[%s8275_s3 + $0xd0] sm:$0xff]  ;;  %834 = vmatprep.subr.bf16.mxu0 %v695_v7  ;;  %v1482_v19 = vld [vmem:[#allocation2 + $0xc0] sm:$0xff] }
  0x4a   :  { %v694_v18 = vpack.c.bf16 %v188_v17, %v186_v16  ;;  %v1484_v20 = vld [vmem:[#allocation2 + $0xd0] sm:$0xff]  ;;  %v1994_v21 = vmul.f32 0.001, %v186_v16  ;;  %v1996_v22 = vmul.f32 0.001, %v188_v17  ;;  %v191_v27 = vld [vmem:[%s8275_s3 + $0xe8] sm:$0xff] }
  0x4b   :  { %2502 = vst [vmem:[#allocation10 + $0xa0] sm:$0xff] %v2246_v12  ;;  %2504 = vst [vmem:[#allocation10 + $0xb0] sm:$0xff] %v2248_v13  ;;  %v2251_v23 = vadd.f32 %v1995_v10, %v1739_v14  ;;  %v2253_v24 = vadd.f32 %v1997_v11, %v1741_v15  ;;  %v1738_v25 = vmul.f32 0.999, %v1482_v19  ;;  %v1740_v26 = vmul.f32 0.999, %v1484_v20 }
  0x4c   :  { %v193_v28 = vld [vmem:[%s8275_s3 + $0xf8] sm:$0xff]  ;;  %835 = vmatpush1.bf16.msra.mxu0 %v694_v18  ;;  %v1487_v30 = vld [vmem:[#allocation2 + $0xe8] sm:$0xff]  ;;  %v1999_v32 = vmul.f32 0.001, %v191_v27  ;;  %v190_v38 = vld [vmem:[%s8275_s3 + $0xe0] sm:$0xff] }
  0x4d   :  { %v697_v29 = vpack.c.bf16 %v193_v28, %v191_v27  ;;  %v1489_v31 = vld [vmem:[#allocation2 + $0xf8] sm:$0xff]  ;;  %v2001_v33 = vmul.f32 0.001, %v193_v28  ;;  %2507 = vst [vmem:[#allocation10 + $0xc8] sm:$0xff] %v2251_v23  ;;  %2509 = vst [vmem:[#allocation10 + $0xd8] sm:$0xff] %v2253_v24  ;;  %v2250_v34 = vadd.f32 %v1994_v21, %v1738_v25  ;;  %v2252_v35 = vadd.f32 %v1996_v22, %v1740_v26  ;;  %v192_v39 = vld [vmem:[%s8275_s3 + $0xf0] sm:$0xff] }
  0x4e   :  { %v1743_v36 = vmul.f32 0.999, %v1487_v30  ;;  %v1745_v37 = vmul.f32 0.999, %v1489_v31  ;;  %v696_v40 = vpack.c.bf16 %v192_v39, %v190_v38  ;;  %v1486_v41 = vld [vmem:[#allocation2 + $0xe0] sm:$0xff]  ;;  %v1488_v42 = vld [vmem:[#allocation2 + $0xf0] sm:$0xff] }
  0x4f   :  { %836 = vmatprep.subr.bf16.mxu0 %v697_v29  ;;  %v1998_v43 = vmul.f32 0.001, %v190_v38  ;;  %v2000_v44 = vmul.f32 0.001, %v192_v39  ;;  %2506 = vst [vmem:[#allocation10 + $0xc0] sm:$0xff] %v2250_v34  ;;  %2508 = vst [vmem:[#allocation10 + $0xd0] sm:$0xff] %v2252_v35 }
  0x50   :  { %v2255_v45 = vadd.f32 %v1999_v32, %v1743_v36  ;;  %v2257_v46 = vadd.f32 %v2001_v33, %v1745_v37  ;;  %v1742_v47 = vmul.f32 0.999, %v1486_v41  ;;  %v1744_v48 = vmul.f32 0.999, %v1488_v42  ;;  %v195_v49 = vld [vmem:[%s8275_s3 + $0x108] sm:$0xff]  ;;  %v197_v50 = vld [vmem:[%s8275_s3 + $0x118] sm:$0xff]  ;;  %837 = vmatpush1.bf16.msra.mxu0 %v696_v40 }
  0x51   :  { %v699_v51 = vpack.c.bf16 %v197_v50, %v195_v49  ;;  %v1491_v52 = vld [vmem:[#allocation2 + $0x108] sm:$0xff]  ;;  %v1493_v53 = vld [vmem:[#allocation2 + $0x118] sm:$0xff]  ;;  %v2003_v54 = vmul.f32 0.001, %v195_v49  ;;  %v2005_v55 = vmul.f32 0.001, %v197_v50 }
  0x52   :  { %2511 = vst [vmem:[#allocation10 + $0xe8] sm:$0xff] %v2255_v45  ;;  %2513 = vst [vmem:[#allocation10 + $0xf8] sm:$0xff] %v2257_v46  ;;  %v2254_v56 = vadd.f32 %v1998_v43, %v1742_v47  ;;  %v2256_v57 = vadd.f32 %v2000_v44, %v1744_v48  ;;  %v1747_v58 = vmul.f32 0.999, %v1491_v52  ;;  %v1749_v59 = vmul.f32 0.999, %v1493_v53 }
  0x53   :  { %v194_v60 = vld [vmem:[%s8275_s3 + $0x100] sm:$0xff]  ;;  %v196_v61 = vld [vmem:[%s8275_s3 + $0x110] sm:$0xff]  ;;  %838 = vmatprep.subr.bf16.mxu0 %v699_v51  ;;  %v199_v7 = vld [vmem:[%s8275_s3 + $0x128] sm:$0xff] }
  0x54   :  { %v698_v62 = vpack.c.bf16 %v196_v61, %v194_v60  ;;  %v1490_v63 = vld [vmem:[#allocation2 + $0x100] sm:$0xff]  ;;  %v1492_v0 = vld [vmem:[#allocation2 + $0x110] sm:$0xff]  ;;  %v2002_v1 = vmul.f32 0.001, %v194_v60  ;;  %v2004_v2 = vmul.f32 0.001, %v196_v61  ;;  %v2259_v3 = vadd.f32 %v2003_v54, %v1747_v58 }
  0x55   :  { %2510 = vst [vmem:[#allocation10 + $0xe0] sm:$0xff] %v2254_v56  ;;  %2512 = vst [vmem:[#allocation10 + $0xf0] sm:$0xff] %v2256_v57  ;;  %v2261_v4 = vadd.f32 %v2005_v55, %v1749_v59  ;;  %v1746_v5 = vmul.f32 0.999, %v1490_v63  ;;  %v1748_v6 = vmul.f32 0.999, %v1492_v0 }
  0x56   :  { %v201_v8 = vld [vmem:[%s8275_s3 + $0x138] sm:$0xff]  ;;  %839 = vmatpush1.bf16.msra.mxu0 %v698_v62  ;;  %v1495_v10 = vld [vmem:[#allocation2 + $0x128] sm:$0xff]  ;;  %v2007_v12 = vmul.f32 0.001, %v199_v7  ;;  %2515 = vst [vmem:[#allocation10 + $0x108] sm:$0xff] %v2259_v3  ;;  %v198_v18 = vld [vmem:[%s8275_s3 + $0x120] sm:$0xff] }
  0x57   :  { %v701_v9 = vpack.c.bf16 %v201_v8, %v199_v7  ;;  %v1497_v11 = vld [vmem:[#allocation2 + $0x138] sm:$0xff]  ;;  %v2009_v13 = vmul.f32 0.001, %v201_v8  ;;  %2517 = vst [vmem:[#allocation10 + $0x118] sm:$0xff] %v2261_v4  ;;  %v2258_v14 = vadd.f32 %v2002_v1, %v1746_v5  ;;  %v2260_v15 = vadd.f32 %v2004_v2, %v1748_v6  ;;  %v200_v19 = vld [vmem:[%s8275_s3 + $0x130] sm:$0xff]  ;;  %v1494_v21 = vld [vmem:[#allocation2 + $0x120] sm:$0xff] }
  0x58   :  { %v1751_v16 = vmul.f32 0.999, %v1495_v10  ;;  %v1753_v17 = vmul.f32 0.999, %v1497_v11  ;;  %v700_v20 = vpack.c.bf16 %v200_v19, %v198_v18  ;;  %v1496_v22 = vld [vmem:[#allocation2 + $0x130] sm:$0xff]  ;;  %v203_v29 = vld [vmem:[%s8275_s3 + $0x148] sm:$0xff] }
  0x59   :  { %840 = vmatprep.subr.bf16.mxu0 %v701_v9  ;;  %v2006_v23 = vmul.f32 0.001, %v198_v18  ;;  %v2008_v24 = vmul.f32 0.001, %v200_v19  ;;  %2514 = vst [vmem:[#allocation10 + $0x100] sm:$0xff] %v2258_v14  ;;  %2516 = vst [vmem:[#allocation10 + $0x110] sm:$0xff] %v2260_v15 }
  0x5a   :  { %v2263_v25 = vadd.f32 %v2007_v12, %v1751_v16  ;;  %v2265_v26 = vadd.f32 %v2009_v13, %v1753_v17  ;;  %v1750_v27 = vmul.f32 0.999, %v1494_v21  ;;  %v1752_v28 = vmul.f32 0.999, %v1496_v22  ;;  %v205_v30 = vld [vmem:[%s8275_s3 + $0x158] sm:$0xff]  ;;  %841 = vmatpush1.bf16.msra.mxu0 %v700_v20  ;;  %v1499_v32 = vld [vmem:[#allocation2 + $0x148] sm:$0xff] }
  0x5b   :  { %v703_v31 = vpack.c.bf16 %v205_v30, %v203_v29  ;;  %v1501_v33 = vld [vmem:[#allocation2 + $0x158] sm:$0xff]  ;;  %v2011_v34 = vmul.f32 0.001, %v203_v29  ;;  %v2013_v35 = vmul.f32 0.001, %v205_v30  ;;  %v202_v40 = vld [vmem:[%s8275_s3 + $0x140] sm:$0xff] }
  0x5c   :  { %2519 = vst [vmem:[#allocation10 + $0x128] sm:$0xff] %v2263_v25  ;;  %2521 = vst [vmem:[#allocation10 + $0x138] sm:$0xff] %v2265_v26  ;;  %v2262_v36 = vadd.f32 %v2006_v23, %v1750_v27  ;;  %v2264_v37 = vadd.f32 %v2008_v24, %v1752_v28  ;;  %v1755_v38 = vmul.f32 0.999, %v1499_v32  ;;  %v1757_v39 = vmul.f32 0.999, %v1501_v33 }
  0x5d   :  { %v204_v41 = vld [vmem:[%s8275_s3 + $0x150] sm:$0xff]  ;;  %842 = vmatprep.subr.bf16.mxu0 %v703_v31  ;;  %v1498_v43 = vld [vmem:[#allocation2 + $0x140] sm:$0xff]  ;;  %v2010_v45 = vmul.f32 0.001, %v202_v40  ;;  %v207_v51 = vld [vmem:[%s8275_s3 + $0x168] sm:$0xff] }
  0x5e   :  { %v702_v42 = vpack.c.bf16 %v204_v41, %v202_v40  ;;  %v1500_v44 = vld [vmem:[#allocation2 + $0x150] sm:$0xff]  ;;  %v2012_v46 = vmul.f32 0.001, %v204_v41  ;;  %2518 = vst [vmem:[#allocation10 + $0x120] sm:$0xff] %v2262_v36  ;;  %2520 = vst [vmem:[#allocation10 + $0x130] sm:$0xff] %v2264_v37  ;;  %v2267_v47 = vadd.f32 %v2011_v34, %v1755_v38  ;;  %v2269_v48 = vadd.f32 %v2013_v35, %v1757_v39  ;;  %v209_v52 = vld [vmem:[%s8275_s3 + $0x178] sm:$0xff] }
  0x5f   :  { %v1754_v49 = vmul.f32 0.999, %v1498_v43  ;;  %v1756_v50 = vmul.f32 0.999, %v1500_v44  ;;  %v705_v53 = vpack.c.bf16 %v209_v52, %v207_v51  ;;  %v1503_v54 = vld [vmem:[#allocation2 + $0x168] sm:$0xff]  ;;  %v1505_v55 = vld [vmem:[#allocation2 + $0x178] sm:$0xff] }
  0x60   :  { %843 = vmatpush1.bf16.msra.mxu0 %v702_v42  ;;  %v2015_v56 = vmul.f32 0.001, %v207_v51  ;;  %v2017_v57 = vmul.f32 0.001, %v209_v52  ;;  %2523 = vst [vmem:[#allocation10 + $0x148] sm:$0xff] %v2267_v47  ;;  %2525 = vst [vmem:[#allocation10 + $0x158] sm:$0xff] %v2269_v48 }
  0x61   :  { %v2266_v58 = vadd.f32 %v2010_v45, %v1754_v49  ;;  %v2268_v59 = vadd.f32 %v2012_v46, %v1756_v50  ;;  %v1759_v60 = vmul.f32 0.999, %v1503_v54  ;;  %v1761_v61 = vmul.f32 0.999, %v1505_v55  ;;  %v206_v62 = vld [vmem:[%s8275_s3 + $0x160] sm:$0xff]  ;;  %v208_v63 = vld [vmem:[%s8275_s3 + $0x170] sm:$0xff]  ;;  %844 = vmatprep.subr.bf16.mxu0 %v705_v53 }
  0x62   :  { %v704_v0 = vpack.c.bf16 %v208_v63, %v206_v62  ;;  %v1502_v1 = vld [vmem:[#allocation2 + $0x160] sm:$0xff]  ;;  %v1504_v2 = vld [vmem:[#allocation2 + $0x170] sm:$0xff]  ;;  %v2014_v3 = vmul.f32 0.001, %v206_v62  ;;  %v2016_v4 = vmul.f32 0.001, %v208_v63 }
  0x63   :  { %2522 = vst [vmem:[#allocation10 + $0x140] sm:$0xff] %v2266_v58  ;;  %2524 = vst [vmem:[#allocation10 + $0x150] sm:$0xff] %v2268_v59  ;;  %v2271_v5 = vadd.f32 %v2015_v56, %v1759_v60  ;;  %v2273_v6 = vadd.f32 %v2017_v57, %v1761_v61  ;;  %v1758_v7 = vmul.f32 0.999, %v1502_v1  ;;  %v1760_v8 = vmul.f32 0.999, %v1504_v2 }
  0x64   :  { %v211_v9 = vld [vmem:[%s8275_s3 + $0x188] sm:$0xff]  ;;  %v213_v10 = vld [vmem:[%s8275_s3 + $0x198] sm:$0xff]  ;;  %845 = vmatpush1.bf16.msra.mxu0 %v704_v0  ;;  %v210_v20 = vld [vmem:[%s8275_s3 + $0x180] sm:$0xff] }
  0x65   :  { %v707_v11 = vpack.c.bf16 %v213_v10, %v211_v9  ;;  %v1507_v12 = vld [vmem:[#allocation2 + $0x188] sm:$0xff]  ;;  %v1509_v13 = vld [vmem:[#allocation2 + $0x198] sm:$0xff]  ;;  %v2019_v14 = vmul.f32 0.001, %v211_v9  ;;  %v2021_v15 = vmul.f32 0.001, %v213_v10  ;;  %v2270_v16 = vadd.f32 %v2014_v3, %v1758_v7 }
  0x66   :  { %2527 = vst [vmem:[#allocation10 + $0x168] sm:$0xff] %v2271_v5  ;;  %2529 = vst [vmem:[#allocation10 + $0x178] sm:$0xff] %v2273_v6  ;;  %v2272_v17 = vadd.f32 %v2016_v4, %v1760_v8  ;;  %v1763_v18 = vmul.f32 0.999, %v1507_v12  ;;  %v1765_v19 = vmul.f32 0.999, %v1509_v13 }
  0x67   :  { %v212_v21 = vld [vmem:[%s8275_s3 + $0x190] sm:$0xff]  ;;  %846 = vmatprep.subr.bf16.mxu0 %v707_v11  ;;  %v1506_v23 = vld [vmem:[#allocation2 + $0x180] sm:$0xff]  ;;  %v2018_v25 = vmul.f32 0.001, %v210_v20  ;;  %2526 = vst [vmem:[#allocation10 + $0x160] sm:$0xff] %v2270_v16  ;;  %v215_v31 = vld [vmem:[%s8275_s3 + $0x1a8] sm:$0xff] }
  0x68   :  { %v706_v22 = vpack.c.bf16 %v212_v21, %v210_v20  ;;  %v1508_v24 = vld [vmem:[#allocation2 + $0x190] sm:$0xff]  ;;  %v2020_v26 = vmul.f32 0.001, %v212_v21  ;;  %2528 = vst [vmem:[#allocation10 + $0x170] sm:$0xff] %v2272_v17  ;;  %v2275_v27 = vadd.f32 %v2019_v14, %v1763_v18  ;;  %v2277_v28 = vadd.f32 %v2021_v15, %v1765_v19  ;;  %v217_v32 = vld [vmem:[%s8275_s3 + $0x1b8] sm:$0xff]  ;;  %v1511_v34 = vld [vmem:[#allocation2 + $0x1a8] sm:$0xff] }
  0x69   :  { %v1762_v29 = vmul.f32 0.999, %v1506_v23  ;;  %v1764_v30 = vmul.f32 0.999, %v1508_v24  ;;  %v709_v33 = vpack.c.bf16 %v217_v32, %v215_v31  ;;  %v1513_v35 = vld [vmem:[#allocation2 + $0x1b8] sm:$0xff]  ;;  %v214_v42 = vld [vmem:[%s8275_s3 + $0x1a0] sm:$0xff] }
  0x6a   :  { %847 = vmatpush1.bf16.msra.mxu0 %v706_v22  ;;  %v2023_v36 = vmul.f32 0.001, %v215_v31  ;;  %v2025_v37 = vmul.f32 0.001, %v217_v32  ;;  %2531 = vst [vmem:[#allocation10 + $0x188] sm:$0xff] %v2275_v27  ;;  %2533 = vst [vmem:[#allocation10 + $0x198] sm:$0xff] %v2277_v28 }
  0x6b   :  { %v2274_v38 = vadd.f32 %v2018_v25, %v1762_v29  ;;  %v2276_v39 = vadd.f32 %v2020_v26, %v1764_v30  ;;  %v1767_v40 = vmul.f32 0.999, %v1511_v34  ;;  %v1769_v41 = vmul.f32 0.999, %v1513_v35  ;;  %v216_v43 = vld [vmem:[%s8275_s3 + $0x1b0] sm:$0xff]  ;;  %848 = vmatprep.subr.bf16.mxu0 %v709_v33  ;;  %v1510_v45 = vld [vmem:[#allocation2 + $0x1a0] sm:$0xff] }
  0x6c   :  { %v708_v44 = vpack.c.bf16 %v216_v43, %v214_v42  ;;  %v1512_v46 = vld [vmem:[#allocation2 + $0x1b0] sm:$0xff]  ;;  %v2022_v47 = vmul.f32 0.001, %v214_v42  ;;  %v2024_v48 = vmul.f32 0.001, %v216_v43  ;;  %v219_v53 = vld [vmem:[%s8275_s3 + $0x1c8] sm:$0xff] }
  0x6d   :  { %2530 = vst [vmem:[#allocation10 + $0x180] sm:$0xff] %v2274_v38  ;;  %2532 = vst [vmem:[#allocation10 + $0x190] sm:$0xff] %v2276_v39  ;;  %v2279_v49 = vadd.f32 %v2023_v36, %v1767_v40  ;;  %v2281_v50 = vadd.f32 %v2025_v37, %v1769_v41  ;;  %v1766_v51 = vmul.f32 0.999, %v1510_v45  ;;  %v1768_v52 = vmul.f32 0.999, %v1512_v46 }
  0x6e   :  { %v221_v54 = vld [vmem:[%s8275_s3 + $0x1d8] sm:$0xff]  ;;  %849 = vmatpush1.bf16.msra.mxu0 %v708_v44  ;;  %v1515_v56 = vld [vmem:[#allocation2 + $0x1c8] sm:$0xff]  ;;  %v2027_v58 = vmul.f32 0.001, %v219_v53  ;;  %v218_v0 = vld [vmem:[%s8275_s3 + $0x1c0] sm:$0xff] }
  0x6f   :  { %v711_v55 = vpack.c.bf16 %v221_v54, %v219_v53  ;;  %v1517_v57 = vld [vmem:[#allocation2 + $0x1d8] sm:$0xff]  ;;  %v2029_v59 = vmul.f32 0.001, %v221_v54  ;;  %2535 = vst [vmem:[#allocation10 + $0x1a8] sm:$0xff] %v2279_v49  ;;  %2537 = vst [vmem:[#allocation10 + $0x1b8] sm:$0xff] %v2281_v50  ;;  %v2278_v60 = vadd.f32 %v2022_v47, %v1766_v51  ;;  %v2280_v61 = vadd.f32 %v2024_v48, %v1768_v52  ;;  %v220_v1 = vld [vmem:[%s8275_s3 + $0x1d0] sm:$0xff] }
  0x70   :  { %v1771_v62 = vmul.f32 0.999, %v1515_v56  ;;  %v1773_v63 = vmul.f32 0.999, %v1517_v57  ;;  %v710_v2 = vpack.c.bf16 %v220_v1, %v218_v0  ;;  %v1514_v3 = vld [vmem:[#allocation2 + $0x1c0] sm:$0xff]  ;;  %v1516_v4 = vld [vmem:[#allocation2 + $0x1d0] sm:$0xff] }
  0x71   :  { %850 = vmatprep.subr.bf16.mxu0 %v711_v55  ;;  %v2026_v5 = vmul.f32 0.001, %v218_v0  ;;  %v2028_v6 = vmul.f32 0.001, %v220_v1  ;;  %2534 = vst [vmem:[#allocation10 + $0x1a0] sm:$0xff] %v2278_v60  ;;  %2536 = vst [vmem:[#allocation10 + $0x1b0] sm:$0xff] %v2280_v61 }
  0x72   :  { %v2283_v7 = vadd.f32 %v2027_v58, %v1771_v62  ;;  %v2285_v8 = vadd.f32 %v2029_v59, %v1773_v63  ;;  %v1770_v9 = vmul.f32 0.999, %v1514_v3  ;;  %v1772_v10 = vmul.f32 0.999, %v1516_v4  ;;  %v223_v11 = vld [vmem:[%s8275_s3 + $0x1e8] sm:$0xff]  ;;  %v225_v12 = vld [vmem:[%s8275_s3 + $0x1f8] sm:$0xff]  ;;  %851 = vmatpush1.bf16.msra.mxu0 %v710_v2 }
  0x73   :  { %v713_v13 = vpack.c.bf16 %v225_v12, %v223_v11  ;;  %v1519_v14 = vld [vmem:[#allocation2 + $0x1e8] sm:$0xff]  ;;  %v1521_v15 = vld [vmem:[#allocation2 + $0x1f8] sm:$0xff]  ;;  %v2031_v16 = vmul.f32 0.001, %v223_v11  ;;  %v2033_v17 = vmul.f32 0.001, %v225_v12 }
  0x74   :  { %2539 = vst [vmem:[#allocation10 + $0x1c8] sm:$0xff] %v2283_v7  ;;  %2541 = vst [vmem:[#allocation10 + $0x1d8] sm:$0xff] %v2285_v8  ;;  %v2282_v18 = vadd.f32 %v2026_v5, %v1770_v9  ;;  %v2284_v19 = vadd.f32 %v2028_v6, %v1772_v10  ;;  %v1775_v20 = vmul.f32 0.999, %v1519_v14  ;;  %v1777_v21 = vmul.f32 0.999, %v1521_v15 }
  0x75   :  { %v222_v22 = vld [vmem:[%s8275_s3 + $0x1e0] sm:$0xff]  ;;  %v224_v23 = vld [vmem:[%s8275_s3 + $0x1f0] sm:$0xff]  ;;  %852 = vmatprep.subr.bf16.mxu0 %v713_v13  ;;  %v227_v33 = vld [vmem:[%s8275_s3 + $0x208] sm:$0xff] }
  0x76   :  { %v712_v24 = vpack.c.bf16 %v224_v23, %v222_v22  ;;  %v1518_v25 = vld [vmem:[#allocation2 + $0x1e0] sm:$0xff]  ;;  %v1520_v26 = vld [vmem:[#allocation2 + $0x1f0] sm:$0xff]  ;;  %v2030_v27 = vmul.f32 0.001, %v222_v22  ;;  %v2032_v28 = vmul.f32 0.001, %v224_v23  ;;  %v2287_v29 = vadd.f32 %v2031_v16, %v1775_v20 }
  0x77   :  { %2538 = vst [vmem:[#allocation10 + $0x1c0] sm:$0xff] %v2282_v18  ;;  %2540 = vst [vmem:[#allocation10 + $0x1d0] sm:$0xff] %v2284_v19  ;;  %v2289_v30 = vadd.f32 %v2033_v17, %v1777_v21  ;;  %v1774_v31 = vmul.f32 0.999, %v1518_v25  ;;  %v1776_v32 = vmul.f32 0.999, %v1520_v26 }
  0x78   :  { %853 = vmatpush1.bf16.msra.mxu0 %v712_v24  ;;  %2543 = vst [vmem:[#allocation10 + $0x1e8] sm:$0xff] %v2287_v29  ;;  %v229_v36 = vld [vmem:[%s8275_s3 + $0x218] sm:$0xff]  ;;  %v1523_v37 = vld [vmem:[#allocation2 + $0x208] sm:$0xff]  ;;  %v2035_v42 = vmul.f32 0.001, %v227_v33  ;;  %v4558_v45 = vld [vmem:[%s8275_s3 + $0x200] sm:$0xff] }
  0x79   :  { %2545 = vst [vmem:[#allocation10 + $0x1f8] sm:$0xff] %v2289_v30  ;;  %v2286_v34 = vadd.f32 %v2030_v27, %v1774_v31  ;;  %v2288_v35 = vadd.f32 %v2032_v28, %v1776_v32  ;;  %v1525_v38 = vld [vmem:[#allocation2 + $0x218] sm:$0xff]  ;;  %v715_v39 = vpack.c.bf16 %v229_v36, %v227_v33  ;;  %v1779_v40 = vmul.f32 0.999, %v1523_v37  ;;  %v4563_v46 = vld [vmem:[%s8275_s3 + $0x210] sm:$0xff]  ;;  %v1522_v49 = vld [vmem:[#allocation2 + $0x200] sm:$0xff] }
  0x7a   :  { %v1781_v41 = vmul.f32 0.999, %v1525_v38  ;;  %v2037_v43 = vmul.f32 0.001, %v229_v36  ;;  %v1524_v50 = vld [vmem:[#allocation2 + $0x210] sm:$0xff]  ;;  %v4572_v57 = vld [vmem:[%s8275_s3 + $0x228] sm:$0xff] }
  0x7b   :  { %2542 = vst [vmem:[#allocation10 + $0x1e0] sm:$0xff] %v2286_v34  ;;  %2544 = vst [vmem:[#allocation10 + $0x1f0] sm:$0xff] %v2288_v35  ;;  %865 = vmatprep.subr.bf16.mxu0 %v715_v39  ;;  %v2291_v44 = vadd.f32 %v2035_v42, %v1779_v40  ;;  %v2034_v51 = vmul.f32 0.001, %v4558_v45  ;;  %v1778_v52 = vmul.f32 0.999, %v1522_v49 }
  0x7c   :  { %v2293_v47 = vadd.f32 %v2037_v43, %v1781_v41  ;;  %v1780_v53 = vmul.f32 0.999, %v1524_v50  ;;  %v2036_v54 = vmul.f32 0.001, %v4563_v46  ;;  %v4577_v58 = vld [vmem:[%s8275_s3 + $0x238] sm:$0xff]  ;;  %v1527_v59 = vld [vmem:[#allocation2 + $0x228] sm:$0xff] }
  0x7d   :  { %2547 = vst [vmem:[#allocation10 + $0x208] sm:$0xff] %v2291_v44  ;;  %v2290_v55 = vadd.f32 %v2034_v51, %v1778_v52  ;;  %v1529_v61 = vld [vmem:[#allocation2 + $0x238] sm:$0xff]  ;;  %v1783_v62 = vmul.f32 0.999, %v1527_v59  ;;  %v2039_v63 = vmul.f32 0.001, %v4572_v57 }
  0x7e   :  { %2549 = vst [vmem:[#allocation10 + $0x218] sm:$0xff] %v2293_v47  ;;  %v2292_v56 = vadd.f32 %v2036_v54, %v1780_v53  ;;  %v4585_v0 = vld [vmem:[%s8275_s3 + $0x220] sm:$0xff]  ;;  %v1785_v1 = vmul.f32 0.999, %v1529_v61  ;;  %v2041_v2 = vmul.f32 0.001, %v4577_v58 }
  0x7f   :  { %2546 = vst [vmem:[#allocation10 + $0x200] sm:$0xff] %v2290_v55  ;;  %v4591_v3 = vld [vmem:[%s8275_s3 + $0x230] sm:$0xff]  ;;  %v1526_v4 = vld [vmem:[#allocation2 + $0x220] sm:$0xff]  ;;  %v2295_v5 = vadd.f32 %v2039_v63, %v1783_v62  ;;  %v2038_v9 = vmul.f32 0.001, %v4585_v0  ;;  %v4599_v10 = vld [vmem:[%s8275_s3 + $0x248] sm:$0xff] }
  0x80   :  { %2548 = vst [vmem:[#allocation10 + $0x210] sm:$0xff] %v2292_v56  ;;  %v1528_v7 = vld [vmem:[#allocation2 + $0x230] sm:$0xff]  ;;  %v1782_v8 = vmul.f32 0.999, %v1526_v4  ;;  %v2297_v11 = vadd.f32 %v2041_v2, %v1785_v1  ;;  %v2040_v13 = vmul.f32 0.001, %v4591_v3 }
  0x81   :  { %v1784_v12 = vmul.f32 0.999, %v1528_v7  ;;  %v4605_v14 = vld [vmem:[%s8275_s3 + $0x258] sm:$0xff]  ;;  %v1531_v15 = vld [vmem:[#allocation2 + $0x248] sm:$0xff]  ;;  %2551 = vst [vmem:[#allocation10 + $0x228] sm:$0xff] %v2295_v5  ;;  %v4613_v21 = vld [vmem:[%s8275_s3 + $0x240] sm:$0xff] }
  0x82   :  { %v2294_v16 = vadd.f32 %v2038_v9, %v1782_v8  ;;  %v1533_v18 = vld [vmem:[#allocation2 + $0x258] sm:$0xff]  ;;  %v1787_v19 = vmul.f32 0.999, %v1531_v15  ;;  %v2043_v20 = vmul.f32 0.001, %v4599_v10  ;;  %2553 = vst [vmem:[#allocation10 + $0x238] sm:$0xff] %v2297_v11 }
  0x83   :  { %v2296_v22 = vadd.f32 %v2040_v13, %v1784_v12  ;;  %v1789_v23 = vmul.f32 0.999, %v1533_v18  ;;  %v2045_v24 = vmul.f32 0.001, %v4605_v14  ;;  %v4619_v25 = vld [vmem:[%s8275_s3 + $0x250] sm:$0xff]  ;;  %v1530_v26 = vld [vmem:[#allocation2 + $0x240] sm:$0xff] }
  0x84   :  { %2550 = vst [vmem:[#allocation10 + $0x220] sm:$0xff] %v2294_v16  ;;  %v2299_v27 = vadd.f32 %v2043_v20, %v1787_v19  ;;  %v1532_v29 = vld [vmem:[#allocation2 + $0x250] sm:$0xff]  ;;  %v1786_v30 = vmul.f32 0.999, %v1530_v26  ;;  %v2042_v31 = vmul.f32 0.001, %v4613_v21 }
  0x85   :  { %v4627_v32 = vld [vmem:[%s8275_s3 + $0x268] sm:$0xff]  ;;  %2552 = vst [vmem:[#allocation10 + $0x230] sm:$0xff] %v2296_v22  ;;  %v2301_v33 = vadd.f32 %v2045_v24, %v1789_v23  ;;  %v1788_v34 = vmul.f32 0.999, %v1532_v29  ;;  %v2044_v35 = vmul.f32 0.001, %v4619_v25 }
  0x86   :  { %v4633_v36 = vld [vmem:[%s8275_s3 + $0x278] sm:$0xff]  ;;  %v1535_v37 = vld [vmem:[#allocation2 + $0x268] sm:$0xff]  ;;  %2555 = vst [vmem:[#allocation10 + $0x248] sm:$0xff] %v2299_v27  ;;  %v2298_v38 = vadd.f32 %v2042_v31, %v1786_v30  ;;  %v2047_v42 = vmul.f32 0.001, %v4627_v32  ;;  %v4641_v43 = vld [vmem:[%s8275_s3 + $0x260] sm:$0xff] }
  0x87   :  { %v1537_v40 = vld [vmem:[#allocation2 + $0x278] sm:$0xff]  ;;  %v1791_v41 = vmul.f32 0.999, %v1535_v37  ;;  %2557 = vst [vmem:[#allocation10 + $0x258] sm:$0xff] %v2301_v33  ;;  %v2300_v44 = vadd.f32 %v2044_v35, %v1788_v34  ;;  %v2049_v49 = vmul.f32 0.001, %v4633_v36 }
  0x88   :  { %v1793_v47 = vmul.f32 0.999, %v1537_v40  ;;  %v4647_v50 = vld [vmem:[%s8275_s3 + $0x270] sm:$0xff]  ;;  %v1534_v51 = vld [vmem:[#allocation2 + $0x260] sm:$0xff]  ;;  %2554 = vst [vmem:[#allocation10 + $0x240] sm:$0xff] %v2298_v38  ;;  %v4655_v59 = vld [vmem:[%s8275_s3 + $0x288] sm:$0xff] }
  0x89   :  { %v2303_v52 = vadd.f32 %v2047_v42, %v1791_v41  ;;  %v1536_v54 = vld [vmem:[#allocation2 + $0x270] sm:$0xff]  ;;  %v1790_v55 = vmul.f32 0.999, %v1534_v51  ;;  %v2046_v56 = vmul.f32 0.001, %v4641_v43  ;;  %2556 = vst [vmem:[#allocation10 + $0x250] sm:$0xff] %v2300_v44 }
  0x8a   :  { %v2305_v61 = vadd.f32 %v2049_v49, %v1793_v47  ;;  %v1792_v62 = vmul.f32 0.999, %v1536_v54  ;;  %v2048_v63 = vmul.f32 0.001, %v4647_v50  ;;  %v4661_v1 = vld [vmem:[%s8275_s3 + $0x298] sm:$0xff]  ;;  %v1539_v2 = vld [vmem:[#allocation2 + $0x288] sm:$0xff] }
  0x8b   :  { %2559 = vst [vmem:[#allocation10 + $0x268] sm:$0xff] %v2303_v52  ;;  %v2302_v4 = vadd.f32 %v2046_v56, %v1790_v55  ;;  %v1541_v7 = vld [vmem:[#allocation2 + $0x298] sm:$0xff]  ;;  %v1795_v8 = vmul.f32 0.999, %v1539_v2  ;;  %v2051_v9 = vmul.f32 0.001, %v4655_v59 }
  0x8c   :  { %v4669_v11 = vld [vmem:[%s8275_s3 + $0x280] sm:$0xff]  ;;  %2561 = vst [vmem:[#allocation10 + $0x278] sm:$0xff] %v2305_v61  ;;  %v2304_v12 = vadd.f32 %v2048_v63, %v1792_v62  ;;  %v1797_v13 = vmul.f32 0.999, %v1541_v7  ;;  %v2053_v15 = vmul.f32 0.001, %v4661_v1 }
  0x8d   :  { %v4675_v16 = vld [vmem:[%s8275_s3 + $0x290] sm:$0xff]  ;;  %v1538_v18 = vld [vmem:[#allocation2 + $0x280] sm:$0xff]  ;;  %2558 = vst [vmem:[#allocation10 + $0x260] sm:$0xff] %v2302_v4  ;;  %v2307_v19 = vadd.f32 %v2051_v9, %v1795_v8  ;;  %v2050_v24 = vmul.f32 0.001, %v4669_v11  ;;  %v4683_v26 = vld [vmem:[%s8275_s3 + $0x2a8] sm:$0xff] }
  0x8e   :  { %v1540_v22 = vld [vmem:[#allocation2 + $0x290] sm:$0xff]  ;;  %v1794_v23 = vmul.f32 0.999, %v1538_v18  ;;  %2560 = vst [vmem:[#allocation10 + $0x270] sm:$0xff] %v2304_v12  ;;  %v2309_v27 = vadd.f32 %v2053_v15, %v1797_v13  ;;  %v2052_v30 = vmul.f32 0.001, %v4675_v16 }
  0x8f   :  { %v1796_v29 = vmul.f32 0.999, %v1540_v22  ;;  %v4689_v31 = vld [vmem:[%s8275_s3 + $0x2b8] sm:$0xff]  ;;  %v1543_v33 = vld [vmem:[#allocation2 + $0x2a8] sm:$0xff]  ;;  %2563 = vst [vmem:[#allocation10 + $0x288] sm:$0xff] %v2307_v19  ;;  %v4697_v41 = vld [vmem:[%s8275_s3 + $0x2a0] sm:$0xff] }
  0x90   :  { %v2306_v34 = vadd.f32 %v2050_v24, %v1794_v23  ;;  %v1545_v37 = vld [vmem:[#allocation2 + $0x2b8] sm:$0xff]  ;;  %v1799_v38 = vmul.f32 0.999, %v1543_v33  ;;  %v2055_v40 = vmul.f32 0.001, %v4683_v26  ;;  %2565 = vst [vmem:[#allocation10 + $0x298] sm:$0xff] %v2309_v27 }
  0x91   :  { %v2308_v42 = vadd.f32 %v2052_v30, %v1796_v29  ;;  %v1801_v44 = vmul.f32 0.999, %v1545_v37  ;;  %v2057_v47 = vmul.f32 0.001, %v4689_v31  ;;  %v4703_v49 = vld [vmem:[%s8275_s3 + $0x2b0] sm:$0xff]  ;;  %v1542_v51 = vld [vmem:[#allocation2 + $0x2a0] sm:$0xff] }
  0x92   :  { %2562 = vst [vmem:[#allocation10 + $0x280] sm:$0xff] %v2306_v34  ;;  %v2311_v52 = vadd.f32 %v2055_v40, %v1799_v38  ;;  %v1544_v55 = vld [vmem:[#allocation2 + $0x2b0] sm:$0xff]  ;;  %v1798_v56 = vmul.f32 0.999, %v1542_v51  ;;  %v2054_v61 = vmul.f32 0.001, %v4697_v41 }
  0x93   :  { %v4711_v62 = vld [vmem:[%s8275_s3 + $0x2c8] sm:$0xff]  ;;  %2564 = vst [vmem:[#allocation10 + $0x290] sm:$0xff] %v2308_v42  ;;  %v2313_v63 = vadd.f32 %v2057_v47, %v1801_v44  ;;  %v1800_v2 = vmul.f32 0.999, %v1544_v55  ;;  %v2056_v4 = vmul.f32 0.001, %v4703_v49 }
  0x94   :  { %v4717_v7 = vld [vmem:[%s8275_s3 + $0x2d8] sm:$0xff]  ;;  %v1547_v8 = vld [vmem:[#allocation2 + $0x2c8] sm:$0xff]  ;;  %2567 = vst [vmem:[#allocation10 + $0x2a8] sm:$0xff] %v2311_v52  ;;  %v2310_v9 = vadd.f32 %v2054_v61, %v1798_v56  ;;  %v2059_v18 = vmul.f32 0.001, %v4711_v62  ;;  %v4725_v19 = vld [vmem:[%s8275_s3 + $0x2c0] sm:$0xff] }
  0x95   :  { %v1549_v13 = vld [vmem:[#allocation2 + $0x2d8] sm:$0xff]  ;;  %v1803_v15 = vmul.f32 0.999, %v1547_v8  ;;  %2569 = vst [vmem:[#allocation10 + $0x2b8] sm:$0xff] %v2313_v63  ;;  %v2312_v22 = vadd.f32 %v2056_v4, %v1800_v2  ;;  %v2061_v24 = vmul.f32 0.001, %v4717_v7 }
  0x96   :  { %v1805_v23 = vmul.f32 0.999, %v1549_v13  ;;  %v4731_v27 = vld [vmem:[%s8275_s3 + $0x2d0] sm:$0xff]  ;;  %v1546_v29 = vld [vmem:[#allocation2 + $0x2c0] sm:$0xff]  ;;  %2566 = vst [vmem:[#allocation10 + $0x2a0] sm:$0xff] %v2310_v9  ;;  %v4739_v40 = vld [vmem:[%s8275_s3 + $0x2e8] sm:$0xff] }
  0x97   :  { %v2315_v30 = vadd.f32 %v2059_v18, %v1803_v15  ;;  %v1548_v34 = vld [vmem:[#allocation2 + $0x2d0] sm:$0xff]  ;;  %v1802_v37 = vmul.f32 0.999, %v1546_v29  ;;  %v2058_v38 = vmul.f32 0.001, %v4725_v19  ;;  %2568 = vst [vmem:[#allocation10 + $0x2b0] sm:$0xff] %v2312_v22 }
  0x98   :  { %v2317_v42 = vadd.f32 %v2061_v24, %v1805_v23  ;;  %v1804_v44 = vmul.f32 0.999, %v1548_v34  ;;  %v2060_v47 = vmul.f32 0.001, %v4731_v27  ;;  %v4745_v51 = vld [vmem:[%s8275_s3 + $0x2f8] sm:$0xff]  ;;  %v1551_v52 = vld [vmem:[#allocation2 + $0x2e8] sm:$0xff] }
  0x99   :  { %2571 = vst [vmem:[#allocation10 + $0x2c8] sm:$0xff] %v2315_v30  ;;  %v2314_v55 = vadd.f32 %v2058_v38, %v1802_v37  ;;  %v1553_v61 = vld [vmem:[#allocation2 + $0x2f8] sm:$0xff]  ;;  %v1807_v63 = vmul.f32 0.999, %v1551_v52  ;;  %v2063_v2 = vmul.f32 0.001, %v4739_v40 }
  0x9a   :  { %v4753_v4 = vld [vmem:[%s8275_s3 + $0x2e0] sm:$0xff]  ;;  %2573 = vst [vmem:[#allocation10 + $0x2d8] sm:$0xff] %v2317_v42  ;;  %v2316_v8 = vadd.f32 %v2060_v47, %v1804_v44  ;;  %v1809_v9 = vmul.f32 0.999, %v1553_v61  ;;  %v2065_v13 = vmul.f32 0.001, %v4745_v51 }
  0x9b   :  { %v4759_v15 = vld [vmem:[%s8275_s3 + $0x2f0] sm:$0xff]  ;;  %v1550_v18 = vld [vmem:[#allocation2 + $0x2e0] sm:$0xff]  ;;  %2570 = vst [vmem:[#allocation10 + $0x2c0] sm:$0xff] %v2314_v55  ;;  %v2319_v22 = vadd.f32 %v2063_v2, %v1807_v63  ;;  %v2062_v30 = vmul.f32 0.001, %v4753_v4  ;;  %v4767_v34 = vld [vmem:[%s8275_s3 + $0x308] sm:$0xff] }
  0x9c   :  { %v1552_v24 = vld [vmem:[#allocation2 + $0x2f0] sm:$0xff]  ;;  %v1806_v29 = vmul.f32 0.999, %v1550_v18  ;;  %2572 = vst [vmem:[#allocation10 + $0x2d0] sm:$0xff] %v2316_v8  ;;  %v2321_v37 = vadd.f32 %v2065_v13, %v1809_v9  ;;  %v2064_v42 = vmul.f32 0.001, %v4759_v15 }
  0x9d   :  { %v1808_v38 = vmul.f32 0.999, %v1552_v24  ;;  %v4773_v44 = vld [vmem:[%s8275_s3 + $0x318] sm:$0xff]  ;;  %v1555_v47 = vld [vmem:[#allocation2 + $0x308] sm:$0xff]  ;;  %2575 = vst [vmem:[#allocation10 + $0x2e8] sm:$0xff] %v2319_v22  ;;  %v4781_v8 = vld [vmem:[%s8275_s3 + $0x300] sm:$0xff] }
  0x9e   :  { %v2318_v52 = vadd.f32 %v2062_v30, %v1806_v29  ;;  %v1557_v61 = vld [vmem:[#allocation2 + $0x318] sm:$0xff]  ;;  %v1811_v63 = vmul.f32 0.999, %v1555_v47  ;;  %v2067_v2 = vmul.f32 0.001, %v4767_v34  ;;  %8508 = vst [vmem:[#allocation18_spill] sm:$0xff] %v4781_v8 }
  0x9f   :  { %2577 = vst [vmem:[#allocation10 + $0x2f8] sm:$0xff] %v2321_v37  ;;  %v2320_v9 = vadd.f32 %v2064_v42, %v1808_v38  ;;  %v1813_v13 = vmul.f32 0.999, %v1557_v61  ;;  %v2069_v18 = vmul.f32 0.001, %v4773_v44  ;;  %v4787_v22 = vld [vmem:[%s8275_s3 + $0x310] sm:$0xff] }
  0xa0   :  { %8509 = vst [vmem:[#allocation19_spill] sm:$0xff] %v4787_v22  ;;  %v1554_v24 = vld [vmem:[#allocation2 + $0x300] sm:$0xff]  ;;  %2574 = vst [vmem:[#allocation10 + $0x2e0] sm:$0xff] %v2318_v52  ;;  %v2323_v29 = vadd.f32 %v2067_v2, %v1811_v63  ;;  %v1556_v47 = vld [vmem:[#allocation2 + $0x310] sm:$0xff]  ;;  %v2066_v23 = vmul.f32 0.001, %v4781_v8 }
  0xa1   :  { %v1810_v55 = vmul.f32 0.999, %v1554_v24  ;;  %v4795_v37 = vld [vmem:[%s8275_s3 + $0x328] sm:$0xff]  ;;  %2576 = vst [vmem:[#allocation10 + $0x2f0] sm:$0xff] %v2320_v9  ;;  %v2325_v38 = vadd.f32 %v2069_v18, %v1813_v13  ;;  %v1812_v42 = vmul.f32 0.999, %v1556_v47 }
  0xa2   :  { %8510 = vst [vmem:[#allocation20_spill] sm:$0xff] %v4795_v37  ;;  %v2068_v61 = vmul.f32 0.001, %v4787_v22  ;;  %v4801_v52 = vld [vmem:[%s8275_s3 + $0x338] sm:$0xff]  ;;  %v1559_v63 = vld [vmem:[#allocation2 + $0x328] sm:$0xff]  ;;  %2579 = vst [vmem:[#allocation10 + $0x308] sm:$0xff] %v2323_v29 }
  0xa3   :  { %8511 = vst [vmem:[#allocation21_spill] sm:$0xff] %v4801_v52  ;;  %v2322_v2 = vadd.f32 %v2066_v23, %v1810_v55  ;;  %v1561_v30 = vld [vmem:[#allocation2 + $0x338] sm:$0xff]  ;;  %v1815_v56 = vmul.f32 0.999, %v1559_v63  ;;  %v2071_v33 = vmul.f32 0.001, %v4795_v37 }
  0xa4   :  { %v4809_v9 = vld [vmem:[%s8275_s3 + $0x320] sm:$0xff]  ;;  %2581 = vst [vmem:[#allocation10 + $0x318] sm:$0xff] %v2325_v38  ;;  %v2324_v13 = vadd.f32 %v2068_v61, %v1812_v42  ;;  %v1817_v18 = vmul.f32 0.999, %v1561_v30  ;;  %v2073_v47 = vmul.f32 0.001, %v4801_v52 }
  0xa5   :  { %8512 = vst [vmem:[#allocation22_spill] sm:$0xff] %v4809_v9  ;;  %v4815_v23 = vld [vmem:[%s8275_s3 + $0x330] sm:$0xff]  ;;  %v1558_v55 = vld [vmem:[#allocation2 + $0x320] sm:$0xff]  ;;  %2578 = vst [vmem:[#allocation10 + $0x300] sm:$0xff] %v2322_v2  ;;  %v2327_v29 = vadd.f32 %v2071_v33, %v1815_v56  ;;  %v2070_v54 = vmul.f32 0.001, %v4809_v9 }
  0xa6   :  { %8513 = vst [vmem:[#allocation23_spill] sm:$0xff] %v4815_v23  ;;  %v1560_v24 = vld [vmem:[#allocation2 + $0x330] sm:$0xff]  ;;  %v1814_v12 = vmul.f32 0.999, %v1558_v55  ;;  %v4823_v30 = vld [vmem:[%s8275_s3 + $0x348] sm:$0xff]  ;;  %2580 = vst [vmem:[#allocation10 + $0x310] sm:$0xff] %v2324_v13  ;;  %v2329_v38 = vadd.f32 %v2073_v47, %v1817_v18 }
  0xa7   :  { %8514 = vst [vmem:[#allocation24_spill] sm:$0xff] %v4823_v30  ;;  %v1816_v42 = vmul.f32 0.999, %v1560_v24  ;;  %v2072_v61 = vmul.f32 0.001, %v4815_v23  ;;  %v4829_v33 = vld [vmem:[%s8275_s3 + $0x358] sm:$0xff] }
  0xa8   :  { %8515 = vst [vmem:[#allocation25_spill] sm:$0xff] %v4829_v33  ;;  %v1563_v56 = vld [vmem:[#allocation2 + $0x348] sm:$0xff]  ;;  %2583 = vst [vmem:[#allocation10 + $0x328] sm:$0xff] %v2327_v29  ;;  %v2326_v2 = vadd.f32 %v2070_v54, %v1814_v12  ;;  %v1565_v63 = vld [vmem:[#allocation2 + $0x358] sm:$0xff]  ;;  %v2075_v20 = vmul.f32 0.001, %v4823_v30 }
  0xa9   :  { %v1819_v35 = vmul.f32 0.999, %v1563_v56  ;;  %v4837_v24 = vld [vmem:[%s8275_s3 + $0x340] sm:$0xff]  ;;  %2585 = vst [vmem:[#allocation10 + $0x338] sm:$0xff] %v2329_v38  ;;  %v2328_v13 = vadd.f32 %v2072_v61, %v1816_v42  ;;  %v1821_v18 = vmul.f32 0.999, %v1565_v63 }
  0xaa   :  { %8516 = vst [vmem:[#allocation26_spill] sm:$0xff] %v4837_v24  ;;  %v2077_v47 = vmul.f32 0.001, %v4829_v33  ;;  %v4843_v54 = vld [vmem:[%s8275_s3 + $0x350] sm:$0xff]  ;;  %v1562_v12 = vld [vmem:[#allocation2 + $0x340] sm:$0xff]  ;;  %2582 = vst [vmem:[#allocation10 + $0x320] sm:$0xff] %v2326_v2 }
  0xab   :  { %8517 = vst [vmem:[#allocation27_spill] sm:$0xff] %v4843_v54  ;;  %v2331_v29 = vadd.f32 %v2075_v20, %v1819_v35  ;;  %v1564_v55 = vld [vmem:[#allocation2 + $0x350] sm:$0xff]  ;;  %v1818_v5 = vmul.f32 0.999, %v1562_v12  ;;  %v2074_v53 = vmul.f32 0.001, %v4837_v24 }
  0xac   :  { %v4851_v63 = vld [vmem:[%s8275_s3 + $0x368] sm:$0xff]  ;;  %2584 = vst [vmem:[#allocation10 + $0x330] sm:$0xff] %v2328_v13  ;;  %v2333_v38 = vadd.f32 %v2077_v47, %v1821_v18  ;;  %v1820_v42 = vmul.f32 0.999, %v1564_v55  ;;  %v2076_v61 = vmul.f32 0.001, %v4843_v54 }
  0xad   :  { %8518 = vst [vmem:[#allocation28_spill] sm:$0xff] %v4851_v63  ;;  %v4857_v20 = vld [vmem:[%s8275_s3 + $0x378] sm:$0xff]  ;;  %v1567_v35 = vld [vmem:[#allocation2 + $0x368] sm:$0xff]  ;;  %2587 = vst [vmem:[#allocation10 + $0x348] sm:$0xff] %v2331_v29  ;;  %v2330_v13 = vadd.f32 %v2074_v53, %v1818_v5  ;;  %v2079_v56 = vmul.f32 0.001, %v4851_v63 }
  0xae   :  { %8519 = vst [vmem:[#allocation29_spill] sm:$0xff] %v4857_v20  ;;  %v71_v2 = vld [vmem:[%s8272_s0 + $0x8] sm:$0xff]  ;;  %v1569_v18 = vld [vmem:[#allocation2 + $0x378] sm:$0xff]  ;;  %v1823_v47 = vmul.f32 0.999, %v1567_v35  ;;  %v4873_v39 = vld [vmem:[%s8275_s3 + $0x360] sm:$0xff]  ;;  %v2332_v28 = vadd.f32 %v2076_v61, %v1820_v42 }
  0xaf   :  { %v4865_v12 = vld [vmem:[%s8273_s1 + $0x8] sm:$0xff]  ;;  %8520 = vst [vmem:[#allocation30_spill] sm:$0xff] %v4873_v39  ;;  %2589 = vst [vmem:[#allocation10 + $0x358] sm:$0xff] %v2333_v38  ;;  %v1825_v17 = vmul.f32 0.999, %v1569_v18  ;;  %v4879_v53 = vld [vmem:[%s8275_s3 + $0x370] sm:$0xff] }
  0xb0   :  { %v2081_v6 = vmul.f32 0.001, %v4857_v20  ;;  %8521 = vst [vmem:[#allocation31_spill] sm:$0xff] %v4879_v53  ;;  %v1566_v5 = vld [vmem:[#allocation2 + $0x360] sm:$0xff]  ;;  %v4884_v29 = vld [vmem:[%s8272_s0 + $0x48] sm:$0xff]  ;;  %2586 = vst [vmem:[#allocation10 + $0x340] sm:$0xff] %v2330_v13  ;;  %v2335_v38 = vadd.f32 %v2079_v56, %v1823_v47 }
  0xb1   :  { %v4889_v35 = vld [vmem:[%s8273_s1 + $0x48] sm:$0xff]  ;;  %v1568_v61 = vld [vmem:[#allocation2 + $0x370] sm:$0xff]  ;;  %v1822_v18 = vmul.f32 0.999, %v1566_v5  ;;  %v2078_v55 = vmul.f32 0.001, %v4873_v39 }
  0xb2   :  { %v4897_v60 = vld [vmem:[%s8275_s3 + $0x388] sm:$0xff]  ;;  %2588 = vst [vmem:[#allocation10 + $0x350] sm:$0xff] %v2332_v28  ;;  %v2337_v48 = vadd.f32 %v2081_v6, %v1825_v17  ;;  %v1824_v63 = vmul.f32 0.999, %v1568_v61  ;;  %v2080_v20 = vmul.f32 0.001, %v4879_v53  ;;  %v4922_v53 = vsub.f32 %v71_v2, %v4865_v12 }
  0xb3   :  { %8522 = vst [vmem:[#allocation32_spill] sm:$0xff] %v4897_v60  ;;  %v4903_v56 = vld [vmem:[%s8275_s3 + $0x398] sm:$0xff]  ;;  %v1571_v13 = vld [vmem:[#allocation2 + $0x388] sm:$0xff]  ;;  %v70_v47 = vld [vmem:[%s8272_s0] sm:$0xff]  ;;  %v2334_v6 = vadd.f32 %v2078_v55, %v1822_v18  ;;  %v2083_v42 = vmul.f32 0.001, %v4897_v60 }
  0xb4   :  { %8523 = vst [vmem:[#allocation33_spill] sm:$0xff] %v4903_v56  ;;  %v4911_v5 = vld [vmem:[%s8273_s1] sm:$0xff]  ;;  %2591 = vst [vmem:[#allocation10 + $0x368] sm:$0xff] %v2335_v38  ;;  %v1573_v28 = vld [vmem:[#allocation2 + $0x398] sm:$0xff]  ;;  %v1827_v61 = vmul.f32 0.999, %v1571_v13  ;;  %v2336_v24 = vadd.f32 %v2080_v20, %v1824_v63 }
  0xb5   :  { %v4919_v39 = vld [vmem:[%s8275_s3 + $0x380] sm:$0xff]  ;;  %8525 = vst [vmem:[#allocation35_spill] sm:$0xff] %v4922_v53  ;;  %2593 = vst [vmem:[#allocation10 + $0x378] sm:$0xff] %v2337_v48  ;;  %v1829_v54 = vmul.f32 0.999, %v1573_v28  ;;  %v4928_v38 = vld [vmem:[%s8275_s3 + $0x390] sm:$0xff] }
  0xb6   :  { %8524 = vst [vmem:[#allocation34_spill] sm:$0xff] %v4919_v39  ;;  %v2085_v55 = vmul.f32 0.001, %v4903_v56  ;;  %8526 = vst [vmem:[#allocation36_spill] sm:$0xff] %v4928_v38  ;;  %v1570_v18 = vld [vmem:[#allocation2 + $0x380] sm:$0xff]  ;;  %v73_v13 = vld [vmem:[%s8272_s0 + $0x18] sm:$0xff]  ;;  %v2339_v48 = vadd.f32 %v2083_v42, %v1827_v61 }
  0xb7   :  { %v4936_v2 = vld [vmem:[%s8273_s1 + $0x18] sm:$0xff]  ;;  %2590 = vst [vmem:[#allocation10 + $0x360] sm:$0xff] %v2334_v6  ;;  %v1572_v20 = vld [vmem:[#allocation2 + $0x390] sm:$0xff]  ;;  %v1826_v28 = vmul.f32 0.999, %v1570_v18  ;;  %v4944_v60 = vld [vmem:[%s8275_s3 + $0x3a8] sm:$0xff] }
  0xb8   :  { %v2082_v17 = vmul.f32 0.001, %v4919_v39  ;;  %8527 = vst [vmem:[#allocation37_spill] sm:$0xff] %v4944_v60  ;;  %2592 = vst [vmem:[#allocation10 + $0x370] sm:$0xff] %v2336_v24  ;;  %v2341_v30 = vadd.f32 %v2085_v55, %v1829_v54  ;;  %v1828_v33 = vmul.f32 0.999, %v1572_v20 }
  0xb9   :  { %v2084_v42 = vmul.f32 0.001, %v4928_v38  ;;  %v4952_v6 = vld [vmem:[%s8275_s3 + $0x3b8] sm:$0xff]  ;;  %v1575_v61 = vld [vmem:[#allocation2 + $0x3a8] sm:$0xff]  ;;  %v4957_v18 = vld [vmem:[%s8272_s0 + $0x40] sm:$0xff]  ;;  %2595 = vst [vmem:[#allocation10 + $0x388] sm:$0xff] %v2339_v48  ;;  %v4973_v38 = vsub.f32 %v70_v47, %v4911_v5 }
  0xba   :  { %8528 = vst [vmem:[#allocation38_spill] sm:$0xff] %v4952_v6  ;;  %v4962_v63 = vld [vmem:[%s8273_s1 + $0x40] sm:$0xff]  ;;  %v2338_v24 = vadd.f32 %v2082_v17, %v1826_v28  ;;  %v1577_v55 = vld [vmem:[#allocation2 + $0x3b8] sm:$0xff]  ;;  %v1831_v20 = vmul.f32 0.999, %v1575_v61  ;;  %2597 = vst [vmem:[#allocation10 + $0x398] sm:$0xff] %v2341_v30 }
  0xbb   :  { %v2087_v56 = vmul.f32 0.001, %v4944_v60  ;;  %v4970_v39 = vld [vmem:[%s8275_s3 + $0x3a0] sm:$0xff]  ;;  %8530 = vst [vmem:[#allocation40_spill] sm:$0xff] %v4973_v38  ;;  %v4978_v48 = vld [vmem:[%s8272_s0 + $0x58] sm:$0xff]  ;;  %v2340_v28 = vadd.f32 %v2084_v42, %v1828_v33  ;;  %v4989_v47 = vld [vmem:[%s8275_s3 + $0x3b0] sm:$0xff]  ;;  %v5000_v33 = vsub.f32 %v73_v13, %v4936_v2 }
  0xbc   :  { %8529 = vst [vmem:[#allocation39_spill] sm:$0xff] %v4970_v39  ;;  %v4983_v17 = vld [vmem:[%s8273_s1 + $0x58] sm:$0xff]  ;;  %v1833_v61 = vmul.f32 0.999, %v1577_v55  ;;  %v2089_v54 = vmul.f32 0.001, %v4952_v6 }
  0xbd   :  { %8531 = vst [vmem:[#allocation41_spill] sm:$0xff] %v4989_v47  ;;  %v1574_v60 = vld [vmem:[#allocation2 + $0x3a0] sm:$0xff]  ;;  %2594 = vst [vmem:[#allocation10 + $0x380] sm:$0xff] %v2338_v24  ;;  %v2343_v9 = vadd.f32 %v2087_v56, %v1831_v20  ;;  %v1576_v37 = vld [vmem:[#allocation2 + $0x3b0] sm:$0xff]  ;;  %v2086_v8 = vmul.f32 0.001, %v4970_v39 }
  0xbe   :  { %v1830_v52 = vmul.f32 0.999, %v1574_v60  ;;  %v4997_v30 = vld [vmem:[%s8275_s3 + $0x3c8] sm:$0xff]  ;;  %8533 = vst [vmem:[#allocation43_spill] sm:$0xff] %v5000_v33  ;;  %2596 = vst [vmem:[#allocation10 + $0x390] sm:$0xff] %v2340_v28  ;;  %v2345_v42 = vadd.f32 %v2089_v54, %v1833_v61  ;;  %v5006_v24 = vld [vmem:[%s8275_s3 + $0x3d8] sm:$0xff]  ;;  %v5011_v28 = vpop.permute.xlu0 %122 }
  0xbf   :  { %8532 = vst [vmem:[#allocation42_spill] sm:$0xff] %v4997_v30  ;;  %v1832_v55 = vmul.f32 0.999, %v1576_v37  ;;  %v2088_v56 = vmul.f32 0.001, %v4989_v47  ;;  %8534 = vst [vmem:[#allocation44_spill] sm:$0xff] %v5006_v24  ;;  %v112_v37 = vsub.f32 %v4957_v18, %v4962_v63 }
  0xc0   :  { %v1579_v60 = vld [vmem:[#allocation2 + $0x3c8] sm:$0xff]  ;;  %2599 = vst [vmem:[#allocation10 + $0x3a8] sm:$0xff] %v2343_v9  ;;  %v2342_v20 = vadd.f32 %v2086_v8, %v1830_v52  ;;  %v1581_v39 = vld [vmem:[#allocation2 + $0x3d8] sm:$0xff]  ;;  %v2091_v13 = vmul.f32 0.001, %v4997_v30  ;;  %2601 = vst [vmem:[#allocation10 + $0x3b8] sm:$0xff] %v2345_v42  ;;  %v131_v8 = vmul.f32 %v5011_v28, %v4922_v53  ;;  %v130_v52 = vmul.f32 %v5011_v28, %v4973_v38 }
  0xc1   :  { %v1835_v6 = vmul.f32 0.999, %v1579_v60  ;;  %v2344_v54 = vadd.f32 %v2088_v56, %v1832_v55  ;;  %v1837_v61 = vmul.f32 0.999, %v1581_v39  ;;  %v2093_v47 = vmul.f32 0.001, %v5006_v24 }
  0xc2   :  { %v1578_v22 = vld [vmem:[#allocation2 + $0x3c0] sm:$0xff]  ;;  %v115_v9 = vsub.f32 %v4978_v48, %v4983_v17  ;;  %2598 = vst [vmem:[#allocation10 + $0x3a0] sm:$0xff] %v2342_v20  ;;  %v1580_v39 = vld [vmem:[#allocation2 + $0x3d0] sm:$0xff]  ;;  %v133_v42 = vmul.f32 %v5011_v28, %v5000_v33  ;;  %v1583_v53 = vld [vmem:[#allocation2 + $0x3e8] sm:$0xff]  ;;  %v147_v30 = vadd.f32 %v131_v8, %v4865_v12  ;;  %v8536_v12 = vsub.f32 %v4884_v29, %v4889_v35 }
  0xc3   :  { %v2347_v60 = vadd.f32 %v2091_v13, %v1835_v6  ;;  %v5025_v18 = vld [vmem:[%s8275_s3 + $0x3c0] sm:$0xff]  ;;  %2600 = vst [vmem:[#allocation10 + $0x3b0] sm:$0xff] %v2344_v54  ;;  %v2349_v55 = vadd.f32 %v2093_v47, %v1837_v61  ;;  %v1834_v56 = vmul.f32 0.999, %v1578_v22  ;;  %v1836_v23 = vmul.f32 0.999, %v1580_v39  ;;  %v5036_v13 = vpop.permute.xlu0 %127 }
  0xc4   :  { %v1585_v38 = vld [vmem:[#allocation2 + $0x3f8] sm:$0xff]  ;;  %v5033_v6 = vld [vmem:[%s8275_s3 + $0x3d0] sm:$0xff]  ;;  %v2090_v48 = vmul.f32 0.001, %v5025_v18  ;;  %v1582_v20 = vld [vmem:[#allocation2 + $0x3e0] sm:$0xff]  ;;  %8535 = vst [vmem:[#allocation45_spill] sm:$0xff] %v5036_v13  ;;  %v146_v54 = vadd.f32 %v130_v52, %v4911_v5  ;;  %v139_v8 = vmul.f32 %v5036_v13, %v8536_v12  ;;  %v141_v39 = vmul.f32 %v5036_v13, %v115_v9 }
  0xc5   :  { %2603 = vst [vmem:[#allocation10 + $0x3c8] sm:$0xff] %v2347_v60  ;;  %2605 = vst [vmem:[#allocation10 + $0x3d8] sm:$0xff] %v2349_v55  ;;  %v2092_v22 = vmul.f32 0.001, %v5033_v6  ;;  %v1839_v47 = vmul.f32 0.999, %v1583_v53  ;;  %v138_v60 = vmul.f32 %v5036_v13, %v112_v37  ;;  %v149_v29 = vadd.f32 %v133_v42, %v4936_v2 }
  0xc6   :  { %v1841_v61 = vmul.f32 0.999, %v1585_v38  ;;  %v2346_v33 = vadd.f32 %v2090_v48, %v1834_v56  ;;  %v5049_v24 = vld [vmem:[%s8275_s3 + $0x3e8] sm:$0xff]  ;;  %v5054_v53 = vld [vmem:[%s8275_s3 + $0x3f8] sm:$0xff]  ;;  %v1584_v5 = vld [vmem:[#allocation2 + $0x3f0] sm:$0xff]  ;;  %v155_v9 = vadd.f32 %v139_v8, %v4889_v35  ;;  %v157_v56 = vadd.f32 %v141_v39, %v4983_v17 }
  0xc7   :  { %v2348_v38 = vadd.f32 %v2092_v22, %v1836_v23  ;;  %v2095_v52 = vmul.f32 0.001, %v5049_v24  ;;  %v2097_v37 = vmul.f32 0.001, %v5054_v53  ;;  %v154_v55 = vadd.f32 %v138_v60, %v4962_v63  ;;  %v5065_v48 = vld [vmem:[%s8275_s3 + $0x3e0] sm:$0xff]  ;;  %v5070_v23 = vld [vmem:[%s8275_s3 + $0x3f0] sm:$0xff] }
  0xc8   :  { %2602 = vst [vmem:[#allocation10 + $0x3c0] sm:$0xff] %v2346_v33  ;;  %v1838_v2 = vmul.f32 0.999, %v1582_v20  ;;  %v1840_v35 = vmul.f32 0.999, %v1584_v5  ;;  %v1587_v12 = vld [vmem:[#allocation2 + $0x408] sm:$0xff]  ;;  %v675_v33 = vpack.c.bf16 %v155_v9, %v147_v30  ;;  %v677_v13 = vpack.c.bf16 %v157_v56, %v149_v29 }
  0xc9   :  { %2604 = vst [vmem:[#allocation10 + $0x3d0] sm:$0xff] %v2348_v38  ;;  %v2351_v42 = vadd.f32 %v2095_v52, %v1839_v47  ;;  %v2353_v22 = vadd.f32 %v2097_v37, %v1841_v61  ;;  %v2094_v63 = vmul.f32 0.001, %v5065_v48  ;;  %v1589_v17 = vld [vmem:[#allocation2 + $0x418] sm:$0xff]  ;;  %v674_v8 = vpack.c.bf16 %v154_v55, %v146_v54  ;;  %v5077_v39 = vld [vmem:[%s8275_s3 + $0x408] sm:$0xff]  ;;  %v1586_v61 = vld [vmem:[#allocation2 + $0x400] sm:$0xff] }
  0xca   :  { %v2096_v60 = vmul.f32 0.001, %v5070_v23  ;;  %v5082_v47 = vld [vmem:[%s8275_s3 + $0x418] sm:$0xff]  ;;  %v1588_v5 = vld [vmem:[#allocation2 + $0x410] sm:$0xff]  ;;  %854 = vmatprep.mubr.bf16.mxu0 %v675_v33  ;;  %v1843_v54 = vmul.f32 0.999, %v1587_v12  ;;  %v8537_v55 = vpack.c.bf16 %v4563_v46, %v4558_v45 }
  0xcb   :  { %2607 = vst [vmem:[#allocation10 + $0x3e8] sm:$0xff] %v2351_v42  ;;  %2609 = vst [vmem:[#allocation10 + $0x3f8] sm:$0xff] %v2353_v22  ;;  %v2350_v20 = vadd.f32 %v2094_v63, %v1838_v2  ;;  %v1845_v38 = vmul.f32 0.999, %v1589_v17  ;;  %v2099_v52 = vmul.f32 0.001, %v5077_v39  ;;  %855 = vmatmul.mubr.bf16.vlgmr.msra.gmra.mrb[0].mxu0 %v674_v8 }
  0xcc   :  { %v2352_v30 = vadd.f32 %v2096_v60, %v1840_v35  ;;  %v2101_v29 = vmul.f32 0.001, %v5082_v47  ;;  %v5089_v37 = vld [vmem:[%s8275_s3 + $0x400] sm:$0xff]  ;;  %v5094_v9 = vld [vmem:[%s8275_s3 + $0x410] sm:$0xff]  ;;  %866 = vmatpush1.bf16.msra.mxu0 %v8537_v55  ;;  %897 = vmatprep.mubr.bf16.mxu0 %v677_v13  ;;  %v1842_v2 = vmul.f32 0.999, %v1586_v61  ;;  %v8538_v35 = vpack.c.bf16 %v4577_v58, %v4572_v57 }
  0xcd   :  { %2606 = vst [vmem:[#allocation10 + $0x3e0] sm:$0xff] %v2350_v20  ;;  %v2355_v56 = vadd.f32 %v2099_v52, %v1843_v54  ;;  %v1844_v42 = vmul.f32 0.999, %v1588_v5  ;;  %v2098_v22 = vmul.f32 0.001, %v5089_v37  ;;  %v1591_v17 = vld [vmem:[#allocation2 + $0x428] sm:$0xff]  ;;  %v8539_v5 = vpack.c.bf16 %v4591_v3, %v4585_v0 }
  0xce   :  { %2608 = vst [vmem:[#allocation10 + $0x3f0] sm:$0xff] %v2352_v30  ;;  %867 = vmatprep.subr.bf16.mxu0 %v8538_v35  ;;  %v2357_v63 = vadd.f32 %v2101_v29, %v1845_v38  ;;  %v2100_v12 = vmul.f32 0.001, %v5094_v9  ;;  %v1593_v33 = vld [vmem:[#allocation2 + $0x438] sm:$0xff]  ;;  %v5107_v45 = vld [vmem:[%s8275_s3 + $0x428] sm:$0xff]  ;;  %v1590_v46 = vld [vmem:[#allocation2 + $0x420] sm:$0xff]  ;;  %v8540_v55 = vpack.c.bf16 %v4605_v14, %v4599_v10 }
  0xcf   :  { %2611 = vst [vmem:[#allocation10 + $0x408] sm:$0xff] %v2355_v56  ;;  %v2354_v8 = vadd.f32 %v2098_v22, %v1842_v2  ;;  %v1592_v13 = vld [vmem:[#allocation2 + $0x430] sm:$0xff]  ;;  %v5112_v57 = vld [vmem:[%s8275_s3 + $0x438] sm:$0xff]  ;;  %v1847_v58 = vmul.f32 0.999, %v1591_v17  ;;  %v5117_v61 = vld [vmem:[%s8275_s3 + $0x420] sm:$0xff] }
  0xd0   :  { %2613 = vst [vmem:[#allocation10 + $0x418] sm:$0xff] %v2357_v63  ;;  %v2356_v60 = vadd.f32 %v2100_v12, %v1844_v42  ;;  %v1849_v20 = vmul.f32 0.999, %v1593_v33  ;;  %868 = vmatpush1.bf16.msra.mxu0 %v8539_v5  ;;  %v2103_v30 = vmul.f32 0.001, %v5107_v45  ;;  %v5127_v38 = vld [vmem:[%s8275_s3 + $0x430] sm:$0xff] }
  0xd1   :  { %2610 = vst [vmem:[#allocation10 + $0x400] sm:$0xff] %v2354_v8  ;;  %v2105_v54 = vmul.f32 0.001, %v5112_v57  ;;  %v1595_v52 = vld [vmem:[#allocation2 + $0x448] sm:$0xff]  ;;  %v1597_v29 = vld [vmem:[#allocation2 + $0x458] sm:$0xff]  ;;  %869 = vmatprep.subr.bf16.mxu0 %v8540_v55  ;;  %v1594_v63 = vld [vmem:[#allocation2 + $0x440] sm:$0xff] }
  0xd2   :  { %2612 = vst [vmem:[#allocation10 + $0x410] sm:$0xff] %v2356_v60  ;;  %v1846_v56 = vmul.f32 0.999, %v1590_v46  ;;  %v1848_v0 = vmul.f32 0.999, %v1592_v13  ;;  %v2359_v2 = vadd.f32 %v2103_v30, %v1847_v58  ;;  %v5136_v22 = vld [vmem:[%s8275_s3 + $0x448] sm:$0xff]  ;;  %v8541_v46 = vpack.c.bf16 %v4619_v25, %v4613_v21 }
  0xd3   :  { %v2102_v3 = vmul.f32 0.001, %v5117_v61  ;;  %v2361_v42 = vadd.f32 %v2105_v54, %v1849_v20  ;;  %v5141_v35 = vld [vmem:[%s8275_s3 + $0x458] sm:$0xff]  ;;  %v2104_v10 = vmul.f32 0.001, %v5127_v38  ;;  %v5147_v17 = vld [vmem:[%s8275_s3 + $0x440] sm:$0xff]  ;;  %v8542_v20 = vpack.c.bf16 %v4633_v36, %v4627_v32 }
  0xd4   :  { %v1851_v12 = vmul.f32 0.999, %v1595_v52  ;;  %v5152_v33 = vld [vmem:[%s8275_s3 + $0x450] sm:$0xff]  ;;  %870 = vmatpush1.bf16.msra.mxu0 %v8541_v46  ;;  %2615 = vst [vmem:[#allocation10 + $0x428] sm:$0xff] %v2359_v2  ;;  %v1853_v13 = vmul.f32 0.999, %v1597_v29 }
  0xd5   :  { %v2358_v14 = vadd.f32 %v2102_v3, %v1846_v56  ;;  %v1596_v8 = vld [vmem:[#allocation2 + $0x450] sm:$0xff]  ;;  %2617 = vst [vmem:[#allocation10 + $0x438] sm:$0xff] %v2361_v42  ;;  %v2107_v60 = vmul.f32 0.001, %v5136_v22  ;;  %v2109_v58 = vmul.f32 0.001, %v5141_v35  ;;  %871 = vmatprep.subr.bf16.mxu0 %v8542_v20  ;;  %v2360_v5 = vadd.f32 %v2104_v10, %v1848_v0 }
  0xd6   :  { %v1850_v30 = vmul.f32 0.999, %v1594_v63  ;;  %v1852_v54 = vmul.f32 0.999, %v1596_v8  ;;  %v5165_v21 = vld [vmem:[%s8275_s3 + $0x468] sm:$0xff]  ;;  %v5172_v32 = vld [vmem:[%s8275_s3 + $0x478] sm:$0xff]  ;;  %v8543_v63 = vpack.c.bf16 %v4647_v50, %v4641_v43 }
  0xd7   :  { %2614 = vst [vmem:[#allocation10 + $0x420] sm:$0xff] %v2358_v14  ;;  %v1599_v25 = vld [vmem:[#allocation2 + $0x468] sm:$0xff]  ;;  %v2363_v52 = vadd.f32 %v2107_v60, %v1851_v12  ;;  %v2365_v29 = vadd.f32 %v2109_v58, %v1853_v13  ;;  %v2106_v55 = vmul.f32 0.001, %v5147_v17  ;;  %v2108_v56 = vmul.f32 0.001, %v5152_v33 }
  0xd8   :  { %v1601_v36 = vld [vmem:[#allocation2 + $0x478] sm:$0xff]  ;;  %2616 = vst [vmem:[#allocation10 + $0x430] sm:$0xff] %v2360_v5  ;;  %v1855_v0 = vmul.f32 0.999, %v1599_v25  ;;  %v2111_v2 = vmul.f32 0.001, %v5165_v21  ;;  %872 = vmatpush1.bf16.msra.mxu0 %v8543_v63  ;;  %v8544_v60 = vpack.c.bf16 %v4661_v1, %v4655_v59 }
  0xd9   :  { %v1857_v3 = vmul.f32 0.999, %v1601_v36  ;;  %v5178_v42 = vld [vmem:[%s8275_s3 + $0x460] sm:$0xff]  ;;  %2619 = vst [vmem:[#allocation10 + $0x448] sm:$0xff] %v2363_v52  ;;  %2621 = vst [vmem:[#allocation10 + $0x458] sm:$0xff] %v2365_v29  ;;  %v2362_v10 = vadd.f32 %v2106_v55, %v1850_v30  ;;  %v2364_v14 = vadd.f32 %v2108_v56, %v1852_v54  ;;  %v5187_v8 = vld [vmem:[%s8275_s3 + $0x470] sm:$0xff]  ;;  %v8545_v56 = vpack.c.bf16 %v4675_v16, %v4669_v11 }
  0xda   :  { %v2113_v12 = vmul.f32 0.001, %v5172_v32  ;;  %v1598_v46 = vld [vmem:[#allocation2 + $0x460] sm:$0xff]  ;;  %v1600_v13 = vld [vmem:[#allocation2 + $0x470] sm:$0xff]  ;;  %873 = vmatprep.subr.bf16.mxu0 %v8544_v60  ;;  %v2367_v58 = vadd.f32 %v2111_v2, %v1855_v0  ;;  %v5195_v20 = vld [vmem:[%s8275_s3 + $0x488] sm:$0xff] }
  0xdb   :  { %v1854_v43 = vmul.f32 0.999, %v1598_v46  ;;  %v1856_v50 = vmul.f32 0.999, %v1600_v13  ;;  %v5200_v5 = vld [vmem:[%s8275_s3 + $0x498] sm:$0xff]  ;;  %2618 = vst [vmem:[#allocation10 + $0x440] sm:$0xff] %v2362_v10  ;;  %v8546_v10 = vpack.c.bf16 %v4689_v31, %v4683_v26 }
  0xdc   :  { %2620 = vst [vmem:[#allocation10 + $0x450] sm:$0xff] %v2364_v14  ;;  %v2369_v30 = vadd.f32 %v2113_v12, %v1857_v3  ;;  %v2110_v54 = vmul.f32 0.001, %v5178_v42  ;;  %v2112_v59 = vmul.f32 0.001, %v5187_v8  ;;  %v1603_v1 = vld [vmem:[#allocation2 + $0x488] sm:$0xff]  ;;  %874 = vmatpush1.bf16.msra.mxu0 %v8545_v56 }
  0xdd   :  { %v1605_v25 = vld [vmem:[#allocation2 + $0x498] sm:$0xff]  ;;  %2623 = vst [vmem:[#allocation10 + $0x468] sm:$0xff] %v2367_v58  ;;  %v1859_v52 = vmul.f32 0.999, %v1603_v1  ;;  %v2115_v55 = vmul.f32 0.001, %v5195_v20  ;;  %875 = vmatprep.subr.bf16.mxu0 %v8546_v10  ;;  %v8547_v1 = vpack.c.bf16 %v4703_v49, %v4697_v41 }
  0xde   :  { %v1861_v29 = vmul.f32 0.999, %v1605_v25  ;;  %2625 = vst [vmem:[#allocation10 + $0x478] sm:$0xff] %v2369_v30  ;;  %v2366_v36 = vadd.f32 %v2110_v54, %v1854_v43  ;;  %v2368_v0 = vadd.f32 %v2112_v59, %v1856_v50  ;;  %v2117_v3 = vmul.f32 0.001, %v5200_v5  ;;  %v5212_v2 = vld [vmem:[%s8275_s3 + $0x480] sm:$0xff] }
  0xdf   :  { %v1602_v63 = vld [vmem:[#allocation2 + $0x480] sm:$0xff]  ;;  %v2371_v14 = vadd.f32 %v2115_v55, %v1859_v52  ;;  %v5220_v11 = vld [vmem:[%s8275_s3 + $0x490] sm:$0xff]  ;;  %v2114_v46 = vmul.f32 0.001, %v5212_v2  ;;  %v5227_v26 = vld [vmem:[%s8275_s3 + $0x4a8] sm:$0xff] }
  0xe0   :  { %v1604_v16 = vld [vmem:[#allocation2 + $0x490] sm:$0xff]  ;;  %v1858_v12 = vmul.f32 0.999, %v1602_v63  ;;  %2622 = vst [vmem:[#allocation10 + $0x460] sm:$0xff] %v2366_v36  ;;  %2624 = vst [vmem:[#allocation10 + $0x470] sm:$0xff] %v2368_v0  ;;  %v2373_v13 = vadd.f32 %v2117_v3, %v1861_v29  ;;  %v1607_v31 = vld [vmem:[#allocation2 + $0x4a8] sm:$0xff]  ;;  %876 = vmatpush1.bf16.msra.mxu0 %v8547_v1  ;;  %v8548_v36 = vpack.c.bf16 %v4717_v7, %v4711_v62 }
  0xe1   :  { %v1860_v60 = vmul.f32 0.999, %v1604_v16  ;;  %v2116_v58 = vmul.f32 0.001, %v5220_v11  ;;  %2627 = vst [vmem:[#allocation10 + $0x488] sm:$0xff] %v2371_v14  ;;  %v5232_v50 = vld [vmem:[%s8275_s3 + $0x4b8] sm:$0xff] }
  0xe2   :  { %v2370_v43 = vadd.f32 %v2114_v46, %v1858_v12  ;;  %v1609_v30 = vld [vmem:[#allocation2 + $0x4b8] sm:$0xff]  ;;  %v1863_v54 = vmul.f32 0.999, %v1607_v31  ;;  %v2119_v59 = vmul.f32 0.001, %v5227_v26  ;;  %2629 = vst [vmem:[#allocation10 + $0x498] sm:$0xff] %v2373_v13  ;;  %877 = vmatprep.subr.bf16.mxu0 %v8548_v36  ;;  %v8549_v31 = vpack.c.bf16 %v4731_v27, %v4725_v19 }
  0xe3   :  { %v2372_v25 = vadd.f32 %v2116_v58, %v1860_v60  ;;  %v1865_v52 = vmul.f32 0.999, %v1609_v30  ;;  %v2121_v29 = vmul.f32 0.001, %v5232_v50  ;;  %v5242_v55 = vld [vmem:[%s8275_s3 + $0x4a0] sm:$0xff]  ;;  %v5250_v41 = vld [vmem:[%s8275_s3 + $0x4b0] sm:$0xff] }
  0xe4   :  { %v1606_v56 = vld [vmem:[#allocation2 + $0x4a0] sm:$0xff]  ;;  %2626 = vst [vmem:[#allocation10 + $0x480] sm:$0xff] %v2370_v43  ;;  %v2375_v0 = vadd.f32 %v2119_v59, %v1863_v54  ;;  %v1608_v49 = vld [vmem:[#allocation2 + $0x4b0] sm:$0xff]  ;;  %v2118_v63 = vmul.f32 0.001, %v5242_v55  ;;  %v5257_v62 = vld [vmem:[%s8275_s3 + $0x4c8] sm:$0xff]  ;;  %878 = vmatpush1.bf16.msra.mxu0 %v8549_v31 }
  0xe5   :  { %v1862_v3 = vmul.f32 0.999, %v1606_v56  ;;  %2628 = vst [vmem:[#allocation10 + $0x490] sm:$0xff] %v2372_v25  ;;  %v2377_v10 = vadd.f32 %v2121_v29, %v1865_v52  ;;  %v1864_v14 = vmul.f32 0.999, %v1608_v49  ;;  %v1611_v7 = vld [vmem:[#allocation2 + $0x4c8] sm:$0xff]  ;;  %v8550_v25 = vpack.c.bf16 %v4745_v51, %v4739_v40 }
  0xe6   :  { %v2120_v16 = vmul.f32 0.001, %v5250_v41  ;;  %2631 = vst [vmem:[#allocation10 + $0x4a8] sm:$0xff] %v2375_v0  ;;  %v5262_v46 = vld [vmem:[%s8275_s3 + $0x4d8] sm:$0xff]  ;;  %v1867_v60 = vmul.f32 0.999, %v1611_v7  ;;  %v8553_v7 = vpack.c.bf16 %v4759_v15, %v4753_v4 }
  0xe7   :  { %v2374_v12 = vadd.f32 %v2118_v63, %v1862_v3  ;;  %v1613_v13 = vld [vmem:[#allocation2 + $0x4d8] sm:$0xff]  ;;  %v2123_v58 = vmul.f32 0.001, %v5257_v62  ;;  %2633 = vst [vmem:[#allocation10 + $0x4b8] sm:$0xff] %v2377_v10  ;;  %v2125_v54 = vmul.f32 0.001, %v5262_v46  ;;  %879 = vmatprep.subr.bf16.mxu0 %v8550_v25 }
  0xe8   :  { %v2376_v43 = vadd.f32 %v2120_v16, %v1864_v14  ;;  %v1869_v30 = vmul.f32 0.999, %v1613_v13  ;;  %v5272_v59 = vld [vmem:[%s8275_s3 + $0x4c0] sm:$0xff]  ;;  %v5280_v19 = vld [vmem:[%s8275_s3 + $0x4d0] sm:$0xff]  ;;  %v5287_v40 = vld [vmem:[%s8275_s3 + $0x4e8] sm:$0xff]  ;;  %880 = vmatpush1.bf16.msra.mxu0 %v8553_v7 }
  0xe9   :  { %v1610_v1 = vld [vmem:[#allocation2 + $0x4c0] sm:$0xff]  ;;  %2630 = vst [vmem:[#allocation10 + $0x4a0] sm:$0xff] %v2374_v12  ;;  %v2379_v52 = vadd.f32 %v2123_v58, %v1867_v60  ;;  %v1612_v27 = vld [vmem:[#allocation2 + $0x4d0] sm:$0xff]  ;;  %v2122_v56 = vmul.f32 0.001, %v5272_v59  ;;  %8551 = vst [vmem:[#allocation46_spill] sm:$0xff] %v5287_v40 }
  0xea   :  { %v1866_v29 = vmul.f32 0.999, %v1610_v1  ;;  %2632 = vst [vmem:[#allocation10 + $0x4b0] sm:$0xff] %v2376_v43  ;;  %v2381_v36 = vadd.f32 %v2125_v54, %v1869_v30  ;;  %v1868_v0 = vmul.f32 0.999, %v1612_v27  ;;  %v1615_v51 = vld [vmem:[#allocation2 + $0x4e8] sm:$0xff]  ;;  %v8555_v43 = vpack.c.bf16 %v4773_v44, %v4767_v34 }
  0xeb   :  { %v2124_v49 = vmul.f32 0.001, %v5280_v19  ;;  %2635 = vst [vmem:[#allocation10 + $0x4c8] sm:$0xff] %v2379_v52  ;;  %v5292_v63 = vld [vmem:[%s8275_s3 + $0x4f8] sm:$0xff]  ;;  %v1871_v14 = vmul.f32 0.999, %v1615_v51 }
  0xec   :  { %v2378_v3 = vadd.f32 %v2122_v56, %v1866_v29  ;;  %8552 = vst [vmem:[#allocation47_spill] sm:$0xff] %v5292_v63  ;;  %v1617_v10 = vld [vmem:[#allocation2 + $0x4f8] sm:$0xff]  ;;  %v2127_v16 = vmul.f32 0.001, %v5287_v40  ;;  %2637 = vst [vmem:[#allocation10 + $0x4d8] sm:$0xff] %v2381_v36  ;;  %v5302_v58 = vld [vmem:[%s8275_s3 + $0x4e0] sm:$0xff]  ;;  %881 = vmatprep.subr.bf16.mxu0 %v8555_v43 }
  0xed   :  { %v2380_v12 = vadd.f32 %v2124_v49, %v1868_v0  ;;  %v1873_v13 = vmul.f32 0.999, %v1617_v10  ;;  %v2129_v60 = vmul.f32 0.001, %v5292_v63  ;;  %8554 = vst [vmem:[#allocation48_spill] sm:$0xff] %v5302_v58  ;;  %v1614_v31 = vld [vmem:[#allocation2 + $0x4e0] sm:$0xff] }
  0xee   :  { %2634 = vst [vmem:[#allocation10 + $0x4c0] sm:$0xff] %v2378_v3  ;;  %v2383_v30 = vadd.f32 %v2127_v16, %v1871_v14  ;;  %v5310_v4 = vld [vmem:[%s8275_s3 + $0x4f0] sm:$0xff]  ;;  %v1870_v54 = vmul.f32 0.999, %v1614_v31  ;;  %v2126_v1 = vmul.f32 0.001, %v5302_v58 }
  0xef   :  { %8556 = vst [vmem:[#allocation49_spill] sm:$0xff] %v5310_v4  ;;  %v1616_v15 = vld [vmem:[#allocation2 + $0x4f0] sm:$0xff]  ;;  %2636 = vst [vmem:[#allocation10 + $0x4d0] sm:$0xff] %v2380_v12  ;;  %v2385_v25 = vadd.f32 %v2129_v60, %v1873_v13  ;;  %v2128_v27 = vmul.f32 0.001, %v5310_v4  ;;  %v5317_v34 = vld [vmem:[%s8275_s3 + $0x508] sm:$0xff] }
  0xf0   :  { %v1872_v52 = vmul.f32 0.999, %v1616_v15  ;;  %8557 = vst [vmem:[#allocation50_spill] sm:$0xff] %v5317_v34  ;;  %v1619_v44 = vld [vmem:[#allocation2 + $0x508] sm:$0xff]  ;;  %2639 = vst [vmem:[#allocation10 + $0x4e8] sm:$0xff] %v2383_v30  ;;  %v2382_v29 = vadd.f32 %v2126_v1, %v1870_v54  ;;  %v5322_v56 = vld [vmem:[%s8275_s3 + $0x518] sm:$0xff] }
  0xf1   :  { %8558 = vst [vmem:[#allocation51_spill] sm:$0xff] %v5322_v56  ;;  %v1621_v36 = vld [vmem:[#allocation2 + $0x518] sm:$0xff]  ;;  %v1875_v0 = vmul.f32 0.999, %v1619_v44  ;;  %v2131_v49 = vmul.f32 0.001, %v5317_v34 }
  0xf2   :  { %v8559_v51 = vld [vmem:[#allocation19_spill] sm:$0xff]  ;;  %v8560_v3 = vld [vmem:[#allocation18_spill] sm:$0xff]  ;;  %2641 = vst [vmem:[#allocation10 + $0x4f8] sm:$0xff] %v2385_v25  ;;  %v2384_v14 = vadd.f32 %v2128_v27, %v1872_v52  ;;  %v1877_v16 = vmul.f32 0.999, %v1621_v36  ;;  %v8563_v60 = vld [vmem:[#allocation21_spill] sm:$0xff] }
  0xf3   :  { %v8561_v10 = vpack.c.bf16 %v8559_v51, %v8560_v3  ;;  %v2133_v7 = vmul.f32 0.001, %v5322_v56  ;;  %v5332_v12 = vld [vmem:[%s8275_s3 + $0x500] sm:$0xff]  ;;  %v8564_v31 = vld [vmem:[#allocation20_spill] sm:$0xff]  ;;  %2638 = vst [vmem:[#allocation10 + $0x4e0] sm:$0xff] %v2382_v29  ;;  %v2387_v30 = vadd.f32 %v2131_v49, %v1875_v0  ;;  %v5347_v36 = vld [vmem:[%s8275_s3 + $0x528] sm:$0xff] }
  0xf4   :  { %8562 = vst [vmem:[#allocation19_spill] sm:$0xff] %v5332_v12  ;;  %v1618_v13 = vld [vmem:[#allocation2 + $0x500] sm:$0xff]  ;;  %v8565_v43 = vpack.c.bf16 %v8563_v60, %v8564_v31  ;;  %v5340_v15 = vld [vmem:[%s8275_s3 + $0x510] sm:$0xff]  ;;  %v2130_v25 = vmul.f32 0.001, %v5332_v12  ;;  %2640 = vst [vmem:[#allocation10 + $0x4f0] sm:$0xff] %v2384_v14 }
  0xf5   :  { %882 = vmatpush1.bf16.msra.mxu0 %v8561_v10  ;;  %8566 = vst [vmem:[#allocation18_spill] sm:$0xff] %v5340_v15  ;;  %v1620_v54 = vld [vmem:[#allocation2 + $0x510] sm:$0xff]  ;;  %v1874_v1 = vmul.f32 0.999, %v1618_v13  ;;  %v2389_v52 = vadd.f32 %v2133_v7, %v1877_v16  ;;  %v2132_v44 = vmul.f32 0.001, %v5340_v15 }
  0xf6   :  { %883 = vmatprep.subr.bf16.mxu0 %v8565_v43  ;;  %v1876_v27 = vmul.f32 0.999, %v1620_v54  ;;  %8567 = vst [vmem:[#allocation21_spill] sm:$0xff] %v5347_v36  ;;  %v1623_v29 = vld [vmem:[#allocation2 + $0x528] sm:$0xff]  ;;  %2643 = vst [vmem:[#allocation10 + $0x508] sm:$0xff] %v2387_v30  ;;  %v5352_v49 = vld [vmem:[%s8275_s3 + $0x538] sm:$0xff] }
  0xf7   :  { %v2386_v0 = vadd.f32 %v2130_v25, %v1874_v1  ;;  %8568 = vst [vmem:[#allocation20_spill] sm:$0xff] %v5352_v49  ;;  %v1625_v51 = vld [vmem:[#allocation2 + $0x538] sm:$0xff]  ;;  %v1879_v3 = vmul.f32 0.999, %v1623_v29  ;;  %v2135_v10 = vmul.f32 0.001, %v5347_v36 }
  0xf8   :  { %v8569_v14 = vld [vmem:[#allocation23_spill] sm:$0xff]  ;;  %v8570_v16 = vld [vmem:[#allocation22_spill] sm:$0xff]  ;;  %2645 = vst [vmem:[#allocation10 + $0x518] sm:$0xff] %v2389_v52  ;;  %v2388_v13 = vadd.f32 %v2132_v44, %v1876_v27  ;;  %v1881_v60 = vmul.f32 0.999, %v1625_v51  ;;  %v8573_v54 = vld [vmem:[#allocation25_spill] sm:$0xff] }
  0xf9   :  { %v8571_v7 = vpack.c.bf16 %v8569_v14, %v8570_v16  ;;  %v2137_v31 = vmul.f32 0.001, %v5352_v49  ;;  %v5362_v43 = vld [vmem:[%s8275_s3 + $0x520] sm:$0xff]  ;;  %v8574_v1 = vld [vmem:[#allocation24_spill] sm:$0xff]  ;;  %2642 = vst [vmem:[#allocation10 + $0x500] sm:$0xff] %v2386_v0  ;;  %v2391_v29 = vadd.f32 %v2135_v10, %v1879_v3  ;;  %v1627_v0 = vld [vmem:[#allocation2 + $0x548] sm:$0xff] }
  0xfa   :  { %8572 = vst [vmem:[#allocation23_spill] sm:$0xff] %v5362_v43  ;;  %v1622_v30 = vld [vmem:[#allocation2 + $0x520] sm:$0xff]  ;;  %v8575_v25 = vpack.c.bf16 %v8573_v54, %v8574_v1  ;;  %v5370_v52 = vld [vmem:[%s8275_s3 + $0x530] sm:$0xff]  ;;  %v2134_v51 = vmul.f32 0.001, %v5362_v43  ;;  %2644 = vst [vmem:[#allocation10 + $0x510] sm:$0xff] %v2388_v13 }
  0xfb   :  { %884 = vmatpush1.bf16.msra.mxu0 %v8571_v7  ;;  %8576 = vst [vmem:[#allocation22_spill] sm:$0xff] %v5370_v52  ;;  %v1624_v27 = vld [vmem:[#allocation2 + $0x530] sm:$0xff]  ;;  %v1878_v44 = vmul.f32 0.999, %v1622_v30  ;;  %v2393_v14 = vadd.f32 %v2137_v31, %v1881_v60  ;;  %v2136_v7 = vmul.f32 0.001, %v5370_v52 }
  0xfc   :  { %885 = vmatprep.subr.bf16.mxu0 %v8575_v25  ;;  %v1880_v16 = vmul.f32 0.999, %v1624_v27  ;;  %v5377_v54 = vld [vmem:[%s8275_s3 + $0x548] sm:$0xff]  ;;  %2647 = vst [vmem:[#allocation10 + $0x528] sm:$0xff] %v2391_v29  ;;  %v5382_v10 = vld [vmem:[%s8275_s3 + $0x558] sm:$0xff]  ;;  %v8580_v31 = vld [vmem:[#allocation26_spill] sm:$0xff] }
  0xfd   :  { %8577 = vst [vmem:[#allocation25_spill] sm:$0xff] %v5377_v54  ;;  %v2390_v3 = vadd.f32 %v2134_v51, %v1878_v44  ;;  %8578 = vst [vmem:[#allocation24_spill] sm:$0xff] %v5382_v10  ;;  %v1629_v30 = vld [vmem:[#allocation2 + $0x558] sm:$0xff]  ;;  %v1883_v1 = vmul.f32 0.999, %v1627_v0  ;;  %v8579_v60 = vld [vmem:[#allocation27_spill] sm:$0xff] }
  0xfe   :  { %v2139_v13 = vmul.f32 0.001, %v5377_v54  ;;  %v8581_v25 = vpack.c.bf16 %v8579_v60, %v8580_v31  ;;  %v72_v27 = vld [vmem:[%s8272_s0 + $0x10] sm:$0xff]  ;;  %2649 = vst [vmem:[#allocation10 + $0x538] sm:$0xff] %v2393_v14  ;;  %v2392_v44 = vadd.f32 %v2136_v7, %v1880_v16  ;;  %v1885_v51 = vmul.f32 0.999, %v1629_v30 }
  0xff   :  { %v5394_v29 = vld [vmem:[%s8273_s1 + $0x10] sm:$0xff]  ;;  %v2141_v0 = vmul.f32 0.001, %v5382_v10  ;;  %v5400_v54 = vld [vmem:[%s8275_s3 + $0x540] sm:$0xff]  ;;  %v8583_v31 = vld [vmem:[#allocation29_spill] sm:$0xff]  ;;  %2646 = vst [vmem:[#allocation10 + $0x520] sm:$0xff] %v2390_v3 }
 0x100   :  { %886 = vmatpush1.bf16.msra.mxu0 %v8581_v25  ;;  %8582 = vst [vmem:[#allocation27_spill] sm:$0xff] %v5400_v54  ;;  %v1626_v60 = vld [vmem:[#allocation2 + $0x540] sm:$0xff]  ;;  %v8584_v25 = vld [vmem:[#allocation28_spill] sm:$0xff]  ;;  %v2395_v43 = vadd.f32 %v2139_v13, %v1883_v1  ;;  %v2138_v30 = vmul.f32 0.001, %v5400_v54  ;;  %2648 = vst [vmem:[#allocation10 + $0x530] sm:$0xff] %v2392_v44 }
 0x101   :  { %v8585_v52 = vpack.c.bf16 %v8583_v31, %v8584_v25  ;;  %v5408_v14 = vld [vmem:[%s8275_s3 + $0x550] sm:$0xff]  ;;  %v1882_v7 = vmul.f32 0.999, %v1626_v60  ;;  %v2397_v3 = vadd.f32 %v2141_v0, %v1885_v51  ;;  %v5425_v60 = vld [vmem:[%s8275_s3 + $0x568] sm:$0xff]  ;;  %v5432_v49 = vld [vmem:[%s8275_s3 + $0x578] sm:$0xff] }
 0x102   :  { %8586 = vst [vmem:[#allocation26_spill] sm:$0xff] %v5408_v14  ;;  %v1628_v16 = vld [vmem:[#allocation2 + $0x550] sm:$0xff]  ;;  %v2140_v13 = vmul.f32 0.001, %v5408_v14  ;;  %8587 = vst [vmem:[#allocation29_spill] sm:$0xff] %v5425_v60  ;;  %v1631_v31 = vld [vmem:[#allocation2 + $0x568] sm:$0xff] }
 0x103   :  { %887 = vmatprep.subr.bf16.mxu0 %v8585_v52  ;;  %v5414_v10 = vld [vmem:[%s8272_s0 + $0x50] sm:$0xff]  ;;  %v1884_v1 = vmul.f32 0.999, %v1628_v16  ;;  %2651 = vst [vmem:[#allocation10 + $0x548] sm:$0xff] %v2395_v43  ;;  %v2394_v54 = vadd.f32 %v2138_v30, %v1882_v7  ;;  %8588 = vst [vmem:[#allocation28_spill] sm:$0xff] %v5432_v49  ;;  %v1633_v44 = vld [vmem:[#allocation2 + $0x578] sm:$0xff] }
 0x104   :  { %v5419_v52 = vld [vmem:[%s8273_s1 + $0x50] sm:$0xff]  ;;  %v1887_v51 = vmul.f32 0.999, %v1631_v31  ;;  %v2143_v0 = vmul.f32 0.001, %v5425_v60  ;;  %v8589_v16 = vld [vmem:[#allocation31_spill] sm:$0xff] }
 0x105   :  { %v8590_v14 = vld [vmem:[#allocation30_spill] sm:$0xff]  ;;  %2653 = vst [vmem:[#allocation10 + $0x558] sm:$0xff] %v2397_v3  ;;  %v2396_v25 = vadd.f32 %v2140_v13, %v1884_v1  ;;  %v1889_v43 = vmul.f32 0.999, %v1633_v44  ;;  %v2145_v7 = vmul.f32 0.001, %v5432_v49 }
 0x106   :  { %v8591_v36 = vpack.c.bf16 %v8589_v16, %v8590_v14  ;;  %v5444_v30 = vld [vmem:[%s8275_s3 + $0x560] sm:$0xff]  ;;  %v8593_v12 = vld [vmem:[#allocation33_spill] sm:$0xff]  ;;  %v8594_v60 = vld [vmem:[#allocation32_spill] sm:$0xff]  ;;  %2650 = vst [vmem:[#allocation10 + $0x540] sm:$0xff] %v2394_v54  ;;  %v2399_v1 = vadd.f32 %v2143_v0, %v1887_v51  ;;  %v114_v0 = vsub.f32 %v5414_v10, %v5419_v52 }
 0x107   :  { %8592 = vst [vmem:[#allocation31_spill] sm:$0xff] %v5444_v30  ;;  %v1630_v31 = vld [vmem:[#allocation2 + $0x560] sm:$0xff]  ;;  %v8595_v56 = vpack.c.bf16 %v8593_v12, %v8594_v60  ;;  %v5455_v14 = vld [vmem:[%s8272_s0 + $0x68] sm:$0xff]  ;;  %v5465_v12 = vld [vmem:[%s8275_s3 + $0x570] sm:$0xff]  ;;  %v2142_v13 = vmul.f32 0.001, %v5444_v30  ;;  %v2401_v44 = vadd.f32 %v2145_v7, %v1889_v43 }
 0x108   :  { %888 = vmatpush1.bf16.msra.mxu0 %v8591_v36  ;;  %v5450_v36 = vsub.f32 %v72_v27, %v5394_v29  ;;  %v5460_v3 = vld [vmem:[%s8273_s1 + $0x68] sm:$0xff]  ;;  %8597 = vst [vmem:[#allocation33_spill] sm:$0xff] %v5465_v12  ;;  %v1886_v27 = vmul.f32 0.999, %v1630_v31  ;;  %2652 = vst [vmem:[#allocation10 + $0x550] sm:$0xff] %v2396_v25  ;;  %v5489_v7 = vld [vmem:[%s8275_s3 + $0x598] sm:$0xff] }
 0x109   :  { %889 = vmatprep.subr.bf16.mxu0 %v8595_v56  ;;  %v1632_v56 = vld [vmem:[#allocation2 + $0x570] sm:$0xff]  ;;  %v2144_v15 = vmul.f32 0.001, %v5465_v12  ;;  %v5474_v54 = vld [vmem:[%s8275_s3 + $0x588] sm:$0xff]  ;;  %2655 = vst [vmem:[#allocation10 + $0x568] sm:$0xff] %v2399_v1  ;;  %8599 = vst [vmem:[#allocation52_spill] sm:$0xff] %v5489_v7 }
 0x10a   :  { %8596 = vst [vmem:[#allocation30_spill] sm:$0xff] %v5450_v36  ;;  %v1888_v16 = vmul.f32 0.999, %v1632_v56  ;;  %8598 = vst [vmem:[#allocation32_spill] sm:$0xff] %v5474_v54  ;;  %v1635_v51 = vld [vmem:[#allocation2 + $0x588] sm:$0xff]  ;;  %v2398_v43 = vadd.f32 %v2142_v13, %v1886_v27  ;;  %v1637_v56 = vld [vmem:[#allocation2 + $0x598] sm:$0xff] }
 0x10b   :  { %v75_v31 = vld [vmem:[%s8272_s0 + $0x28] sm:$0xff]  ;;  %v1891_v60 = vmul.f32 0.999, %v1635_v51  ;;  %v2147_v10 = vmul.f32 0.001, %v5474_v54  ;;  %v8600_v12 = vld [vmem:[#allocation36_spill] sm:$0xff] }
 0x10c   :  { %v5484_v25 = vld [vmem:[%s8273_s1 + $0x28] sm:$0xff]  ;;  %v8601_v30 = vld [vmem:[#allocation34_spill] sm:$0xff]  ;;  %2657 = vst [vmem:[#allocation10 + $0x578] sm:$0xff] %v2401_v44  ;;  %v2400_v4 = vadd.f32 %v2144_v15, %v1888_v16  ;;  %v1893_v1 = vmul.f32 0.999, %v1637_v56  ;;  %v8605_v54 = vld [vmem:[#allocation37_spill] sm:$0xff]  ;;  %v117_v56 = vsub.f32 %v5455_v14, %v5460_v3 }
 0x10d   :  { %v8602_v49 = vpack.c.bf16 %v8600_v12, %v8601_v30  ;;  %v2149_v27 = vmul.f32 0.001, %v5489_v7  ;;  %v5501_v13 = vld [vmem:[%s8275_s3 + $0x580] sm:$0xff]  ;;  %2654 = vst [vmem:[#allocation10 + $0x560] sm:$0xff] %v2398_v43  ;;  %v2403_v30 = vadd.f32 %v2147_v10, %v1891_v60  ;;  %v5511_v15 = vld [vmem:[%s8275_s3 + $0x590] sm:$0xff]  ;;  %v5520_v60 = vld [vmem:[%s8275_s3 + $0x5a8] sm:$0xff] }
 0x10e   :  { %8603 = vst [vmem:[#allocation36_spill] sm:$0xff] %v5501_v13  ;;  %v1634_v51 = vld [vmem:[#allocation2 + $0x580] sm:$0xff]  ;;  %8607 = vst [vmem:[#allocation34_spill] sm:$0xff] %v5511_v15  ;;  %v1636_v12 = vld [vmem:[#allocation2 + $0x590] sm:$0xff]  ;;  %v2146_v16 = vmul.f32 0.001, %v5501_v13  ;;  %v5533_v13 = vsub.f32 %v75_v31, %v5484_v25 }
 0x10f   :  { %890 = vmatpush1.bf16.msra.mxu0 %v8602_v49  ;;  %v8604_v58 = vld [vmem:[#allocation38_spill] sm:$0xff]  ;;  %v132_v49 = vmul.f32 %v5011_v28, %v5450_v36  ;;  %v1890_v44 = vmul.f32 0.999, %v1634_v51  ;;  %2656 = vst [vmem:[#allocation10 + $0x570] sm:$0xff] %v2400_v4  ;;  %v1639_v43 = vld [vmem:[#allocation2 + $0x5a8] sm:$0xff]  ;;  %v8609_v10 = vld [vmem:[#allocation45_spill] sm:$0xff] }
 0x110   :  { %v8606_v63 = vpack.c.bf16 %v8604_v58, %v8605_v54  ;;  %v2405_v58 = vadd.f32 %v2149_v27, %v1893_v1  ;;  %v2148_v54 = vmul.f32 0.001, %v5511_v15  ;;  %8608 = vst [vmem:[#allocation38_spill] sm:$0xff] %v5520_v60  ;;  %v140_v34 = vmul.f32 %v8609_v10, %v114_v0  ;;  %2659 = vst [vmem:[#allocation10 + $0x588] sm:$0xff] %v2403_v30  ;;  %v5526_v36 = vld [vmem:[%s8275_s3 + $0x5b8] sm:$0xff]  ;;  %v8614_v7 = vld [vmem:[#allocation44_spill] sm:$0xff] }
 0x111   :  { %v2402_v51 = vadd.f32 %v2146_v16, %v1890_v44  ;;  %v1641_v4 = vld [vmem:[#allocation2 + $0x5b8] sm:$0xff]  ;;  %v1895_v14 = vmul.f32 0.999, %v1639_v43  ;;  %v2151_v1 = vmul.f32 0.001, %v5520_v60  ;;  %8613 = vst [vmem:[#allocation37_spill] sm:$0xff] %v5533_v13 }
 0x112   :  { %891 = vmatprep.subr.bf16.mxu0 %v8606_v63  ;;  %v1892_v63 = vmul.f32 0.999, %v1636_v12  ;;  %v8610_v27 = vld [vmem:[#allocation41_spill] sm:$0xff]  ;;  %v8611_v12 = vld [vmem:[#allocation39_spill] sm:$0xff]  ;;  %2661 = vst [vmem:[#allocation10 + $0x598] sm:$0xff] %v2405_v58  ;;  %v5539_v16 = vld [vmem:[%s8275_s3 + $0x5a0] sm:$0xff] }
 0x113   :  { %v8612_v15 = vpack.c.bf16 %v8610_v27, %v8611_v12  ;;  %v1897_v30 = vmul.f32 0.999, %v1641_v4  ;;  %v2153_v44 = vmul.f32 0.001, %v5526_v36  ;;  %v1638_v43 = vld [vmem:[#allocation2 + $0x5a0] sm:$0xff]  ;;  %2658 = vst [vmem:[#allocation10 + $0x580] sm:$0xff] %v2402_v51  ;;  %v2407_v31 = vadd.f32 %v2151_v1, %v1895_v14 }
 0x114   :  { %v2404_v0 = vadd.f32 %v2148_v54, %v1892_v63  ;;  %v8615_v60 = vld [vmem:[#allocation42_spill] sm:$0xff]  ;;  %v5549_v58 = vld [vmem:[%s8275_s3 + $0x5b0] sm:$0xff]  ;;  %v1894_v54 = vmul.f32 0.999, %v1638_v43  ;;  %v2150_v4 = vmul.f32 0.001, %v5539_v16  ;;  %v143_v27 = vmul.f32 %v8609_v10, %v117_v56 }
 0x115   :  { %892 = vmatpush1.bf16.msra.mxu0 %v8612_v15  ;;  %v8616_v40 = vpack.c.bf16 %v8614_v7, %v8615_v60  ;;  %v1640_v63 = vld [vmem:[#allocation2 + $0x5b0] sm:$0xff]  ;;  %v2409_v12 = vadd.f32 %v2153_v44, %v1897_v30  ;;  %v5557_v60 = vld [vmem:[%s8275_s3 + $0x5c8] sm:$0xff]  ;;  %v148_v14 = vadd.f32 %v132_v49, %v5394_v29  ;;  %2663 = vst [vmem:[#allocation10 + $0x5a8] sm:$0xff] %v2407_v31  ;;  %v5563_v43 = vld [vmem:[%s8275_s3 + $0x5d8] sm:$0xff] }
 0x116   :  { %2660 = vst [vmem:[#allocation10 + $0x590] sm:$0xff] %v2404_v0  ;;  %v1896_v7 = vmul.f32 0.999, %v1640_v63  ;;  %v1643_v51 = vld [vmem:[#allocation2 + $0x5c8] sm:$0xff]  ;;  %v2406_v1 = vadd.f32 %v2150_v4, %v1894_v54  ;;  %v1645_v56 = vld [vmem:[#allocation2 + $0x5d8] sm:$0xff]  ;;  %v8617_v44 = vpack.c.bf16 %v5033_v6, %v5025_v18  ;;  %v135_v63 = vmul.f32 %v5011_v28, %v5533_v13  ;;  %v5575_v54 = vld [vmem:[%s8275_s3 + $0x5c0] sm:$0xff] }
 0x117   :  { %893 = vmatprep.subr.bf16.mxu0 %v8616_v40  ;;  %v2152_v40 = vmul.f32 0.001, %v5549_v58  ;;  %v1899_v0 = vmul.f32 0.999, %v1643_v51  ;;  %v2155_v30 = vmul.f32 0.001, %v5557_v60  ;;  %v8618_v51 = vpack.c.bf16 %v5054_v53, %v5049_v24 }
 0x118   :  { %2665 = vst [vmem:[#allocation10 + $0x5b8] sm:$0xff] %v2409_v12  ;;  %v1901_v49 = vmul.f32 0.999, %v1645_v56  ;;  %v2157_v31 = vmul.f32 0.001, %v5563_v43  ;;  %v1642_v4 = vld [vmem:[#allocation2 + $0x5c0] sm:$0xff]  ;;  %v156_v18 = vadd.f32 %v140_v34, %v5419_v52  ;;  %v749_v52 = vpack.c.bf16 %v5112_v57, %v5107_v45 }
 0x119   :  { %894 = vmatpush1.bf16.msra.mxu0 %v8617_v44  ;;  %v2408_v29 = vadd.f32 %v2152_v40, %v1896_v7  ;;  %2662 = vst [vmem:[#allocation10 + $0x5a0] sm:$0xff] %v2406_v1  ;;  %v2411_v6 = vadd.f32 %v2155_v30, %v1899_v0  ;;  %v5584_v12 = vld [vmem:[%s8275_s3 + $0x5d0] sm:$0xff]  ;;  %v1898_v40 = vmul.f32 0.999, %v1642_v4  ;;  %v2154_v56 = vmul.f32 0.001, %v5575_v54 }
 0x11a   :  { %895 = vmatprep.subr.bf16.mxu0 %v8618_v51  ;;  %v1644_v7 = vld [vmem:[#allocation2 + $0x5d0] sm:$0xff]  ;;  %v159_v44 = vadd.f32 %v143_v27, %v5460_v3  ;;  %v2413_v15 = vadd.f32 %v2157_v31, %v1901_v49  ;;  %v2156_v24 = vmul.f32 0.001, %v5584_v12  ;;  %v5592_v53 = vld [vmem:[%s8275_s3 + $0x5e8] sm:$0xff]  ;;  %v5599_v3 = vld [vmem:[%s8275_s3 + $0x5f8] sm:$0xff]  ;;  %v151_v49 = vadd.f32 %v135_v63, %v5484_v25 }
 0x11b   :  { %2664 = vst [vmem:[#allocation10 + $0x5b0] sm:$0xff] %v2408_v29  ;;  %v1900_v13 = vmul.f32 0.999, %v1644_v7  ;;  %v1647_v34 = vld [vmem:[#allocation2 + $0x5e8] sm:$0xff]  ;;  %2667 = vst [vmem:[#allocation10 + $0x5c8] sm:$0xff] %v2411_v6  ;;  %v2410_v1 = vadd.f32 %v2154_v56, %v1898_v40  ;;  %v1649_v27 = vld [vmem:[#allocation2 + $0x5f8] sm:$0xff]  ;;  %v8619_v29 = vpack.c.bf16 %v5070_v23, %v5065_v48  ;;  %v676_v6 = vpack.c.bf16 %v156_v18, %v148_v14 }
 0x11c   :  { %v1903_v0 = vmul.f32 0.999, %v1647_v34  ;;  %v2159_v30 = vmul.f32 0.001, %v5592_v53  ;;  %2669 = vst [vmem:[#allocation10 + $0x5d8] sm:$0xff] %v2413_v15  ;;  %v5610_v4 = vld [vmem:[%s8275_s3 + $0x5e0] sm:$0xff]  ;;  %v8620_v7 = vpack.c.bf16 %v5082_v47, %v5077_v39  ;;  %v679_v63 = vpack.c.bf16 %v159_v44, %v151_v49 }
 0x11d   :  { %896 = vmatpush1.bf16.msra.mxu0 %v8619_v29  ;;  %v2412_v31 = vadd.f32 %v2156_v24, %v1900_v13  ;;  %v1905_v45 = vmul.f32 0.999, %v1649_v27  ;;  %v2161_v57 = vmul.f32 0.001, %v5599_v3  ;;  %v1646_v51 = vld [vmem:[#allocation2 + $0x5e0] sm:$0xff]  ;;  %2666 = vst [vmem:[#allocation10 + $0x5c0] sm:$0xff] %v2410_v1  ;;  %v8621_v44 = vpack.c.bf16 %v5094_v9, %v5089_v37 }
 0x11e   :  { %908 = vmatprep.subr.bf16.mxu0 %v8620_v7  ;;  %v2415_v48 = vadd.f32 %v2159_v30, %v1903_v0  ;;  %v5618_v23 = vld [vmem:[%s8275_s3 + $0x5f0] sm:$0xff]  ;;  %v1902_v13 = vmul.f32 0.999, %v1646_v51  ;;  %v2158_v15 = vmul.f32 0.001, %v5610_v4  ;;  %v5625_v47 = vld [vmem:[%s8275_s3 + $0x608] sm:$0xff]  ;;  %v748_v24 = vpack.c.bf16 %v5127_v38, %v5117_v61 }
 0x11f   :  { %v1648_v25 = vld [vmem:[#allocation2 + $0x5f0] sm:$0xff]  ;;  %2668 = vst [vmem:[#allocation10 + $0x5d0] sm:$0xff] %v2412_v31  ;;  %v2417_v40 = vadd.f32 %v2161_v57, %v1905_v45  ;;  %v2160_v14 = vmul.f32 0.001, %v5618_v23  ;;  %v5630_v18 = vld [vmem:[%s8275_s3 + $0x618] sm:$0xff]  ;;  %v1651_v1 = vld [vmem:[#allocation2 + $0x608] sm:$0xff]  ;;  %v751_v37 = vpack.c.bf16 %v5141_v35, %v5136_v22  ;;  %v750_v22 = vpack.c.bf16 %v5152_v33, %v5147_v17 }
 0x120   :  { %v1904_v56 = vmul.f32 0.999, %v1648_v25  ;;  %898 = vmatmul.mubr.bf16.vlgmr.msra.gmra.mrb[0].mxu0 %v676_v6  ;;  %2671 = vst [vmem:[#allocation10 + $0x5e8] sm:$0xff] %v2415_v48  ;;  %v2414_v39 = vadd.f32 %v2158_v15, %v1902_v13  ;;  %v1653_v27 = vld [vmem:[#allocation2 + $0x618] sm:$0xff]  ;;  %v2163_v0 = vmul.f32 0.001, %v5625_v47  ;;  %v753_v7 = vpack.c.bf16 %v5172_v32, %v5165_v21 }
 0x121   :  { %909 = vmatpush1.bf16.msra.mxu0 %v8621_v44  ;;  %940 = vmatprep.mubr.bf16.mxu0 %v679_v63  ;;  %2673 = vst [vmem:[#allocation10 + $0x5f8] sm:$0xff] %v2417_v40  ;;  %v5641_v30 = vld [vmem:[%s8275_s3 + $0x600] sm:$0xff]  ;;  %v1907_v9 = vmul.f32 0.999, %v1651_v1  ;;  %v1909_v29 = vmul.f32 0.999, %v1653_v27 }
 0x122   :  { %v2416_v34 = vadd.f32 %v2160_v14, %v1904_v56  ;;  %910 = vmatprep.subr.bf16.mxu0 %v749_v52  ;;  %2670 = vst [vmem:[#allocation10 + $0x5e0] sm:$0xff] %v2414_v39  ;;  %v2165_v61 = vmul.f32 0.001, %v5630_v18  ;;  %v1650_v38 = vld [vmem:[#allocation2 + $0x600] sm:$0xff]  ;;  %v1652_v49 = vld [vmem:[#allocation2 + $0x610] sm:$0xff]  ;;  %v5660_v48 = vld [vmem:[%s8275_s3 + $0x628] sm:$0xff]  ;;  %v752_v56 = vpack.c.bf16 %v5187_v8, %v5178_v42 }
 0x123   :  { %v2162_v31 = vmul.f32 0.001, %v5641_v30  ;;  %v2419_v45 = vadd.f32 %v2163_v0, %v1907_v9  ;;  %v5650_v51 = vld [vmem:[%s8275_s3 + $0x610] sm:$0xff]  ;;  %v1906_v35 = vmul.f32 0.999, %v1650_v38  ;;  %v5665_v17 = vld [vmem:[%s8275_s3 + $0x638] sm:$0xff] }
 0x124   :  { %2672 = vst [vmem:[#allocation10 + $0x5f0] sm:$0xff] %v2416_v34  ;;  %v2421_v57 = vadd.f32 %v2165_v61, %v1909_v29  ;;  %v1908_v52 = vmul.f32 0.999, %v1652_v49  ;;  %v2164_v6 = vmul.f32 0.001, %v5650_v51  ;;  %v1655_v33 = vld [vmem:[#allocation2 + $0x628] sm:$0xff]  ;;  %v755_v34 = vpack.c.bf16 %v5200_v5, %v5195_v20 }
 0x125   :  { %911 = vmatpush1.bf16.msra.mxu0 %v748_v24  ;;  %2675 = vst [vmem:[#allocation10 + $0x608] sm:$0xff] %v2419_v45  ;;  %v2418_v25 = vadd.f32 %v2162_v31, %v1906_v35  ;;  %v1657_v15 = vld [vmem:[#allocation2 + $0x638] sm:$0xff]  ;;  %v1911_v63 = vmul.f32 0.999, %v1655_v33  ;;  %v5670_v21 = vld [vmem:[%s8275_s3 + $0x620] sm:$0xff]  ;;  %v5679_v44 = vld [vmem:[%s8275_s3 + $0x630] sm:$0xff] }
 0x126   :  { %912 = vmatprep.subr.bf16.mxu0 %v751_v37  ;;  %2677 = vst [vmem:[#allocation10 + $0x618] sm:$0xff] %v2421_v57  ;;  %v2420_v13 = vadd.f32 %v2164_v6, %v1908_v52  ;;  %v1913_v40 = vmul.f32 0.999, %v1657_v15  ;;  %v1654_v32 = vld [vmem:[#allocation2 + $0x620] sm:$0xff]  ;;  %v2167_v14 = vmul.f32 0.001, %v5660_v48  ;;  %v754_v57 = vpack.c.bf16 %v5220_v11, %v5212_v2 }
 0x127   :  { %2674 = vst [vmem:[#allocation10 + $0x600] sm:$0xff] %v2418_v25  ;;  %v2169_v39 = vmul.f32 0.001, %v5665_v17  ;;  %v1656_v24 = vld [vmem:[#allocation2 + $0x630] sm:$0xff]  ;;  %v1910_v1 = vmul.f32 0.999, %v1654_v32  ;;  %v757_v25 = vpack.c.bf16 %v5232_v50, %v5227_v26 }
 0x128   :  { %2676 = vst [vmem:[#allocation10 + $0x610] sm:$0xff] %v2420_v13  ;;  %v1912_v27 = vmul.f32 0.999, %v1656_v24  ;;  %v2166_v42 = vmul.f32 0.001, %v5670_v21  ;;  %v5687_v8 = vld [vmem:[%s8275_s3 + $0x648] sm:$0xff]  ;;  %v2423_v0 = vadd.f32 %v2167_v14, %v1911_v63  ;;  %v756_v24 = vpack.c.bf16 %v5250_v41, %v5242_v55 }
 0x129   :  { %913 = vmatpush1.bf16.msra.mxu0 %v750_v22  ;;  %v2425_v37 = vadd.f32 %v2169_v39, %v1913_v40  ;;  %v2168_v9 = vmul.f32 0.001, %v5679_v44  ;;  %v5693_v29 = vld [vmem:[%s8275_s3 + $0x658] sm:$0xff]  ;;  %v1659_v61 = vld [vmem:[#allocation2 + $0x648] sm:$0xff]  ;;  %v5698_v31 = vld [vmem:[%s8275_s3 + $0x640] sm:$0xff] }
 0x12a   :  { %914 = vmatprep.subr.bf16.mxu0 %v753_v7  ;;  %v1661_v20 = vld [vmem:[#allocation2 + $0x658] sm:$0xff]  ;;  %v2422_v5 = vadd.f32 %v2166_v42, %v1910_v1  ;;  %v1915_v38 = vmul.f32 0.999, %v1659_v61  ;;  %v5703_v45 = vld [vmem:[%s8275_s3 + $0x650] sm:$0xff]  ;;  %2679 = vst [vmem:[#allocation10 + $0x628] sm:$0xff] %v2423_v0  ;;  %v1658_v6 = vld [vmem:[#allocation2 + $0x640] sm:$0xff] }
 0x12b   :  { %v1917_v49 = vmul.f32 0.999, %v1661_v20  ;;  %2681 = vst [vmem:[#allocation10 + $0x638] sm:$0xff] %v2425_v37  ;;  %v2424_v22 = vadd.f32 %v2168_v9, %v1912_v27  ;;  %v2171_v35 = vmul.f32 0.001, %v5687_v8  ;;  %v1660_v7 = vld [vmem:[#allocation2 + $0x650] sm:$0xff]  ;;  %v759_v37 = vpack.c.bf16 %v5262_v46, %v5257_v62 }
 0x12c   :  { %v2173_v52 = vmul.f32 0.001, %v5693_v29  ;;  %2678 = vst [vmem:[#allocation10 + $0x620] sm:$0xff] %v2422_v5  ;;  %v1914_v13 = vmul.f32 0.999, %v1658_v6  ;;  %v5716_v40 = vld [vmem:[%s8275_s3 + $0x668] sm:$0xff] }
 0x12d   :  { %915 = vmatpush1.bf16.msra.mxu0 %v752_v56  ;;  %v1916_v33 = vmul.f32 0.999, %v1660_v7  ;;  %v2170_v15 = vmul.f32 0.001, %v5698_v31  ;;  %2680 = vst [vmem:[#allocation10 + $0x630] sm:$0xff] %v2424_v22  ;;  %v2427_v2 = vadd.f32 %v2171_v35, %v1915_v38  ;;  %v1663_v32 = vld [vmem:[#allocation2 + $0x668] sm:$0xff]  ;;  %v758_v7 = vpack.c.bf16 %v5280_v19, %v5272_v59 }
 0x12e   :  { %916 = vmatprep.subr.bf16.mxu0 %v755_v34  ;;  %v2429_v11 = vadd.f32 %v2173_v52, %v1917_v49  ;;  %v2172_v63 = vmul.f32 0.001, %v5703_v45  ;;  %v5721_v26 = vld [vmem:[%s8275_s3 + $0x678] sm:$0xff]  ;;  %v1919_v14 = vmul.f32 0.999, %v1663_v32  ;;  %v5730_v42 = vld [vmem:[%s8275_s3 + $0x660] sm:$0xff] }
 0x12f   :  { %v2426_v56 = vadd.f32 %v2170_v15, %v1914_v13  ;;  %v1665_v50 = vld [vmem:[#allocation2 + $0x678] sm:$0xff]  ;;  %v2175_v39 = vmul.f32 0.001, %v5716_v40  ;;  %2683 = vst [vmem:[#allocation10 + $0x648] sm:$0xff] %v2427_v2  ;;  %v2177_v27 = vmul.f32 0.001, %v5721_v26 }
 0x130   :  { %2685 = vst [vmem:[#allocation10 + $0x658] sm:$0xff] %v2429_v11  ;;  %v2428_v34 = vadd.f32 %v2172_v63, %v1916_v33  ;;  %v1921_v1 = vmul.f32 0.999, %v1665_v50  ;;  %v1662_v0 = vld [vmem:[#allocation2 + $0x660] sm:$0xff]  ;;  %v5737_v55 = vld [vmem:[%s8275_s3 + $0x670] sm:$0xff]  ;;  %v5744_v62 = vld [vmem:[%s8275_s3 + $0x688] sm:$0xff] }
 0x131   :  { %917 = vmatpush1.bf16.msra.mxu0 %v754_v57  ;;  %2682 = vst [vmem:[#allocation10 + $0x640] sm:$0xff] %v2426_v56  ;;  %v2431_v9 = vadd.f32 %v2175_v39, %v1919_v14  ;;  %v1664_v41 = vld [vmem:[#allocation2 + $0x670] sm:$0xff]  ;;  %v1918_v61 = vmul.f32 0.999, %v1662_v0  ;;  %v2174_v20 = vmul.f32 0.001, %v5730_v42 }
 0x132   :  { %918 = vmatprep.subr.bf16.mxu0 %v757_v25  ;;  %2684 = vst [vmem:[#allocation10 + $0x650] sm:$0xff] %v2428_v34  ;;  %v2433_v5 = vadd.f32 %v2177_v27, %v1921_v1  ;;  %v1920_v38 = vmul.f32 0.999, %v1664_v41  ;;  %v2176_v49 = vmul.f32 0.001, %v5737_v55  ;;  %v1667_v46 = vld [vmem:[#allocation2 + $0x688] sm:$0xff] }
 0x133   :  { %2687 = vst [vmem:[#allocation10 + $0x668] sm:$0xff] %v2431_v9  ;;  %v2430_v57 = vadd.f32 %v2174_v20, %v1918_v61  ;;  %v5749_v22 = vld [vmem:[%s8275_s3 + $0x698] sm:$0xff]  ;;  %v1923_v52 = vmul.f32 0.999, %v1667_v46  ;;  %v2179_v6 = vmul.f32 0.001, %v5744_v62 }
 0x134   :  { %v1669_v35 = vld [vmem:[#allocation2 + $0x698] sm:$0xff]  ;;  %2689 = vst [vmem:[#allocation10 + $0x678] sm:$0xff] %v2433_v5  ;;  %v2432_v25 = vadd.f32 %v2176_v49, %v1920_v38  ;;  %v2181_v33 = vmul.f32 0.001, %v5749_v22  ;;  %v5758_v15 = vld [vmem:[%s8275_s3 + $0x680] sm:$0xff]  ;;  %v8623_v63 = vld [vmem:[#allocation47_spill] sm:$0xff] }
 0x135   :  { %919 = vmatpush1.bf16.msra.mxu0 %v756_v24  ;;  %v1925_v13 = vmul.f32 0.999, %v1669_v35  ;;  %v1666_v2 = vld [vmem:[#allocation2 + $0x680] sm:$0xff]  ;;  %2686 = vst [vmem:[#allocation10 + $0x660] sm:$0xff] %v2430_v57  ;;  %v2435_v56 = vadd.f32 %v2179_v6, %v1923_v52  ;;  %v5765_v59 = vld [vmem:[%s8275_s3 + $0x690] sm:$0xff]  ;;  %v5772_v1 = vld [vmem:[%s8275_s3 + $0x6a8] sm:$0xff] }
 0x136   :  { %920 = vmatprep.subr.bf16.mxu0 %v759_v37  ;;  %v8622_v11 = vld [vmem:[#allocation46_spill] sm:$0xff]  ;;  %v1668_v19 = vld [vmem:[#allocation2 + $0x690] sm:$0xff]  ;;  %v1922_v50 = vmul.f32 0.999, %v1666_v2  ;;  %v2178_v14 = vmul.f32 0.001, %v5758_v15 }
 0x137   :  { %v761_v32 = vpack.c.bf16 %v8623_v63, %v8622_v11  ;;  %2688 = vst [vmem:[#allocation10 + $0x670] sm:$0xff] %v2432_v25  ;;  %v2437_v39 = vadd.f32 %v2181_v33, %v1925_v13  ;;  %v1924_v24 = vmul.f32 0.999, %v1668_v19  ;;  %v2180_v34 = vmul.f32 0.001, %v5765_v59  ;;  %v1671_v27 = vld [vmem:[#allocation2 + $0x6a8] sm:$0xff] }
 0x138   :  { %2691 = vst [vmem:[#allocation10 + $0x688] sm:$0xff] %v2435_v56  ;;  %v2434_v0 = vadd.f32 %v2178_v14, %v1922_v50  ;;  %v5777_v37 = vld [vmem:[%s8275_s3 + $0x6b8] sm:$0xff]  ;;  %v1927_v41 = vmul.f32 0.999, %v1671_v27  ;;  %v2183_v61 = vmul.f32 0.001, %v5772_v1 }
 0x139   :  { %v1673_v9 = vld [vmem:[#allocation2 + $0x6b8] sm:$0xff]  ;;  %921 = vmatpush1.bf16.msra.mxu0 %v758_v7  ;;  %v8624_v20 = vld [vmem:[#allocation48_spill] sm:$0xff]  ;;  %2693 = vst [vmem:[#allocation10 + $0x698] sm:$0xff] %v2437_v39  ;;  %v2436_v49 = vadd.f32 %v2180_v34, %v1924_v24  ;;  %v2185_v57 = vmul.f32 0.001, %v5777_v37  ;;  %v5786_v35 = vld [vmem:[%s8275_s3 + $0x6a0] sm:$0xff] }
 0x13a   :  { %v8625_v5 = vld [vmem:[#allocation49_spill] sm:$0xff]  ;;  %v1929_v46 = vmul.f32 0.999, %v1673_v9  ;;  %v1670_v52 = vld [vmem:[#allocation2 + $0x6a0] sm:$0xff]  ;;  %922 = vmatprep.subr.bf16.mxu0 %v761_v32  ;;  %v8627_v25 = vld [vmem:[#allocation51_spill] sm:$0xff]  ;;  %2690 = vst [vmem:[#allocation10 + $0x680] sm:$0xff] %v2434_v0  ;;  %v2439_v7 = vadd.f32 %v2183_v61, %v1927_v41 }
 0x13b   :  { %v760_v38 = vpack.c.bf16 %v8625_v5, %v8624_v20  ;;  %v8626_v6 = vld [vmem:[#allocation50_spill] sm:$0xff]  ;;  %v5793_v33 = vld [vmem:[%s8275_s3 + $0x6b0] sm:$0xff]  ;;  %v1926_v11 = vmul.f32 0.999, %v1670_v52  ;;  %v2182_v63 = vmul.f32 0.001, %v5786_v35 }
 0x13c   :  { %v763_v13 = vpack.c.bf16 %v8627_v25, %v8626_v6  ;;  %v1672_v2 = vld [vmem:[#allocation2 + $0x6b0] sm:$0xff]  ;;  %2692 = vst [vmem:[#allocation10 + $0x690] sm:$0xff] %v2436_v49  ;;  %v2441_v56 = vadd.f32 %v2185_v57, %v1929_v46  ;;  %v2184_v50 = vmul.f32 0.001, %v5793_v33  ;;  %v5800_v32 = vld [vmem:[%s8275_s3 + $0x6c8] sm:$0xff]  ;;  %2695 = vst [vmem:[#allocation10 + $0x6a8] sm:$0xff] %v2439_v7 }
 0x13d   :  { %v1928_v19 = vmul.f32 0.999, %v1672_v2  ;;  %8628 = vst [vmem:[#allocation45_spill] sm:$0xff] %v5800_v32  ;;  %v1675_v14 = vld [vmem:[#allocation2 + $0x6c8] sm:$0xff]  ;;  %v2438_v39 = vadd.f32 %v2182_v63, %v1926_v11  ;;  %v5805_v24 = vld [vmem:[%s8275_s3 + $0x6d8] sm:$0xff]  ;;  %923 = vmatpush1.bf16.msra.mxu0 %v760_v38  ;;  %v8631_v41 = vld [vmem:[#allocation18_spill] sm:$0xff] }
 0x13e   :  { %8629 = vst [vmem:[#allocation41_spill] sm:$0xff] %v5805_v24  ;;  %v1677_v34 = vld [vmem:[#allocation2 + $0x6d8] sm:$0xff]  ;;  %v1931_v27 = vmul.f32 0.999, %v1675_v14  ;;  %v2187_v0 = vmul.f32 0.001, %v5800_v32  ;;  %924 = vmatprep.subr.bf16.mxu0 %v763_v13 }
 0x13f   :  { %v8630_v9 = vld [vmem:[#allocation19_spill] sm:$0xff]  ;;  %2697 = vst [vmem:[#allocation10 + $0x6b8] sm:$0xff] %v2441_v56  ;;  %v2440_v20 = vadd.f32 %v2184_v50, %v1928_v19  ;;  %v1933_v5 = vmul.f32 0.999, %v1677_v34  ;;  %v2189_v49 = vmul.f32 0.001, %v5805_v24 }
 0x140   :  { %v762_v61 = vpack.c.bf16 %v8631_v41, %v8630_v9  ;;  %v5814_v46 = vld [vmem:[%s8275_s3 + $0x6c0] sm:$0xff]  ;;  %v8633_v52 = vld [vmem:[#allocation21_spill] sm:$0xff]  ;;  %v8634_v6 = vld [vmem:[#allocation20_spill] sm:$0xff]  ;;  %2694 = vst [vmem:[#allocation10 + $0x6a0] sm:$0xff] %v2438_v39  ;;  %v2443_v38 = vadd.f32 %v2187_v0, %v1931_v27 }
 0x141   :  { %8632 = vst [vmem:[#allocation39_spill] sm:$0xff] %v5814_v46  ;;  %v1674_v57 = vld [vmem:[#allocation2 + $0x6c0] sm:$0xff]  ;;  %v765_v25 = vpack.c.bf16 %v8634_v6, %v8633_v52  ;;  %v5821_v7 = vld [vmem:[%s8275_s3 + $0x6d0] sm:$0xff]  ;;  %v2186_v63 = vmul.f32 0.001, %v5814_v46  ;;  %2696 = vst [vmem:[#allocation10 + $0x6b0] sm:$0xff] %v2440_v20  ;;  %v2445_v56 = vadd.f32 %v2189_v49, %v1933_v5 }
 0x142   :  { %8635 = vst [vmem:[#allocation44_spill] sm:$0xff] %v5821_v7  ;;  %v1676_v2 = vld [vmem:[#allocation2 + $0x6d0] sm:$0xff]  ;;  %v1930_v11 = vmul.f32 0.999, %v1674_v57  ;;  %v2188_v50 = vmul.f32 0.001, %v5821_v7  ;;  %925 = vmatpush1.bf16.msra.mxu0 %v762_v61 }
 0x143   :  { %v1932_v19 = vmul.f32 0.999, %v1676_v2  ;;  %v5828_v13 = vld [vmem:[%s8275_s3 + $0x6e8] sm:$0xff]  ;;  %2699 = vst [vmem:[#allocation10 + $0x6c8] sm:$0xff] %v2443_v38  ;;  %v5833_v34 = vld [vmem:[%s8275_s3 + $0x6f8] sm:$0xff]  ;;  %v8639_v20 = vld [vmem:[#allocation22_spill] sm:$0xff]  ;;  %926 = vmatprep.subr.bf16.mxu0 %v765_v25 }
 0x144   :  { %8636 = vst [vmem:[#allocation42_spill] sm:$0xff] %v5828_v13  ;;  %v1679_v14 = vld [vmem:[#allocation2 + $0x6e8] sm:$0xff]  ;;  %v2442_v39 = vadd.f32 %v2186_v63, %v1930_v11  ;;  %8637 = vst [vmem:[#allocation46_spill] sm:$0xff] %v5833_v34  ;;  %v1681_v27 = vld [vmem:[#allocation2 + $0x6f8] sm:$0xff]  ;;  %v2191_v9 = vmul.f32 0.001, %v5828_v13 }
 0x145   :  { %v1935_v0 = vmul.f32 0.999, %v1679_v14  ;;  %v8638_v41 = vld [vmem:[#allocation23_spill] sm:$0xff]  ;;  %2701 = vst [vmem:[#allocation10 + $0x6d8] sm:$0xff] %v2445_v56  ;;  %v2444_v49 = vadd.f32 %v2188_v50, %v1932_v19  ;;  %v1937_v57 = vmul.f32 0.999, %v1681_v27 }
 0x146   :  { %v764_v5 = vpack.c.bf16 %v8639_v20, %v8638_v41  ;;  %v2193_v52 = vmul.f32 0.001, %v5833_v34  ;;  %v5842_v6 = vld [vmem:[%s8275_s3 + $0x6e0] sm:$0xff]  ;;  %v8641_v2 = vld [vmem:[#allocation25_spill] sm:$0xff]  ;;  %v8642_v11 = vld [vmem:[#allocation24_spill] sm:$0xff]  ;;  %2698 = vst [vmem:[#allocation10 + $0x6c0] sm:$0xff] %v2442_v39 }
 0x147   :  { %8640 = vst [vmem:[#allocation47_spill] sm:$0xff] %v5842_v6  ;;  %v1678_v38 = vld [vmem:[#allocation2 + $0x6e0] sm:$0xff]  ;;  %v767_v63 = vpack.c.bf16 %v8642_v11, %v8641_v2  ;;  %v2447_v61 = vadd.f32 %v2191_v9, %v1935_v0  ;;  %v5849_v56 = vld [vmem:[%s8275_s3 + $0x6f0] sm:$0xff]  ;;  %v2190_v14 = vmul.f32 0.001, %v5842_v6  ;;  %2700 = vst [vmem:[#allocation10 + $0x6d0] sm:$0xff] %v2444_v49 }
 0x148   :  { %8643 = vst [vmem:[#allocation48_spill] sm:$0xff] %v5849_v56  ;;  %v1680_v19 = vld [vmem:[#allocation2 + $0x6f0] sm:$0xff]  ;;  %v1934_v50 = vmul.f32 0.999, %v1678_v38  ;;  %v2449_v27 = vadd.f32 %v2193_v52, %v1937_v57  ;;  %v2192_v20 = vmul.f32 0.001, %v5849_v56  ;;  %927 = vmatpush1.bf16.msra.mxu0 %v764_v5 }
 0x149   :  { %v1936_v41 = vmul.f32 0.999, %v1680_v19  ;;  %v5856_v25 = vld [vmem:[%s8275_s3 + $0x708] sm:$0xff]  ;;  %v8646_v9 = vld [vmem:[#allocation26_spill] sm:$0xff]  ;;  %2703 = vst [vmem:[#allocation10 + $0x6e8] sm:$0xff] %v2447_v61  ;;  %v5863_v38 = vld [vmem:[%s8275_s3 + $0x718] sm:$0xff]  ;;  %928 = vmatprep.subr.bf16.mxu0 %v767_v63 }
 0x14a   :  { %8644 = vst [vmem:[#allocation49_spill] sm:$0xff] %v5856_v25  ;;  %v1683_v39 = vld [vmem:[#allocation2 + $0x708] sm:$0xff]  ;;  %v2446_v11 = vadd.f32 %v2190_v14, %v1934_v50  ;;  %8647 = vst [vmem:[#allocation50_spill] sm:$0xff] %v5863_v38  ;;  %v1685_v49 = vld [vmem:[#allocation2 + $0x718] sm:$0xff]  ;;  %v2195_v52 = vmul.f32 0.001, %v5856_v25 }
 0x14b   :  { %v8645_v0 = vld [vmem:[#allocation27_spill] sm:$0xff]  ;;  %v1939_v57 = vmul.f32 0.999, %v1683_v39  ;;  %v8648_v19 = vld [vmem:[#allocation29_spill] sm:$0xff]  ;;  %v8649_v56 = vld [vmem:[#allocation28_spill] sm:$0xff]  ;;  %2705 = vst [vmem:[#allocation10 + $0x6f8] sm:$0xff] %v2449_v27  ;;  %v2448_v34 = vadd.f32 %v2192_v20, %v1936_v41 }
 0x14c   :  { %v766_v2 = vpack.c.bf16 %v8646_v9, %v8645_v0  ;;  %v769_v6 = vpack.c.bf16 %v8649_v56, %v8648_v19  ;;  %v1941_v13 = vmul.f32 0.999, %v1685_v49  ;;  %v2197_v0 = vmul.f32 0.001, %v5863_v38  ;;  %v5872_v61 = vld [vmem:[%s8275_s3 + $0x700] sm:$0xff]  ;;  %v8651_v14 = vld [vmem:[#allocation31_spill] sm:$0xff] }
 0x14d   :  { %8650 = vst [vmem:[#allocation51_spill] sm:$0xff] %v5872_v61  ;;  %v1682_v50 = vld [vmem:[#allocation2 + $0x700] sm:$0xff]  ;;  %v8652_v39 = vld [vmem:[#allocation33_spill] sm:$0xff]  ;;  %2702 = vst [vmem:[#allocation10 + $0x6e0] sm:$0xff] %v2446_v11  ;;  %v2451_v5 = vadd.f32 %v2195_v52, %v1939_v57  ;;  %v2194_v20 = vmul.f32 0.001, %v5872_v61 }
 0x14e   :  { %v768_v9 = vpack.c.bf16 %v8652_v39, %v8651_v14  ;;  %v5879_v56 = vld [vmem:[%s8275_s3 + $0x710] sm:$0xff]  ;;  %v1938_v41 = vmul.f32 0.999, %v1682_v50  ;;  %2704 = vst [vmem:[#allocation10 + $0x6f0] sm:$0xff] %v2448_v34  ;;  %v2453_v25 = vadd.f32 %v2197_v0, %v1941_v13  ;;  %v5888_v11 = vld [vmem:[%s8275_s3 + $0x728] sm:$0xff]  ;;  %v8658_v14 = vld [vmem:[#allocation34_spill] sm:$0xff]  ;;  %929 = vmatpush1.bf16.msra.mxu0 %v766_v2 }
 0x14f   :  { %8653 = vst [vmem:[#allocation19_spill] sm:$0xff] %v5879_v56  ;;  %v1684_v27 = vld [vmem:[#allocation2 + $0x710] sm:$0xff]  ;;  %v2196_v7 = vmul.f32 0.001, %v5879_v56  ;;  %8656 = vst [vmem:[#allocation18_spill] sm:$0xff] %v5888_v11  ;;  %v1687_v57 = vld [vmem:[#allocation2 + $0x728] sm:$0xff]  ;;  %930 = vmatprep.subr.bf16.mxu0 %v769_v6 }
 0x150   :  { %v8654_v49 = vld [vmem:[#allocation32_spill] sm:$0xff]  ;;  %v1940_v63 = vmul.f32 0.999, %v1684_v27  ;;  %2707 = vst [vmem:[#allocation10 + $0x708] sm:$0xff] %v2451_v5  ;;  %v2450_v50 = vadd.f32 %v2194_v20, %v1938_v41  ;;  %v1689_v13 = vld [vmem:[#allocation2 + $0x738] sm:$0xff]  ;;  %v8660_v27 = vld [vmem:[#allocation38_spill] sm:$0xff] }
 0x151   :  { %v8655_v19 = vld [vmem:[#allocation52_spill] sm:$0xff]  ;;  %v1943_v34 = vmul.f32 0.999, %v1687_v57  ;;  %v2199_v0 = vmul.f32 0.001, %v5888_v11  ;;  %v74_v56 = vld [vmem:[%s8272_s0 + $0x20] sm:$0xff] }
 0x152   :  { %v771_v38 = vpack.c.bf16 %v8655_v19, %v8654_v49  ;;  %v8657_v52 = vld [vmem:[#allocation36_spill] sm:$0xff]  ;;  %v5895_v49 = vld [vmem:[%s8275_s3 + $0x738] sm:$0xff]  ;;  %v5906_v5 = vld [vmem:[%s8273_s1 + $0x20] sm:$0xff]  ;;  %2709 = vst [vmem:[#allocation10 + $0x718] sm:$0xff] %v2453_v25  ;;  %v2452_v41 = vadd.f32 %v2196_v7, %v1940_v63  ;;  %v1945_v20 = vmul.f32 0.999, %v1689_v13  ;;  %931 = vmatpush1.bf16.msra.mxu0 %v768_v9 }
 0x153   :  { %8659 = vst [vmem:[#allocation21_spill] sm:$0xff] %v5895_v49  ;;  %v2201_v57 = vmul.f32 0.001, %v5895_v49  ;;  %v5912_v2 = vld [vmem:[%s8275_s3 + $0x720] sm:$0xff]  ;;  %2706 = vst [vmem:[#allocation10 + $0x700] sm:$0xff] %v2450_v50  ;;  %v2455_v11 = vadd.f32 %v2199_v0, %v1943_v34  ;;  %v5919_v25 = vld [vmem:[%s8275_s3 + $0x730] sm:$0xff] }
 0x154   :  { %8661 = vst [vmem:[#allocation20_spill] sm:$0xff] %v5912_v2  ;;  %v1686_v19 = vld [vmem:[#allocation2 + $0x720] sm:$0xff]  ;;  %8662 = vst [vmem:[#allocation23_spill] sm:$0xff] %v5919_v25  ;;  %v1688_v7 = vld [vmem:[#allocation2 + $0x730] sm:$0xff]  ;;  %v2198_v13 = vmul.f32 0.001, %v5912_v2  ;;  %932 = vmatprep.subr.bf16.mxu0 %v771_v38 }
 0x155   :  { %v1942_v63 = vmul.f32 0.999, %v1686_v19  ;;  %v5927_v6 = vld [vmem:[%s8272_s0 + $0x60] sm:$0xff]  ;;  %2708 = vst [vmem:[#allocation10 + $0x710] sm:$0xff] %v2452_v41  ;;  %v2457_v34 = vadd.f32 %v2201_v57, %v1945_v20  ;;  %v1944_v0 = vmul.f32 0.999, %v1688_v7 }
 0x156   :  { %v5932_v50 = vld [vmem:[%s8273_s1 + $0x60] sm:$0xff]  ;;  %v2200_v19 = vmul.f32 0.001, %v5919_v25  ;;  %v5938_v39 = vld [vmem:[%s8275_s3 + $0x748] sm:$0xff]  ;;  %2711 = vst [vmem:[#allocation10 + $0x728] sm:$0xff] %v2455_v11  ;;  %v5945_v46 = vld [vmem:[%s8275_s3 + $0x758] sm:$0xff] }
 0x157   :  { %8663 = vst [vmem:[#allocation22_spill] sm:$0xff] %v5938_v39  ;;  %v1691_v49 = vld [vmem:[#allocation2 + $0x748] sm:$0xff]  ;;  %v2454_v61 = vadd.f32 %v2198_v13, %v1942_v63  ;;  %8664 = vst [vmem:[#allocation25_spill] sm:$0xff] %v5945_v46  ;;  %v1693_v41 = vld [vmem:[#allocation2 + $0x758] sm:$0xff]  ;;  %v2203_v57 = vmul.f32 0.001, %v5938_v39 }
 0x158   :  { %v1947_v20 = vmul.f32 0.999, %v1691_v49  ;;  %2713 = vst [vmem:[#allocation10 + $0x738] sm:$0xff] %v2457_v34  ;;  %v2456_v25 = vadd.f32 %v2200_v19, %v1944_v0  ;;  %v1949_v24 = vmul.f32 0.999, %v1693_v41  ;;  %v5954_v11 = vld [vmem:[%s8275_s3 + $0x740] sm:$0xff]  ;;  %v5957_v49 = vsub.f32 %v74_v56, %v5906_v5 }
 0x159   :  { %v2205_v2 = vmul.f32 0.001, %v5945_v46  ;;  %8665 = vst [vmem:[#allocation24_spill] sm:$0xff] %v5954_v11  ;;  %v1690_v63 = vld [vmem:[#allocation2 + $0x740] sm:$0xff]  ;;  %v5962_v9 = vld [vmem:[%s8272_s0 + $0x78] sm:$0xff]  ;;  %2710 = vst [vmem:[#allocation10 + $0x720] sm:$0xff] %v2454_v61 }
 0x15a   :  { %8666 = vst [vmem:[#allocation27_spill] sm:$0xff] %v5957_v49  ;;  %v5967_v13 = vld [vmem:[%s8273_s1 + $0x78] sm:$0xff]  ;;  %v2459_v34 = vadd.f32 %v2203_v57, %v1947_v20  ;;  %v5972_v0 = vld [vmem:[%s8275_s3 + $0x750] sm:$0xff]  ;;  %v1946_v56 = vmul.f32 0.999, %v1690_v63  ;;  %2712 = vst [vmem:[#allocation10 + $0x730] sm:$0xff] %v2456_v25  ;;  %v116_v57 = vsub.f32 %v5927_v6, %v5932_v50 }
 0x15b   :  { %8667 = vst [vmem:[#allocation26_spill] sm:$0xff] %v5972_v0  ;;  %v1692_v38 = vld [vmem:[#allocation2 + $0x750] sm:$0xff]  ;;  %v2202_v19 = vmul.f32 0.001, %v5954_v11  ;;  %v2461_v7 = vadd.f32 %v2205_v2, %v1949_v24  ;;  %v2204_v39 = vmul.f32 0.001, %v5972_v0  ;;  %v8669_v0 = vpack.c.bf16 %v8658_v14, %v8657_v52 }
 0x15c   :  { %v1948_v46 = vmul.f32 0.999, %v1692_v38  ;;  %v5981_v61 = vld [vmem:[%s8275_s3 + $0x768] sm:$0xff]  ;;  %v77_v63 = vld [vmem:[%s8272_s0 + $0x38] sm:$0xff]  ;;  %2715 = vst [vmem:[#allocation10 + $0x748] sm:$0xff] %v2459_v34  ;;  %v134_v52 = vmul.f32 %v5011_v28, %v5957_v49  ;;  %v8673_v49 = vpack.c.bf16 %v5563_v43, %v5557_v60 }
 0x15d   :  { %8668 = vst [vmem:[#allocation29_spill] sm:$0xff] %v5981_v61  ;;  %v1695_v20 = vld [vmem:[#allocation2 + $0x768] sm:$0xff]  ;;  %v5991_v24 = vld [vmem:[%s8273_s1 + $0x38] sm:$0xff]  ;;  %v2458_v2 = vadd.f32 %v2202_v19, %v1946_v56  ;;  %v2207_v6 = vmul.f32 0.001, %v5981_v61  ;;  %933 = vmatpush1.bf16.msra.mxu0 %v8669_v0  ;;  %2717 = vst [vmem:[#allocation10 + $0x758] sm:$0xff] %v2461_v7  ;;  %v8670_v61 = vpack.c.bf16 %v5526_v36, %v8660_v27 }
 0x15e   :  { %v5996_v25 = vld [vmem:[%s8275_s3 + $0x778] sm:$0xff]  ;;  %v1951_v41 = vmul.f32 0.999, %v1695_v20  ;;  %v2460_v32 = vadd.f32 %v2204_v39, %v1948_v46  ;;  %v6008_v19 = vld [vmem:[%s8275_s3 + $0x760] sm:$0xff]  ;;  %v6018_v46 = vld [vmem:[%s8275_s3 + $0x770] sm:$0xff] }
 0x15f   :  { %v1697_v38 = vld [vmem:[#allocation2 + $0x778] sm:$0xff]  ;;  %v2209_v56 = vmul.f32 0.001, %v5996_v25  ;;  %v1694_v20 = vld [vmem:[#allocation2 + $0x760] sm:$0xff]  ;;  %934 = vmatprep.subr.bf16.mxu0 %v8670_v61  ;;  %2714 = vst [vmem:[#allocation10 + $0x740] sm:$0xff] %v2458_v2  ;;  %v1696_v39 = vld [vmem:[#allocation2 + $0x770] sm:$0xff] }
 0x160   :  { %v1953_v34 = vmul.f32 0.999, %v1697_v38  ;;  %v2463_v14 = vadd.f32 %v2207_v6, %v1951_v41  ;;  %v1950_v7 = vmul.f32 0.999, %v1694_v20  ;;  %v2206_v0 = vmul.f32 0.001, %v6008_v19 }
 0x161   :  { %v119_v38 = vsub.f32 %v5962_v9, %v5967_v13  ;;  %2716 = vst [vmem:[#allocation10 + $0x750] sm:$0xff] %v2460_v32  ;;  %v1952_v27 = vmul.f32 0.999, %v1696_v39  ;;  %v2208_v61 = vmul.f32 0.001, %v6018_v46  ;;  %v6027_v41 = vld [vmem:[%s8275_s3 + $0x788] sm:$0xff]  ;;  %v142_v6 = vmul.f32 %v8609_v10, %v116_v57 }
 0x162   :  { %v2465_v36 = vadd.f32 %v2209_v56, %v1953_v34  ;;  %v1699_v2 = vld [vmem:[#allocation2 + $0x788] sm:$0xff]  ;;  %2719 = vst [vmem:[#allocation10 + $0x768] sm:$0xff] %v2463_v14  ;;  %v2462_v20 = vadd.f32 %v2206_v0, %v1950_v7  ;;  %v6033_v11 = vld [vmem:[%s8275_s3 + $0x798] sm:$0xff]  ;;  %v2211_v34 = vmul.f32 0.001, %v6027_v41  ;;  %v8671_v56 = vpack.c.bf16 %v5549_v58, %v5539_v16  ;;  %v6046_v0 = vld [vmem:[%s8275_s3 + $0x780] sm:$0xff] }
 0x163   :  { %v1701_v32 = vld [vmem:[#allocation2 + $0x798] sm:$0xff]  ;;  %v1955_v9 = vmul.f32 0.999, %v1699_v2  ;;  %v6040_v39 = vsub.f32 %v77_v63, %v5991_v24  ;;  %v2464_v57 = vadd.f32 %v2208_v61, %v1952_v27  ;;  %v2213_v7 = vmul.f32 0.001, %v6033_v11  ;;  %v1698_v2 = vld [vmem:[#allocation2 + $0x780] sm:$0xff] }
 0x164   :  { %935 = vmatpush1.bf16.msra.mxu0 %v8671_v56  ;;  %2721 = vst [vmem:[#allocation10 + $0x778] sm:$0xff] %v2465_v36  ;;  %v1957_v14 = vmul.f32 0.999, %v1701_v32  ;;  %v6052_v16 = vadd.f32 %v134_v52, %v5906_v5  ;;  %2718 = vst [vmem:[#allocation10 + $0x760] sm:$0xff] %v2462_v20  ;;  %v6057_v63 = vld [vmem:[%s8275_s3 + $0x790] sm:$0xff]  ;;  %v145_v32 = vmul.f32 %v8609_v10, %v119_v38  ;;  %v6065_v5 = vld [vmem:[%s8275_s3 + $0x7a8] sm:$0xff] }
 0x165   :  { %8672 = vst [vmem:[#allocation28_spill] sm:$0xff] %v6040_v39  ;;  %936 = vmatprep.subr.bf16.mxu0 %v8673_v49  ;;  %v2467_v58 = vadd.f32 %v2211_v34, %v1955_v9  ;;  %v1700_v36 = vld [vmem:[#allocation2 + $0x790] sm:$0xff]  ;;  %v1954_v27 = vmul.f32 0.999, %v1698_v2  ;;  %v2210_v61 = vmul.f32 0.001, %v6046_v0  ;;  %v158_v52 = vadd.f32 %v142_v6, %v5932_v50 }
 0x166   :  { %2720 = vst [vmem:[#allocation10 + $0x770] sm:$0xff] %v2464_v57  ;;  %v2469_v56 = vadd.f32 %v2213_v7, %v1957_v14  ;;  %v1956_v60 = vmul.f32 0.999, %v1700_v36  ;;  %v2212_v43 = vmul.f32 0.001, %v6057_v63  ;;  %v1703_v49 = vld [vmem:[#allocation2 + $0x7a8] sm:$0xff]  ;;  %v8674_v14 = vpack.c.bf16 %v5584_v12, %v5575_v54 }
 0x167   :  { %2723 = vst [vmem:[#allocation10 + $0x788] sm:$0xff] %v2467_v58  ;;  %v2466_v20 = vadd.f32 %v2210_v61, %v1954_v27  ;;  %v6071_v9 = vld [vmem:[%s8275_s3 + $0x7b8] sm:$0xff]  ;;  %v1959_v34 = vmul.f32 0.999, %v1703_v49  ;;  %v2215_v57 = vmul.f32 0.001, %v6065_v5  ;;  %v137_v7 = vmul.f32 %v5011_v28, %v6040_v39 }
 0x168   :  { %v1705_v38 = vld [vmem:[#allocation2 + $0x7b8] sm:$0xff]  ;;  %937 = vmatpush1.bf16.msra.mxu0 %v8674_v14  ;;  %2725 = vst [vmem:[#allocation10 + $0x798] sm:$0xff] %v2469_v56  ;;  %v2468_v50 = vadd.f32 %v2212_v43, %v1956_v60  ;;  %v2217_v2 = vmul.f32 0.001, %v6071_v9  ;;  %v6083_v58 = vld [vmem:[%s8275_s3 + $0x7a0] sm:$0xff]  ;;  %v8675_v27 = vpack.c.bf16 %v5599_v3, %v5592_v53  ;;  %v778_v54 = vpack.c.bf16 %v5650_v51, %v5641_v30  ;;  %v6093_v61 = vld [vmem:[%s8275_s3 + $0x7b0] sm:$0xff] }
 0x169   :  { %v1961_v6 = vmul.f32 0.999, %v1705_v38  ;;  %v1702_v36 = vld [vmem:[#allocation2 + $0x7a0] sm:$0xff]  ;;  %2722 = vst [vmem:[#allocation10 + $0x780] sm:$0xff] %v2466_v20  ;;  %v2471_v12 = vadd.f32 %v2215_v57, %v1959_v34  ;;  %v1704_v56 = vld [vmem:[#allocation2 + $0x7b0] sm:$0xff]  ;;  %v161_v49 = vadd.f32 %v145_v32, %v5967_v13  ;;  %v6101_v30 = vld [vmem:[%s8275_s3 + $0x7c8] sm:$0xff]  ;;  %v678_v20 = vpack.c.bf16 %v158_v52, %v6052_v16 }
 0x16a   :  { %938 = vmatprep.subr.bf16.mxu0 %v8675_v27  ;;  %v1958_v60 = vmul.f32 0.999, %v1702_v36  ;;  %v2214_v43 = vmul.f32 0.001, %v6083_v58  ;;  %2724 = vst [vmem:[#allocation10 + $0x790] sm:$0xff] %v2468_v50  ;;  %v1707_v51 = vld [vmem:[#allocation2 + $0x7c8] sm:$0xff]  ;;  %v8676_v50 = vpack.c.bf16 %v5618_v23, %v5610_v4  ;;  %v781_v4 = vpack.c.bf16 %v5665_v17, %v5660_v48 }
 0x16b   :  { %v2473_v38 = vadd.f32 %v2217_v2, %v1961_v6  ;;  %v1960_v53 = vmul.f32 0.999, %v1704_v56  ;;  %v2216_v3 = vmul.f32 0.001, %v6093_v61  ;;  %2727 = vst [vmem:[#allocation10 + $0x7a8] sm:$0xff] %v2471_v12  ;;  %v6107_v57 = vld [vmem:[%s8275_s3 + $0x7d8] sm:$0xff]  ;;  %v153_v6 = vadd.f32 %v137_v7, %v5991_v24 }
 0x16c   :  { %v2470_v34 = vadd.f32 %v2214_v43, %v1958_v60  ;;  %v1709_v13 = vld [vmem:[#allocation2 + $0x7d8] sm:$0xff]  ;;  %v1963_v32 = vmul.f32 0.999, %v1707_v51  ;;  %v2219_v14 = vmul.f32 0.001, %v6101_v30  ;;  %939 = vmatpush1.bf16.msra.mxu0 %v8676_v50  ;;  %v6118_v36 = vld [vmem:[%s8275_s3 + $0x7c0] sm:$0xff]  ;;  %v8677_v12 = vpack.c.bf16 %v5630_v18, %v5625_v47 }
 0x16d   :  { %2729 = vst [vmem:[#allocation10 + $0x7b8] sm:$0xff] %v2473_v38  ;;  %v2472_v2 = vadd.f32 %v2216_v3, %v1960_v53  ;;  %v1965_v16 = vmul.f32 0.999, %v1709_v13  ;;  %v2221_v52 = vmul.f32 0.001, %v6107_v57  ;;  %v1706_v27 = vld [vmem:[#allocation2 + $0x7c0] sm:$0xff]  ;;  %v681_v43 = vpack.c.bf16 %v161_v49, %v153_v6 }
 0x16e   :  { %951 = vmatprep.subr.bf16.mxu0 %v8677_v12  ;;  %2726 = vst [vmem:[#allocation10 + $0x7a0] sm:$0xff] %v2470_v34  ;;  %v2475_v23 = vadd.f32 %v2219_v14, %v1963_v32  ;;  %v6128_v24 = vld [vmem:[%s8275_s3 + $0x7d0] sm:$0xff]  ;;  %v1962_v56 = vmul.f32 0.999, %v1706_v27  ;;  %v2218_v60 = vmul.f32 0.001, %v6118_v36  ;;  %v780_v13 = vpack.c.bf16 %v5679_v44, %v5670_v21 }
 0x16f   :  { %v1708_v7 = vld [vmem:[#allocation2 + $0x7d0] sm:$0xff]  ;;  %2728 = vst [vmem:[#allocation10 + $0x7b0] sm:$0xff] %v2472_v2  ;;  %v2477_v38 = vadd.f32 %v2221_v52, %v1965_v16  ;;  %v2220_v47 = vmul.f32 0.001, %v6128_v24  ;;  %v6135_v18 = vld [vmem:[%s8275_s3 + $0x7e8] sm:$0xff]  ;;  %941 = vmatmul.mubr.bf16.vlgmr.msra.gmra.mrb[0].mxu0 %v678_v20  ;;  %v6140_v3 = vld [vmem:[%s8275_s3 + $0x7f8] sm:$0xff]  ;;  %v783_v2 = vpack.c.bf16 %v5693_v29, %v5687_v8 }
 0x170   :  { %v1964_v53 = vmul.f32 0.999, %v1708_v7  ;;  %v1711_v48 = vld [vmem:[#allocation2 + $0x7e8] sm:$0xff]  ;;  %2731 = vst [vmem:[#allocation10 + $0x7c8] sm:$0xff] %v2475_v23  ;;  %v2474_v17 = vadd.f32 %v2218_v60, %v1962_v56  ;;  %v1713_v49 = vld [vmem:[#allocation2 + $0x7f8] sm:$0xff]  ;;  %952 = vmatpush1.bf16.msra.mxu0 %v778_v54  ;;  %983 = vmatprep.mubr.bf16.mxu0 %v681_v43  ;;  %v6149_v50 = vld [vmem:[%s8275_s3 + $0x7e0] sm:$0xff]  ;;  %v782_v7 = vpack.c.bf16 %v5703_v45, %v5698_v31 }
 0x171   :  { %v1967_v51 = vmul.f32 0.999, %v1711_v48  ;;  %v2223_v34 = vmul.f32 0.001, %v6135_v18  ;;  %2733 = vst [vmem:[#allocation10 + $0x7d8] sm:$0xff] %v2477_v38  ;;  %v1710_v6 = vld [vmem:[#allocation2 + $0x7e0] sm:$0xff]  ;;  %953 = vmatprep.subr.bf16.mxu0 %v781_v4  ;;  %v785_v48 = vpack.c.bf16 %v5721_v26, %v5716_v40  ;;  %v784_v31 = vpack.c.bf16 %v5737_v55, %v5730_v42 }
 0x172   :  { %v2476_v32 = vadd.f32 %v2220_v47, %v1964_v53  ;;  %v1969_v14 = vmul.f32 0.999, %v1713_v49  ;;  %v2225_v20 = vmul.f32 0.001, %v6140_v3  ;;  %2730 = vst [vmem:[#allocation10 + $0x7c0] sm:$0xff] %v2474_v17  ;;  %v6156_v21 = vld [vmem:[%s8275_s3 + $0x7f0] sm:$0xff]  ;;  %v787_v45 = vpack.c.bf16 %v5749_v22, %v5744_v62 }
 0x173   :  { %v2479_v54 = vadd.f32 %v2223_v34, %v1967_v51  ;;  %v1712_v44 = vld [vmem:[#allocation2 + $0x7f0] sm:$0xff]  ;;  %v1966_v16 = vmul.f32 0.999, %v1710_v6  ;;  %v2222_v52 = vmul.f32 0.001, %v6149_v50  ;;  %v419_v8 = vld [vmem:[%s8278_s6 + $0x8] sm:$0xff]  ;;  %v786_v34 = vpack.c.bf16 %v5765_v59, %v5758_v15 }
 0x174   :  { %2732 = vst [vmem:[#allocation10 + $0x7d0] sm:$0xff] %v2476_v32  ;;  %v2481_v27 = vadd.f32 %v2225_v20, %v1969_v14  ;;  %v1968_v12 = vmul.f32 0.999, %v1712_v44  ;;  %v2224_v23 = vmul.f32 0.001, %v6156_v21  ;;  %v427_v29 = vld [vmem:[%s8278_s6 + $0x48] sm:$0xff]  ;;  %954 = vmatpush1.bf16.msra.mxu0 %v780_v13  ;;  %v789_v14 = vpack.c.bf16 %v5777_v37, %v5772_v1 }
 0x175   :  { %2735 = vst [vmem:[#allocation10 + $0x7e8] sm:$0xff] %v2479_v54  ;;  %v2478_v4 = vadd.f32 %v2222_v52, %v1966_v16  ;;  %v1021_v60 = vpack.c.bf16 %v427_v29, %v419_v8  ;;  %v2739_v43 = vld [vmem:[#allocation6 + $0x8] sm:$0xff]  ;;  %v3251_v53 = vmul.f32 0.001, %v419_v8  ;;  %v418_v47 = vld [vmem:[%s8278_s6] sm:$0xff]  ;;  %955 = vmatprep.subr.bf16.mxu0 %v783_v2  ;;  %v788_v2 = vpack.c.bf16 %v5793_v33, %v5786_v35  ;;  %v8678_v52 = vld [vmem:[#allocation45_spill] sm:$0xff] }
 0x176   :  { %2737 = vst [vmem:[#allocation10 + $0x7f8] sm:$0xff] %v2481_v27  ;;  %v2480_v56 = vadd.f32 %v2224_v23, %v1968_v12  ;;  %v2747_v38 = vld [vmem:[#allocation6 + $0x48] sm:$0xff]  ;;  %v2995_v17 = vmul.f32 0.999, %v2739_v43  ;;  %v3259_v51 = vmul.f32 0.001, %v427_v29 }
 0x177   :  { %2734 = vst [vmem:[#allocation10 + $0x7e0] sm:$0xff] %v2478_v4  ;;  %v3003_v49 = vmul.f32 0.999, %v2747_v38  ;;  %1190 = vmatprep.subr.bf16.mxu1 %v1021_v60  ;;  %v426_v13 = vld [vmem:[%s8278_s6 + $0x40] sm:$0xff]  ;;  %v3250_v32 = vmul.f32 0.001, %v418_v47 }
 0x178   :  { %2736 = vst [vmem:[#allocation10 + $0x7f0] sm:$0xff] %v2480_v56  ;;  %v2738_v40 = vld [vmem:[#allocation6] sm:$0xff]  ;;  %v3507_v20 = vadd.f32 %v3251_v53, %v2995_v17  ;;  %v1020_v55 = vpack.c.bf16 %v426_v13, %v418_v47  ;;  %v435_v62 = vld [vmem:[%s8278_s6 + $0x88] sm:$0xff]  ;;  %956 = vmatpush1.bf16.msra.mxu0 %v782_v7  ;;  %v3258_v16 = vmul.f32 0.001, %v426_v13  ;;  %v8679_v27 = vld [vmem:[#allocation41_spill] sm:$0xff] }
 0x179   :  { %v2746_v26 = vld [vmem:[#allocation6 + $0x40] sm:$0xff]  ;;  %v3515_v42 = vadd.f32 %v3259_v51, %v3003_v49  ;;  %v443_v22 = vld [vmem:[%s8278_s6 + $0xc8] sm:$0xff]  ;;  %v2994_v54 = vmul.f32 0.999, %v2738_v40  ;;  %957 = vmatprep.subr.bf16.mxu0 %v785_v48  ;;  %v791_v12 = vpack.c.bf16 %v8679_v27, %v8678_v52  ;;  %v3267_v29 = vmul.f32 0.001, %v435_v62 }
 0x17a   :  { %v2755_v6 = vld [vmem:[#allocation6 + $0x88] sm:$0xff]  ;;  %v3002_v44 = vmul.f32 0.999, %v2746_v26  ;;  %3763 = vst [vmem:[#allocation12 + $0x8] sm:$0xff] %v3507_v20  ;;  %1191 = vmatpush1.bf16.msra.mxu1 %v1020_v55  ;;  %v1029_v23 = vpack.c.bf16 %v443_v22, %v435_v62  ;;  %v434_v7 = vld [vmem:[%s8278_s6 + $0x80] sm:$0xff]  ;;  %v8681_v60 = vld [vmem:[#allocation44_spill] sm:$0xff] }
 0x17b   :  { %3771 = vst [vmem:[#allocation12 + $0x48] sm:$0xff] %v3515_v42  ;;  %v2763_v4 = vld [vmem:[#allocation6 + $0xc8] sm:$0xff]  ;;  %v3011_v8 = vmul.f32 0.999, %v2755_v6  ;;  %v3506_v38 = vadd.f32 %v3250_v32, %v2994_v54  ;;  %v442_v48 = vld [vmem:[%s8278_s6 + $0xc0] sm:$0xff]  ;;  %v8686_v15 = vld [vmem:[#allocation49_spill] sm:$0xff] }
 0x17c   :  { %v8680_v56 = vld [vmem:[#allocation39_spill] sm:$0xff]  ;;  %v3514_v53 = vadd.f32 %v3258_v16, %v3002_v44  ;;  %v3019_v47 = vmul.f32 0.999, %v2763_v4  ;;  %v2754_v17 = vld [vmem:[#allocation6 + $0x80] sm:$0xff]  ;;  %1192 = vmatprep.subr.bf16.mxu1 %v1029_v23  ;;  %v3275_v51 = vmul.f32 0.001, %v443_v22  ;;  %v1028_v40 = vpack.c.bf16 %v442_v48, %v434_v7  ;;  %958 = vmatpush1.bf16.msra.mxu0 %v784_v31 }
 0x17d   :  { %v2762_v49 = vld [vmem:[#allocation6 + $0xc0] sm:$0xff]  ;;  %v3523_v13 = vadd.f32 %v3267_v29, %v3011_v8  ;;  %v3010_v26 = vmul.f32 0.999, %v2754_v17  ;;  %v451_v20 = vld [vmem:[%s8278_s6 + $0x108] sm:$0xff]  ;;  %3762 = vst [vmem:[#allocation12] sm:$0xff] %v3506_v38  ;;  %959 = vmatprep.subr.bf16.mxu0 %v787_v45  ;;  %v8691_v33 = vld [vmem:[#allocation21_spill] sm:$0xff] }
 0x17e   :  { %v459_v32 = vld [vmem:[%s8278_s6 + $0x148] sm:$0xff]  ;;  %3770 = vst [vmem:[#allocation12 + $0x40] sm:$0xff] %v3514_v53  ;;  %v3018_v42 = vmul.f32 0.999, %v2762_v49  ;;  %v3266_v55 = vmul.f32 0.001, %v434_v7  ;;  %v3531_v16 = vadd.f32 %v3275_v51, %v3019_v47  ;;  %1193 = vmatpush1.bf16.msra.mxu1 %v1028_v40 }
 0x17f   :  { %v3274_v62 = vmul.f32 0.001, %v442_v48  ;;  %v1037_v6 = vpack.c.bf16 %v459_v32, %v451_v20  ;;  %v8682_v22 = vld [vmem:[#allocation42_spill] sm:$0xff]  ;;  %3779 = vst [vmem:[#allocation12 + $0x88] sm:$0xff] %v3523_v13  ;;  %v2771_v23 = vld [vmem:[#allocation6 + $0x108] sm:$0xff]  ;;  %v8685_v47 = vld [vmem:[#allocation48_spill] sm:$0xff] }
 0x180   :  { %v8683_v54 = vld [vmem:[#allocation46_spill] sm:$0xff]  ;;  %v2779_v4 = vld [vmem:[#allocation6 + $0x148] sm:$0xff]  ;;  %v3283_v8 = vmul.f32 0.001, %v451_v20  ;;  %v3291_v29 = vmul.f32 0.001, %v459_v32  ;;  %v3522_v17 = vadd.f32 %v3266_v55, %v3010_v26  ;;  %960 = vmatpush1.bf16.msra.mxu0 %v786_v34 }
 0x181   :  { %v793_v44 = vpack.c.bf16 %v8683_v54, %v8682_v22  ;;  %v3530_v43 = vadd.f32 %v3274_v62, %v3018_v42  ;;  %1194 = vmatprep.subr.bf16.mxu1 %v1037_v6  ;;  %v3027_v31 = vmul.f32 0.999, %v2771_v23  ;;  %v3035_v38 = vmul.f32 0.999, %v2779_v4  ;;  %v450_v7 = vld [vmem:[%s8278_s6 + $0x100] sm:$0xff]  ;;  %v8684_v53 = vld [vmem:[#allocation47_spill] sm:$0xff]  ;;  %961 = vmatprep.subr.bf16.mxu0 %v789_v14 }
 0x182   :  { %v458_v45 = vld [vmem:[%s8278_s6 + $0x140] sm:$0xff]  ;;  %v792_v48 = vpack.c.bf16 %v8685_v47, %v8684_v53  ;;  %3787 = vst [vmem:[#allocation12 + $0xc8] sm:$0xff] %v3531_v16  ;;  %v3282_v40 = vmul.f32 0.001, %v450_v7  ;;  %3778 = vst [vmem:[#allocation12 + $0x80] sm:$0xff] %v3522_v17  ;;  %v467_v62 = vld [vmem:[%s8278_s6 + $0x188] sm:$0xff] }
 0x183   :  { %v1036_v49 = vpack.c.bf16 %v458_v45, %v450_v7  ;;  %v2770_v51 = vld [vmem:[#allocation6 + $0x100] sm:$0xff]  ;;  %v3290_v26 = vmul.f32 0.001, %v458_v45  ;;  %3786 = vst [vmem:[#allocation12 + $0xc0] sm:$0xff] %v3530_v43  ;;  %v3539_v20 = vadd.f32 %v3283_v8, %v3027_v31  ;;  %v3547_v32 = vadd.f32 %v3291_v29, %v3035_v38  ;;  %v475_v6 = vld [vmem:[%s8278_s6 + $0x1c8] sm:$0xff]  ;;  %v8699_v53 = vld [vmem:[#allocation29_spill] sm:$0xff] }
 0x184   :  { %v2778_v13 = vld [vmem:[#allocation6 + $0x140] sm:$0xff]  ;;  %v3026_v42 = vmul.f32 0.999, %v2770_v51  ;;  %v1045_v43 = vpack.c.bf16 %v475_v6, %v467_v62  ;;  %v2787_v16 = vld [vmem:[#allocation6 + $0x188] sm:$0xff]  ;;  %v3299_v4 = vmul.f32 0.001, %v467_v62  ;;  %962 = vmatpush1.bf16.msra.mxu0 %v788_v2  ;;  %v801_v47 = vpack.c.bf16 %v5996_v25, %v8699_v53 }
 0x185   :  { %v3034_v55 = vmul.f32 0.999, %v2778_v13  ;;  %v8687_v59 = vld [vmem:[#allocation50_spill] sm:$0xff]  ;;  %1195 = vmatpush1.bf16.msra.mxu1 %v1036_v49  ;;  %v2795_v23 = vld [vmem:[#allocation6 + $0x1c8] sm:$0xff]  ;;  %v3307_v8 = vmul.f32 0.001, %v475_v6  ;;  %963 = vmatprep.subr.bf16.mxu0 %v791_v12 }
 0x186   :  { %v795_v34 = vpack.c.bf16 %v8687_v59, %v8686_v15  ;;  %3795 = vst [vmem:[#allocation12 + $0x108] sm:$0xff] %v3539_v20  ;;  %3803 = vst [vmem:[#allocation12 + $0x148] sm:$0xff] %v3547_v32  ;;  %v3538_v29 = vadd.f32 %v3282_v40, %v3026_v42  ;;  %v3043_v31 = vmul.f32 0.999, %v2787_v16  ;;  %v3051_v38 = vmul.f32 0.999, %v2795_v23  ;;  %1196 = vmatprep.subr.bf16.mxu1 %v1045_v43 }
 0x187   :  { %v3546_v17 = vadd.f32 %v3290_v26, %v3034_v55  ;;  %v466_v1 = vld [vmem:[%s8278_s6 + $0x180] sm:$0xff]  ;;  %v8688_v14 = vld [vmem:[#allocation51_spill] sm:$0xff]  ;;  %v8692_v12 = vld [vmem:[#allocation20_spill] sm:$0xff] }
 0x188   :  { %v474_v37 = vld [vmem:[%s8278_s6 + $0x1c0] sm:$0xff]  ;;  %v8689_v7 = vld [vmem:[#allocation19_spill] sm:$0xff]  ;;  %v3298_v20 = vmul.f32 0.001, %v466_v1  ;;  %3794 = vst [vmem:[#allocation12 + $0x100] sm:$0xff] %v3538_v29  ;;  %v3555_v26 = vadd.f32 %v3299_v4, %v3043_v31  ;;  %v3563_v32 = vadd.f32 %v3307_v8, %v3051_v38 }
 0x189   :  { %v794_v45 = vpack.c.bf16 %v8689_v7, %v8688_v14  ;;  %v1044_v49 = vpack.c.bf16 %v474_v37, %v466_v1  ;;  %v2786_v51 = vld [vmem:[#allocation6 + $0x180] sm:$0xff]  ;;  %v3306_v40 = vmul.f32 0.001, %v474_v37  ;;  %3802 = vst [vmem:[#allocation12 + $0x140] sm:$0xff] %v3546_v17  ;;  %v483_v62 = vld [vmem:[%s8278_s6 + $0x208] sm:$0xff]  ;;  %v803_v14 = vpack.c.bf16 %v6033_v11, %v6027_v41 }
 0x18a   :  { %v2794_v13 = vld [vmem:[#allocation6 + $0x1c0] sm:$0xff]  ;;  %v3042_v42 = vmul.f32 0.999, %v2786_v51  ;;  %v491_v6 = vld [vmem:[%s8278_s6 + $0x248] sm:$0xff]  ;;  %v3315_v4 = vmul.f32 0.001, %v483_v62 }
 0x18b   :  { %v3050_v55 = vmul.f32 0.999, %v2794_v13  ;;  %v8690_v35 = vld [vmem:[#allocation18_spill] sm:$0xff]  ;;  %1197 = vmatpush1.bf16.msra.mxu1 %v1044_v49  ;;  %v1053_v43 = vpack.c.bf16 %v491_v6, %v483_v62  ;;  %v2803_v16 = vld [vmem:[#allocation6 + $0x208] sm:$0xff]  ;;  %v3323_v8 = vmul.f32 0.001, %v491_v6 }
 0x18c   :  { %v797_v2 = vpack.c.bf16 %v8691_v33, %v8690_v35  ;;  %v2811_v23 = vld [vmem:[#allocation6 + $0x248] sm:$0xff]  ;;  %3811 = vst [vmem:[#allocation12 + $0x188] sm:$0xff] %v3555_v26  ;;  %3819 = vst [vmem:[#allocation12 + $0x1c8] sm:$0xff] %v3563_v32  ;;  %v3554_v29 = vadd.f32 %v3298_v20, %v3042_v42  ;;  %v3059_v31 = vmul.f32 0.999, %v2803_v16  ;;  %v482_v52 = vld [vmem:[%s8278_s6 + $0x200] sm:$0xff] }
 0x18d   :  { %v3562_v17 = vadd.f32 %v3306_v40, %v3050_v55  ;;  %v3067_v38 = vmul.f32 0.999, %v2811_v23  ;;  %v490_v27 = vld [vmem:[%s8278_s6 + $0x240] sm:$0xff]  ;;  %v8693_v1 = vld [vmem:[#allocation23_spill] sm:$0xff]  ;;  %1198 = vmatprep.subr.bf16.mxu1 %v1053_v43  ;;  %v3314_v26 = vmul.f32 0.001, %v482_v52  ;;  %v8694_v40 = vpack.c.bf16 %v8681_v60, %v8680_v56 }
 0x18e   :  { %v796_v37 = vpack.c.bf16 %v8693_v1, %v8692_v12  ;;  %v1052_v49 = vpack.c.bf16 %v490_v27, %v482_v52  ;;  %v2802_v51 = vld [vmem:[#allocation6 + $0x200] sm:$0xff]  ;;  %v3322_v20 = vmul.f32 0.001, %v490_v27  ;;  %3810 = vst [vmem:[#allocation12 + $0x180] sm:$0xff] %v3554_v29  ;;  %v3571_v32 = vadd.f32 %v3315_v4, %v3059_v31  ;;  %v499_v6 = vld [vmem:[%s8278_s6 + $0x288] sm:$0xff]  ;;  %v8696_v60 = vld [vmem:[#allocation25_spill] sm:$0xff] }
 0x18f   :  { %v2810_v13 = vld [vmem:[#allocation6 + $0x240] sm:$0xff]  ;;  %964 = vmatpush1.bf16.msra.mxu0 %v8694_v40  ;;  %3818 = vst [vmem:[#allocation12 + $0x1c0] sm:$0xff] %v3562_v17  ;;  %v3579_v42 = vadd.f32 %v3323_v8, %v3067_v38  ;;  %v3058_v55 = vmul.f32 0.999, %v2802_v51  ;;  %v507_v43 = vld [vmem:[%s8278_s6 + $0x2c8] sm:$0xff]  ;;  %v805_v12 = vpack.c.bf16 %v6071_v9, %v6065_v5 }
 0x190   :  { %v3066_v62 = vmul.f32 0.999, %v2810_v13  ;;  %965 = vmatprep.subr.bf16.mxu0 %v793_v44  ;;  %v8695_v56 = vld [vmem:[#allocation22_spill] sm:$0xff]  ;;  %1199 = vmatpush1.bf16.msra.mxu1 %v1052_v49  ;;  %v1061_v23 = vpack.c.bf16 %v507_v43, %v499_v6  ;;  %v2819_v4 = vld [vmem:[#allocation6 + $0x288] sm:$0xff]  ;;  %v3331_v29 = vmul.f32 0.001, %v499_v6 }
 0x191   :  { %v799_v16 = vpack.c.bf16 %v8696_v60, %v8695_v56  ;;  %v2827_v8 = vld [vmem:[#allocation6 + $0x2c8] sm:$0xff]  ;;  %v3339_v17 = vmul.f32 0.001, %v507_v43  ;;  %3827 = vst [vmem:[#allocation12 + $0x208] sm:$0xff] %v3571_v32  ;;  %3835 = vst [vmem:[#allocation12 + $0x248] sm:$0xff] %v3579_v42  ;;  %v3570_v31 = vadd.f32 %v3314_v26, %v3058_v55  ;;  %v498_v22 = vld [vmem:[%s8278_s6 + $0x280] sm:$0xff] }
 0x192   :  { %v3578_v38 = vadd.f32 %v3322_v20, %v3066_v62  ;;  %v3075_v52 = vmul.f32 0.999, %v2819_v4  ;;  %v3083_v27 = vmul.f32 0.999, %v2827_v8  ;;  %v506_v54 = vld [vmem:[%s8278_s6 + $0x2c0] sm:$0xff]  ;;  %v8697_v44 = vld [vmem:[#allocation24_spill] sm:$0xff]  ;;  %1200 = vmatprep.subr.bf16.mxu1 %v1061_v23 }
 0x193   :  { %v8698_v49 = vld [vmem:[#allocation26_spill] sm:$0xff]  ;;  %v1060_v13 = vpack.c.bf16 %v506_v54, %v498_v22  ;;  %v3330_v42 = vmul.f32 0.001, %v498_v22  ;;  %v3338_v26 = vmul.f32 0.001, %v506_v54  ;;  %966 = vmatpush1.bf16.msra.mxu0 %v792_v48  ;;  %3826 = vst [vmem:[#allocation12 + $0x200] sm:$0xff] %v3570_v31 }
 0x194   :  { %v798_v51 = vpack.c.bf16 %v8698_v49, %v8697_v44  ;;  %v2818_v40 = vld [vmem:[#allocation6 + $0x280] sm:$0xff]  ;;  %3834 = vst [vmem:[#allocation12 + $0x240] sm:$0xff] %v3578_v38  ;;  %v3587_v20 = vadd.f32 %v3331_v29, %v3075_v52  ;;  %v3595_v55 = vadd.f32 %v3339_v17, %v3083_v27  ;;  %v515_v43 = vld [vmem:[%s8278_s6 + $0x308] sm:$0xff]  ;;  %967 = vmatprep.subr.bf16.mxu0 %v795_v34 }
 0x195   :  { %v2826_v32 = vld [vmem:[#allocation6 + $0x2c0] sm:$0xff]  ;;  %v3074_v62 = vmul.f32 0.999, %v2818_v40  ;;  %v523_v23 = vld [vmem:[%s8278_s6 + $0x348] sm:$0xff]  ;;  %1201 = vmatpush1.bf16.msra.mxu1 %v1060_v13  ;;  %v3347_v29 = vmul.f32 0.001, %v515_v43  ;;  %v800_v34 = vpack.c.bf16 %v6018_v46, %v6008_v19  ;;  %v807_v44 = vpack.c.bf16 %v6107_v57, %v6101_v30 }
 0x196   :  { %v3082_v6 = vmul.f32 0.999, %v2826_v32  ;;  %v1069_v48 = vpack.c.bf16 %v523_v23, %v515_v43  ;;  %v2835_v4 = vld [vmem:[#allocation6 + $0x308] sm:$0xff]  ;;  %v3355_v17 = vmul.f32 0.001, %v523_v23  ;;  %3843 = vst [vmem:[#allocation12 + $0x288] sm:$0xff] %v3587_v20 }
 0x197   :  { %v2843_v8 = vld [vmem:[#allocation6 + $0x348] sm:$0xff]  ;;  %3851 = vst [vmem:[#allocation12 + $0x2c8] sm:$0xff] %v3595_v55  ;;  %v3586_v31 = vadd.f32 %v3330_v42, %v3074_v62  ;;  %v3091_v52 = vmul.f32 0.999, %v2835_v4  ;;  %v514_v15 = vld [vmem:[%s8278_s6 + $0x300] sm:$0xff]  ;;  %968 = vmatpush1.bf16.msra.mxu0 %v794_v45 }
 0x198   :  { %v3594_v38 = vadd.f32 %v3338_v26, %v3082_v6  ;;  %v3099_v27 = vmul.f32 0.999, %v2843_v8  ;;  %v522_v59 = vld [vmem:[%s8278_s6 + $0x340] sm:$0xff]  ;;  %1202 = vmatprep.subr.bf16.mxu1 %v1069_v48  ;;  %v3346_v40 = vmul.f32 0.001, %v514_v15  ;;  %v531_v62 = vld [vmem:[%s8278_s6 + $0x388] sm:$0xff]  ;;  %969 = vmatprep.subr.bf16.mxu0 %v797_v2  ;;  %v802_v2 = vpack.c.bf16 %v6057_v63, %v6046_v0 }
 0x199   :  { %v1068_v22 = vpack.c.bf16 %v522_v59, %v514_v15  ;;  %v2834_v54 = vld [vmem:[#allocation6 + $0x300] sm:$0xff]  ;;  %v3354_v32 = vmul.f32 0.001, %v522_v59  ;;  %3842 = vst [vmem:[#allocation12 + $0x280] sm:$0xff] %v3586_v31  ;;  %v3603_v42 = vadd.f32 %v3347_v29, %v3091_v52  ;;  %v539_v6 = vld [vmem:[%s8278_s6 + $0x3c8] sm:$0xff] }
 0x19a   :  { %v2842_v13 = vld [vmem:[#allocation6 + $0x340] sm:$0xff]  ;;  %3850 = vst [vmem:[#allocation12 + $0x2c0] sm:$0xff] %v3594_v38  ;;  %v3611_v26 = vadd.f32 %v3355_v17, %v3099_v27  ;;  %v3090_v20 = vmul.f32 0.999, %v2834_v54  ;;  %v1077_v7 = vpack.c.bf16 %v539_v6, %v531_v62  ;;  %v2851_v45 = vld [vmem:[#allocation6 + $0x388] sm:$0xff] }
 0x19b   :  { %v3098_v55 = vmul.f32 0.999, %v2842_v13  ;;  %1203 = vmatpush1.bf16.msra.mxu1 %v1068_v22  ;;  %v2859_v43 = vld [vmem:[#allocation6 + $0x3c8] sm:$0xff]  ;;  %v3363_v23 = vmul.f32 0.001, %v531_v62  ;;  %3859 = vst [vmem:[#allocation12 + $0x308] sm:$0xff] %v3603_v42  ;;  %970 = vmatpush1.bf16.msra.mxu0 %v796_v37 }
 0x19c   :  { %v3371_v48 = vmul.f32 0.001, %v539_v6  ;;  %3867 = vst [vmem:[#allocation12 + $0x348] sm:$0xff] %v3611_v26  ;;  %v3602_v4 = vadd.f32 %v3346_v40, %v3090_v20  ;;  %v3107_v29 = vmul.f32 0.999, %v2851_v45  ;;  %v530_v35 = vld [vmem:[%s8278_s6 + $0x380] sm:$0xff]  ;;  %1204 = vmatprep.subr.bf16.mxu1 %v1077_v7  ;;  %971 = vmatprep.subr.bf16.mxu0 %v799_v16  ;;  %v804_v16 = vpack.c.bf16 %v6093_v61, %v6083_v58 }
 0x19d   :  { %v3610_v8 = vadd.f32 %v3354_v32, %v3098_v55  ;;  %v3115_v17 = vmul.f32 0.999, %v2859_v43  ;;  %v538_v33 = vld [vmem:[%s8278_s6 + $0x3c0] sm:$0xff]  ;;  %v3362_v27 = vmul.f32 0.001, %v530_v35  ;;  %v547_v40 = vld [vmem:[%s8278_s6 + $0x408] sm:$0xff] }
 0x19e   :  { %v1076_v31 = vpack.c.bf16 %v538_v33, %v530_v35  ;;  %v2850_v38 = vld [vmem:[#allocation6 + $0x380] sm:$0xff]  ;;  %v3370_v15 = vmul.f32 0.001, %v538_v33  ;;  %3858 = vst [vmem:[#allocation12 + $0x300] sm:$0xff] %v3602_v4  ;;  %v3619_v59 = vadd.f32 %v3363_v23, %v3107_v29  ;;  %v555_v32 = vld [vmem:[%s8278_s6 + $0x448] sm:$0xff] }
 0x19f   :  { %v2858_v52 = vld [vmem:[#allocation6 + $0x3c0] sm:$0xff]  ;;  %3866 = vst [vmem:[#allocation12 + $0x340] sm:$0xff] %v3610_v8  ;;  %v3627_v22 = vadd.f32 %v3371_v48, %v3115_v17  ;;  %v3106_v54 = vmul.f32 0.999, %v2850_v38  ;;  %v1085_v1 = vpack.c.bf16 %v555_v32, %v547_v40  ;;  %v2867_v37 = vld [vmem:[#allocation6 + $0x408] sm:$0xff]  ;;  %972 = vmatpush1.bf16.msra.mxu0 %v798_v51 }
 0x1a0   :  { %v3114_v13 = vmul.f32 0.999, %v2858_v52  ;;  %1205 = vmatpush1.bf16.msra.mxu1 %v1076_v31  ;;  %v2875_v42 = vld [vmem:[#allocation6 + $0x448] sm:$0xff]  ;;  %v3379_v26 = vmul.f32 0.001, %v547_v40  ;;  %3875 = vst [vmem:[#allocation12 + $0x388] sm:$0xff] %v3619_v59  ;;  %973 = vmatprep.subr.bf16.mxu0 %v801_v47  ;;  %v806_v47 = vpack.c.bf16 %v6128_v24, %v6118_v36 }
 0x1a1   :  { %v3387_v20 = vmul.f32 0.001, %v555_v32  ;;  %3883 = vst [vmem:[#allocation12 + $0x3c8] sm:$0xff] %v3627_v22  ;;  %v3618_v55 = vadd.f32 %v3362_v27, %v3106_v54  ;;  %v3123_v6 = vmul.f32 0.999, %v2867_v37  ;;  %v546_v56 = vld [vmem:[%s8278_s6 + $0x400] sm:$0xff]  ;;  %1206 = vmatprep.subr.bf16.mxu1 %v1085_v1 }
 0x1a2   :  { %v3626_v62 = vadd.f32 %v3370_v15, %v3114_v13  ;;  %v3131_v7 = vmul.f32 0.999, %v2875_v42  ;;  %v554_v60 = vld [vmem:[%s8278_s6 + $0x440] sm:$0xff]  ;;  %v3378_v48 = vmul.f32 0.001, %v546_v56  ;;  %v563_v33 = vld [vmem:[%s8278_s6 + $0x488] sm:$0xff] }
 0x1a3   :  { %v1084_v45 = vpack.c.bf16 %v554_v60, %v546_v56  ;;  %v2866_v43 = vld [vmem:[#allocation6 + $0x400] sm:$0xff]  ;;  %v3386_v4 = vmul.f32 0.001, %v554_v60  ;;  %3874 = vst [vmem:[#allocation12 + $0x380] sm:$0xff] %v3618_v55  ;;  %v3635_v8 = vadd.f32 %v3379_v26, %v3123_v6  ;;  %v571_v31 = vld [vmem:[%s8278_s6 + $0x4c8] sm:$0xff]  ;;  %974 = vmatpush1.bf16.msra.mxu0 %v800_v34  ;;  %v6378_v42 = vld [vmem:[%s8272_s0 + $0x70] sm:$0xff]  ;;  %v809_v34 = vpack.c.bf16 %v6140_v3, %v6135_v18 }
 0x1a4   :  { %v2874_v23 = vld [vmem:[#allocation6 + $0x440] sm:$0xff]  ;;  %3882 = vst [vmem:[#allocation12 + $0x3c0] sm:$0xff] %v3626_v62  ;;  %v3643_v29 = vadd.f32 %v3387_v20, %v3131_v7  ;;  %v3122_v17 = vmul.f32 0.999, %v2866_v43  ;;  %v1093_v49 = vpack.c.bf16 %v571_v31, %v563_v33  ;;  %v2883_v51 = vld [vmem:[#allocation6 + $0x488] sm:$0xff]  ;;  %v6383_v26 = vld [vmem:[%s8273_s1 + $0x70] sm:$0xff]  ;;  %975 = vmatprep.subr.bf16.mxu0 %v803_v14 }
 0x1a5   :  { %v3130_v35 = vmul.f32 0.999, %v2874_v23  ;;  %1207 = vmatpush1.bf16.msra.mxu1 %v1084_v45  ;;  %v2891_v38 = vld [vmem:[#allocation6 + $0x4c8] sm:$0xff]  ;;  %v3395_v52 = vmul.f32 0.001, %v563_v33  ;;  %3891 = vst [vmem:[#allocation12 + $0x408] sm:$0xff] %v3635_v8  ;;  %v118_v0 = vsub.f32 %v6378_v42, %v6383_v26 }
 0x1a6   :  { %v3403_v27 = vmul.f32 0.001, %v571_v31  ;;  %3899 = vst [vmem:[#allocation12 + $0x448] sm:$0xff] %v3643_v29  ;;  %v3634_v15 = vadd.f32 %v3378_v48, %v3122_v17  ;;  %v3139_v22 = vmul.f32 0.999, %v2883_v51  ;;  %v562_v25 = vld [vmem:[%s8278_s6 + $0x480] sm:$0xff]  ;;  %1208 = vmatprep.subr.bf16.mxu1 %v1093_v49  ;;  %v808_v17 = vpack.c.bf16 %v6156_v21, %v6149_v50 }
 0x1a7   :  { %v3642_v59 = vadd.f32 %v3386_v4, %v3130_v35  ;;  %v3147_v54 = vmul.f32 0.999, %v2891_v38  ;;  %v570_v53 = vld [vmem:[%s8278_s6 + $0x4c0] sm:$0xff]  ;;  %v3394_v1 = vmul.f32 0.001, %v562_v25  ;;  %v579_v19 = vld [vmem:[%s8278_s6 + $0x508] sm:$0xff]  ;;  %976 = vmatpush1.bf16.msra.mxu0 %v802_v2  ;;  %v144_v58 = vmul.f32 %v8609_v10, %v118_v0 }
 0x1a8   :  { %v1092_v13 = vpack.c.bf16 %v570_v53, %v562_v25  ;;  %v2882_v40 = vld [vmem:[#allocation6 + $0x480] sm:$0xff]  ;;  %v3402_v37 = vmul.f32 0.001, %v570_v53  ;;  %3890 = vst [vmem:[#allocation12 + $0x400] sm:$0xff] %v3634_v15  ;;  %v3651_v20 = vadd.f32 %v3395_v52, %v3139_v22  ;;  %v587_v46 = vld [vmem:[%s8278_s6 + $0x548] sm:$0xff]  ;;  %v76_v23 = vld [vmem:[%s8272_s0 + $0x30] sm:$0xff]  ;;  %977 = vmatprep.subr.bf16.mxu0 %v805_v12 }
 0x1a9   :  { %v2890_v32 = vld [vmem:[#allocation6 + $0x4c0] sm:$0xff]  ;;  %3898 = vst [vmem:[#allocation12 + $0x440] sm:$0xff] %v3642_v59  ;;  %v3659_v55 = vadd.f32 %v3403_v27, %v3147_v54  ;;  %v3138_v62 = vmul.f32 0.999, %v2882_v40  ;;  %v1101_v7 = vpack.c.bf16 %v587_v46, %v579_v19  ;;  %v2899_v56 = vld [vmem:[#allocation6 + $0x508] sm:$0xff]  ;;  %v6402_v48 = vld [vmem:[%s8273_s1 + $0x30] sm:$0xff] }
 0x1aa   :  { %v3146_v6 = vmul.f32 0.999, %v2890_v32  ;;  %1209 = vmatpush1.bf16.msra.mxu1 %v1092_v13  ;;  %v2907_v60 = vld [vmem:[#allocation6 + $0x548] sm:$0xff]  ;;  %v3411_v45 = vmul.f32 0.001, %v579_v19  ;;  %3907 = vst [vmem:[#allocation12 + $0x488] sm:$0xff] %v3651_v20  ;;  %v6433_v12 = vsub.f32 %v76_v23, %v6402_v48 }
 0x1ab   :  { %v3419_v43 = vmul.f32 0.001, %v587_v46  ;;  %3915 = vst [vmem:[#allocation12 + $0x4c8] sm:$0xff] %v3659_v55  ;;  %v3650_v11 = vadd.f32 %v3394_v1, %v3138_v62  ;;  %v3155_v14 = vmul.f32 0.999, %v2899_v56  ;;  %v578_v8 = vld [vmem:[%s8278_s6 + $0x500] sm:$0xff]  ;;  %1210 = vmatprep.subr.bf16.mxu1 %v1101_v7  ;;  %978 = vmatpush1.bf16.msra.mxu0 %v804_v16 }
 0x1ac   :  { %v3658_v41 = vadd.f32 %v3402_v37, %v3146_v6  ;;  %v3163_v4 = vmul.f32 0.999, %v2907_v60  ;;  %v586_v29 = vld [vmem:[%s8278_s6 + $0x540] sm:$0xff]  ;;  %v3410_v49 = vmul.f32 0.001, %v578_v8  ;;  %v595_v59 = vld [vmem:[%s8278_s6 + $0x588] sm:$0xff]  ;;  %979 = vmatprep.subr.bf16.mxu0 %v807_v44  ;;  %v136_v57 = vmul.f32 %v5011_v28, %v6433_v12 }
 0x1ad   :  { %v1100_v35 = vpack.c.bf16 %v586_v29, %v578_v8  ;;  %v2898_v33 = vld [vmem:[#allocation6 + $0x500] sm:$0xff]  ;;  %v3418_v51 = vmul.f32 0.001, %v586_v29  ;;  %3906 = vst [vmem:[#allocation12 + $0x480] sm:$0xff] %v3650_v11  ;;  %v3667_v38 = vadd.f32 %v3411_v45, %v3155_v14  ;;  %v603_v22 = vld [vmem:[%s8278_s6 + $0x5c8] sm:$0xff]  ;;  %8700 = vst [vmem:[#allocation31_spill] sm:$0xff] %v6433_v12 }
 0x1ae   :  { %v2906_v31 = vld [vmem:[#allocation6 + $0x540] sm:$0xff]  ;;  %3914 = vst [vmem:[#allocation12 + $0x4c0] sm:$0xff] %v3658_v41  ;;  %v3675_v52 = vadd.f32 %v3419_v43, %v3163_v4  ;;  %v3154_v27 = vmul.f32 0.999, %v2898_v33  ;;  %v1109_v63 = vpack.c.bf16 %v603_v22, %v595_v59  ;;  %v2915_v2 = vld [vmem:[#allocation6 + $0x588] sm:$0xff]  ;;  %v152_v36 = vadd.f32 %v136_v57, %v6402_v48 }
 0x1af   :  { %v3162_v15 = vmul.f32 0.999, %v2906_v31  ;;  %1211 = vmatpush1.bf16.msra.mxu1 %v1100_v35  ;;  %v2923_v54 = vld [vmem:[#allocation6 + $0x5c8] sm:$0xff]  ;;  %v3427_v25 = vmul.f32 0.001, %v595_v59  ;;  %3923 = vst [vmem:[#allocation12 + $0x508] sm:$0xff] %v3667_v38  ;;  %980 = vmatpush1.bf16.msra.mxu0 %v806_v47  ;;  %v812_v47 = vlaneseq }
 0x1b0   :  { %v3435_v53 = vmul.f32 0.001, %v603_v22  ;;  %3931 = vst [vmem:[#allocation12 + $0x548] sm:$0xff] %v3675_v52  ;;  %v3666_v13 = vadd.f32 %v3410_v49, %v3154_v27  ;;  %v3171_v32 = vmul.f32 0.999, %v2915_v2  ;;  %v594_v5 = vld [vmem:[%s8278_s6 + $0x580] sm:$0xff]  ;;  %1212 = vmatprep.subr.bf16.mxu1 %v1109_v63  ;;  %981 = vmatprep.subr.bf16.mxu0 %v809_v34  ;;  %v160_v27 = vadd.f32 %v144_v58, %v6383_v26 }
 0x1b1   :  { %v3674_v40 = vadd.f32 %v3418_v51, %v3162_v15  ;;  %v3179_v1 = vmul.f32 0.999, %v2923_v54  ;;  %v602_v9 = vld [vmem:[%s8278_s6 + $0x5c0] sm:$0xff]  ;;  %v3426_v55 = vmul.f32 0.001, %v594_v5  ;;  %v611_v56 = vld [vmem:[%s8278_s6 + $0x608] sm:$0xff] }
 0x1b2   :  { %v1108_v37 = vpack.c.bf16 %v602_v9, %v594_v5  ;;  %v2914_v42 = vld [vmem:[#allocation6 + $0x580] sm:$0xff]  ;;  %v3434_v62 = vmul.f32 0.001, %v602_v9  ;;  %3922 = vst [vmem:[#allocation12 + $0x500] sm:$0xff] %v3666_v13  ;;  %v3683_v6 = vadd.f32 %v3427_v25, %v3171_v32  ;;  %v619_v60 = vld [vmem:[%s8278_s6 + $0x648] sm:$0xff]  ;;  %v680_v24 = vpack.c.bf16 %v160_v27, %v152_v36 }
 0x1b3   :  { %v2922_v20 = vld [vmem:[#allocation6 + $0x5c0] sm:$0xff]  ;;  %3930 = vst [vmem:[#allocation12 + $0x540] sm:$0xff] %v3674_v40  ;;  %v3691_v19 = vadd.f32 %v3435_v53, %v3179_v1  ;;  %v3170_v46 = vmul.f32 0.999, %v2914_v42  ;;  %v1117_v61 = vpack.c.bf16 %v619_v60, %v611_v56  ;;  %v2931_v16 = vld [vmem:[#allocation6 + $0x608] sm:$0xff]  ;;  %982 = vmatpush1.bf16.msra.mxu0 %v808_v17  ;;  %v6467_v18 = vshrl.u32 %v812_v47, 7 }
 0x1b4   :  { %v3178_v7 = vmul.f32 0.999, %v2922_v20  ;;  %1213 = vmatpush1.bf16.msra.mxu1 %v1108_v37  ;;  %v2939_v45 = vld [vmem:[#allocation6 + $0x648] sm:$0xff]  ;;  %v3443_v43 = vmul.f32 0.001, %v611_v56  ;;  %3939 = vst [vmem:[#allocation12 + $0x588] sm:$0xff] %v3683_v6 }
 0x1b5   :  { %v3451_v23 = vmul.f32 0.001, %v619_v60  ;;  %3947 = vst [vmem:[#allocation12 + $0x5c8] sm:$0xff] %v3691_v19  ;;  %v3682_v11 = vadd.f32 %v3426_v55, %v3170_v46  ;;  %v3187_v14 = vmul.f32 0.999, %v2931_v16  ;;  %v610_v8 = vld [vmem:[%s8278_s6 + $0x600] sm:$0xff]  ;;  %1214 = vmatprep.subr.bf16.mxu1 %v1117_v61 }
 0x1b6   :  { %v3690_v41 = vadd.f32 %v3434_v62, %v3178_v7  ;;  %v3195_v4 = vmul.f32 0.999, %v2939_v45  ;;  %v618_v30 = vld [vmem:[%s8278_s6 + $0x640] sm:$0xff]  ;;  %v3442_v33 = vmul.f32 0.001, %v610_v8  ;;  %984 = vmatmul.mubr.bf16.vlgmr.msra.gmra.mrb[0].mxu0 %v680_v24  ;;  %8701 = vst [vmem:[#allocation33_spill] sm:$0xff] %v6467_v18 }
 0x1b7   :  { %v1116_v44 = vpack.c.bf16 %v618_v30, %v610_v8  ;;  %v2930_v29 = vld [vmem:[#allocation6 + $0x600] sm:$0xff]  ;;  %v3450_v31 = vmul.f32 0.001, %v618_v30  ;;  %3938 = vst [vmem:[#allocation12 + $0x580] sm:$0xff] %v3682_v11  ;;  %v3699_v49 = vadd.f32 %v3443_v43, %v3187_v14  ;;  %v627_v3 = vld [vmem:[%s8278_s6 + $0x688] sm:$0xff]  ;;  %v6482_v37 = vsub.s32 0, %v6467_v18 }
 0x1b8   :  { %v2938_v35 = vld [vmem:[#allocation6 + $0x640] sm:$0xff]  ;;  %3946 = vst [vmem:[#allocation12 + $0x5c0] sm:$0xff] %v3690_v41  ;;  %v3707_v51 = vadd.f32 %v3451_v23, %v3195_v4  ;;  %v3186_v38 = vmul.f32 0.999, %v2930_v29  ;;  %v635_v26 = vld [vmem:[%s8278_s6 + $0x6c8] sm:$0xff]  ;;  %v6485_v42 = vsub.s32 1, %v6467_v18 }
 0x1b9   :  { %v3194_v52 = vmul.f32 0.999, %v2938_v35  ;;  %1215 = vmatpush1.bf16.msra.mxu1 %v1116_v44  ;;  %3955 = vst [vmem:[#allocation12 + $0x608] sm:$0xff] %v3699_v49  ;;  %v2947_v34 = vld [vmem:[#allocation6 + $0x688] sm:$0xff]  ;;  %v1125_v48 = vpack.c.bf16 %v635_v26, %v627_v3  ;;  %v3459_v21 = vmul.f32 0.001, %v627_v3 }
 0x1ba   :  { %3963 = vst [vmem:[#allocation12 + $0x648] sm:$0xff] %v3707_v51  ;;  %v3698_v15 = vadd.f32 %v3442_v33, %v3186_v38  ;;  %v2955_v22 = vld [vmem:[#allocation6 + $0x6c8] sm:$0xff]  ;;  %v3203_v50 = vmul.f32 0.999, %v2947_v34  ;;  %v626_v17 = vld [vmem:[%s8278_s6 + $0x680] sm:$0xff]  ;;  %8702 = vst [vmem:[#allocation32_spill] sm:$0xff] %v6482_v37 }
 0x1bb   :  { %v3706_v59 = vadd.f32 %v3450_v31, %v3194_v52  ;;  %v3211_v0 = vmul.f32 0.999, %v2955_v22  ;;  %v3467_v63 = vmul.f32 0.001, %v635_v26  ;;  %v634_v2 = vld [vmem:[%s8278_s6 + $0x6c0] sm:$0xff]  ;;  %1216 = vmatprep.subr.bf16.mxu1 %v1125_v48  ;;  %8703 = vst [vmem:[#allocation52_spill] sm:$0xff] %v6485_v42 }
 0x1bc   :  { %3954 = vst [vmem:[#allocation12 + $0x600] sm:$0xff] %v3698_v15  ;;  %v2946_v54 = vld [vmem:[#allocation6 + $0x680] sm:$0xff]  ;;  %v3715_v25 = vadd.f32 %v3459_v21, %v3203_v50  ;;  %v1124_v53 = vpack.c.bf16 %v634_v2, %v626_v17  ;;  %v3458_v32 = vmul.f32 0.001, %v626_v17  ;;  %v3466_v9 = vmul.f32 0.001, %v634_v2 }
 0x1bd   :  { %3962 = vst [vmem:[#allocation12 + $0x640] sm:$0xff] %v3706_v59  ;;  %v2954_v13 = vld [vmem:[#allocation6 + $0x6c0] sm:$0xff]  ;;  %v3202_v40 = vmul.f32 0.999, %v2946_v54  ;;  %v3723_v1 = vadd.f32 %v3467_v63, %v3211_v0  ;;  %v643_v55 = vld [vmem:[%s8278_s6 + $0x708] sm:$0xff]  ;;  %v421_v22 = vld [vmem:[%s8278_s6 + $0x18] sm:$0xff] }
 0x1be   :  { %v3210_v5 = vmul.f32 0.999, %v2954_v13  ;;  %3971 = vst [vmem:[#allocation12 + $0x688] sm:$0xff] %v3715_v25  ;;  %1217 = vmatpush1.bf16.msra.mxu1 %v1124_v53  ;;  %v651_v62 = vld [vmem:[%s8278_s6 + $0x748] sm:$0xff]  ;;  %v3475_v60 = vmul.f32 0.001, %v643_v55 }
 0x1bf   :  { %v3714_v20 = vadd.f32 %v3458_v32, %v3202_v40  ;;  %v2963_v6 = vld [vmem:[#allocation6 + $0x708] sm:$0xff]  ;;  %3979 = vst [vmem:[#allocation12 + $0x6c8] sm:$0xff] %v3723_v1  ;;  %v1133_v46 = vpack.c.bf16 %v651_v62, %v643_v55  ;;  %v642_v58 = vld [vmem:[%s8278_s6 + $0x700] sm:$0xff]  ;;  %v3483_v16 = vmul.f32 0.001, %v651_v62  ;;  %v429_v0 = vld [vmem:[%s8278_s6 + $0x58] sm:$0xff] }
 0x1c0   :  { %v3722_v19 = vadd.f32 %v3466_v9, %v3210_v5  ;;  %v2971_v7 = vld [vmem:[#allocation6 + $0x748] sm:$0xff]  ;;  %v3219_v56 = vmul.f32 0.999, %v2963_v6  ;;  %v650_v45 = vld [vmem:[%s8278_s6 + $0x740] sm:$0xff]  ;;  %v3474_v4 = vmul.f32 0.001, %v642_v58  ;;  %v1023_v54 = vpack.c.bf16 %v429_v0, %v421_v22 }
 0x1c1   :  { %3970 = vst [vmem:[#allocation12 + $0x680] sm:$0xff] %v3714_v20  ;;  %v3227_v61 = vmul.f32 0.999, %v2971_v7  ;;  %v2962_v43 = vld [vmem:[#allocation6 + $0x700] sm:$0xff]  ;;  %1218 = vmatprep.subr.bf16.mxu1 %v1133_v46  ;;  %v1132_v11 = vpack.c.bf16 %v650_v45, %v642_v58  ;;  %v659_v8 = vld [vmem:[%s8278_s6 + $0x788] sm:$0xff]  ;;  %v2741_v63 = vld [vmem:[#allocation6 + $0x18] sm:$0xff] }
 0x1c2   :  { %3978 = vst [vmem:[#allocation12 + $0x6c0] sm:$0xff] %v3722_v19  ;;  %v3731_v23 = vadd.f32 %v3475_v60, %v3219_v56  ;;  %v2970_v41 = vld [vmem:[#allocation6 + $0x740] sm:$0xff]  ;;  %v3218_v14 = vmul.f32 0.999, %v2962_v43  ;;  %v3482_v44 = vmul.f32 0.001, %v650_v45 }
 0x1c3   :  { %v3739_v30 = vadd.f32 %v3483_v16, %v3227_v61  ;;  %v3226_v57 = vmul.f32 0.999, %v2970_v41  ;;  %v667_v29 = vld [vmem:[%s8278_s6 + $0x7c8] sm:$0xff]  ;;  %1219 = vmatpush1.bf16.msra.mxu1 %v1132_v11  ;;  %v3491_v38 = vmul.f32 0.001, %v659_v8  ;;  %v658_v52 = vld [vmem:[%s8278_s6 + $0x780] sm:$0xff] }
 0x1c4   :  { %v2979_v35 = vld [vmem:[#allocation6 + $0x788] sm:$0xff]  ;;  %3987 = vst [vmem:[#allocation12 + $0x708] sm:$0xff] %v3731_v23  ;;  %v3730_v33 = vadd.f32 %v3474_v4, %v3218_v14  ;;  %v1141_v31 = vpack.c.bf16 %v667_v29, %v659_v8  ;;  %v3499_v59 = vmul.f32 0.001, %v667_v29  ;;  %v666_v36 = vld [vmem:[%s8278_s6 + $0x7c0] sm:$0xff]  ;;  %v2749_v25 = vld [vmem:[#allocation6 + $0x58] sm:$0xff] }
 0x1c5   :  { %v2987_v49 = vld [vmem:[#allocation6 + $0x7c8] sm:$0xff]  ;;  %v3235_v51 = vmul.f32 0.999, %v2979_v35  ;;  %3995 = vst [vmem:[#allocation12 + $0x748] sm:$0xff] %v3739_v30  ;;  %v3738_v27 = vadd.f32 %v3482_v44, %v3226_v57  ;;  %v2978_v24 = vld [vmem:[#allocation6 + $0x780] sm:$0xff]  ;;  %v1140_v3 = vpack.c.bf16 %v666_v36, %v658_v52  ;;  %v6520_v40 = vld [vmem:[%s8278_s6 + $0x10] sm:$0xff] }
 0x1c6   :  { %v3243_v15 = vmul.f32 0.999, %v2987_v49  ;;  %3986 = vst [vmem:[#allocation12 + $0x700] sm:$0xff] %v3730_v33  ;;  %1220 = vmatprep.subr.bf16.mxu1 %v1141_v31  ;;  %v2986_v26 = vld [vmem:[#allocation6 + $0x7c0] sm:$0xff]  ;;  %v3234_v34 = vmul.f32 0.999, %v2978_v24 }
 0x1c7   :  { %v3747_v47 = vadd.f32 %v3491_v38, %v3235_v51  ;;  %v3490_v48 = vmul.f32 0.001, %v658_v52  ;;  %3994 = vst [vmem:[#allocation12 + $0x740] sm:$0xff] %v3738_v27  ;;  %v3242_v21 = vmul.f32 0.999, %v2986_v26  ;;  %1221 = vmatpush1.bf16.msra.mxu1 %v1140_v3  ;;  %v6525_v9 = vld [vmem:[%s8278_s6 + $0x50] sm:$0xff] }
 0x1c8   :  { %v3755_v50 = vadd.f32 %v3499_v59, %v3243_v15  ;;  %v3498_v17 = vmul.f32 0.001, %v666_v36  ;;  %v2997_v53 = vmul.f32 0.999, %v2741_v63  ;;  %v3253_v13 = vmul.f32 0.001, %v421_v22  ;;  %1233 = vmatprep.subr.bf16.mxu1 %v1023_v54 }
 0x1c9   :  { %4003 = vst [vmem:[#allocation12 + $0x788] sm:$0xff] %v3747_v47  ;;  %v3746_v2 = vadd.f32 %v3490_v48, %v3234_v34  ;;  %v3005_v1 = vmul.f32 0.999, %v2749_v25  ;;  %v3261_v5 = vmul.f32 0.001, %v429_v0  ;;  %v2740_v20 = vld [vmem:[#allocation6 + $0x10] sm:$0xff] }
 0x1ca   :  { %4011 = vst [vmem:[#allocation12 + $0x7c8] sm:$0xff] %v3755_v50  ;;  %v3754_v32 = vadd.f32 %v3498_v17, %v3242_v21  ;;  %v3509_v55 = vadd.f32 %v3253_v13, %v2997_v53  ;;  %v2748_v6 = vld [vmem:[#allocation6 + $0x50] sm:$0xff]  ;;  %v2996_v19 = vmul.f32 0.999, %v2740_v20  ;;  %v3252_v46 = vmul.f32 0.001, %v6520_v40 }
 0x1cb   :  { %4002 = vst [vmem:[#allocation12 + $0x780] sm:$0xff] %v3746_v2  ;;  %v6533_v7 = vld [vmem:[%s8278_s6 + $0x98] sm:$0xff]  ;;  %v3517_v56 = vadd.f32 %v3261_v5, %v3005_v1  ;;  %v3004_v60 = vmul.f32 0.999, %v2748_v6  ;;  %v3260_v58 = vmul.f32 0.001, %v6525_v9 }
 0x1cc   :  { %4010 = vst [vmem:[#allocation12 + $0x7c0] sm:$0xff] %v3754_v32  ;;  %v6539_v61 = vld [vmem:[%s8278_s6 + $0xd8] sm:$0xff]  ;;  %3765 = vst [vmem:[#allocation12 + $0x18] sm:$0xff] %v3509_v55  ;;  %v3508_v45 = vadd.f32 %v3252_v46, %v2996_v19  ;;  %v3269_v41 = vmul.f32 0.001, %v6533_v7  ;;  %v6547_v14 = vld [vmem:[%s8278_s6 + $0x90] sm:$0xff] }
 0x1cd   :  { %v2757_v16 = vld [vmem:[#allocation6 + $0x98] sm:$0xff]  ;;  %3773 = vst [vmem:[#allocation12 + $0x58] sm:$0xff] %v3517_v56  ;;  %v3516_v4 = vadd.f32 %v3260_v58, %v3004_v60  ;;  %v3277_v30 = vmul.f32 0.001, %v6539_v61  ;;  %v6553_v57 = vld [vmem:[%s8278_s6 + $0xd0] sm:$0xff] }
 0x1ce   :  { %v2765_v23 = vld [vmem:[#allocation6 + $0xd8] sm:$0xff]  ;;  %v3013_v11 = vmul.f32 0.999, %v2757_v16  ;;  %v2756_v44 = vld [vmem:[#allocation6 + $0x90] sm:$0xff]  ;;  %3764 = vst [vmem:[#allocation12 + $0x10] sm:$0xff] %v3508_v45 }
 0x1cf   :  { %v3021_v8 = vmul.f32 0.999, %v2765_v23  ;;  %v2764_v33 = vld [vmem:[#allocation6 + $0xd0] sm:$0xff]  ;;  %v3012_v31 = vmul.f32 0.999, %v2756_v44  ;;  %v6561_v51 = vld [vmem:[%s8278_s6 + $0x118] sm:$0xff] }
 0x1d0   :  { %v3525_v29 = vadd.f32 %v3269_v41, %v3013_v11  ;;  %v3268_v49 = vmul.f32 0.001, %v6547_v14  ;;  %3772 = vst [vmem:[#allocation12 + $0x50] sm:$0xff] %v3516_v4  ;;  %v3020_v52 = vmul.f32 0.999, %v2764_v33  ;;  %v6567_v15 = vld [vmem:[%s8278_s6 + $0x158] sm:$0xff] }
 0x1d1   :  { %v3533_v38 = vadd.f32 %v3277_v30, %v3021_v8  ;;  %v3276_v27 = vmul.f32 0.001, %v6553_v57  ;;  %v2773_v59 = vld [vmem:[#allocation6 + $0x118] sm:$0xff]  ;;  %v3285_v26 = vmul.f32 0.001, %v6561_v51  ;;  %v6575_v34 = vld [vmem:[%s8278_s6 + $0x110] sm:$0xff] }
 0x1d2   :  { %3781 = vst [vmem:[#allocation12 + $0x98] sm:$0xff] %v3525_v29  ;;  %v3524_v36 = vadd.f32 %v3268_v49, %v3012_v31  ;;  %v2781_v47 = vld [vmem:[#allocation6 + $0x158] sm:$0xff]  ;;  %v3029_v3 = vmul.f32 0.999, %v2773_v59  ;;  %v3293_v50 = vmul.f32 0.001, %v6567_v15 }
 0x1d3   :  { %3789 = vst [vmem:[#allocation12 + $0xd8] sm:$0xff] %v3533_v38  ;;  %v3532_v48 = vadd.f32 %v3276_v27, %v3020_v52  ;;  %v3037_v22 = vmul.f32 0.999, %v2781_v47  ;;  %v6581_v21 = vld [vmem:[%s8278_s6 + $0x150] sm:$0xff]  ;;  %v3284_v25 = vmul.f32 0.001, %v6575_v34 }
 0x1d4   :  { %v2772_v17 = vld [vmem:[#allocation6 + $0x110] sm:$0xff]  ;;  %3780 = vst [vmem:[#allocation12 + $0x90] sm:$0xff] %v3524_v36  ;;  %v3541_v0 = vadd.f32 %v3285_v26, %v3029_v3  ;;  %v6589_v53 = vld [vmem:[%s8278_s6 + $0x198] sm:$0xff]  ;;  %v3292_v1 = vmul.f32 0.001, %v6581_v21 }
 0x1d5   :  { %v2780_v2 = vld [vmem:[#allocation6 + $0x150] sm:$0xff]  ;;  %v3028_v54 = vmul.f32 0.999, %v2772_v17  ;;  %3788 = vst [vmem:[#allocation12 + $0xd0] sm:$0xff] %v3532_v48  ;;  %v3549_v13 = vadd.f32 %v3293_v50, %v3037_v22  ;;  %v6595_v5 = vld [vmem:[%s8278_s6 + $0x1d8] sm:$0xff] }
 0x1d6   :  { %v3036_v32 = vmul.f32 0.999, %v2780_v2  ;;  %v2789_v20 = vld [vmem:[#allocation6 + $0x198] sm:$0xff]  ;;  %3797 = vst [vmem:[#allocation12 + $0x118] sm:$0xff] %v3541_v0  ;;  %v3301_v56 = vmul.f32 0.001, %v6589_v53 }
 0x1d7   :  { %v3540_v55 = vadd.f32 %v3284_v25, %v3028_v54  ;;  %v2797_v19 = vld [vmem:[#allocation6 + $0x1d8] sm:$0xff]  ;;  %v3045_v46 = vmul.f32 0.999, %v2789_v20  ;;  %v6603_v60 = vld [vmem:[%s8278_s6 + $0x190] sm:$0xff]  ;;  %3805 = vst [vmem:[#allocation12 + $0x158] sm:$0xff] %v3549_v13 }
 0x1d8   :  { %v3548_v58 = vadd.f32 %v3292_v1, %v3036_v32  ;;  %v3053_v16 = vmul.f32 0.999, %v2797_v19  ;;  %v3309_v45 = vmul.f32 0.001, %v6595_v5  ;;  %v6609_v23 = vld [vmem:[%s8278_s6 + $0x1d0] sm:$0xff]  ;;  %v6617_v29 = vld [vmem:[%s8278_s6 + $0x218] sm:$0xff] }
 0x1d9   :  { %v2788_v11 = vld [vmem:[#allocation6 + $0x190] sm:$0xff]  ;;  %3796 = vst [vmem:[#allocation12 + $0x110] sm:$0xff] %v3540_v55  ;;  %v3557_v41 = vadd.f32 %v3301_v56, %v3045_v46  ;;  %v3300_v44 = vmul.f32 0.001, %v6603_v60  ;;  %v3308_v49 = vmul.f32 0.001, %v6609_v23 }
 0x1da   :  { %v2796_v8 = vld [vmem:[#allocation6 + $0x1d0] sm:$0xff]  ;;  %v3044_v30 = vmul.f32 0.999, %v2788_v11  ;;  %3804 = vst [vmem:[#allocation12 + $0x150] sm:$0xff] %v3548_v58  ;;  %v3565_v33 = vadd.f32 %v3309_v45, %v3053_v16  ;;  %v6623_v38 = vld [vmem:[%s8278_s6 + $0x258] sm:$0xff] }
 0x1db   :  { %v3052_v31 = vmul.f32 0.999, %v2796_v8  ;;  %v2805_v52 = vld [vmem:[#allocation6 + $0x218] sm:$0xff]  ;;  %3813 = vst [vmem:[#allocation12 + $0x198] sm:$0xff] %v3557_v41  ;;  %v3317_v3 = vmul.f32 0.001, %v6617_v29 }
 0x1dc   :  { %v3556_v27 = vadd.f32 %v3300_v44, %v3044_v30  ;;  %v2813_v36 = vld [vmem:[#allocation6 + $0x258] sm:$0xff]  ;;  %v3061_v47 = vmul.f32 0.999, %v2805_v52  ;;  %v6631_v26 = vld [vmem:[%s8278_s6 + $0x210] sm:$0xff]  ;;  %3821 = vst [vmem:[#allocation12 + $0x1d8] sm:$0xff] %v3565_v33 }
 0x1dd   :  { %v3564_v48 = vadd.f32 %v3308_v49, %v3052_v31  ;;  %v3069_v22 = vmul.f32 0.999, %v2813_v36  ;;  %v3325_v50 = vmul.f32 0.001, %v6623_v38  ;;  %v6637_v17 = vld [vmem:[%s8278_s6 + $0x250] sm:$0xff]  ;;  %v6645_v1 = vld [vmem:[%s8278_s6 + $0x298] sm:$0xff] }
 0x1de   :  { %v2804_v0 = vld [vmem:[#allocation6 + $0x210] sm:$0xff]  ;;  %3812 = vst [vmem:[#allocation12 + $0x190] sm:$0xff] %v3556_v27  ;;  %v3573_v2 = vadd.f32 %v3317_v3, %v3061_v47  ;;  %v3316_v32 = vmul.f32 0.001, %v6631_v26  ;;  %v3324_v19 = vmul.f32 0.001, %v6637_v17 }
 0x1df   :  { %v2812_v25 = vld [vmem:[#allocation6 + $0x250] sm:$0xff]  ;;  %v3060_v13 = vmul.f32 0.999, %v2804_v0  ;;  %3820 = vst [vmem:[#allocation12 + $0x1d0] sm:$0xff] %v3564_v48  ;;  %v3581_v20 = vadd.f32 %v3325_v50, %v3069_v22  ;;  %v6651_v46 = vld [vmem:[%s8278_s6 + $0x2d8] sm:$0xff] }
 0x1e0   :  { %v3068_v55 = vmul.f32 0.999, %v2812_v25  ;;  %v2821_v56 = vld [vmem:[#allocation6 + $0x298] sm:$0xff]  ;;  %3829 = vst [vmem:[#allocation12 + $0x218] sm:$0xff] %v3573_v2  ;;  %v3333_v41 = vmul.f32 0.001, %v6645_v1 }
 0x1e1   :  { %v3572_v58 = vadd.f32 %v3316_v32, %v3060_v13  ;;  %v2829_v45 = vld [vmem:[#allocation6 + $0x2d8] sm:$0xff]  ;;  %v3077_v11 = vmul.f32 0.999, %v2821_v56  ;;  %v6659_v8 = vld [vmem:[%s8278_s6 + $0x290] sm:$0xff]  ;;  %3837 = vst [vmem:[#allocation12 + $0x258] sm:$0xff] %v3581_v20 }
 0x1e2   :  { %v3580_v30 = vadd.f32 %v3324_v19, %v3068_v55  ;;  %v3085_v44 = vmul.f32 0.999, %v2829_v45  ;;  %v3341_v33 = vmul.f32 0.001, %v6651_v46  ;;  %v6665_v31 = vld [vmem:[%s8278_s6 + $0x2d0] sm:$0xff]  ;;  %v6673_v48 = vld [vmem:[%s8278_s6 + $0x318] sm:$0xff] }
 0x1e3   :  { %v2820_v49 = vld [vmem:[#allocation6 + $0x290] sm:$0xff]  ;;  %3828 = vst [vmem:[#allocation12 + $0x210] sm:$0xff] %v3572_v58  ;;  %v3589_v52 = vadd.f32 %v3333_v41, %v3077_v11  ;;  %v3332_v3 = vmul.f32 0.001, %v6659_v8  ;;  %v3340_v0 = vmul.f32 0.001, %v6665_v31 }
 0x1e4   :  { %v2828_v36 = vld [vmem:[#allocation6 + $0x2d0] sm:$0xff]  ;;  %v3076_v47 = vmul.f32 0.999, %v2820_v49  ;;  %3836 = vst [vmem:[#allocation12 + $0x250] sm:$0xff] %v3580_v30  ;;  %v3597_v22 = vadd.f32 %v3341_v33, %v3085_v44  ;;  %v6679_v2 = vld [vmem:[%s8278_s6 + $0x358] sm:$0xff] }
 0x1e5   :  { %v3084_v50 = vmul.f32 0.999, %v2828_v36  ;;  %v2837_v25 = vld [vmem:[#allocation6 + $0x318] sm:$0xff]  ;;  %3845 = vst [vmem:[#allocation12 + $0x298] sm:$0xff] %v3589_v52  ;;  %v3349_v19 = vmul.f32 0.001, %v6673_v48 }
 0x1e6   :  { %v3588_v13 = vadd.f32 %v3332_v3, %v3076_v47  ;;  %v2845_v20 = vld [vmem:[#allocation6 + $0x358] sm:$0xff]  ;;  %v3093_v55 = vmul.f32 0.999, %v2837_v25  ;;  %v6687_v56 = vld [vmem:[%s8278_s6 + $0x310] sm:$0xff]  ;;  %3853 = vst [vmem:[#allocation12 + $0x2d8] sm:$0xff] %v3597_v22 }
 0x1e7   :  { %v3596_v58 = vadd.f32 %v3340_v0, %v3084_v50  ;;  %v3101_v45 = vmul.f32 0.999, %v2845_v20  ;;  %v3357_v11 = vmul.f32 0.001, %v6679_v2  ;;  %v6693_v41 = vld [vmem:[%s8278_s6 + $0x350] sm:$0xff]  ;;  %v6701_v47 = vld [vmem:[%s8278_s6 + $0x398] sm:$0xff] }
 0x1e8   :  { %v2836_v30 = vld [vmem:[#allocation6 + $0x310] sm:$0xff]  ;;  %3844 = vst [vmem:[#allocation12 + $0x290] sm:$0xff] %v3588_v13  ;;  %v3605_v44 = vadd.f32 %v3349_v19, %v3093_v55  ;;  %v3348_v36 = vmul.f32 0.001, %v6687_v56  ;;  %v3356_v50 = vmul.f32 0.001, %v6693_v41 }
 0x1e9   :  { %v2844_v49 = vld [vmem:[#allocation6 + $0x350] sm:$0xff]  ;;  %v3092_v52 = vmul.f32 0.999, %v2836_v30  ;;  %3852 = vst [vmem:[#allocation12 + $0x2d0] sm:$0xff] %v3596_v58  ;;  %v3613_v3 = vadd.f32 %v3357_v11, %v3101_v45  ;;  %v6707_v0 = vld [vmem:[%s8278_s6 + $0x3d8] sm:$0xff] }
 0x1ea   :  { %v3100_v22 = vmul.f32 0.999, %v2844_v49  ;;  %v2853_v25 = vld [vmem:[#allocation6 + $0x398] sm:$0xff]  ;;  %3861 = vst [vmem:[#allocation12 + $0x318] sm:$0xff] %v3605_v44  ;;  %v3365_v30 = vmul.f32 0.001, %v6701_v47 }
 0x1eb   :  { %v3604_v13 = vadd.f32 %v3348_v36, %v3092_v52  ;;  %v2861_v55 = vld [vmem:[#allocation6 + $0x3d8] sm:$0xff]  ;;  %v3109_v19 = vmul.f32 0.999, %v2853_v25  ;;  %v6715_v58 = vld [vmem:[%s8278_s6 + $0x390] sm:$0xff]  ;;  %3869 = vst [vmem:[#allocation12 + $0x358] sm:$0xff] %v3613_v3 }
 0x1ec   :  { %v3612_v45 = vadd.f32 %v3356_v50, %v3100_v22  ;;  %v3117_v11 = vmul.f32 0.999, %v2861_v55  ;;  %v3373_v49 = vmul.f32 0.001, %v6707_v0  ;;  %v6721_v44 = vld [vmem:[%s8278_s6 + $0x3d0] sm:$0xff]  ;;  %v6729_v3 = vld [vmem:[%s8278_s6 + $0x418] sm:$0xff] }
 0x1ed   :  { %v2852_v52 = vld [vmem:[#allocation6 + $0x390] sm:$0xff]  ;;  %3860 = vst [vmem:[#allocation12 + $0x310] sm:$0xff] %v3604_v13  ;;  %v3621_v36 = vadd.f32 %v3365_v30, %v3109_v19  ;;  %v3364_v32 = vmul.f32 0.001, %v6715_v58  ;;  %v3372_v55 = vmul.f32 0.001, %v6721_v44 }
 0x1ee   :  { %v2860_v20 = vld [vmem:[#allocation6 + $0x3d0] sm:$0xff]  ;;  %v3108_v33 = vmul.f32 0.999, %v2852_v52  ;;  %3868 = vst [vmem:[#allocation12 + $0x350] sm:$0xff] %v3612_v45  ;;  %v3629_v22 = vadd.f32 %v3373_v49, %v3117_v11  ;;  %v6735_v13 = vld [vmem:[%s8278_s6 + $0x458] sm:$0xff] }
 0x1ef   :  { %v3116_v50 = vmul.f32 0.999, %v2860_v20  ;;  %v2869_v19 = vld [vmem:[#allocation6 + $0x418] sm:$0xff]  ;;  %3877 = vst [vmem:[#allocation12 + $0x398] sm:$0xff] %v3621_v36  ;;  %v3381_v16 = vmul.f32 0.001, %v6729_v3 }
 0x1f0   :  { %v3620_v30 = vadd.f32 %v3364_v32, %v3108_v33  ;;  %v2877_v25 = vld [vmem:[#allocation6 + $0x458] sm:$0xff]  ;;  %v3125_v27 = vmul.f32 0.999, %v2869_v19  ;;  %v6743_v20 = vld [vmem:[%s8278_s6 + $0x410] sm:$0xff]  ;;  %3885 = vst [vmem:[#allocation12 + $0x3d8] sm:$0xff] %v3629_v22 }
 0x1f1   :  { %v3628_v45 = vadd.f32 %v3372_v55, %v3116_v50  ;;  %v3133_v11 = vmul.f32 0.999, %v2877_v25  ;;  %v3389_v49 = vmul.f32 0.001, %v6735_v13  ;;  %v6749_v32 = vld [vmem:[%s8278_s6 + $0x450] sm:$0xff]  ;;  %v6757_v25 = vld [vmem:[%s8278_s6 + $0x498] sm:$0xff] }
 0x1f2   :  { %v2868_v33 = vld [vmem:[#allocation6 + $0x410] sm:$0xff]  ;;  %3876 = vst [vmem:[#allocation12 + $0x390] sm:$0xff] %v3620_v30  ;;  %v3637_v36 = vadd.f32 %v3381_v16, %v3125_v27  ;;  %v3380_v59 = vmul.f32 0.001, %v6743_v20  ;;  %8704 = vst [vmem:[#allocation36_spill] sm:$0xff] %v6757_v25  ;;  %v6763_v16 = vld [vmem:[%s8278_s6 + $0x4d8] sm:$0xff] }
 0x1f3   :  { %v2876_v52 = vld [vmem:[#allocation6 + $0x450] sm:$0xff]  ;;  %v3124_v54 = vmul.f32 0.999, %v2868_v33  ;;  %3884 = vst [vmem:[#allocation12 + $0x3d0] sm:$0xff] %v3628_v45  ;;  %v3645_v22 = vadd.f32 %v3389_v49, %v3133_v11  ;;  %v3388_v55 = vmul.f32 0.001, %v6749_v32 }
 0x1f4   :  { %v3132_v50 = vmul.f32 0.999, %v2876_v52  ;;  %v2885_v27 = vld [vmem:[#allocation6 + $0x498] sm:$0xff]  ;;  %3893 = vst [vmem:[#allocation12 + $0x418] sm:$0xff] %v3637_v36  ;;  %v3397_v6 = vmul.f32 0.001, %v6757_v25 }
 0x1f5   :  { %v3636_v30 = vadd.f32 %v3380_v59, %v3124_v54  ;;  %v2893_v19 = vld [vmem:[#allocation6 + $0x4d8] sm:$0xff]  ;;  %v3141_v4 = vmul.f32 0.999, %v2885_v27  ;;  %v6771_v52 = vld [vmem:[%s8278_s6 + $0x490] sm:$0xff]  ;;  %3901 = vst [vmem:[#allocation12 + $0x458] sm:$0xff] %v3645_v22 }
 0x1f6   :  { %8705 = vst [vmem:[#allocation34_spill] sm:$0xff] %v6771_v52  ;;  %v3644_v45 = vadd.f32 %v3388_v55, %v3132_v50  ;;  %v3149_v11 = vmul.f32 0.999, %v2893_v19  ;;  %v3405_v49 = vmul.f32 0.001, %v6763_v16  ;;  %v6777_v59 = vld [vmem:[%s8278_s6 + $0x4d0] sm:$0xff] }
 0x1f7   :  { %8706 = vst [vmem:[#allocation38_spill] sm:$0xff] %v6777_v59  ;;  %v2884_v54 = vld [vmem:[#allocation6 + $0x490] sm:$0xff]  ;;  %3892 = vst [vmem:[#allocation12 + $0x410] sm:$0xff] %v3636_v30  ;;  %v3653_v36 = vadd.f32 %v3397_v6, %v3141_v4  ;;  %v3396_v24 = vmul.f32 0.001, %v6771_v52  ;;  %v6785_v19 = vld [vmem:[%s8278_s6 + $0x518] sm:$0xff] }
 0x1f8   :  { %v2892_v33 = vld [vmem:[#allocation6 + $0x4d0] sm:$0xff]  ;;  %v3140_v63 = vmul.f32 0.999, %v2884_v54  ;;  %8707 = vst [vmem:[#allocation45_spill] sm:$0xff] %v6785_v19  ;;  %3900 = vst [vmem:[#allocation12 + $0x450] sm:$0xff] %v3644_v45  ;;  %v3661_v22 = vadd.f32 %v3405_v49, %v3149_v11  ;;  %v6791_v6 = vld [vmem:[%s8278_s6 + $0x558] sm:$0xff] }
 0x1f9   :  { %v3148_v50 = vmul.f32 0.999, %v2892_v33  ;;  %v3404_v55 = vmul.f32 0.001, %v6777_v59  ;;  %8708 = vst [vmem:[#allocation41_spill] sm:$0xff] %v6791_v6  ;;  %v2901_v4 = vld [vmem:[#allocation6 + $0x518] sm:$0xff] }
 0x1fa   :  { %3909 = vst [vmem:[#allocation12 + $0x498] sm:$0xff] %v3653_v36  ;;  %v3652_v30 = vadd.f32 %v3396_v24, %v3140_v63  ;;  %v2909_v27 = vld [vmem:[#allocation6 + $0x558] sm:$0xff]  ;;  %v3157_v35 = vmul.f32 0.999, %v2901_v4  ;;  %v3413_v43 = vmul.f32 0.001, %v6785_v19 }
 0x1fb   :  { %v6799_v33 = vld [vmem:[%s8278_s6 + $0x510] sm:$0xff]  ;;  %3917 = vst [vmem:[#allocation12 + $0x4d8] sm:$0xff] %v3661_v22  ;;  %v3660_v45 = vadd.f32 %v3404_v55, %v3148_v50  ;;  %v3165_v11 = vmul.f32 0.999, %v2909_v27  ;;  %v3421_v49 = vmul.f32 0.001, %v6791_v6 }
 0x1fc   :  { %8709 = vst [vmem:[#allocation39_spill] sm:$0xff] %v6799_v33  ;;  %v6805_v24 = vld [vmem:[%s8278_s6 + $0x550] sm:$0xff]  ;;  %3908 = vst [vmem:[#allocation12 + $0x490] sm:$0xff] %v3652_v30  ;;  %v3669_v36 = vadd.f32 %v3413_v43, %v3157_v35  ;;  %v3412_v39 = vmul.f32 0.001, %v6799_v33  ;;  %v6813_v27 = vld [vmem:[%s8278_s6 + $0x598] sm:$0xff] }
 0x1fd   :  { %8710 = vst [vmem:[#allocation44_spill] sm:$0xff] %v6805_v24  ;;  %v2900_v63 = vld [vmem:[#allocation6 + $0x510] sm:$0xff]  ;;  %8711 = vst [vmem:[#allocation42_spill] sm:$0xff] %v6813_v27  ;;  %v3677_v22 = vadd.f32 %v3421_v49, %v3165_v11  ;;  %v3420_v55 = vmul.f32 0.001, %v6805_v24  ;;  %v6819_v43 = vld [vmem:[%s8278_s6 + $0x5d8] sm:$0xff] }
 0x1fe   :  { %v2908_v54 = vld [vmem:[#allocation6 + $0x550] sm:$0xff]  ;;  %v3156_v62 = vmul.f32 0.999, %v2900_v63  ;;  %3916 = vst [vmem:[#allocation12 + $0x4d0] sm:$0xff] %v3660_v45  ;;  %8712 = vst [vmem:[#allocation46_spill] sm:$0xff] %v6819_v43  ;;  %v2917_v35 = vld [vmem:[#allocation6 + $0x598] sm:$0xff] }
 0x1ff   :  { %v3164_v50 = vmul.f32 0.999, %v2908_v54  ;;  %3925 = vst [vmem:[#allocation12 + $0x518] sm:$0xff] %v3669_v36  ;;  %v2925_v4 = vld [vmem:[#allocation6 + $0x5d8] sm:$0xff]  ;;  %v3173_v12 = vmul.f32 0.999, %v2917_v35 }
 0x200   :  { %v3668_v30 = vadd.f32 %v3412_v39, %v3156_v62  ;;  %v3429_v18 = vmul.f32 0.001, %v6813_v27  ;;  %v6827_v54 = vld [vmem:[%s8278_s6 + $0x590] sm:$0xff]  ;;  %3933 = vst [vmem:[#allocation12 + $0x558] sm:$0xff] %v3677_v22  ;;  %v3181_v11 = vmul.f32 0.999, %v2925_v4 }
 0x201   :  { %8713 = vst [vmem:[#allocation47_spill] sm:$0xff] %v6827_v54  ;;  %v3676_v45 = vadd.f32 %v3420_v55, %v3164_v50  ;;  %v3437_v49 = vmul.f32 0.001, %v6819_v43  ;;  %v6833_v39 = vld [vmem:[%s8278_s6 + $0x5d0] sm:$0xff]  ;;  %v3428_v33 = vmul.f32 0.001, %v6827_v54 }
 0x202   :  { %8714 = vst [vmem:[#allocation48_spill] sm:$0xff] %v6833_v39  ;;  %v2916_v62 = vld [vmem:[#allocation6 + $0x590] sm:$0xff]  ;;  %3924 = vst [vmem:[#allocation12 + $0x510] sm:$0xff] %v3668_v30  ;;  %v3685_v36 = vadd.f32 %v3429_v18, %v3173_v12  ;;  %v6841_v4 = vld [vmem:[%s8278_s6 + $0x618] sm:$0xff]  ;;  %v3436_v55 = vmul.f32 0.001, %v6833_v39 }
 0x203   :  { %v2924_v63 = vld [vmem:[#allocation6 + $0x5d0] sm:$0xff]  ;;  %v3172_v27 = vmul.f32 0.999, %v2916_v62  ;;  %8715 = vst [vmem:[#allocation49_spill] sm:$0xff] %v6841_v4  ;;  %3932 = vst [vmem:[#allocation12 + $0x550] sm:$0xff] %v3676_v45  ;;  %v3693_v22 = vadd.f32 %v3437_v49, %v3181_v11  ;;  %v6847_v12 = vld [vmem:[%s8278_s6 + $0x658] sm:$0xff] }
 0x204   :  { %v3180_v50 = vmul.f32 0.999, %v2924_v63  ;;  %8716 = vst [vmem:[#allocation50_spill] sm:$0xff] %v6847_v12  ;;  %v2933_v18 = vld [vmem:[#allocation6 + $0x618] sm:$0xff]  ;;  %3941 = vst [vmem:[#allocation12 + $0x598] sm:$0xff] %v3685_v36  ;;  %v6855_v63 = vld [vmem:[%s8278_s6 + $0x610] sm:$0xff] }
 0x205   :  { %v3684_v30 = vadd.f32 %v3428_v33, %v3172_v27  ;;  %v2941_v35 = vld [vmem:[#allocation6 + $0x658] sm:$0xff]  ;;  %v3189_v54 = vmul.f32 0.999, %v2933_v18  ;;  %v3445_v43 = vmul.f32 0.001, %v6841_v4  ;;  %8717 = vst [vmem:[#allocation51_spill] sm:$0xff] %v6855_v63 }
 0x206   :  { %3949 = vst [vmem:[#allocation12 + $0x5d8] sm:$0xff] %v3693_v22  ;;  %v3692_v45 = vadd.f32 %v3436_v55, %v3180_v50  ;;  %v3197_v11 = vmul.f32 0.999, %v2941_v35  ;;  %v3453_v49 = vmul.f32 0.001, %v6847_v12  ;;  %v6861_v33 = vld [vmem:[%s8278_s6 + $0x650] sm:$0xff] }
 0x207   :  { %8718 = vst [vmem:[#allocation19_spill] sm:$0xff] %v6861_v33  ;;  %v2932_v27 = vld [vmem:[#allocation6 + $0x610] sm:$0xff]  ;;  %3940 = vst [vmem:[#allocation12 + $0x590] sm:$0xff] %v3684_v30  ;;  %v3701_v36 = vadd.f32 %v3445_v43, %v3189_v54  ;;  %v3444_v39 = vmul.f32 0.001, %v6855_v63  ;;  %v6869_v35 = vld [vmem:[%s8278_s6 + $0x698] sm:$0xff] }
 0x208   :  { %v2940_v62 = vld [vmem:[#allocation6 + $0x650] sm:$0xff]  ;;  %v3188_v4 = vmul.f32 0.999, %v2932_v27  ;;  %8719 = vst [vmem:[#allocation18_spill] sm:$0xff] %v6869_v35  ;;  %3948 = vst [vmem:[#allocation12 + $0x5d0] sm:$0xff] %v3692_v45  ;;  %v3709_v22 = vadd.f32 %v3453_v49, %v3197_v11  ;;  %v6875_v43 = vld [vmem:[%s8278_s6 + $0x6d8] sm:$0xff] }
 0x209   :  { %v3196_v50 = vmul.f32 0.999, %v2940_v62  ;;  %v3452_v55 = vmul.f32 0.001, %v6861_v33  ;;  %8720 = vst [vmem:[#allocation21_spill] sm:$0xff] %v6875_v43  ;;  %v2949_v54 = vld [vmem:[#allocation6 + $0x698] sm:$0xff] }
 0x20a   :  { %3957 = vst [vmem:[#allocation12 + $0x618] sm:$0xff] %v3701_v36  ;;  %v3700_v30 = vadd.f32 %v3444_v39, %v3188_v4  ;;  %v2957_v18 = vld [vmem:[#allocation6 + $0x6d8] sm:$0xff]  ;;  %v3205_v63 = vmul.f32 0.999, %v2949_v54  ;;  %v3461_v12 = vmul.f32 0.001, %v6869_v35 }
 0x20b   :  { %v6883_v62 = vld [vmem:[%s8278_s6 + $0x690] sm:$0xff]  ;;  %3965 = vst [vmem:[#allocation12 + $0x658] sm:$0xff] %v3709_v22  ;;  %v3708_v45 = vadd.f32 %v3452_v55, %v3196_v50  ;;  %v3213_v11 = vmul.f32 0.999, %v2957_v18  ;;  %v3469_v49 = vmul.f32 0.001, %v6875_v43 }
 0x20c   :  { %8721 = vst [vmem:[#allocation20_spill] sm:$0xff] %v6883_v62  ;;  %v6889_v39 = vld [vmem:[%s8278_s6 + $0x6d0] sm:$0xff]  ;;  %3956 = vst [vmem:[#allocation12 + $0x610] sm:$0xff] %v3700_v30  ;;  %v3717_v36 = vadd.f32 %v3461_v12, %v3205_v63  ;;  %v3460_v33 = vmul.f32 0.001, %v6883_v62  ;;  %v6897_v18 = vld [vmem:[%s8278_s6 + $0x718] sm:$0xff] }
 0x20d   :  { %8722 = vst [vmem:[#allocation23_spill] sm:$0xff] %v6889_v39  ;;  %v2948_v4 = vld [vmem:[#allocation6 + $0x690] sm:$0xff]  ;;  %8723 = vst [vmem:[#allocation22_spill] sm:$0xff] %v6897_v18  ;;  %v3725_v22 = vadd.f32 %v3469_v49, %v3213_v11  ;;  %v3468_v55 = vmul.f32 0.001, %v6889_v39  ;;  %v6903_v12 = vld [vmem:[%s8278_s6 + $0x758] sm:$0xff] }
 0x20e   :  { %v2956_v27 = vld [vmem:[#allocation6 + $0x6d0] sm:$0xff]  ;;  %v3204_v35 = vmul.f32 0.999, %v2948_v4  ;;  %3964 = vst [vmem:[#allocation12 + $0x650] sm:$0xff] %v3708_v45  ;;  %8724 = vst [vmem:[#allocation25_spill] sm:$0xff] %v6903_v12  ;;  %v2965_v63 = vld [vmem:[#allocation6 + $0x718] sm:$0xff] }
 0x20f   :  { %v3212_v50 = vmul.f32 0.999, %v2956_v27  ;;  %3973 = vst [vmem:[#allocation12 + $0x698] sm:$0xff] %v3717_v36  ;;  %v2973_v54 = vld [vmem:[#allocation6 + $0x758] sm:$0xff]  ;;  %v3221_v62 = vmul.f32 0.999, %v2965_v63 }
 0x210   :  { %v3716_v30 = vadd.f32 %v3460_v33, %v3204_v35  ;;  %v3477_v43 = vmul.f32 0.001, %v6897_v18  ;;  %v6911_v27 = vld [vmem:[%s8278_s6 + $0x710] sm:$0xff]  ;;  %3981 = vst [vmem:[#allocation12 + $0x6d8] sm:$0xff] %v3725_v22  ;;  %v3229_v11 = vmul.f32 0.999, %v2973_v54 }
 0x211   :  { %8725 = vst [vmem:[#allocation24_spill] sm:$0xff] %v6911_v27  ;;  %v3724_v45 = vadd.f32 %v3468_v55, %v3212_v50  ;;  %v3485_v49 = vmul.f32 0.001, %v6903_v12  ;;  %v6917_v33 = vld [vmem:[%s8278_s6 + $0x750] sm:$0xff]  ;;  %v3476_v39 = vmul.f32 0.001, %v6911_v27 }
 0x212   :  { %8726 = vst [vmem:[#allocation26_spill] sm:$0xff] %v6917_v33  ;;  %v2964_v35 = vld [vmem:[#allocation6 + $0x710] sm:$0xff]  ;;  %3972 = vst [vmem:[#allocation12 + $0x690] sm:$0xff] %v3716_v30  ;;  %v3733_v36 = vadd.f32 %v3477_v43, %v3221_v62  ;;  %v6925_v54 = vld [vmem:[%s8278_s6 + $0x798] sm:$0xff]  ;;  %v3484_v55 = vmul.f32 0.001, %v6917_v33 }
 0x213   :  { %v2972_v4 = vld [vmem:[#allocation6 + $0x750] sm:$0xff]  ;;  %v3220_v18 = vmul.f32 0.999, %v2964_v35  ;;  %8727 = vst [vmem:[#allocation29_spill] sm:$0xff] %v6925_v54  ;;  %3980 = vst [vmem:[#allocation12 + $0x6d0] sm:$0xff] %v3724_v45  ;;  %v3741_v22 = vadd.f32 %v3485_v49, %v3229_v11  ;;  %v6931_v43 = vld [vmem:[%s8278_s6 + $0x7d8] sm:$0xff] }
 0x214   :  { %v3228_v50 = vmul.f32 0.999, %v2972_v4  ;;  %8728 = vst [vmem:[#allocation53_spill] sm:$0xff] %v6931_v43  ;;  %v2981_v62 = vld [vmem:[#allocation6 + $0x798] sm:$0xff]  ;;  %3989 = vst [vmem:[#allocation12 + $0x718] sm:$0xff] %v3733_v36  ;;  %v6939_v4 = vld [vmem:[%s8278_s6 + $0x790] sm:$0xff] }
 0x215   :  { %v3732_v30 = vadd.f32 %v3476_v39, %v3220_v18  ;;  %v2989_v63 = vld [vmem:[#allocation6 + $0x7d8] sm:$0xff]  ;;  %v3237_v27 = vmul.f32 0.999, %v2981_v62  ;;  %v3493_v12 = vmul.f32 0.001, %v6925_v54  ;;  %8729 = vst [vmem:[#allocation54_spill] sm:$0xff] %v6939_v4 }
 0x216   :  { %3997 = vst [vmem:[#allocation12 + $0x758] sm:$0xff] %v3741_v22  ;;  %v3740_v45 = vadd.f32 %v3484_v55, %v3228_v50  ;;  %v3245_v11 = vmul.f32 0.999, %v2989_v63  ;;  %v3501_v49 = vmul.f32 0.001, %v6931_v43  ;;  %v6945_v39 = vld [vmem:[%s8278_s6 + $0x7d0] sm:$0xff] }
 0x217   :  { %8730 = vst [vmem:[#allocation55_spill] sm:$0xff] %v6945_v39  ;;  %v2980_v18 = vld [vmem:[#allocation6 + $0x790] sm:$0xff]  ;;  %3988 = vst [vmem:[#allocation12 + $0x710] sm:$0xff] %v3732_v30  ;;  %v3749_v36 = vadd.f32 %v3493_v12, %v3237_v27  ;;  %v3492_v33 = vmul.f32 0.001, %v6939_v4  ;;  %v6953_v63 = vld [vmem:[%s8278_s6 + $0x28] sm:$0xff] }
 0x218   :  { %v2988_v35 = vld [vmem:[#allocation6 + $0x7d0] sm:$0xff]  ;;  %v3236_v54 = vmul.f32 0.999, %v2980_v18  ;;  %8731 = vst [vmem:[#allocation56_spill] sm:$0xff] %v6953_v63  ;;  %3996 = vst [vmem:[#allocation12 + $0x750] sm:$0xff] %v3740_v45  ;;  %v3757_v22 = vadd.f32 %v3501_v49, %v3245_v11  ;;  %v6959_v12 = vld [vmem:[%s8278_s6 + $0x68] sm:$0xff] }
 0x219   :  { %v3244_v50 = vmul.f32 0.999, %v2988_v35  ;;  %v3500_v55 = vmul.f32 0.001, %v6945_v39  ;;  %8732 = vst [vmem:[#allocation57_spill] sm:$0xff] %v6959_v12  ;;  %v2743_v27 = vld [vmem:[#allocation6 + $0x28] sm:$0xff] }
 0x21a   :  { %4005 = vst [vmem:[#allocation12 + $0x798] sm:$0xff] %v3749_v36  ;;  %v3748_v30 = vadd.f32 %v3492_v33, %v3236_v54  ;;  %v2751_v62 = vld [vmem:[#allocation6 + $0x68] sm:$0xff]  ;;  %v2999_v4 = vmul.f32 0.999, %v2743_v27  ;;  %v3255_v43 = vmul.f32 0.001, %v6953_v63 }
 0x21b   :  { %v6967_v35 = vld [vmem:[%s8278_s6 + $0x20] sm:$0xff]  ;;  %4013 = vst [vmem:[#allocation12 + $0x7d8] sm:$0xff] %v3757_v22  ;;  %v3756_v45 = vadd.f32 %v3500_v55, %v3244_v50  ;;  %v3007_v11 = vmul.f32 0.999, %v2751_v62  ;;  %v3263_v49 = vmul.f32 0.001, %v6959_v12 }
 0x21c   :  { %8733 = vst [vmem:[#allocation58_spill] sm:$0xff] %v6967_v35  ;;  %v6973_v33 = vld [vmem:[%s8278_s6 + $0x60] sm:$0xff]  ;;  %4004 = vst [vmem:[#allocation12 + $0x790] sm:$0xff] %v3748_v30  ;;  %v3511_v36 = vadd.f32 %v3255_v43, %v2999_v4  ;;  %v3254_v39 = vmul.f32 0.001, %v6967_v35  ;;  %v6981_v62 = vld [vmem:[%s8278_s6 + $0xa8] sm:$0xff] }
 0x21d   :  { %8734 = vst [vmem:[#allocation59_spill] sm:$0xff] %v6973_v33  ;;  %v2742_v54 = vld [vmem:[#allocation6 + $0x20] sm:$0xff]  ;;  %8735 = vst [vmem:[#allocation60_spill] sm:$0xff] %v6981_v62  ;;  %v3519_v22 = vadd.f32 %v3263_v49, %v3007_v11  ;;  %v3262_v55 = vmul.f32 0.001, %v6973_v33  ;;  %v6987_v43 = vld [vmem:[%s8278_s6 + $0xe8] sm:$0xff] }
 0x21e   :  { %v2750_v18 = vld [vmem:[#allocation6 + $0x60] sm:$0xff]  ;;  %v2998_v63 = vmul.f32 0.999, %v2742_v54  ;;  %4012 = vst [vmem:[#allocation12 + $0x7d0] sm:$0xff] %v3756_v45  ;;  %8736 = vst [vmem:[#allocation61_spill] sm:$0xff] %v6987_v43  ;;  %v2759_v4 = vld [vmem:[#allocation6 + $0xa8] sm:$0xff] }
 0x21f   :  { %v3006_v50 = vmul.f32 0.999, %v2750_v18  ;;  %3767 = vst [vmem:[#allocation12 + $0x28] sm:$0xff] %v3511_v36  ;;  %v2767_v27 = vld [vmem:[#allocation6 + $0xe8] sm:$0xff]  ;;  %v3015_v35 = vmul.f32 0.999, %v2759_v4 }
 0x220   :  { %v3510_v30 = vadd.f32 %v3254_v39, %v2998_v63  ;;  %v3271_v12 = vmul.f32 0.001, %v6981_v62  ;;  %v6995_v18 = vld [vmem:[%s8278_s6 + $0xa0] sm:$0xff]  ;;  %3775 = vst [vmem:[#allocation12 + $0x68] sm:$0xff] %v3519_v22  ;;  %v3023_v11 = vmul.f32 0.999, %v2767_v27 }
 0x221   :  { %8737 = vst [vmem:[#allocation62_spill] sm:$0xff] %v6995_v18  ;;  %v3518_v45 = vadd.f32 %v3262_v55, %v3006_v50  ;;  %v3279_v49 = vmul.f32 0.001, %v6987_v43  ;;  %v7001_v39 = vld [vmem:[%s8278_s6 + $0xe0] sm:$0xff]  ;;  %v3270_v33 = vmul.f32 0.001, %v6995_v18 }
 0x222   :  { %8738 = vst [vmem:[#allocation63_spill] sm:$0xff] %v7001_v39  ;;  %v2758_v63 = vld [vmem:[#allocation6 + $0xa0] sm:$0xff]  ;;  %3766 = vst [vmem:[#allocation12 + $0x20] sm:$0xff] %v3510_v30  ;;  %v3527_v36 = vadd.f32 %v3271_v12, %v3015_v35  ;;  %v7009_v27 = vld [vmem:[%s8278_s6 + $0x128] sm:$0xff]  ;;  %v3278_v55 = vmul.f32 0.001, %v7001_v39 }
 0x223   :  { %v2766_v54 = vld [vmem:[#allocation6 + $0xe0] sm:$0xff]  ;;  %v3014_v62 = vmul.f32 0.999, %v2758_v63  ;;  %8739 = vst [vmem:[#allocation64_spill] sm:$0xff] %v7009_v27  ;;  %3774 = vst [vmem:[#allocation12 + $0x60] sm:$0xff] %v3518_v45  ;;  %v3535_v22 = vadd.f32 %v3279_v49, %v3023_v11  ;;  %v7015_v12 = vld [vmem:[%s8278_s6 + $0x168] sm:$0xff] }
 0x224   :  { %v3022_v50 = vmul.f32 0.999, %v2766_v54  ;;  %8740 = vst [vmem:[#allocation65_spill] sm:$0xff] %v7015_v12  ;;  %v2775_v35 = vld [vmem:[#allocation6 + $0x128] sm:$0xff]  ;;  %3783 = vst [vmem:[#allocation12 + $0xa8] sm:$0xff] %v3527_v36  ;;  %v7023_v54 = vld [vmem:[%s8278_s6 + $0x120] sm:$0xff] }
 0x225   :  { %v3526_v30 = vadd.f32 %v3270_v33, %v3014_v62  ;;  %v2783_v4 = vld [vmem:[#allocation6 + $0x168] sm:$0xff]  ;;  %v3031_v18 = vmul.f32 0.999, %v2775_v35  ;;  %v3287_v43 = vmul.f32 0.001, %v7009_v27  ;;  %8741 = vst [vmem:[#allocation66_spill] sm:$0xff] %v7023_v54 }
 0x226   :  { %3791 = vst [vmem:[#allocation12 + $0xe8] sm:$0xff] %v3535_v22  ;;  %v3534_v45 = vadd.f32 %v3278_v55, %v3022_v50  ;;  %v3039_v11 = vmul.f32 0.999, %v2783_v4  ;;  %v3295_v49 = vmul.f32 0.001, %v7015_v12  ;;  %v7029_v33 = vld [vmem:[%s8278_s6 + $0x160] sm:$0xff] }
 0x227   :  { %8742 = vst [vmem:[#allocation67_spill] sm:$0xff] %v7029_v33  ;;  %v2774_v62 = vld [vmem:[#allocation6 + $0x120] sm:$0xff]  ;;  %3782 = vst [vmem:[#allocation12 + $0xa0] sm:$0xff] %v3526_v30  ;;  %v3543_v36 = vadd.f32 %v3287_v43, %v3031_v18  ;;  %v3286_v39 = vmul.f32 0.001, %v7023_v54  ;;  %v7037_v4 = vld [vmem:[%s8278_s6 + $0x1a8] sm:$0xff] }
 0x228   :  { %v2782_v63 = vld [vmem:[#allocation6 + $0x160] sm:$0xff]  ;;  %v3030_v27 = vmul.f32 0.999, %v2774_v62  ;;  %8743 = vst [vmem:[#allocation68_spill] sm:$0xff] %v7037_v4  ;;  %3790 = vst [vmem:[#allocation12 + $0xe0] sm:$0xff] %v3534_v45  ;;  %v3551_v22 = vadd.f32 %v3295_v49, %v3039_v11  ;;  %v7043_v43 = vld [vmem:[%s8278_s6 + $0x1e8] sm:$0xff] }
 0x229   :  { %v3038_v50 = vmul.f32 0.999, %v2782_v63  ;;  %v3294_v55 = vmul.f32 0.001, %v7029_v33  ;;  %8744 = vst [vmem:[#allocation69_spill] sm:$0xff] %v7043_v43  ;;  %v2791_v18 = vld [vmem:[#allocation6 + $0x1a8] sm:$0xff] }
 0x22a   :  { %3799 = vst [vmem:[#allocation12 + $0x128] sm:$0xff] %v3543_v36  ;;  %v3542_v30 = vadd.f32 %v3286_v39, %v3030_v27  ;;  %v2799_v35 = vld [vmem:[#allocation6 + $0x1e8] sm:$0xff]  ;;  %v3047_v54 = vmul.f32 0.999, %v2791_v18  ;;  %v3303_v12 = vmul.f32 0.001, %v7037_v4 }
 0x22b   :  { %v7051_v63 = vld [vmem:[%s8278_s6 + $0x1a0] sm:$0xff]  ;;  %3807 = vst [vmem:[#allocation12 + $0x168] sm:$0xff] %v3551_v22  ;;  %v3550_v45 = vadd.f32 %v3294_v55, %v3038_v50  ;;  %v3055_v11 = vmul.f32 0.999, %v2799_v35  ;;  %v3311_v49 = vmul.f32 0.001, %v7043_v43 }
 0x22c   :  { %8745 = vst [vmem:[#allocation70_spill] sm:$0xff] %v7051_v63  ;;  %v7057_v39 = vld [vmem:[%s8278_s6 + $0x1e0] sm:$0xff]  ;;  %3798 = vst [vmem:[#allocation12 + $0x120] sm:$0xff] %v3542_v30  ;;  %v3559_v36 = vadd.f32 %v3303_v12, %v3047_v54  ;;  %v3302_v33 = vmul.f32 0.001, %v7051_v63  ;;  %v7065_v35 = vld [vmem:[%s8278_s6 + $0x228] sm:$0xff] }
 0x22d   :  { %8746 = vst [vmem:[#allocation71_spill] sm:$0xff] %v7057_v39  ;;  %v2790_v27 = vld [vmem:[#allocation6 + $0x1a0] sm:$0xff]  ;;  %8747 = vst [vmem:[#allocation72_spill] sm:$0xff] %v7065_v35  ;;  %v3567_v22 = vadd.f32 %v3311_v49, %v3055_v11  ;;  %v3310_v55 = vmul.f32 0.001, %v7057_v39  ;;  %v7071_v12 = vld [vmem:[%s8278_s6 + $0x268] sm:$0xff] }
 0x22e   :  { %v2798_v62 = vld [vmem:[#allocation6 + $0x1e0] sm:$0xff]  ;;  %v3046_v4 = vmul.f32 0.999, %v2790_v27  ;;  %3806 = vst [vmem:[#allocation12 + $0x160] sm:$0xff] %v3550_v45  ;;  %8748 = vst [vmem:[#allocation73_spill] sm:$0xff] %v7071_v12  ;;  %v2807_v54 = vld [vmem:[#allocation6 + $0x228] sm:$0xff] }
 0x22f   :  { %v3054_v50 = vmul.f32 0.999, %v2798_v62  ;;  %3815 = vst [vmem:[#allocation12 + $0x1a8] sm:$0xff] %v3559_v36  ;;  %v2815_v18 = vld [vmem:[#allocation6 + $0x268] sm:$0xff]  ;;  %v3063_v63 = vmul.f32 0.999, %v2807_v54 }
 0x230   :  { %v3558_v30 = vadd.f32 %v3302_v33, %v3046_v4  ;;  %v3319_v43 = vmul.f32 0.001, %v7065_v35  ;;  %v7079_v62 = vld [vmem:[%s8278_s6 + $0x220] sm:$0xff]  ;;  %3823 = vst [vmem:[#allocation12 + $0x1e8] sm:$0xff] %v3567_v22  ;;  %v3071_v11 = vmul.f32 0.999, %v2815_v18 }
 0x231   :  { %8749 = vst [vmem:[#allocation74_spill] sm:$0xff] %v7079_v62  ;;  %v3566_v45 = vadd.f32 %v3310_v55, %v3054_v50  ;;  %v3327_v49 = vmul.f32 0.001, %v7071_v12  ;;  %v7085_v33 = vld [vmem:[%s8278_s6 + $0x260] sm:$0xff]  ;;  %v3318_v39 = vmul.f32 0.001, %v7079_v62 }
 0x232   :  { %8750 = vst [vmem:[#allocation75_spill] sm:$0xff] %v7085_v33  ;;  %v2806_v4 = vld [vmem:[#allocation6 + $0x220] sm:$0xff]  ;;  %3814 = vst [vmem:[#allocation12 + $0x1a0] sm:$0xff] %v3558_v30  ;;  %v3575_v36 = vadd.f32 %v3319_v43, %v3063_v63  ;;  %v7093_v18 = vld [vmem:[%s8278_s6 + $0x2a8] sm:$0xff]  ;;  %v3326_v55 = vmul.f32 0.001, %v7085_v33 }
 0x233   :  { %v2814_v27 = vld [vmem:[#allocation6 + $0x260] sm:$0xff]  ;;  %v3062_v35 = vmul.f32 0.999, %v2806_v4  ;;  %8751 = vst [vmem:[#allocation76_spill] sm:$0xff] %v7093_v18  ;;  %3822 = vst [vmem:[#allocation12 + $0x1e0] sm:$0xff] %v3566_v45  ;;  %v3583_v22 = vadd.f32 %v3327_v49, %v3071_v11  ;;  %v7099_v43 = vld [vmem:[%s8278_s6 + $0x2e8] sm:$0xff] }
 0x234   :  { %v3070_v50 = vmul.f32 0.999, %v2814_v27  ;;  %8752 = vst [vmem:[#allocation77_spill] sm:$0xff] %v7099_v43  ;;  %v2823_v63 = vld [vmem:[#allocation6 + $0x2a8] sm:$0xff]  ;;  %3831 = vst [vmem:[#allocation12 + $0x228] sm:$0xff] %v3575_v36  ;;  %v7107_v27 = vld [vmem:[%s8278_s6 + $0x2a0] sm:$0xff] }
 0x235   :  { %v3574_v30 = vadd.f32 %v3318_v39, %v3062_v35  ;;  %v2831_v54 = vld [vmem:[#allocation6 + $0x2e8] sm:$0xff]  ;;  %v3079_v62 = vmul.f32 0.999, %v2823_v63  ;;  %v3335_v12 = vmul.f32 0.001, %v7093_v18  ;;  %8753 = vst [vmem:[#allocation78_spill] sm:$0xff] %v7107_v27 }
 0x236   :  { %3839 = vst [vmem:[#allocation12 + $0x268] sm:$0xff] %v3583_v22  ;;  %v3582_v45 = vadd.f32 %v3326_v55, %v3070_v50  ;;  %v3087_v11 = vmul.f32 0.999, %v2831_v54  ;;  %v3343_v49 = vmul.f32 0.001, %v7099_v43  ;;  %v7113_v39 = vld [vmem:[%s8278_s6 + $0x2e0] sm:$0xff] }
 0x237   :  { %8754 = vst [vmem:[#allocation79_spill] sm:$0xff] %v7113_v39  ;;  %v2822_v35 = vld [vmem:[#allocation6 + $0x2a0] sm:$0xff]  ;;  %3830 = vst [vmem:[#allocation12 + $0x220] sm:$0xff] %v3574_v30  ;;  %v3591_v36 = vadd.f32 %v3335_v12, %v3079_v62  ;;  %v3334_v33 = vmul.f32 0.001, %v7107_v27  ;;  %v7121_v54 = vld [vmem:[%s8278_s6 + $0x328] sm:$0xff] }
 0x238   :  { %v2830_v4 = vld [vmem:[#allocation6 + $0x2e0] sm:$0xff]  ;;  %v3078_v18 = vmul.f32 0.999, %v2822_v35  ;;  %8755 = vst [vmem:[#allocation80_spill] sm:$0xff] %v7121_v54  ;;  %3838 = vst [vmem:[#allocation12 + $0x260] sm:$0xff] %v3582_v45  ;;  %v3599_v22 = vadd.f32 %v3343_v49, %v3087_v11  ;;  %v7127_v12 = vld [vmem:[%s8278_s6 + $0x368] sm:$0xff] }
 0x239   :  { %v3086_v50 = vmul.f32 0.999, %v2830_v4  ;;  %v3342_v55 = vmul.f32 0.001, %v7113_v39  ;;  %8756 = vst [vmem:[#allocation81_spill] sm:$0xff] %v7127_v12  ;;  %v2839_v62 = vld [vmem:[#allocation6 + $0x328] sm:$0xff] }
 0x23a   :  { %3847 = vst [vmem:[#allocation12 + $0x2a8] sm:$0xff] %v3591_v36  ;;  %v3590_v30 = vadd.f32 %v3334_v33, %v3078_v18  ;;  %v2847_v63 = vld [vmem:[#allocation6 + $0x368] sm:$0xff]  ;;  %v3095_v27 = vmul.f32 0.999, %v2839_v62  ;;  %v3351_v43 = vmul.f32 0.001, %v7121_v54 }
 0x23b   :  { %v7135_v4 = vld [vmem:[%s8278_s6 + $0x320] sm:$0xff]  ;;  %3855 = vst [vmem:[#allocation12 + $0x2e8] sm:$0xff] %v3599_v22  ;;  %v3598_v45 = vadd.f32 %v3342_v55, %v3086_v50  ;;  %v3103_v11 = vmul.f32 0.999, %v2847_v63  ;;  %v3359_v49 = vmul.f32 0.001, %v7127_v12 }
 0x23c   :  { %8757 = vst [vmem:[#allocation82_spill] sm:$0xff] %v7135_v4  ;;  %v7141_v33 = vld [vmem:[%s8278_s6 + $0x360] sm:$0xff]  ;;  %3846 = vst [vmem:[#allocation12 + $0x2a0] sm:$0xff] %v3590_v30  ;;  %v3607_v62 = vadd.f32 %v3351_v43, %v3095_v27  ;;  %v3350_v55 = vmul.f32 0.001, %v7135_v4  ;;  %v7154_v35 = vld [vmem:[%s8278_s6 + $0x3a8] sm:$0xff] }
 0x23d   :  { %8758 = vst [vmem:[#allocation83_spill] sm:$0xff] %v7141_v33  ;;  %v2838_v18 = vld [vmem:[#allocation6 + $0x320] sm:$0xff]  ;;  %8759 = vst [vmem:[#allocation84_spill] sm:$0xff] %v7154_v35  ;;  %v3615_v54 = vadd.f32 %v3359_v49, %v3103_v11  ;;  %v3358_v39 = vmul.f32 0.001, %v7141_v33  ;;  %v7160_v43 = vld [vmem:[%s8278_s6 + $0x3e8] sm:$0xff] }
 0x23e   :  { %v7146_v36 = vld [vmem:[%s8276_s4] sm:$0x3]  ;;  %v3094_v63 = vmul.f32 0.999, %v2838_v18  ;;  %3854 = vst [vmem:[#allocation12 + $0x2e0] sm:$0xff] %v3598_v45  ;;  %8760 = vst [vmem:[#allocation85_spill] sm:$0xff] %v7160_v43 }
 0x23f   :  { %v2846_v50 = vld [vmem:[#allocation6 + $0x360] sm:$0xff]  ;;  %v2855_v27 = vld [vmem:[#allocation6 + $0x3a8] sm:$0xff]  ;;  %3863 = vst [vmem:[#allocation12 + $0x328] sm:$0xff] %v3607_v62  ;;  %v3367_v49 = vmul.f32 0.001, %v7154_v35  ;;  %3871 = vst [vmem:[#allocation12 + $0x368] sm:$0xff] %v3615_v54  ;;  %v7189_v54 = vrot.slane %v7146_v36, %v6482_v37 }
 0x240   :  { %v3102_v12 = vmul.f32 0.999, %v2846_v50  ;;  %v994_v30 = vld [vmem:[%s8277_s5] sm:$0x3]  ;;  %v3606_v18 = vadd.f32 %v3350_v55, %v3094_v63  ;;  %v2863_v45 = vld [vmem:[#allocation6 + $0x3e8] sm:$0xff] }
 0x241   :  { %v3111_v11 = vmul.f32 0.999, %v2855_v27  ;;  %v7171_v50 = vld [vmem:[%s8278_s6 + $0x3a0] sm:$0xff]  ;;  %v3119_v33 = vmul.f32 0.999, %v2863_v45 }
 0x242   :  { %8761 = vst [vmem:[#allocation86_spill] sm:$0xff] %v7171_v50  ;;  %v3614_v4 = vadd.f32 %v3358_v39, %v3102_v12  ;;  %v3375_v24 = vmul.f32 0.001, %v7160_v43  ;;  %v7177_v62 = vld [vmem:[%s8278_s6 + $0x3e0] sm:$0xff]  ;;  %3862 = vst [vmem:[#allocation12 + $0x320] sm:$0xff] %v3606_v18  ;;  %v7185_v39 = vld [vmem:[%s8278_s6 + $0x428] sm:$0xff] }
 0x243   :  { %8762 = vst [vmem:[#allocation87_spill] sm:$0xff] %v7177_v62  ;;  %v2854_v63 = vld [vmem:[#allocation6 + $0x3a0] sm:$0xff]  ;;  %v3623_v55 = vadd.f32 %v3367_v49, %v3111_v11  ;;  %v3366_v19 = vmul.f32 0.001, %v7171_v50  ;;  %8763 = vst [vmem:[#allocation88_spill] sm:$0xff] %v7185_v39  ;;  %v7195_v11 = vld [vmem:[%s8278_s6 + $0x468] sm:$0xff] }
 0x244   :  { %v2862_v22 = vld [vmem:[#allocation6 + $0x3e0] sm:$0xff]  ;;  %v3110_v35 = vmul.f32 0.999, %v2854_v63  ;;  %3870 = vst [vmem:[#allocation12 + $0x360] sm:$0xff] %v3614_v4  ;;  %v3631_v12 = vadd.f32 %v3375_v24, %v3119_v33  ;;  %v3374_v45 = vmul.f32 0.001, %v7177_v62  ;;  %v999_v4 = vrot.slane %v994_v30, %v6482_v37 }
 0x245   :  { %v3118_v18 = vmul.f32 0.999, %v2862_v22  ;;  %8764 = vst [vmem:[#allocation89_spill] sm:$0xff] %v7195_v11  ;;  %v2871_v49 = vld [vmem:[#allocation6 + $0x428] sm:$0xff]  ;;  %3879 = vst [vmem:[#allocation12 + $0x3a8] sm:$0xff] %v3623_v55  ;;  %v7203_v24 = vld [vmem:[%s8278_s6 + $0x420] sm:$0xff] }
 0x246   :  { %v3622_v63 = vadd.f32 %v3366_v19, %v3110_v35  ;;  %v2879_v50 = vld [vmem:[#allocation6 + $0x468] sm:$0xff]  ;;  %v3127_v43 = vmul.f32 0.999, %v2871_v49  ;;  %v3383_v6 = vmul.f32 0.001, %v7185_v39  ;;  %8765 = vst [vmem:[#allocation90_spill] sm:$0xff] %v7203_v24 }
 0x247   :  { %3887 = vst [vmem:[#allocation12 + $0x3e8] sm:$0xff] %v3631_v12  ;;  %v3630_v33 = vadd.f32 %v3374_v45, %v3118_v18  ;;  %v3135_v22 = vmul.f32 0.999, %v2879_v50  ;;  %v3391_v55 = vmul.f32 0.001, %v7195_v11  ;;  %v7210_v19 = vld [vmem:[%s8278_s6 + $0x460] sm:$0xff]  ;;  %v7221_v12 = vrot.slane %v994_v30, %v6485_v42 }
 0x248   :  { %8766 = vst [vmem:[#allocation91_spill] sm:$0xff] %v7210_v19  ;;  %v2870_v35 = vld [vmem:[#allocation6 + $0x420] sm:$0xff]  ;;  %3878 = vst [vmem:[#allocation12 + $0x3a0] sm:$0xff] %v3622_v63  ;;  %v3639_v49 = vadd.f32 %v3383_v6, %v3127_v43  ;;  %v3382_v37 = vmul.f32 0.001, %v7203_v24  ;;  %v7218_v50 = vld [vmem:[%s8278_s6 + $0x4a8] sm:$0xff] }
 0x249   :  { %v2878_v39 = vld [vmem:[#allocation6 + $0x460] sm:$0xff]  ;;  %v3126_v62 = vmul.f32 0.999, %v2870_v35  ;;  %8767 = vst [vmem:[#allocation92_spill] sm:$0xff] %v7218_v50  ;;  %3886 = vst [vmem:[#allocation12 + $0x3e0] sm:$0xff] %v3630_v33  ;;  %v3647_v18 = vadd.f32 %v3391_v55, %v3135_v22  ;;  %v7227_v43 = vld [vmem:[%s8278_s6 + $0x4e8] sm:$0xff]  ;;  %v7238_v33 = vmul.f32 %v999_v4, %v5011_v28 }
 0x24a   :  { %v3134_v45 = vmul.f32 0.999, %v2878_v39  ;;  %v3390_v6 = vmul.f32 0.001, %v7210_v19  ;;  %8768 = vst [vmem:[#allocation93_spill] sm:$0xff] %v7227_v43  ;;  %v2887_v63 = vld [vmem:[#allocation6 + $0x4a8] sm:$0xff] }
 0x24b   :  { %3895 = vst [vmem:[#allocation12 + $0x428] sm:$0xff] %v3639_v49  ;;  %v3638_v35 = vadd.f32 %v3382_v37, %v3126_v62  ;;  %v2895_v24 = vld [vmem:[#allocation6 + $0x4e8] sm:$0xff]  ;;  %v3143_v11 = vmul.f32 0.999, %v2887_v63  ;;  %v3399_v30 = vmul.f32 0.001, %v7218_v50 }
 0x24c   :  { %v7235_v39 = vld [vmem:[%s8278_s6 + $0x4a0] sm:$0xff]  ;;  %3903 = vst [vmem:[#allocation12 + $0x468] sm:$0xff] %v3647_v18  ;;  %v3646_v22 = vadd.f32 %v3390_v6, %v3134_v45  ;;  %v3151_v55 = vmul.f32 0.999, %v2895_v24  ;;  %v3407_v37 = vmul.f32 0.001, %v7227_v43  ;;  %v7256_v18 = vmul.f32 %v7221_v12, %v5011_v28 }
 0x24d   :  { %8769 = vst [vmem:[#allocation94_spill] sm:$0xff] %v7235_v39  ;;  %v7244_v62 = vld [vmem:[%s8278_s6 + $0x4e0] sm:$0xff]  ;;  %3894 = vst [vmem:[#allocation12 + $0x420] sm:$0xff] %v3638_v35  ;;  %v3655_v63 = vadd.f32 %v3399_v30, %v3143_v11  ;;  %v3398_v52 = vmul.f32 0.001, %v7235_v39  ;;  %v7252_v24 = vld [vmem:[%s8278_s6 + $0x528] sm:$0xff] }
 0x24e   :  { %8770 = vst [vmem:[#allocation95_spill] sm:$0xff] %v7244_v62  ;;  %v2886_v49 = vld [vmem:[#allocation6 + $0x4a0] sm:$0xff]  ;;  %8771 = vst [vmem:[#allocation96_spill] sm:$0xff] %v7252_v24  ;;  %v3663_v45 = vadd.f32 %v3407_v37, %v3151_v55  ;;  %v3406_v11 = vmul.f32 0.001, %v7244_v62  ;;  %v7262_v35 = vld [vmem:[%s8278_s6 + $0x568] sm:$0xff] }
 0x24f   :  { %v2894_v50 = vld [vmem:[#allocation6 + $0x4e0] sm:$0xff]  ;;  %v3142_v19 = vmul.f32 0.999, %v2886_v49  ;;  %3902 = vst [vmem:[#allocation12 + $0x460] sm:$0xff] %v3646_v22  ;;  %8772 = vst [vmem:[#allocation97_spill] sm:$0xff] %v7262_v35  ;;  %v2903_v30 = vld [vmem:[#allocation6 + $0x528] sm:$0xff]  ;;  %v7273_v22 = vmul.f32 %v999_v4, %v8609_v10 }
 0x250   :  { %v3150_v6 = vmul.f32 0.999, %v2894_v50  ;;  %3911 = vst [vmem:[#allocation12 + $0x4a8] sm:$0xff] %v3655_v63  ;;  %v2911_v39 = vld [vmem:[#allocation6 + $0x568] sm:$0xff]  ;;  %v3159_v43 = vmul.f32 0.999, %v2903_v30 }
 0x251   :  { %v3654_v49 = vadd.f32 %v3398_v52, %v3142_v19  ;;  %v3415_v28 = vmul.f32 0.001, %v7252_v24  ;;  %v7270_v50 = vld [vmem:[%s8278_s6 + $0x520] sm:$0xff]  ;;  %3919 = vst [vmem:[#allocation12 + $0x4e8] sm:$0xff] %v3663_v45  ;;  %v3167_v37 = vmul.f32 0.999, %v2911_v39  ;;  %v819_v45 = vrot.slane %v7146_v36, %v6485_v42 }
 0x252   :  { %8773 = vst [vmem:[#allocation98_spill] sm:$0xff] %v7270_v50  ;;  %v3662_v55 = vadd.f32 %v3406_v11, %v3150_v6  ;;  %v3423_v52 = vmul.f32 0.001, %v7262_v35  ;;  %v7279_v19 = vld [vmem:[%s8278_s6 + $0x560] sm:$0xff]  ;;  %v3414_v4 = vmul.f32 0.001, %v7270_v50 }
 0x253   :  { %8774 = vst [vmem:[#allocation99_spill] sm:$0xff] %v7279_v19  ;;  %v2902_v63 = vld [vmem:[#allocation6 + $0x520] sm:$0xff]  ;;  %3910 = vst [vmem:[#allocation12 + $0x4a0] sm:$0xff] %v3654_v49  ;;  %v3671_v30 = vadd.f32 %v3415_v28, %v3159_v43  ;;  %v7287_v39 = vld [vmem:[%s8278_s6 + $0x5a8] sm:$0xff]  ;;  %v3422_v43 = vmul.f32 0.001, %v7279_v19 }
 0x254   :  { %v2910_v24 = vld [vmem:[#allocation6 + $0x560] sm:$0xff]  ;;  %v3158_v62 = vmul.f32 0.999, %v2902_v63  ;;  %8775 = vst [vmem:[#allocation100_spill] sm:$0xff] %v7287_v39  ;;  %3918 = vst [vmem:[#allocation12 + $0x4e0] sm:$0xff] %v3662_v55  ;;  %v3679_v6 = vadd.f32 %v3423_v52, %v3167_v37  ;;  %v7295_v49 = vld [vmem:[%s8278_s6 + $0x5e8] sm:$0xff]  ;;  %v1009_v37 = vmul.f32 %v7221_v12, %v8609_v10 }
 0x255   :  { %v3166_v11 = vmul.f32 0.999, %v2910_v24  ;;  %8776 = vst [vmem:[#allocation101_spill] sm:$0xff] %v7295_v49  ;;  %v2919_v28 = vld [vmem:[#allocation6 + $0x5a8] sm:$0xff]  ;;  %3927 = vst [vmem:[#allocation12 + $0x528] sm:$0xff] %v3671_v30  ;;  %v7303_v24 = vld [vmem:[%s8278_s6 + $0x5a0] sm:$0xff] }
 0x256   :  { %v3670_v63 = vadd.f32 %v3414_v4, %v3158_v62  ;;  %v2927_v50 = vld [vmem:[#allocation6 + $0x5e8] sm:$0xff]  ;;  %v3175_v35 = vmul.f32 0.999, %v2919_v28  ;;  %v3431_v36 = vmul.f32 0.001, %v7287_v39  ;;  %8777 = vst [vmem:[#allocation102_spill] sm:$0xff] %v7303_v24 }
 0x257   :  { %3935 = vst [vmem:[#allocation12 + $0x568] sm:$0xff] %v3679_v6  ;;  %v3678_v52 = vadd.f32 %v3422_v43, %v3166_v11  ;;  %v3183_v30 = vmul.f32 0.999, %v2927_v50  ;;  %v3439_v62 = vmul.f32 0.001, %v7295_v49  ;;  %v7311_v4 = vld [vmem:[%s8278_s6 + $0x5e0] sm:$0xff] }
 0x258   :  { %8778 = vst [vmem:[#allocation103_spill] sm:$0xff] %v7311_v4  ;;  %3926 = vst [vmem:[#allocation12 + $0x520] sm:$0xff] %v3670_v63  ;;  %v3687_v42 = vadd.f32 %v3431_v36, %v3175_v35  ;;  %v2918_v19 = vld [vmem:[#allocation6 + $0x5a0] sm:$0xff]  ;;  %v3430_v12 = vmul.f32 0.001, %v7303_v24  ;;  %v7320_v50 = vld [vmem:[%s8278_s6 + $0x628] sm:$0xff] }
 0x259   :  { %v2926_v10 = vld [vmem:[#allocation6 + $0x5e0] sm:$0xff]  ;;  %8779 = vst [vmem:[#allocation104_spill] sm:$0xff] %v7320_v50  ;;  %3934 = vst [vmem:[#allocation12 + $0x560] sm:$0xff] %v3678_v52  ;;  %v3695_v43 = vadd.f32 %v3439_v62, %v3183_v30  ;;  %v7325_v35 = vld [vmem:[%s8278_s6 + $0x668] sm:$0xff]  ;;  %v3438_v24 = vmul.f32 0.001, %v7311_v4 }
 0x25a   :  { %v3182_v49 = vmul.f32 0.999, %v2926_v10  ;;  %8780 = vst [vmem:[#allocation105_spill] sm:$0xff] %v7325_v35  ;;  %3943 = vst [vmem:[#allocation12 + $0x5a8] sm:$0xff] %v3687_v42  ;;  %v2935_v52 = vld [vmem:[#allocation6 + $0x628] sm:$0xff]  ;;  %v7341_v42 = vld [vmem:[%s8278_s6 + $0x660] sm:$0xff] }
 0x25b   :  { %v2943_v30 = vld [vmem:[#allocation6 + $0x668] sm:$0xff]  ;;  %3951 = vst [vmem:[#allocation12 + $0x5e8] sm:$0xff] %v3695_v43  ;;  %8782 = vst [vmem:[#allocation107_spill] sm:$0xff] %v7341_v42  ;;  %v3447_v43 = vmul.f32 0.001, %v7320_v50 }
 0x25c   :  { %v3694_v59 = vadd.f32 %v3438_v24, %v3182_v49  ;;  %v3199_v25 = vmul.f32 0.999, %v2943_v30  ;;  %v2959_v49 = vld [vmem:[#allocation6 + $0x6e8] sm:$0xff] }
 0x25e   :  { %3950 = vst [vmem:[#allocation12 + $0x5e0] sm:$0xff] %v3694_v59  ;;  %v2950_v59 = vld [vmem:[#allocation6 + $0x6a0] sm:$0xff] }
 0x289   :  { %v985_v55 = vpop.f32.mrb[0].mxu0 }
 0x28a   :  { %v4080_v28 = vadd.f32 %v985_v55, %v7189_v54  ;;  %v987_v27 = vpop.f32.mrb[1].mxu0  ;;  %v3174_v55 = vmul.f32 0.999, %v2918_v19  ;;  %v7335_v19 = vld [vmem:[%s8278_s6 + $0x620] sm:$0xff] }
 0x28b   :  { %v4081_v6 = vadd.f32 %v987_v27, %v819_v45  ;;  %v989_v11 = vpop.f32.mrb[2].mxu0  ;;  %8781 = vst [vmem:[#allocation106_spill] sm:$0xff] %v7335_v19 }
 0x28c   :  { %v1010_v63 = vadd.f32 %v4080_v28, %v7238_v33  ;;  %v4082_v36 = vadd.f32 %v989_v11, %v7189_v54  ;;  %v991_v39 = vpop.f32.mrb[3].mxu0  ;;  %v3686_v33 = vadd.f32 %v3430_v12, %v3174_v55  ;;  %v3191_v54 = vmul.f32 0.999, %v2935_v52  ;;  %v2934_v28 = vld [vmem:[#allocation6 + $0x620] sm:$0xff] }
 0x28d   :  { %v1011_v62 = vadd.f32 %v4081_v6, %v7256_v18  ;;  %v4083_v10 = vadd.f32 %v991_v39, %v819_v45  ;;  %v2942_v11 = vld [vmem:[#allocation6 + $0x660] sm:$0xff]  ;;  %v7347_v18 = vld [vmem:[%s8278_s6 + $0x6a8] sm:$0xff] }
 0x28e   :  { %v1014_v27 = vmax.f32 %v1010_v63, 0.0  ;;  %v1012_v4 = vadd.f32 %v4082_v36, %v7273_v22  ;;  %8783 = vst [vmem:[#allocation108_spill] sm:$0xff] %v7347_v18  ;;  %v7352_v39 = vld [vmem:[%s8278_s6 + $0x6e8] sm:$0xff]  ;;  %3942 = vst [vmem:[#allocation12 + $0x5a0] sm:$0xff] %v3686_v33  ;;  %v3455_v22 = vmul.f32 0.001, %v7325_v35 }
 0x28f   :  { %v2951_v45 = vld [vmem:[#allocation6 + $0x6a8] sm:$0xff]  ;;  %v1015_v12 = vmax.f32 %v1011_v62, 0.0  ;;  %v1013_v6 = vadd.f32 %v4083_v10, %v1009_v37  ;;  %v3190_v63 = vmul.f32 0.999, %v2934_v28  ;;  %v3198_v36 = vmul.f32 0.999, %v2942_v11 }
 0x290   :  { %v1016_v24 = vmax.f32 %v1012_v4, 0.0  ;;  %v7361_v52 = vld [vmem:[%s8278_s6 + $0x6a0] sm:$0xff]  ;;  %v3703_v37 = vadd.f32 %v3447_v43, %v3191_v54  ;;  %v3711_v62 = vadd.f32 %v3455_v22, %v3199_v25  ;;  %v3446_v10 = vmul.f32 0.001, %v7335_v19  ;;  %v7377_v25 = vld [vmem:[%s8278_s6 + $0x728] sm:$0xff] }
 0x291   :  { %v1017_v30 = vmax.f32 %v1013_v6, 0.0  ;;  %v7367_v4 = vld [vmem:[%s8278_s6 + $0x6e0] sm:$0xff]  ;;  %v3454_v28 = vmul.f32 0.001, %v7341_v42  ;;  %v3207_v50 = vmul.f32 0.999, %v2951_v45 }
 0x292   :  { %v2958_v33 = vld [vmem:[#allocation6 + $0x6e0] sm:$0xff]  ;;  %v7369_v55 = vpack.c.bf16 %v1016_v24, %v1014_v27  ;;  %v7382_v54 = vld [vmem:[%s8278_s6 + $0x768] sm:$0xff]  ;;  %3959 = vst [vmem:[#allocation12 + $0x628] sm:$0xff] %v3703_v37  ;;  %3967 = vst [vmem:[#allocation12 + $0x668] sm:$0xff] %v3711_v62  ;;  %v3702_v27 = vadd.f32 %v3446_v10, %v3190_v63  ;;  %v3215_v43 = vmul.f32 0.999, %v2959_v49 }
 0x293   :  { %v7384_v6 = vpack.c.bf16 %v1017_v30, %v1015_v12  ;;  %v3463_v22 = vmul.f32 0.001, %v7347_v18  ;;  %v2967_v24 = vld [vmem:[#allocation6 + $0x728] sm:$0xff]  ;;  %v3710_v11 = vadd.f32 %v3454_v28, %v3198_v36  ;;  %v3471_v19 = vmul.f32 0.001, %v7352_v39  ;;  %v7393_v12 = vld [vmem:[%s8278_s6 + $0x720] sm:$0xff] }
 0x294   :  { %v2975_v45 = vld [vmem:[#allocation6 + $0x768] sm:$0xff]  ;;  %v3206_v35 = vmul.f32 0.999, %v2950_v59  ;;  %v7398_v49 = vld [vmem:[%s8278_s6 + $0x760] sm:$0xff]  ;;  %3958 = vst [vmem:[#allocation12 + $0x620] sm:$0xff] %v3702_v27  ;;  %v8784_v27 = vpack.c.bf16 %v6525_v9, %v6520_v40  ;;  %v8785_v40 = vpack.c.bf16 %v6539_v61, %v6533_v7 }
 0x295   :  { %1222 = vmatprep.mubr.bf16.mxu1 %v7384_v6  ;;  %v3719_v63 = vadd.f32 %v3463_v22, %v3207_v50  ;;  %v3214_v36 = vmul.f32 0.999, %v2958_v33  ;;  %v3462_v30 = vmul.f32 0.001, %v7361_v52  ;;  %v3470_v37 = vmul.f32 0.001, %v7367_v4 }
 0x296   :  { %1223 = vmatmul.mubr.bf16.vlgmr.msra.gmra.mrb[0].mxu1 %v7369_v55  ;;  %3966 = vst [vmem:[#allocation12 + $0x660] sm:$0xff] %v3710_v11  ;;  %v3727_v62 = vadd.f32 %v3471_v19, %v3215_v43  ;;  %v3223_v59 = vmul.f32 0.999, %v2967_v24  ;;  %v3231_v28 = vmul.f32 0.999, %v2975_v45  ;;  %v2966_v42 = vld [vmem:[#allocation6 + $0x720] sm:$0xff] }
 0x297   :  { %v2974_v18 = vld [vmem:[#allocation6 + $0x760] sm:$0xff]  ;;  %1234 = vmatpush1.bf16.msra.mxu1 %v8784_v27  ;;  %1265 = vmatprep.mubr.bf16.mxu1 %v7384_v6  ;;  %3975 = vst [vmem:[#allocation12 + $0x6a8] sm:$0xff] %v3719_v63  ;;  %v3718_v50 = vadd.f32 %v3462_v30, %v3206_v35  ;;  %v3726_v33 = vadd.f32 %v3470_v37, %v3214_v36  ;;  %v3479_v22 = vmul.f32 0.001, %v7377_v25  ;;  %v3487_v19 = vmul.f32 0.001, %v7382_v54 }
 0x298   :  { %v7415_v11 = vld [vmem:[%s8278_s6 + $0x7a8] sm:$0xff]  ;;  %1235 = vmatprep.subr.bf16.mxu1 %v8785_v40  ;;  %3983 = vst [vmem:[#allocation12 + $0x6e8] sm:$0xff] %v3727_v62  ;;  %v3222_v35 = vmul.f32 0.999, %v2966_v42  ;;  %v3230_v24 = vmul.f32 0.999, %v2974_v18 }
 0x299   :  { %v7420_v43 = vld [vmem:[%s8278_s6 + $0x7e8] sm:$0xff]  ;;  %v3478_v45 = vmul.f32 0.001, %v7393_v12  ;;  %3974 = vst [vmem:[#allocation12 + $0x6a0] sm:$0xff] %v3718_v50  ;;  %3982 = vst [vmem:[#allocation12 + $0x6e0] sm:$0xff] %v3726_v33  ;;  %v3735_v63 = vadd.f32 %v3479_v22, %v3223_v59  ;;  %v3743_v36 = vadd.f32 %v3487_v19, %v3231_v28  ;;  %v7434_v61 = vld [vmem:[%s8278_s6 + $0x7a0] sm:$0xff]  ;;  %v8786_v59 = vpack.c.bf16 %v6553_v57, %v6547_v14 }
 0x29a   :  { %v3486_v30 = vmul.f32 0.001, %v7398_v49  ;;  %v2983_v27 = vld [vmem:[#allocation6 + $0x7a8] sm:$0xff]  ;;  %v3495_v50 = vmul.f32 0.001, %v7415_v11  ;;  %v7444_v22 = vld [vmem:[%s8278_s6 + $0x7e0] sm:$0xff] }
 0x29b   :  { %v2991_v7 = vld [vmem:[#allocation6 + $0x7e8] sm:$0xff]  ;;  %v3734_v42 = vadd.f32 %v3478_v45, %v3222_v35  ;;  %v3239_v18 = vmul.f32 0.999, %v2983_v27  ;;  %1236 = vmatpush1.bf16.msra.mxu1 %v8786_v59  ;;  %3991 = vst [vmem:[#allocation12 + $0x728] sm:$0xff] %v3735_v63  ;;  %3999 = vst [vmem:[#allocation12 + $0x768] sm:$0xff] %v3743_v36  ;;  %v2982_v19 = vld [vmem:[#allocation6 + $0x7a0] sm:$0xff]  ;;  %v8787_v35 = vpack.c.bf16 %v6567_v15, %v6561_v51 }
 0x29c   :  { %v3247_v62 = vmul.f32 0.999, %v2991_v7  ;;  %v3742_v28 = vadd.f32 %v3486_v30, %v3230_v24  ;;  %v3503_v33 = vmul.f32 0.001, %v7420_v43  ;;  %v2990_v40 = vld [vmem:[#allocation6 + $0x7e0] sm:$0xff]  ;;  %v7454_v63 = vld [vmem:[%s8278_s6 + $0x38] sm:$0xff] }
 0x29d   :  { %1237 = vmatprep.subr.bf16.mxu1 %v8787_v35  ;;  %3990 = vst [vmem:[#allocation12 + $0x720] sm:$0xff] %v3734_v42  ;;  %v3751_v45 = vadd.f32 %v3495_v50, %v3239_v18  ;;  %v3238_v57 = vmul.f32 0.999, %v2982_v19  ;;  %v3246_v24 = vmul.f32 0.999, %v2990_v40  ;;  %v7459_v36 = vld [vmem:[%s8278_s6 + $0x78] sm:$0xff]  ;;  %v8788_v19 = vpack.c.bf16 %v6581_v21, %v6575_v34 }
 0x29e   :  { %3998 = vst [vmem:[#allocation12 + $0x760] sm:$0xff] %v3742_v28  ;;  %v3759_v51 = vadd.f32 %v3503_v33, %v3247_v62  ;;  %v3494_v15 = vmul.f32 0.001, %v7434_v61  ;;  %v3502_v30 = vmul.f32 0.001, %v7444_v22  ;;  %v2745_v7 = vld [vmem:[#allocation6 + $0x38] sm:$0xff]  ;;  %v8789_v34 = vpack.c.bf16 %v6595_v5, %v6589_v53 }
 0x29f   :  { %v2753_v42 = vld [vmem:[#allocation6 + $0x78] sm:$0xff]  ;;  %4007 = vst [vmem:[#allocation12 + $0x7a8] sm:$0xff] %v3751_v45  ;;  %v3001_v18 = vmul.f32 0.999, %v2745_v7  ;;  %v3257_v59 = vmul.f32 0.001, %v7454_v63  ;;  %1238 = vmatpush1.bf16.msra.mxu1 %v8788_v19 }
 0x2a0   :  { %v3009_v50 = vmul.f32 0.999, %v2753_v42  ;;  %4015 = vst [vmem:[#allocation12 + $0x7e8] sm:$0xff] %v3759_v51  ;;  %v3750_v62 = vadd.f32 %v3494_v15, %v3238_v57  ;;  %v3758_v28 = vadd.f32 %v3502_v30, %v3246_v24  ;;  %v3265_v33 = vmul.f32 0.001, %v7459_v36  ;;  %v7473_v40 = vld [vmem:[%s8278_s6 + $0x30] sm:$0xff]  ;;  %1239 = vmatprep.subr.bf16.mxu1 %v8789_v34 }
 0x2a1   :  { %v7478_v35 = vld [vmem:[%s8278_s6 + $0x70] sm:$0xff]  ;;  %v3513_v21 = vadd.f32 %v3257_v59, %v3001_v18  ;;  %v3256_v15 = vmul.f32 0.001, %v7473_v40  ;;  %v7489_v30 = vld [vmem:[%s8278_s6 + $0xb8] sm:$0xff] }
 0x2a2   :  { %v2744_v45 = vld [vmem:[#allocation6 + $0x30] sm:$0xff]  ;;  %4006 = vst [vmem:[#allocation12 + $0x7a0] sm:$0xff] %v3750_v62  ;;  %4014 = vst [vmem:[#allocation12 + $0x7e0] sm:$0xff] %v3758_v28  ;;  %v3521_v7 = vadd.f32 %v3265_v33, %v3009_v50  ;;  %v3264_v53 = vmul.f32 0.001, %v7478_v35  ;;  %v7495_v5 = vld [vmem:[%s8278_s6 + $0xf8] sm:$0xff]  ;;  %v8790_v28 = vpack.c.bf16 %v6609_v23, %v6603_v60 }
 0x2a3   :  { %v2752_v24 = vld [vmem:[#allocation6 + $0x70] sm:$0xff]  ;;  %v3000_v51 = vmul.f32 0.999, %v2744_v45  ;;  %v2761_v18 = vld [vmem:[#allocation6 + $0xb8] sm:$0xff]  ;;  %3769 = vst [vmem:[#allocation12 + $0x38] sm:$0xff] %v3513_v21 }
 0x2a4   :  { %v3008_v42 = vmul.f32 0.999, %v2752_v24  ;;  %v2769_v45 = vld [vmem:[#allocation6 + $0xf8] sm:$0xff]  ;;  %v3017_v34 = vmul.f32 0.999, %v2761_v18  ;;  %v7503_v50 = vld [vmem:[%s8278_s6 + $0xb0] sm:$0xff]  ;;  %1240 = vmatpush1.bf16.msra.mxu1 %v8790_v28  ;;  %v8791_v18 = vpack.c.bf16 %v6623_v38, %v6617_v29 }
 0x2a5   :  { %v3512_v59 = vadd.f32 %v3256_v15, %v3000_v51  ;;  %v3273_v62 = vmul.f32 0.001, %v7489_v30  ;;  %3777 = vst [vmem:[#allocation12 + $0x78] sm:$0xff] %v3521_v7  ;;  %v3025_v21 = vmul.f32 0.999, %v2769_v45  ;;  %v7512_v51 = vld [vmem:[%s8278_s6 + $0xf0] sm:$0xff] }
 0x2a6   :  { %v3520_v33 = vadd.f32 %v3264_v53, %v3008_v42  ;;  %v3281_v24 = vmul.f32 0.001, %v7495_v5  ;;  %v2760_v15 = vld [vmem:[#allocation6 + $0xb0] sm:$0xff]  ;;  %1241 = vmatprep.subr.bf16.mxu1 %v8791_v18  ;;  %v3272_v42 = vmul.f32 0.001, %v7503_v50  ;;  %v7523_v53 = vld [vmem:[%s8278_s6 + $0x138] sm:$0xff] }
 0x2a7   :  { %3768 = vst [vmem:[#allocation12 + $0x30] sm:$0xff] %v3512_v59  ;;  %v3529_v19 = vadd.f32 %v3273_v62, %v3017_v34  ;;  %v2768_v23 = vld [vmem:[#allocation6 + $0xf0] sm:$0xff]  ;;  %v3016_v7 = vmul.f32 0.999, %v2760_v15  ;;  %v3280_v29 = vmul.f32 0.001, %v7512_v51 }
 0x2a8   :  { %3776 = vst [vmem:[#allocation12 + $0x70] sm:$0xff] %v3520_v33  ;;  %v3537_v45 = vadd.f32 %v3281_v24, %v3025_v21  ;;  %v3024_v28 = vmul.f32 0.999, %v2768_v23  ;;  %v7529_v38 = vld [vmem:[%s8278_s6 + $0x178] sm:$0xff]  ;;  %v3289_v60 = vmul.f32 0.001, %v7523_v53  ;;  %v8792_v21 = vpack.c.bf16 %v6637_v17, %v6631_v26 }
 0x2a9   :  { %v2777_v59 = vld [vmem:[#allocation6 + $0x138] sm:$0xff]  ;;  %3785 = vst [vmem:[#allocation12 + $0xb8] sm:$0xff] %v3529_v19  ;;  %v3528_v34 = vadd.f32 %v3272_v42, %v3016_v7  ;;  %v7537_v33 = vld [vmem:[%s8278_s6 + $0x130] sm:$0xff]  ;;  %v3297_v23 = vmul.f32 0.001, %v7529_v38 }
 0x2aa   :  { %v2785_v15 = vld [vmem:[#allocation6 + $0x178] sm:$0xff]  ;;  %v3033_v18 = vmul.f32 0.999, %v2777_v59  ;;  %1242 = vmatpush1.bf16.msra.mxu1 %v8792_v21  ;;  %3793 = vst [vmem:[#allocation12 + $0xf8] sm:$0xff] %v3537_v45  ;;  %v3536_v24 = vadd.f32 %v3280_v29, %v3024_v28  ;;  %v7546_v7 = vld [vmem:[%s8278_s6 + $0x170] sm:$0xff]  ;;  %v8793_v59 = vpack.c.bf16 %v6651_v46, %v6645_v1 }
 0x2ab   :  { %v3041_v19 = vmul.f32 0.999, %v2785_v15  ;;  %v2776_v42 = vld [vmem:[#allocation6 + $0x130] sm:$0xff]  ;;  %3784 = vst [vmem:[#allocation12 + $0xb0] sm:$0xff] %v3528_v34  ;;  %v3288_v28 = vmul.f32 0.001, %v7537_v33 }
 0x2ac   :  { %1243 = vmatprep.subr.bf16.mxu1 %v8793_v59  ;;  %v3545_v62 = vadd.f32 %v3289_v60, %v3033_v18  ;;  %v2784_v17 = vld [vmem:[#allocation6 + $0x170] sm:$0xff]  ;;  %v3032_v45 = vmul.f32 0.999, %v2776_v42  ;;  %v7557_v29 = vld [vmem:[%s8278_s6 + $0x1b8] sm:$0xff]  ;;  %3792 = vst [vmem:[#allocation12 + $0xf0] sm:$0xff] %v3536_v24 }
 0x2ad   :  { %v3553_v15 = vadd.f32 %v3297_v23, %v3041_v19  ;;  %v3040_v21 = vmul.f32 0.999, %v2784_v17  ;;  %v3296_v1 = vmul.f32 0.001, %v7546_v7  ;;  %v7563_v46 = vld [vmem:[%s8278_s6 + $0x1f8] sm:$0xff]  ;;  %v7571_v24 = vld [vmem:[%s8278_s6 + $0x1b0] sm:$0xff]  ;;  %v8794_v19 = vpack.c.bf16 %v6665_v31, %v6659_v8 }
 0x2ae   :  { %v2793_v60 = vld [vmem:[#allocation6 + $0x1b8] sm:$0xff]  ;;  %3801 = vst [vmem:[#allocation12 + $0x138] sm:$0xff] %v3545_v62  ;;  %v3544_v34 = vadd.f32 %v3288_v28, %v3032_v45  ;;  %v3305_v26 = vmul.f32 0.001, %v7557_v29  ;;  %v3313_v17 = vmul.f32 0.001, %v7563_v46 }
 0x2af   :  { %v2801_v42 = vld [vmem:[#allocation6 + $0x1f8] sm:$0xff]  ;;  %v3049_v59 = vmul.f32 0.999, %v2793_v60  ;;  %1244 = vmatpush1.bf16.msra.mxu1 %v8794_v19  ;;  %3809 = vst [vmem:[#allocation12 + $0x178] sm:$0xff] %v3553_v15  ;;  %v3552_v23 = vadd.f32 %v3296_v1, %v3040_v21  ;;  %v7580_v45 = vld [vmem:[%s8278_s6 + $0x1f0] sm:$0xff]  ;;  %v8795_v60 = vpack.c.bf16 %v6679_v2, %v6673_v48 }
 0x2b0   :  { %v3057_v62 = vmul.f32 0.999, %v2801_v42  ;;  %v2792_v28 = vld [vmem:[#allocation6 + $0x1b0] sm:$0xff]  ;;  %3800 = vst [vmem:[#allocation12 + $0x130] sm:$0xff] %v3544_v34  ;;  %v3304_v21 = vmul.f32 0.001, %v7571_v24 }
 0x2b1   :  { %1245 = vmatprep.subr.bf16.mxu1 %v8795_v60  ;;  %v3561_v18 = vadd.f32 %v3305_v26, %v3049_v59  ;;  %v2800_v31 = vld [vmem:[#allocation6 + $0x1f0] sm:$0xff]  ;;  %v3048_v15 = vmul.f32 0.999, %v2792_v28  ;;  %v7591_v1 = vld [vmem:[%s8278_s6 + $0x238] sm:$0xff]  ;;  %3808 = vst [vmem:[#allocation12 + $0x170] sm:$0xff] %v3552_v23 }
 0x2b2   :  { %v3569_v42 = vadd.f32 %v3313_v17, %v3057_v62  ;;  %v3056_v19 = vmul.f32 0.999, %v2800_v31  ;;  %v3312_v48 = vmul.f32 0.001, %v7580_v45  ;;  %v7597_v2 = vld [vmem:[%s8278_s6 + $0x278] sm:$0xff]  ;;  %v7605_v23 = vld [vmem:[%s8278_s6 + $0x230] sm:$0xff]  ;;  %v8796_v62 = vpack.c.bf16 %v6693_v41, %v6687_v56 }
 0x2b3   :  { %v2809_v26 = vld [vmem:[#allocation6 + $0x238] sm:$0xff]  ;;  %3817 = vst [vmem:[#allocation12 + $0x1b8] sm:$0xff] %v3561_v18  ;;  %v3560_v34 = vadd.f32 %v3304_v21, %v3048_v15  ;;  %v3321_v8 = vmul.f32 0.001, %v7591_v1  ;;  %v3329_v31 = vmul.f32 0.001, %v7597_v2 }
 0x2b4   :  { %v2817_v28 = vld [vmem:[#allocation6 + $0x278] sm:$0xff]  ;;  %v3065_v60 = vmul.f32 0.999, %v2809_v26  ;;  %1246 = vmatpush1.bf16.msra.mxu1 %v8796_v62  ;;  %3825 = vst [vmem:[#allocation12 + $0x1f8] sm:$0xff] %v3569_v42  ;;  %v3568_v17 = vadd.f32 %v3312_v48, %v3056_v19  ;;  %v7614_v15 = vld [vmem:[%s8278_s6 + $0x270] sm:$0xff]  ;;  %v8797_v26 = vpack.c.bf16 %v6707_v0, %v6701_v47 }
 0x2b5   :  { %v3073_v18 = vmul.f32 0.999, %v2817_v28  ;;  %v2808_v21 = vld [vmem:[#allocation6 + $0x230] sm:$0xff]  ;;  %3816 = vst [vmem:[#allocation12 + $0x1b0] sm:$0xff] %v3560_v34  ;;  %v3320_v19 = vmul.f32 0.001, %v7605_v23 }
 0x2b6   :  { %1247 = vmatprep.subr.bf16.mxu1 %v8797_v26  ;;  %v3577_v59 = vadd.f32 %v3321_v8, %v3065_v60  ;;  %v2816_v41 = vld [vmem:[#allocation6 + $0x270] sm:$0xff]  ;;  %v3064_v42 = vmul.f32 0.999, %v2808_v21  ;;  %v7625_v48 = vld [vmem:[%s8278_s6 + $0x2b8] sm:$0xff]  ;;  %3824 = vst [vmem:[#allocation12 + $0x1f0] sm:$0xff] %v3568_v17 }
 0x2b7   :  { %v3585_v28 = vadd.f32 %v3329_v31, %v3073_v18  ;;  %v3072_v62 = vmul.f32 0.999, %v2816_v41  ;;  %v3328_v47 = vmul.f32 0.001, %v7614_v15  ;;  %v7631_v0 = vld [vmem:[%s8278_s6 + $0x2f8] sm:$0xff]  ;;  %v7639_v17 = vld [vmem:[%s8278_s6 + $0x2b0] sm:$0xff]  ;;  %v8798_v18 = vpack.c.bf16 %v6721_v44, %v6715_v58 }
 0x2b8   :  { %v2825_v8 = vld [vmem:[#allocation6 + $0x2b8] sm:$0xff]  ;;  %3833 = vst [vmem:[#allocation12 + $0x238] sm:$0xff] %v3577_v59  ;;  %v3576_v34 = vadd.f32 %v3320_v19, %v3064_v42  ;;  %v3337_v56 = vmul.f32 0.001, %v7625_v48  ;;  %v3345_v41 = vmul.f32 0.001, %v7631_v0 }
 0x2b9   :  { %v2833_v21 = vld [vmem:[#allocation6 + $0x2f8] sm:$0xff]  ;;  %v3081_v26 = vmul.f32 0.999, %v2825_v8  ;;  %1248 = vmatpush1.bf16.msra.mxu1 %v8798_v18  ;;  %3841 = vst [vmem:[#allocation12 + $0x278] sm:$0xff] %v3585_v28  ;;  %v3584_v31 = vadd.f32 %v3328_v47, %v3072_v62  ;;  %v7648_v42 = vld [vmem:[%s8278_s6 + $0x2f0] sm:$0xff]  ;;  %v8799_v8 = vpack.c.bf16 %v6735_v13, %v6729_v3 }
 0x2ba   :  { %v3089_v59 = vmul.f32 0.999, %v2833_v21  ;;  %v2824_v19 = vld [vmem:[#allocation6 + $0x2b0] sm:$0xff]  ;;  %3832 = vst [vmem:[#allocation12 + $0x230] sm:$0xff] %v3576_v34  ;;  %v3336_v62 = vmul.f32 0.001, %v7639_v17 }
 0x2bb   :  { %1249 = vmatprep.subr.bf16.mxu1 %v8799_v8  ;;  %v3593_v60 = vadd.f32 %v3337_v56, %v3081_v26  ;;  %v2832_v44 = vld [vmem:[#allocation6 + $0x2f0] sm:$0xff]  ;;  %v3080_v28 = vmul.f32 0.999, %v2824_v19  ;;  %v7659_v47 = vld [vmem:[%s8278_s6 + $0x338] sm:$0xff]  ;;  %3840 = vst [vmem:[#allocation12 + $0x270] sm:$0xff] %v3584_v31 }
 0x2bc   :  { %v3601_v21 = vadd.f32 %v3345_v41, %v3089_v59  ;;  %v3088_v18 = vmul.f32 0.999, %v2832_v44  ;;  %v3344_v3 = vmul.f32 0.001, %v7648_v42  ;;  %v7665_v13 = vld [vmem:[%s8278_s6 + $0x378] sm:$0xff]  ;;  %v7673_v31 = vld [vmem:[%s8278_s6 + $0x330] sm:$0xff]  ;;  %v8800_v59 = vpack.c.bf16 %v6749_v32, %v6743_v20 }
 0x2bd   :  { %v2841_v56 = vld [vmem:[#allocation6 + $0x338] sm:$0xff]  ;;  %3849 = vst [vmem:[#allocation12 + $0x2b8] sm:$0xff] %v3593_v60  ;;  %v3592_v34 = vadd.f32 %v3336_v62, %v3080_v28  ;;  %v3353_v58 = vmul.f32 0.001, %v7659_v47  ;;  %v3361_v44 = vmul.f32 0.001, %v7665_v13 }
 0x2be   :  { %v2849_v19 = vld [vmem:[#allocation6 + $0x378] sm:$0xff]  ;;  %v3097_v8 = vmul.f32 0.999, %v2841_v56  ;;  %1250 = vmatpush1.bf16.msra.mxu1 %v8800_v59  ;;  %3857 = vst [vmem:[#allocation12 + $0x2f8] sm:$0xff] %v3601_v21  ;;  %v3600_v41 = vadd.f32 %v3344_v3, %v3088_v18  ;;  %v7682_v28 = vld [vmem:[%s8278_s6 + $0x370] sm:$0xff] }
 0x2bf   :  { %v3105_v60 = vmul.f32 0.999, %v2849_v19  ;;  %v2840_v62 = vld [vmem:[#allocation6 + $0x330] sm:$0xff]  ;;  %3848 = vst [vmem:[#allocation12 + $0x2b0] sm:$0xff] %v3592_v34  ;;  %v3352_v18 = vmul.f32 0.001, %v7673_v31 }
 0x2c0   :  { %v8801_v56 = vld [vmem:[#allocation36_spill] sm:$0xff]  ;;  %v3609_v57 = vadd.f32 %v3353_v58, %v3097_v8  ;;  %v3096_v21 = vmul.f32 0.999, %v2840_v62  ;;  %v7693_v3 = vld [vmem:[%s8278_s6 + $0x3b8] sm:$0xff]  ;;  %3856 = vst [vmem:[#allocation12 + $0x2f0] sm:$0xff] %v3600_v41 }
 0x2c1   :  { %v8802_v26 = vpack.c.bf16 %v6763_v16, %v8801_v56  ;;  %v2848_v32 = vld [vmem:[#allocation6 + $0x370] sm:$0xff]  ;;  %8803 = vst [vmem:[#allocation36_spill] sm:$0xff] %v7693_v3  ;;  %v3617_v19 = vadd.f32 %v3361_v44, %v3105_v60  ;;  %v3360_v16 = vmul.f32 0.001, %v7682_v28  ;;  %v7699_v58 = vld [vmem:[%s8278_s6 + $0x3f8] sm:$0xff]  ;;  %v8806_v60 = vld [vmem:[#allocation38_spill] sm:$0xff] }
 0x2c2   :  { %v3104_v59 = vmul.f32 0.999, %v2848_v32  ;;  %8804 = vst [vmem:[#allocation109_spill] sm:$0xff] %v7699_v58  ;;  %v2857_v34 = vld [vmem:[#allocation6 + $0x3b8] sm:$0xff]  ;;  %3865 = vst [vmem:[#allocation12 + $0x338] sm:$0xff] %v3609_v57  ;;  %v7707_v41 = vld [vmem:[%s8278_s6 + $0x3b0] sm:$0xff] }
 0x2c3   :  { %1251 = vmatprep.subr.bf16.mxu1 %v8802_v26  ;;  %v3608_v26 = vadd.f32 %v3352_v18, %v3096_v21  ;;  %v2865_v62 = vld [vmem:[#allocation6 + $0x3f8] sm:$0xff]  ;;  %v3113_v56 = vmul.f32 0.999, %v2857_v34  ;;  %v3369_v20 = vmul.f32 0.001, %v7693_v3  ;;  %8805 = vst [vmem:[#allocation110_spill] sm:$0xff] %v7707_v41 }
 0x2c4   :  { %v8807_v44 = vld [vmem:[#allocation34_spill] sm:$0xff]  ;;  %3873 = vst [vmem:[#allocation12 + $0x378] sm:$0xff] %v3617_v19  ;;  %v3616_v27 = vadd.f32 %v3360_v16, %v3104_v59  ;;  %v3121_v57 = vmul.f32 0.999, %v2865_v62  ;;  %v3377_v21 = vmul.f32 0.001, %v7699_v58 }
 0x2c5   :  { %v8808_v32 = vpack.c.bf16 %v8806_v60, %v8807_v44  ;;  %v7716_v18 = vld [vmem:[%s8278_s6 + $0x3f0] sm:$0xff]  ;;  %v8810_v8 = vld [vmem:[#allocation41_spill] sm:$0xff]  ;;  %3864 = vst [vmem:[#allocation12 + $0x330] sm:$0xff] %v3608_v26  ;;  %v3625_v9 = vadd.f32 %v3369_v20, %v3113_v56  ;;  %v3368_v16 = vmul.f32 0.001, %v7707_v41  ;;  %v8891_v3 = vld [vmem:[#allocation67_spill] sm:$0xff] }
 0x2c6   :  { %8809 = vst [vmem:[#allocation38_spill] sm:$0xff] %v7716_v18  ;;  %v2856_v34 = vld [vmem:[#allocation6 + $0x3b0] sm:$0xff]  ;;  %v8811_v14 = vld [vmem:[#allocation45_spill] sm:$0xff]  ;;  %3872 = vst [vmem:[#allocation12 + $0x370] sm:$0xff] %v3616_v27  ;;  %v3633_v44 = vadd.f32 %v3377_v21, %v3121_v57 }
 0x2c7   :  { %1252 = vmatpush1.bf16.msra.mxu1 %v8808_v32  ;;  %v8812_v37 = vpack.c.bf16 %v8810_v8, %v8811_v14  ;;  %v2864_v19 = vld [vmem:[#allocation6 + $0x3f0] sm:$0xff]  ;;  %v3112_v59 = vmul.f32 0.999, %v2856_v34  ;;  %v7727_v62 = vld [vmem:[%s8278_s6 + $0x438] sm:$0xff]  ;;  %v3376_v14 = vmul.f32 0.001, %v7716_v18 }
 0x2c8   :  { %8813 = vst [vmem:[#allocation34_spill] sm:$0xff] %v7727_v62  ;;  %v3120_v32 = vmul.f32 0.999, %v2864_v19  ;;  %v2873_v20 = vld [vmem:[#allocation6 + $0x438] sm:$0xff]  ;;  %3881 = vst [vmem:[#allocation12 + $0x3b8] sm:$0xff] %v3625_v9  ;;  %v7741_v27 = vld [vmem:[%s8278_s6 + $0x430] sm:$0xff] }
 0x2c9   :  { %1253 = vmatprep.subr.bf16.mxu1 %v8812_v37  ;;  %v7733_v37 = vld [vmem:[%s8278_s6 + $0x478] sm:$0xff]  ;;  %v3624_v26 = vadd.f32 %v3368_v16, %v3112_v59  ;;  %v3129_v34 = vmul.f32 0.999, %v2873_v20  ;;  %v3385_v60 = vmul.f32 0.001, %v7727_v62  ;;  %8815 = vst [vmem:[#allocation45_spill] sm:$0xff] %v7741_v27 }
 0x2ca   :  { %8814 = vst [vmem:[#allocation41_spill] sm:$0xff] %v7733_v37  ;;  %v2881_v56 = vld [vmem:[#allocation6 + $0x478] sm:$0xff]  ;;  %v8816_v57 = vld [vmem:[#allocation44_spill] sm:$0xff]  ;;  %v8817_v21 = vld [vmem:[#allocation39_spill] sm:$0xff]  ;;  %v3632_v10 = vadd.f32 %v3376_v14, %v3120_v32  ;;  %v3393_v59 = vmul.f32 0.001, %v7733_v37 }
 0x2cb   :  { %v8818_v19 = vpack.c.bf16 %v8816_v57, %v8817_v21  ;;  %3889 = vst [vmem:[#allocation12 + $0x3f8] sm:$0xff] %v3633_v44  ;;  %v3137_v9 = vmul.f32 0.999, %v2881_v56  ;;  %v7750_v16 = vld [vmem:[%s8278_s6 + $0x470] sm:$0xff]  ;;  %v8820_v8 = vld [vmem:[#allocation46_spill] sm:$0xff]  ;;  %3880 = vst [vmem:[#allocation12 + $0x3b0] sm:$0xff] %v3624_v26  ;;  %v3641_v18 = vadd.f32 %v3385_v60, %v3129_v34 }
 0x2cc   :  { %8819 = vst [vmem:[#allocation44_spill] sm:$0xff] %v7750_v16  ;;  %v2872_v20 = vld [vmem:[#allocation6 + $0x430] sm:$0xff]  ;;  %v8821_v62 = vld [vmem:[#allocation42_spill] sm:$0xff]  ;;  %v3384_v14 = vmul.f32 0.001, %v7741_v27  ;;  %v7761_v56 = vld [vmem:[%s8278_s6 + $0x4b8] sm:$0xff] }
 0x2cd   :  { %1254 = vmatpush1.bf16.msra.mxu1 %v8818_v19  ;;  %v8822_v41 = vpack.c.bf16 %v8820_v8, %v8821_v62  ;;  %v2880_v44 = vld [vmem:[#allocation6 + $0x470] sm:$0xff]  ;;  %v3128_v32 = vmul.f32 0.999, %v2872_v20  ;;  %8823 = vst [vmem:[#allocation39_spill] sm:$0xff] %v7761_v56  ;;  %3888 = vst [vmem:[#allocation12 + $0x3f0] sm:$0xff] %v3632_v10  ;;  %v3649_v21 = vadd.f32 %v3393_v59, %v3137_v9  ;;  %v2889_v60 = vld [vmem:[#allocation6 + $0x4b8] sm:$0xff] }
 0x2ce   :  { %v3136_v19 = vmul.f32 0.999, %v2880_v44  ;;  %v3392_v62 = vmul.f32 0.001, %v7750_v16  ;;  %3897 = vst [vmem:[#allocation12 + $0x438] sm:$0xff] %v3641_v18  ;;  %v2897_v34 = vld [vmem:[#allocation6 + $0x4f8] sm:$0xff] }
 0x2cf   :  { %1255 = vmatprep.subr.bf16.mxu1 %v8822_v41  ;;  %v7767_v41 = vld [vmem:[%s8278_s6 + $0x4f8] sm:$0xff]  ;;  %v3640_v26 = vadd.f32 %v3384_v14, %v3128_v32  ;;  %v3145_v20 = vmul.f32 0.999, %v2889_v60  ;;  %v3401_v57 = vmul.f32 0.001, %v7761_v56  ;;  %v7775_v10 = vld [vmem:[%s8278_s6 + $0x4b0] sm:$0xff] }
 0x2d0   :  { %8824 = vst [vmem:[#allocation46_spill] sm:$0xff] %v7767_v41  ;;  %8825 = vst [vmem:[#allocation42_spill] sm:$0xff] %v7775_v10  ;;  %v8826_v9 = vld [vmem:[#allocation48_spill] sm:$0xff]  ;;  %v8827_v59 = vld [vmem:[#allocation47_spill] sm:$0xff]  ;;  %v3648_v27 = vadd.f32 %v3392_v62, %v3136_v19  ;;  %v3153_v18 = vmul.f32 0.999, %v2897_v34 }
 0x2d1   :  { %v8828_v44 = vpack.c.bf16 %v8826_v9, %v8827_v59  ;;  %3905 = vst [vmem:[#allocation12 + $0x478] sm:$0xff] %v3649_v21  ;;  %v3409_v32 = vmul.f32 0.001, %v7767_v41  ;;  %v7784_v14 = vld [vmem:[%s8278_s6 + $0x4f0] sm:$0xff]  ;;  %v8830_v8 = vld [vmem:[#allocation50_spill] sm:$0xff]  ;;  %v8831_v56 = vld [vmem:[#allocation49_spill] sm:$0xff]  ;;  %v3657_v37 = vadd.f32 %v3401_v57, %v3145_v20 }
 0x2d2   :  { %8829 = vst [vmem:[#allocation48_spill] sm:$0xff] %v7784_v14  ;;  %v2888_v60 = vld [vmem:[#allocation6 + $0x4b0] sm:$0xff]  ;;  %v8832_v16 = vpack.c.bf16 %v8830_v8, %v8831_v56  ;;  %3896 = vst [vmem:[#allocation12 + $0x430] sm:$0xff] %v3640_v26  ;;  %v3400_v62 = vmul.f32 0.001, %v7775_v10  ;;  %v7795_v34 = vld [vmem:[%s8278_s6 + $0x538] sm:$0xff] }
 0x2d3   :  { %1256 = vmatpush1.bf16.msra.mxu1 %v8828_v44  ;;  %v2896_v21 = vld [vmem:[#allocation6 + $0x4f0] sm:$0xff]  ;;  %v3144_v19 = vmul.f32 0.999, %v2888_v60  ;;  %8833 = vst [vmem:[#allocation47_spill] sm:$0xff] %v7795_v34  ;;  %3904 = vst [vmem:[#allocation12 + $0x470] sm:$0xff] %v3648_v27  ;;  %v3665_v59 = vadd.f32 %v3409_v32, %v3153_v18  ;;  %v2905_v57 = vld [vmem:[#allocation6 + $0x538] sm:$0xff] }
 0x2d4   :  { %1257 = vmatprep.subr.bf16.mxu1 %v8832_v16  ;;  %v3152_v44 = vmul.f32 0.999, %v2896_v21  ;;  %v3408_v56 = vmul.f32 0.001, %v7784_v14  ;;  %v7801_v16 = vld [vmem:[%s8278_s6 + $0x578] sm:$0xff]  ;;  %3913 = vst [vmem:[#allocation12 + $0x4b8] sm:$0xff] %v3657_v37 }
 0x2d5   :  { %8834 = vst [vmem:[#allocation50_spill] sm:$0xff] %v7801_v16  ;;  %v3656_v26 = vadd.f32 %v3400_v62, %v3144_v19  ;;  %v2913_v20 = vld [vmem:[#allocation6 + $0x578] sm:$0xff]  ;;  %v3161_v60 = vmul.f32 0.999, %v2905_v57  ;;  %v3417_v9 = vmul.f32 0.001, %v7795_v34 }
 0x2d6   :  { %v7809_v27 = vld [vmem:[%s8278_s6 + $0x530] sm:$0xff]  ;;  %v8836_v18 = vld [vmem:[#allocation19_spill] sm:$0xff]  ;;  %3921 = vst [vmem:[#allocation12 + $0x4f8] sm:$0xff] %v3665_v59  ;;  %v3664_v10 = vadd.f32 %v3408_v56, %v3152_v44  ;;  %v3169_v37 = vmul.f32 0.999, %v2913_v20  ;;  %v8840_v8 = vld [vmem:[#allocation21_spill] sm:$0xff] }
 0x2d7   :  { %8835 = vst [vmem:[#allocation49_spill] sm:$0xff] %v7809_v27  ;;  %v8837_v32 = vld [vmem:[#allocation51_spill] sm:$0xff]  ;;  %v3425_v19 = vmul.f32 0.001, %v7801_v16  ;;  %v7818_v62 = vld [vmem:[%s8278_s6 + $0x570] sm:$0xff]  ;;  %v8841_v34 = vld [vmem:[#allocation18_spill] sm:$0xff]  ;;  %v3673_v41 = vadd.f32 %v3417_v9, %v3161_v60 }
 0x2d8   :  { %v8838_v21 = vpack.c.bf16 %v8836_v18, %v8837_v32  ;;  %8839 = vst [vmem:[#allocation19_spill] sm:$0xff] %v7818_v62  ;;  %v2904_v57 = vld [vmem:[#allocation6 + $0x530] sm:$0xff]  ;;  %v8842_v14 = vpack.c.bf16 %v8840_v8, %v8841_v34  ;;  %3912 = vst [vmem:[#allocation12 + $0x4b0] sm:$0xff] %v3656_v26  ;;  %v3416_v56 = vmul.f32 0.001, %v7809_v27  ;;  %v7829_v20 = vld [vmem:[%s8278_s6 + $0x5b8] sm:$0xff] }
 0x2d9   :  { %v2912_v59 = vld [vmem:[#allocation6 + $0x570] sm:$0xff]  ;;  %v3160_v44 = vmul.f32 0.999, %v2904_v57  ;;  %8843 = vst [vmem:[#allocation51_spill] sm:$0xff] %v7829_v20  ;;  %3920 = vst [vmem:[#allocation12 + $0x4f0] sm:$0xff] %v3664_v10  ;;  %v3681_v32 = vadd.f32 %v3425_v19, %v3169_v37  ;;  %v2921_v9 = vld [vmem:[#allocation6 + $0x5b8] sm:$0xff] }
 0x2da   :  { %1258 = vmatpush1.bf16.msra.mxu1 %v8838_v21  ;;  %v3168_v21 = vmul.f32 0.999, %v2912_v59  ;;  %v3424_v34 = vmul.f32 0.001, %v7818_v62  ;;  %3929 = vst [vmem:[#allocation12 + $0x538] sm:$0xff] %v3673_v41  ;;  %v2929_v60 = vld [vmem:[#allocation6 + $0x5f8] sm:$0xff] }
 0x2db   :  { %1259 = vmatprep.subr.bf16.mxu1 %v8842_v14  ;;  %v7835_v14 = vld [vmem:[%s8278_s6 + $0x5f8] sm:$0xff]  ;;  %v3672_v26 = vadd.f32 %v3416_v56, %v3160_v44  ;;  %v3177_v57 = vmul.f32 0.999, %v2921_v9  ;;  %v3433_v18 = vmul.f32 0.001, %v7829_v20  ;;  %v7843_v10 = vld [vmem:[%s8278_s6 + $0x5b0] sm:$0xff] }
 0x2dc   :  { %8844 = vst [vmem:[#allocation21_spill] sm:$0xff] %v7835_v14  ;;  %8845 = vst [vmem:[#allocation18_spill] sm:$0xff] %v7843_v10  ;;  %v8846_v37 = vld [vmem:[#allocation23_spill] sm:$0xff]  ;;  %v8847_v19 = vld [vmem:[#allocation20_spill] sm:$0xff]  ;;  %v3680_v27 = vadd.f32 %v3424_v34, %v3168_v21  ;;  %v3185_v41 = vmul.f32 0.999, %v2929_v60 }
 0x2dd   :  { %v8848_v59 = vpack.c.bf16 %v8846_v37, %v8847_v19  ;;  %3937 = vst [vmem:[#allocation12 + $0x578] sm:$0xff] %v3681_v32  ;;  %v3441_v44 = vmul.f32 0.001, %v7835_v14  ;;  %v7852_v56 = vld [vmem:[%s8278_s6 + $0x5f0] sm:$0xff]  ;;  %v8850_v8 = vld [vmem:[#allocation25_spill] sm:$0xff]  ;;  %v8851_v20 = vld [vmem:[#allocation22_spill] sm:$0xff]  ;;  %v3689_v16 = vadd.f32 %v3433_v18, %v3177_v57 }
 0x2de   :  { %8849 = vst [vmem:[#allocation23_spill] sm:$0xff] %v7852_v56  ;;  %v2920_v9 = vld [vmem:[#allocation6 + $0x5b0] sm:$0xff]  ;;  %v8852_v62 = vpack.c.bf16 %v8850_v8, %v8851_v20  ;;  %3928 = vst [vmem:[#allocation12 + $0x530] sm:$0xff] %v3672_v26  ;;  %v3432_v34 = vmul.f32 0.001, %v7843_v10  ;;  %v7863_v60 = vld [vmem:[%s8278_s6 + $0x638] sm:$0xff] }
 0x2df   :  { %1260 = vmatpush1.bf16.msra.mxu1 %v8848_v59  ;;  %v2928_v32 = vld [vmem:[#allocation6 + $0x5f0] sm:$0xff]  ;;  %v3176_v21 = vmul.f32 0.999, %v2920_v9  ;;  %8853 = vst [vmem:[#allocation20_spill] sm:$0xff] %v7863_v60  ;;  %3936 = vst [vmem:[#allocation12 + $0x570] sm:$0xff] %v3680_v27  ;;  %v3697_v19 = vadd.f32 %v3441_v44, %v3185_v41  ;;  %v2937_v18 = vld [vmem:[#allocation6 + $0x638] sm:$0xff] }
 0x2e0   :  { %1261 = vmatprep.subr.bf16.mxu1 %v8852_v62  ;;  %v3184_v59 = vmul.f32 0.999, %v2928_v32  ;;  %v3440_v20 = vmul.f32 0.001, %v7852_v56  ;;  %v7869_v62 = vld [vmem:[%s8278_s6 + $0x678] sm:$0xff]  ;;  %3945 = vst [vmem:[#allocation12 + $0x5b8] sm:$0xff] %v3689_v16 }
 0x2e1   :  { %8854 = vst [vmem:[#allocation25_spill] sm:$0xff] %v7869_v62  ;;  %v3688_v26 = vadd.f32 %v3432_v34, %v3176_v21  ;;  %v2945_v57 = vld [vmem:[#allocation6 + $0x678] sm:$0xff]  ;;  %v3193_v9 = vmul.f32 0.999, %v2937_v18  ;;  %v3449_v37 = vmul.f32 0.001, %v7863_v60 }
 0x2e2   :  { %v7877_v27 = vld [vmem:[%s8278_s6 + $0x630] sm:$0xff]  ;;  %v8856_v41 = vld [vmem:[#allocation26_spill] sm:$0xff]  ;;  %3953 = vst [vmem:[#allocation12 + $0x5f8] sm:$0xff] %v3697_v19  ;;  %v3696_v10 = vadd.f32 %v3440_v20, %v3184_v59  ;;  %v3201_v16 = vmul.f32 0.999, %v2945_v57  ;;  %v8860_v8 = vld [vmem:[#allocation53_spill] sm:$0xff] }
 0x2e3   :  { %8855 = vst [vmem:[#allocation22_spill] sm:$0xff] %v7877_v27  ;;  %v8857_v44 = vld [vmem:[#allocation24_spill] sm:$0xff]  ;;  %v3457_v21 = vmul.f32 0.001, %v7869_v62  ;;  %v8861_v60 = vld [vmem:[#allocation29_spill] sm:$0xff]  ;;  %3944 = vst [vmem:[#allocation12 + $0x5b0] sm:$0xff] %v3688_v26  ;;  %v3705_v14 = vadd.f32 %v3449_v37, %v3193_v9 }
 0x2e4   :  { %v8858_v32 = vpack.c.bf16 %v8856_v41, %v8857_v44  ;;  %v7886_v34 = vld [vmem:[%s8278_s6 + $0x670] sm:$0xff]  ;;  %v8862_v56 = vpack.c.bf16 %v8860_v8, %v8861_v60  ;;  %v3448_v20 = vmul.f32 0.001, %v7877_v27  ;;  %v7897_v57 = vld [vmem:[%s8278_s6 + $0x6b8] sm:$0xff]  ;;  %3952 = vst [vmem:[#allocation12 + $0x5f0] sm:$0xff] %v3696_v10  ;;  %v8892_v58 = vld [vmem:[#allocation66_spill] sm:$0xff] }
 0x2e5   :  { %8859 = vst [vmem:[#allocation26_spill] sm:$0xff] %v7886_v34  ;;  %v2936_v18 = vld [vmem:[#allocation6 + $0x630] sm:$0xff]  ;;  %8863 = vst [vmem:[#allocation24_spill] sm:$0xff] %v7897_v57  ;;  %v3713_v44 = vadd.f32 %v3457_v21, %v3201_v16  ;;  %v3456_v60 = vmul.f32 0.001, %v7886_v34  ;;  %v2953_v37 = vld [vmem:[#allocation6 + $0x6b8] sm:$0xff] }
 0x2e6   :  { %1262 = vmatpush1.bf16.msra.mxu1 %v8858_v32  ;;  %v2944_v19 = vld [vmem:[#allocation6 + $0x670] sm:$0xff]  ;;  %v3192_v59 = vmul.f32 0.999, %v2936_v18  ;;  %3961 = vst [vmem:[#allocation12 + $0x638] sm:$0xff] %v3705_v14  ;;  %v2961_v9 = vld [vmem:[#allocation6 + $0x6f8] sm:$0xff]  ;;  %v8866_v16 = vld [vmem:[#allocation55_spill] sm:$0xff] }
 0x2e7   :  { %1263 = vmatprep.subr.bf16.mxu1 %v8862_v56  ;;  %v3200_v32 = vmul.f32 0.999, %v2944_v19  ;;  %v7903_v56 = vld [vmem:[%s8278_s6 + $0x6f8] sm:$0xff]  ;;  %v3209_v18 = vmul.f32 0.999, %v2953_v37  ;;  %v7911_v10 = vld [vmem:[%s8278_s6 + $0x6b0] sm:$0xff] }
 0x2e8   :  { %8864 = vst [vmem:[#allocation53_spill] sm:$0xff] %v7903_v56  ;;  %v3704_v26 = vadd.f32 %v3448_v20, %v3192_v59  ;;  %v3465_v41 = vmul.f32 0.001, %v7897_v57  ;;  %8865 = vst [vmem:[#allocation29_spill] sm:$0xff] %v7911_v10  ;;  %v8867_v21 = vld [vmem:[#allocation54_spill] sm:$0xff]  ;;  %v7920_v20 = vld [vmem:[%s8278_s6 + $0x6f0] sm:$0xff] }
 0x2e9   :  { %v8868_v19 = vpack.c.bf16 %v8866_v16, %v8867_v21  ;;  %3969 = vst [vmem:[#allocation12 + $0x678] sm:$0xff] %v3713_v44  ;;  %v3712_v27 = vadd.f32 %v3456_v60, %v3200_v32  ;;  %v3217_v14 = vmul.f32 0.999, %v2961_v9  ;;  %v3473_v59 = vmul.f32 0.001, %v7903_v56  ;;  %8869 = vst [vmem:[#allocation55_spill] sm:$0xff] %v7920_v20 }
 0x2ea   :  { %v2952_v37 = vld [vmem:[#allocation6 + $0x6b0] sm:$0xff]  ;;  %v8870_v8 = vld [vmem:[#allocation57_spill] sm:$0xff]  ;;  %3960 = vst [vmem:[#allocation12 + $0x630] sm:$0xff] %v3704_v26  ;;  %v3721_v62 = vadd.f32 %v3465_v41, %v3209_v18  ;;  %v3464_v60 = vmul.f32 0.001, %v7911_v10 }
 0x2eb   :  { %1264 = vmatpush1.bf16.msra.mxu1 %v8868_v19  ;;  %v8871_v57 = vld [vmem:[#allocation56_spill] sm:$0xff]  ;;  %v3208_v32 = vmul.f32 0.999, %v2952_v37  ;;  %v7931_v9 = vld [vmem:[%s8278_s6 + $0x738] sm:$0xff]  ;;  %3968 = vst [vmem:[#allocation12 + $0x670] sm:$0xff] %v3712_v27  ;;  %v3729_v21 = vadd.f32 %v3473_v59, %v3217_v14  ;;  %v8876_v59 = vld [vmem:[#allocation59_spill] sm:$0xff] }
 0x2ec   :  { %v8872_v34 = vpack.c.bf16 %v8870_v8, %v8871_v57  ;;  %v2960_v44 = vld [vmem:[#allocation6 + $0x6f0] sm:$0xff]  ;;  %8873 = vst [vmem:[#allocation54_spill] sm:$0xff] %v7931_v9  ;;  %v3472_v57 = vmul.f32 0.001, %v7920_v20  ;;  %v2969_v41 = vld [vmem:[#allocation6 + $0x738] sm:$0xff]  ;;  %3977 = vst [vmem:[#allocation12 + $0x6b8] sm:$0xff] %v3721_v62 }
 0x2ed   :  { %v3216_v19 = vmul.f32 0.999, %v2960_v44  ;;  %v3720_v26 = vadd.f32 %v3464_v60, %v3208_v32  ;;  %v2977_v18 = vld [vmem:[#allocation6 + $0x778] sm:$0xff]  ;;  %v3225_v37 = vmul.f32 0.999, %v2969_v41  ;;  %v7946_v14 = vld [vmem:[%s8278_s6 + $0x730] sm:$0xff] }
 0x2ee   :  { %1276 = vmatprep.subr.bf16.mxu1 %v8872_v34  ;;  %v7937_v34 = vld [vmem:[%s8278_s6 + $0x778] sm:$0xff]  ;;  %1266 = vmatmul.mubr.bf16.vlgmr.msra.gmra.mrb[4].mxu1 %v7369_v55  ;;  %v3481_v27 = vmul.f32 0.001, %v7931_v9  ;;  %8875 = vst [vmem:[#allocation56_spill] sm:$0xff] %v7946_v14  ;;  %v8877_v44 = vld [vmem:[#allocation58_spill] sm:$0xff]  ;;  %3985 = vst [vmem:[#allocation12 + $0x6f8] sm:$0xff] %v3729_v21 }
 0x2ef   :  { %8874 = vst [vmem:[#allocation57_spill] sm:$0xff] %v7937_v34  ;;  %v8878_v16 = vpack.c.bf16 %v8876_v59, %v8877_v44  ;;  %1308 = vmatprep.mubr.bf16.mxu1 %v7384_v6  ;;  %v3728_v62 = vadd.f32 %v3472_v57, %v3216_v19  ;;  %v3233_v32 = vmul.f32 0.999, %v2977_v18  ;;  %v3489_v60 = vmul.f32 0.001, %v7937_v34  ;;  %v7956_v41 = vld [vmem:[%s8278_s6 + $0x770] sm:$0xff] }
 0x2f0   :  { %8879 = vst [vmem:[#allocation59_spill] sm:$0xff] %v7956_v41  ;;  %v2968_v8 = vld [vmem:[#allocation6 + $0x730] sm:$0xff]  ;;  %v8880_v9 = vld [vmem:[#allocation61_spill] sm:$0xff]  ;;  %3976 = vst [vmem:[#allocation12 + $0x6b0] sm:$0xff] %v3720_v26  ;;  %v3737_v59 = vadd.f32 %v3481_v27, %v3225_v37  ;;  %v3480_v57 = vmul.f32 0.001, %v7946_v14 }
 0x2f1   :  { %1277 = vmatpush1.bf16.msra.mxu1 %v8878_v16  ;;  %v8881_v10 = vld [vmem:[#allocation60_spill] sm:$0xff]  ;;  %v3224_v19 = vmul.f32 0.999, %v2968_v8  ;;  %v7967_v18 = vld [vmem:[%s8278_s6 + $0x7b8] sm:$0xff]  ;;  %3984 = vst [vmem:[#allocation12 + $0x6f0] sm:$0xff] %v3728_v62  ;;  %v3745_v44 = vadd.f32 %v3489_v60, %v3233_v32  ;;  %v8885_v32 = vld [vmem:[#allocation63_spill] sm:$0xff] }
 0x2f2   :  { %v8882_v20 = vpack.c.bf16 %v8880_v9, %v8881_v10  ;;  %v2976_v21 = vld [vmem:[#allocation6 + $0x770] sm:$0xff]  ;;  %8883 = vst [vmem:[#allocation58_spill] sm:$0xff] %v7967_v18  ;;  %v3488_v10 = vmul.f32 0.001, %v7956_v41  ;;  %v2985_v9 = vld [vmem:[#allocation6 + $0x7b8] sm:$0xff]  ;;  %3993 = vst [vmem:[#allocation12 + $0x738] sm:$0xff] %v3737_v59 }
 0x2f3   :  { %v3232_v34 = vmul.f32 0.999, %v2976_v21  ;;  %v3736_v26 = vadd.f32 %v3480_v57, %v3224_v19  ;;  %v2993_v37 = vld [vmem:[#allocation6 + $0x7f8] sm:$0xff]  ;;  %v3241_v27 = vmul.f32 0.999, %v2985_v9  ;;  %v7981_v62 = vld [vmem:[%s8278_s6 + $0x7b0] sm:$0xff] }
 0x2f4   :  { %1278 = vmatprep.subr.bf16.mxu1 %v8882_v20  ;;  %v7973_v20 = vld [vmem:[%s8278_s6 + $0x7f8] sm:$0xff]  ;;  %v3497_v16 = vmul.f32 0.001, %v7967_v18  ;;  %v8886_v60 = vld [vmem:[#allocation62_spill] sm:$0xff]  ;;  %4001 = vst [vmem:[#allocation12 + $0x778] sm:$0xff] %v3745_v44  ;;  %v7990_v57 = vld [vmem:[%s8278_s6 + $0x7f0] sm:$0xff] }
 0x2f5   :  { %8884 = vst [vmem:[#allocation61_spill] sm:$0xff] %v7973_v20  ;;  %v8887_v21 = vpack.c.bf16 %v8885_v32, %v8886_v60  ;;  %v3744_v14 = vadd.f32 %v3488_v10, %v3232_v34  ;;  %v3249_v59 = vmul.f32 0.999, %v2993_v37  ;;  %v3505_v19 = vmul.f32 0.001, %v7973_v20  ;;  %v2984_v9 = vld [vmem:[#allocation6 + $0x7b0] sm:$0xff] }
 0x2f6   :  { %v8888_v8 = vld [vmem:[#allocation65_spill] sm:$0xff]  ;;  %v8889_v18 = vld [vmem:[#allocation64_spill] sm:$0xff]  ;;  %3992 = vst [vmem:[#allocation12 + $0x730] sm:$0xff] %v3736_v26  ;;  %v3753_v56 = vadd.f32 %v3497_v16, %v3241_v27  ;;  %v1146_v32 = vpack.c.bf16 %v7990_v57, %v7981_v62  ;;  %v3240_v34 = vmul.f32 0.999, %v2984_v9  ;;  %v8897_v27 = vld [vmem:[#allocation71_spill] sm:$0xff] }
 0x2f7   :  { %1279 = vmatpush1.bf16.msra.mxu1 %v8887_v21  ;;  %v8890_v41 = vpack.c.bf16 %v8888_v8, %v8889_v18  ;;  %v2992_v44 = vld [vmem:[#allocation6 + $0x7f0] sm:$0xff]  ;;  %v3496_v10 = vmul.f32 0.001, %v7981_v62  ;;  %4000 = vst [vmem:[#allocation12 + $0x770] sm:$0xff] %v3744_v14  ;;  %v3761_v37 = vadd.f32 %v3505_v19, %v3249_v59  ;;  %v3504_v21 = vmul.f32 0.001, %v7990_v57 }
 0x2f8   :  { %v3248_v60 = vmul.f32 0.999, %v2992_v44  ;;  %4009 = vst [vmem:[#allocation12 + $0x7b8] sm:$0xff] %v3753_v56  ;;  %v8893_v18 = vpack.c.bf16 %v8891_v3, %v8892_v58  ;;  %v8894_v16 = vld [vmem:[#allocation69_spill] sm:$0xff]  ;;  %v8895_v26 = vld [vmem:[#allocation68_spill] sm:$0xff]  ;;  %v8898_v14 = vld [vmem:[#allocation70_spill] sm:$0xff] }
 0x2f9   :  { %1280 = vmatprep.subr.bf16.mxu1 %v8890_v41  ;;  %v3752_v20 = vadd.f32 %v3496_v10, %v3240_v34  ;;  %4017 = vst [vmem:[#allocation12 + $0x7f8] sm:$0xff] %v3761_v37  ;;  %v8896_v8 = vpack.c.bf16 %v8894_v16, %v8895_v26  ;;  %v8899_v59 = vpack.c.bf16 %v8897_v27, %v8898_v14  ;;  %v8900_v19 = vld [vmem:[#allocation73_spill] sm:$0xff]  ;;  %v8901_v9 = vld [vmem:[#allocation72_spill] sm:$0xff]  ;;  %v8903_v44 = vld [vmem:[#allocation75_spill] sm:$0xff] }
 0x2fa   :  { %v3760_v41 = vadd.f32 %v3504_v21, %v3248_v60  ;;  %v8902_v56 = vpack.c.bf16 %v8900_v19, %v8901_v9  ;;  %v8904_v34 = vld [vmem:[#allocation74_spill] sm:$0xff]  ;;  %v8906_v58 = vld [vmem:[#allocation77_spill] sm:$0xff]  ;;  %v8907_v10 = vld [vmem:[#allocation76_spill] sm:$0xff] }
 0x2fb   :  { %1281 = vmatpush1.bf16.msra.mxu1 %v8893_v18  ;;  %4008 = vst [vmem:[#allocation12 + $0x7b0] sm:$0xff] %v3752_v20  ;;  %v8905_v3 = vpack.c.bf16 %v8903_v44, %v8904_v34  ;;  %v8908_v37 = vpack.c.bf16 %v8906_v58, %v8907_v10  ;;  %v8909_v60 = vld [vmem:[#allocation79_spill] sm:$0xff]  ;;  %v8910_v21 = vld [vmem:[#allocation78_spill] sm:$0xff]  ;;  %v8912_v18 = vld [vmem:[#allocation81_spill] sm:$0xff] }
 0x2fc   :  { %1282 = vmatprep.subr.bf16.mxu1 %v8896_v8  ;;  %4016 = vst [vmem:[#allocation12 + $0x7f0] sm:$0xff] %v3760_v41  ;;  %v8911_v20 = vpack.c.bf16 %v8909_v60, %v8910_v21  ;;  %v8913_v41 = vld [vmem:[#allocation80_spill] sm:$0xff]  ;;  %v8915_v26 = vld [vmem:[#allocation83_spill] sm:$0xff]  ;;  %v8916_v8 = vld [vmem:[#allocation82_spill] sm:$0xff] }
 0x2fd   :  { %v8914_v16 = vpack.c.bf16 %v8912_v18, %v8913_v41  ;;  %v8917_v27 = vpack.c.bf16 %v8915_v26, %v8916_v8  ;;  %v8918_v14 = vld [vmem:[#allocation85_spill] sm:$0xff]  ;;  %v8921_v9 = vld [vmem:[#allocation87_spill] sm:$0xff]  ;;  %v9028_v62 = vld [vmem:[#allocation40_spill] sm:$0xff] }
 0x2fe   :  { %v8924_v34 = vld [vmem:[#allocation89_spill] sm:$0xff]  ;;  %v8927_v10 = vld [vmem:[#allocation91_spill] sm:$0xff] }
 0x2ff   :  { %1283 = vmatpush1.bf16.msra.mxu1 %v8899_v59  ;;  %v8919_v59 = vld [vmem:[#allocation84_spill] sm:$0xff]  ;;  %v8930_v21 = vld [vmem:[#allocation93_spill] sm:$0xff]  ;;  %v8933_v41 = vld [vmem:[#allocation95_spill] sm:$0xff] }
 0x300   :  { %1284 = vmatprep.subr.bf16.mxu1 %v8902_v56  ;;  %v8920_v19 = vpack.c.bf16 %v8918_v14, %v8919_v59  ;;  %v8922_v56 = vld [vmem:[#allocation86_spill] sm:$0xff]  ;;  %v8936_v8 = vld [vmem:[#allocation97_spill] sm:$0xff]  ;;  %v8939_v59 = vld [vmem:[#allocation99_spill] sm:$0xff] }
 0x301   :  { %v8923_v44 = vpack.c.bf16 %v8921_v9, %v8922_v56  ;;  %v8942_v56 = vld [vmem:[#allocation101_spill] sm:$0xff] }
 0x303   :  { %1285 = vmatpush1.bf16.msra.mxu1 %v8905_v3  ;;  %v8925_v3 = vld [vmem:[#allocation88_spill] sm:$0xff] }
 0x304   :  { %1286 = vmatprep.subr.bf16.mxu1 %v8908_v37  ;;  %v8926_v58 = vpack.c.bf16 %v8924_v34, %v8925_v3  ;;  %v8928_v37 = vld [vmem:[#allocation90_spill] sm:$0xff]  ;;  %v8945_v3 = vld [vmem:[#allocation103_spill] sm:$0xff] }
 0x305   :  { %v8929_v60 = vpack.c.bf16 %v8927_v10, %v8928_v37  ;;  %v8948_v37 = vld [vmem:[#allocation105_spill] sm:$0xff] }
 0x307   :  { %1287 = vmatpush1.bf16.msra.mxu1 %v8911_v20  ;;  %v8931_v20 = vld [vmem:[#allocation92_spill] sm:$0xff] }
 0x308   :  { %1288 = vmatprep.subr.bf16.mxu1 %v8914_v16  ;;  %v8932_v18 = vpack.c.bf16 %v8930_v21, %v8931_v20  ;;  %v8934_v16 = vld [vmem:[#allocation94_spill] sm:$0xff]  ;;  %v8951_v20 = vld [vmem:[#allocation107_spill] sm:$0xff] }
 0x309   :  { %v8935_v26 = vpack.c.bf16 %v8933_v41, %v8934_v16  ;;  %v8954_v16 = vld [vmem:[#allocation108_spill] sm:$0xff] }
 0x30b   :  { %1289 = vmatpush1.bf16.msra.mxu1 %v8917_v27  ;;  %v8937_v27 = vld [vmem:[#allocation96_spill] sm:$0xff] }
 0x30c   :  { %1290 = vmatprep.subr.bf16.mxu1 %v8920_v19  ;;  %v8938_v14 = vpack.c.bf16 %v8936_v8, %v8937_v27  ;;  %v8940_v19 = vld [vmem:[#allocation98_spill] sm:$0xff]  ;;  %v8956_v8 = vpack.c.bf16 %v7367_v4, %v7361_v52  ;;  %v8957_v27 = vpack.c.bf16 %v7382_v54, %v7377_v25  ;;  %v8961_v52 = vpack.c.bf16 %v7459_v36, %v7454_v63 }
 0x30d   :  { %v8941_v9 = vpack.c.bf16 %v8939_v59, %v8940_v19  ;;  %v8959_v59 = vpack.c.bf16 %v7420_v43, %v7415_v11  ;;  %v8962_v4 = vpack.c.bf16 %v7478_v35, %v7473_v40  ;;  %v8963_v25 = vpack.c.bf16 %v7495_v5, %v7489_v30  ;;  %v8975_v35 = vld [vmem:[#allocation109_spill] sm:$0xff]  ;;  %v8976_v30 = vld [vmem:[#allocation36_spill] sm:$0xff]  ;;  %v9000_v19 = vld [vmem:[#allocation51_spill] sm:$0xff] }
 0x30e   :  { %v8964_v54 = vpack.c.bf16 %v7512_v51, %v7503_v50  ;;  %v8967_v11 = vpack.c.bf16 %v7563_v46, %v7557_v29  ;;  %v8969_v43 = vpack.c.bf16 %v7597_v2, %v7591_v1  ;;  %v8972_v63 = vpack.c.bf16 %v7648_v42, %v7639_v17  ;;  %v8978_v50 = vld [vmem:[#allocation38_spill] sm:$0xff]  ;;  %v8984_v29 = vld [vmem:[#allocation44_spill] sm:$0xff]  ;;  %v8985_v46 = vld [vmem:[#allocation45_spill] sm:$0xff] }
 0x30f   :  { %1291 = vmatpush1.bf16.msra.mxu1 %v8923_v44  ;;  %v8943_v44 = vld [vmem:[#allocation100_spill] sm:$0xff]  ;;  %v8973_v36 = vpack.c.bf16 %v7665_v13, %v7659_v47  ;;  %v8974_v40 = vpack.c.bf16 %v7682_v28, %v7673_v31  ;;  %v8977_v5 = vpack.c.bf16 %v8975_v35, %v8976_v30  ;;  %v8979_v51 = vld [vmem:[#allocation110_spill] sm:$0xff]  ;;  %v8988_v1 = vld [vmem:[#allocation39_spill] sm:$0xff] }
 0x310   :  { %1292 = vmatprep.subr.bf16.mxu1 %v8926_v58  ;;  %v8944_v34 = vpack.c.bf16 %v8942_v56, %v8943_v44  ;;  %v8946_v58 = vld [vmem:[#allocation102_spill] sm:$0xff]  ;;  %v8994_v17 = vld [vmem:[#allocation47_spill] sm:$0xff]  ;;  %v8997_v13 = vld [vmem:[#allocation49_spill] sm:$0xff] }
 0x311   :  { %v8947_v10 = vpack.c.bf16 %v8945_v3, %v8946_v58  ;;  %v8996_v47 = vld [vmem:[#allocation19_spill] sm:$0xff]  ;;  %v8999_v28 = vld [vmem:[#allocation21_spill] sm:$0xff]  ;;  %v9003_v44 = vld [vmem:[#allocation18_spill] sm:$0xff] }
 0x312   :  { %v8998_v31 = vpack.c.bf16 %v8996_v47, %v8997_v13  ;;  %v9002_v56 = vld [vmem:[#allocation23_spill] sm:$0xff]  ;;  %v9005_v3 = vld [vmem:[#allocation25_spill] sm:$0xff]  ;;  %v9006_v58 = vld [vmem:[#allocation20_spill] sm:$0xff] }
 0x313   :  { %1293 = vmatpush1.bf16.msra.mxu1 %v8929_v60  ;;  %v8949_v60 = vld [vmem:[#allocation104_spill] sm:$0xff]  ;;  %v9029_v30 = vld [vmem:[#allocation35_spill] sm:$0xff] }
 0x314   :  { %1294 = vmatprep.subr.bf16.mxu1 %v8932_v18  ;;  %v8950_v21 = vpack.c.bf16 %v8948_v37, %v8949_v60  ;;  %v8952_v18 = vld [vmem:[#allocation106_spill] sm:$0xff]  ;;  %v9032_v47 = vld [vmem:[#allocation43_spill] sm:$0xff] }
 0x315   :  { %v8953_v41 = vpack.c.bf16 %v8951_v20, %v8952_v18  ;;  %v9008_v37 = vld [vmem:[#allocation26_spill] sm:$0xff]  ;;  %v9011_v20 = vld [vmem:[#allocation53_spill] sm:$0xff]  ;;  %v9012_v18 = vld [vmem:[#allocation24_spill] sm:$0xff] }
 0x316   :  { %v9009_v60 = vld [vmem:[#allocation22_spill] sm:$0xff] }
 0x317   :  { %1295 = vmatpush1.bf16.msra.mxu1 %v8935_v26  ;;  %v8955_v26 = vpack.c.bf16 %v7352_v39, %v8954_v16  ;;  %v8960_v39 = vpack.c.bf16 %v7444_v22, %v7434_v61  ;;  %v8970_v61 = vpack.c.bf16 %v7614_v15, %v7605_v23  ;;  %v8971_v22 = vpack.c.bf16 %v7631_v0, %v7625_v48  ;;  %v8990_v23 = vld [vmem:[#allocation48_spill] sm:$0xff]  ;;  %v8991_v15 = vld [vmem:[#allocation42_spill] sm:$0xff]  ;;  %v9014_v16 = vld [vmem:[#allocation55_spill] sm:$0xff] }
 0x318   :  { %1296 = vmatprep.subr.bf16.mxu1 %v8938_v14  ;;  %v8958_v14 = vpack.c.bf16 %v7398_v49, %v7393_v12  ;;  %v8965_v12 = vpack.c.bf16 %v7529_v38, %v7523_v53  ;;  %v8966_v49 = vpack.c.bf16 %v7546_v7, %v7537_v33  ;;  %v8980_v53 = vpack.c.bf16 %v8978_v50, %v8979_v51  ;;  %v8981_v38 = vld [vmem:[#allocation41_spill] sm:$0xff]  ;;  %v8982_v33 = vld [vmem:[#allocation34_spill] sm:$0xff] }
 0x319   :  { %v8983_v7 = vpack.c.bf16 %v8981_v38, %v8982_v33  ;;  %v8992_v48 = vpack.c.bf16 %v8990_v23, %v8991_v15  ;;  %v8993_v0 = vld [vmem:[#allocation50_spill] sm:$0xff]  ;;  %v9030_v33 = vld [vmem:[#allocation33_spill] sm:$0xff] }
 0x31a   :  { %v8995_v42 = vpack.c.bf16 %v8993_v0, %v8994_v17 }
 0x31b   :  { %1297 = vmatpush1.bf16.msra.mxu1 %v8941_v9  ;;  %v9001_v9 = vpack.c.bf16 %v8999_v28, %v9000_v19 }
 0x31c   :  { %1298 = vmatprep.subr.bf16.mxu1 %v8944_v34  ;;  %v9004_v34 = vpack.c.bf16 %v9002_v56, %v9003_v44  ;;  %v1168_v44 = vsub.s32 4, %v9030_v33 }
 0x31f   :  { %1299 = vmatpush1.bf16.msra.mxu1 %v8947_v10  ;;  %v9007_v10 = vpack.c.bf16 %v9005_v3, %v9006_v58 }
 0x320   :  { %1300 = vmatprep.subr.bf16.mxu1 %v8950_v21  ;;  %v9010_v21 = vpack.c.bf16 %v9008_v37, %v9009_v60 }
 0x323   :  { %1301 = vmatpush1.bf16.msra.mxu1 %v8953_v41  ;;  %v9013_v41 = vpack.c.bf16 %v9011_v20, %v9012_v18  ;;  %v9033_v18 = vld [vmem:[#allocation27_spill] sm:$0xff] }
 0x324   :  { %1302 = vmatprep.subr.bf16.mxu1 %v8955_v26  ;;  %v9015_v26 = vld [vmem:[#allocation29_spill] sm:$0xff] }
 0x327   :  { %1303 = vmatpush1.bf16.msra.mxu1 %v8956_v8  ;;  %v9016_v8 = vpack.c.bf16 %v9014_v16, %v9015_v26 }
 0x328   :  { %1304 = vmatprep.subr.bf16.mxu1 %v8957_v27  ;;  %v9017_v27 = vld [vmem:[#allocation57_spill] sm:$0xff] }
 0x32b   :  { %1305 = vmatpush1.bf16.msra.mxu1 %v8958_v14  ;;  %v9018_v14 = vld [vmem:[#allocation54_spill] sm:$0xff] }
 0x32c   :  { %1306 = vmatprep.subr.bf16.mxu1 %v8959_v59  ;;  %v9019_v59 = vpack.c.bf16 %v9017_v27, %v9018_v14 }
 0x32f   :  { %1307 = vmatpush1.bf16.msra.mxu1 %v8960_v39  ;;  %v9020_v39 = vld [vmem:[#allocation59_spill] sm:$0xff] }
 0x330   :  { %1319 = vmatprep.subr.bf16.mxu1 %v8961_v52  ;;  %v9021_v52 = vld [vmem:[#allocation56_spill] sm:$0xff] }
 0x332   :  { %1309 = vmatmul.mubr.bf16.vlgmr.msra.gmra.mrb[8].mxu1 %v7369_v55 }
 0x333   :  { %1320 = vmatpush1.bf16.msra.mxu1 %v8962_v4  ;;  %1351 = vmatprep.mubr.bf16.mxu1 %v7384_v6  ;;  %v8968_v6 = vpack.c.bf16 %v7580_v45, %v7571_v24  ;;  %v8986_v24 = vpack.c.bf16 %v8984_v29, %v8985_v46  ;;  %v8987_v45 = vld [vmem:[#allocation46_spill] sm:$0xff]  ;;  %v9022_v4 = vpack.c.bf16 %v9020_v39, %v9021_v52  ;;  %v1164_v29 = vsub.s32 3, %v9030_v33 }
 0x334   :  { %1321 = vmatprep.subr.bf16.mxu1 %v8963_v25  ;;  %v8989_v2 = vpack.c.bf16 %v8987_v45, %v8988_v1  ;;  %v9023_v25 = vld [vmem:[#allocation61_spill] sm:$0xff] }
 0x337   :  { %1322 = vmatpush1.bf16.msra.mxu1 %v8964_v54  ;;  %v9024_v54 = vld [vmem:[#allocation58_spill] sm:$0xff] }
 0x338   :  { %1323 = vmatprep.subr.bf16.mxu1 %v8965_v12  ;;  %v9025_v12 = vpack.c.bf16 %v9023_v25, %v9024_v54  ;;  %v1176_v25 = vsub.s32 6, %v9030_v33  ;;  %v1180_v54 = vsub.s32 7, %v9030_v33 }
 0x33b   :  { %1324 = vmatpush1.bf16.msra.mxu1 %v8966_v49  ;;  %v8182_v49 = vld [vmem:[%s8279_s7] sm:$0xff]  ;;  %s4247_s7 = smov [#allocation10]  }
 0x33c   :  { %1325 = vmatprep.subr.bf16.mxu1 %v8967_v11  ;;  %v9026_v11 = vld [vmem:[#allocation32_spill] sm:$0xff]  ;;  %v1169_v3 = vrot.slane %v8182_v49, %v1168_v44  ;;  %s4043_s16 = sshll.u32 %s4247_s7, 4  ;;  %s4044_s16 = int_to_ptr.vmem [resolvable:$true] %s4043_s16 }
 0x33d   :  { %s4154_s17 = scalar_lea.vmem %s4044_s16, 32768  ;;  %p4159_p3 = scmp.lt.s32.totalorder %s4044_s16, %s4044_s16 }
 0x33e   :  { %p4155_p2 = scmp.ne.s32.totalorder %s4044_s16, %s4154_s17  ;;  %p4160_p4 = scmp.lt.s32.totalorder %s4154_s17, %s4154_s17 }
 0x33f   :  { %1326 = vmatpush1.bf16.msra.mxu1 %v8968_v6  ;;  %v1153_v6 = vrot.slane %v8182_v49, %v9026_v11  ;;  %v1181_v11 = vrot.slane %v8182_v49, %v1180_v54 }
 0x340   :  { %1327 = vmatprep.subr.bf16.mxu1 %v8969_v43  ;;  %v9027_v43 = vld [vmem:[#allocation52_spill] sm:$0xff]  ;;  %p4161_p5 = por %p4160_p4, %p4159_p3 }
 0x342   :  { %p4162_p6 = pnand %p4161_p5, %p4155_p2 }
 0x343   :  { %1328 = vmatpush1.bf16.msra.mxu1 %v8970_v61  ;;  %v1157_v61 = vrot.slane %v8182_v49, %v9027_v43 }
 0x344   :  { %1329 = vmatprep.subr.bf16.mxu1 %v8971_v22 }
 0x347   :  { %1330 = vmatpush1.bf16.msra.mxu1 %v8972_v63 }
 0x348   :  { %1331 = vmatprep.subr.bf16.mxu1 %v8973_v36 }
 0x34b   :  { %1332 = vmatpush1.bf16.msra.mxu1 %v8974_v40 }
 0x34c   :  { %1333 = vmatprep.subr.bf16.mxu1 %v8977_v5 }
 0x34f   :  { %1334 = vmatpush1.bf16.msra.mxu1 %v8980_v53 }
 0x350   :  { %1335 = vmatprep.subr.bf16.mxu1 %v8983_v7  ;;  %v1160_v7 = vsub.s32 2, %v9030_v33 }
 0x352   :  { %v1161_v46 = vrot.slane %v8182_v49, %v1160_v7 }
 0x353   :  { %1336 = vmatpush1.bf16.msra.mxu1 %v8986_v24  ;;  %v1165_v24 = vrot.slane %v8182_v49, %v1164_v29 }
 0x354   :  { %1337 = vmatprep.subr.bf16.mxu1 %v8989_v2 }
 0x357   :  { %1338 = vmatpush1.bf16.msra.mxu1 %v8992_v48  ;;  %v9031_v48 = vld [vmem:[#allocation30_spill] sm:$0xff] }
 0x358   :  { %1339 = vmatprep.subr.bf16.mxu1 %v8995_v42 }
 0x35b   :  { %1340 = vmatpush1.bf16.msra.mxu1 %v8998_v31 }
 0x35c   :  { %1341 = vmatprep.subr.bf16.mxu1 %v9001_v9 }
 0x35f   :  { %1342 = vmatpush1.bf16.msra.mxu1 %v9004_v34  ;;  %v1172_v34 = vsub.s32 5, %v9030_v33 }
 0x360   :  { %1343 = vmatprep.subr.bf16.mxu1 %v9007_v10 }
 0x361   :  { %v1173_v58 = vrot.slane %v8182_v49, %v1172_v34 }
 0x363   :  { %1344 = vmatpush1.bf16.msra.mxu1 %v9010_v21 }
 0x364   :  { %1345 = vmatprep.subr.bf16.mxu1 %v9013_v41 }
 0x367   :  { %1346 = vmatpush1.bf16.msra.mxu1 %v9016_v8  ;;  %v9034_v8 = vld [vmem:[#allocation37_spill] sm:$0xff] }
 0x368   :  { %1347 = vmatprep.subr.bf16.mxu1 %v9019_v59 }
 0x369   :  { %v1224_v22 = vpop.f32.mrb[0].mxu1 }
 0x36a   :  { %v1225_v63 = vadd.f32 %v1224_v22, %v1153_v6  ;;  %v1226_v36 = vpop.f32.mrb[1].mxu1 }
 0x36b   :  { %1348 = vmatpush1.bf16.msra.mxu1 %v9022_v4  ;;  %v1227_v40 = vadd.f32 %v1226_v36, %v1157_v61  ;;  %v1228_v35 = vpop.f32.mrb[2].mxu1  ;;  %v9035_v36 = vld [vmem:[#allocation31_spill] sm:$0xff] }
 0x36c   :  { %1349 = vmatprep.subr.bf16.mxu1 %v9025_v12  ;;  %1362 = vst [vmem:[#allocation9] sm:$0xff] %v1225_v63  ;;  %v1378_v57 = vsub.f32 %v1225_v63, %v9028_v62  ;;  %v1177_v12 = vrot.slane %v8182_v49, %v1176_v25 }
 0x36d   :  { %1363 = vst [vmem:[#allocation9 + $0x8] sm:$0xff] %v1227_v40  ;;  %v1379_v5 = vsub.f32 %v1227_v40, %v9029_v30 }
 0x36e   :  { %v1394_v51 = vmul.f32 %v1378_v57, %v1378_v57 }
 0x36f   :  { %1350 = vmatpush1.bf16.msra.mxu1 %v1146_v32  ;;  %v1230_v32 = vpop.f32.mrb[3].mxu1  ;;  %v1395_v53 = vmul.f32 %v1379_v5, %v1379_v5 }
 0x370   :  { %v1231_v50 = vadd.f32 %v1230_v32, %v1157_v61 }
 0x371   :  { %v1431_v38 = vadd.f32 %v1395_v53, %v1394_v51 }
 0x372   :  { %1352 = vmatmul.mubr.bf16.vlgmr.msra.gmra.mrb[12].mxu1 %v7369_v55  ;;  %v1229_v55 = vadd.f32 %v1228_v35, %v1153_v6  ;;  %1371 = vst [vmem:[#allocation9 + $0x48] sm:$0xff] %v1231_v50 }
 0x374   :  { %1370 = vst [vmem:[#allocation9 + $0x40] sm:$0xff] %v1229_v55  ;;  %v9036_v55 = vld [vmem:[#allocation28_spill] sm:$0xff] }
 0x3c1   :  { %v1267_v45 = vpop.f32.mrb[4].mxu1 }
 0x3c2   :  { %v1268_v1 = vadd.f32 %v1267_v45, %v1161_v46  ;;  %v1269_v2 = vpop.f32.mrb[5].mxu1 }
 0x3c3   :  { %v1270_v23 = vadd.f32 %v1269_v2, %v1165_v24  ;;  %v1271_v15 = vpop.f32.mrb[6].mxu1 }
 0x3c4   :  { %1364 = vst [vmem:[#allocation9 + $0x10] sm:$0xff] %v1268_v1  ;;  %v1380_v0 = vsub.f32 %v1268_v1, %v9031_v48  ;;  %v1272_v17 = vadd.f32 %v1271_v15, %v1161_v46  ;;  %v1273_v42 = vpop.f32.mrb[7].mxu1 }
 0x3c5   :  { %1365 = vst [vmem:[#allocation9 + $0x18] sm:$0xff] %v1270_v23  ;;  %v1381_v13 = vsub.f32 %v1270_v23, %v9032_v47  ;;  %v1274_v31 = vadd.f32 %v1273_v42, %v1165_v24 }
 0x3c6   :  { %v1396_v28 = vmul.f32 %v1380_v0, %v1380_v0  ;;  %1372 = vst [vmem:[#allocation9 + $0x50] sm:$0xff] %v1272_v17 }
 0x3c7   :  { %v1397_v19 = vmul.f32 %v1381_v13, %v1381_v13  ;;  %1373 = vst [vmem:[#allocation9 + $0x58] sm:$0xff] %v1274_v31 }
 0x3c8   :  { %v1432_v9 = vadd.f32 %v1431_v38, %v1396_v28 }
 0x3ca   :  { %v1433_v56 = vadd.f32 %v1432_v9, %v1397_v19 }
 0x405   :  { %v1310_v10 = vpop.f32.mrb[8].mxu1 }
 0x406   :  { %v1311_v37 = vadd.f32 %v1310_v10, %v1169_v3  ;;  %v1312_v60 = vpop.f32.mrb[9].mxu1 }
 0x407   :  { %v1313_v21 = vadd.f32 %v1312_v60, %v1173_v58  ;;  %v1314_v20 = vpop.f32.mrb[10].mxu1 }
 0x408   :  { %1366 = vst [vmem:[#allocation9 + $0x20] sm:$0xff] %v1311_v37  ;;  %v1382_v41 = vsub.f32 %v1311_v37, %v9033_v18  ;;  %v1315_v16 = vadd.f32 %v1314_v20, %v1169_v3  ;;  %v1316_v26 = vpop.f32.mrb[11].mxu1 }
 0x409   :  { %1367 = vst [vmem:[#allocation9 + $0x28] sm:$0xff] %v1313_v21  ;;  %v1383_v27 = vsub.f32 %v1313_v21, %v9034_v8  ;;  %v1317_v14 = vadd.f32 %v1316_v26, %v1173_v58 }
 0x40a   :  { %v1398_v59 = vmul.f32 %v1382_v41, %v1382_v41  ;;  %1374 = vst [vmem:[#allocation9 + $0x60] sm:$0xff] %v1315_v16 }
 0x40b   :  { %v1399_v39 = vmul.f32 %v1383_v27, %v1383_v27  ;;  %1375 = vst [vmem:[#allocation9 + $0x68] sm:$0xff] %v1317_v14 }
 0x40c   :  { %v1434_v52 = vadd.f32 %v1433_v56, %v1398_v59 }
 0x40e   :  { %v1435_v4 = vadd.f32 %v1434_v52, %v1399_v39 }
 0x445   :  { %v1353_v6 = vpop.f32.mrb[12].mxu1 }
 0x446   :  { %v1354_v43 = vadd.f32 %v1353_v6, %v1177_v12  ;;  %v1355_v61 = vpop.f32.mrb[13].mxu1 }
 0x447   :  { %v1356_v22 = vadd.f32 %v1355_v61, %v1181_v11  ;;  %v1357_v63 = vpop.f32.mrb[14].mxu1 }
 0x448   :  { %1368 = vst [vmem:[#allocation9 + $0x30] sm:$0xff] %v1354_v43  ;;  %v1384_v40 = vsub.f32 %v1354_v43, %v9035_v36  ;;  %v1358_v35 = vadd.f32 %v1357_v63, %v1177_v12  ;;  %v1359_v62 = vpop.f32.mrb[15].mxu1 }
 0x449   :  { %1369 = vst [vmem:[#allocation9 + $0x38] sm:$0xff] %v1356_v22  ;;  %v1360_v57 = vadd.f32 %v1359_v62, %v1181_v11  ;;  %v1385_v32 = vsub.f32 %v1356_v22, %v9036_v55 }
 0x44a   :  { %v1400_v30 = vmul.f32 %v1384_v40, %v1384_v40  ;;  %1376 = vst [vmem:[#allocation9 + $0x70] sm:$0xff] %v1358_v35 }
 0x44b   :  { %1377 = vst [vmem:[#allocation9 + $0x78] sm:$0xff] %v1360_v57  ;;  %v1401_v5 = vmul.f32 %v1385_v32, %v1385_v32 }
 0x44c   :  { %v1436_v50 = vadd.f32 %v1435_v4, %v1400_v30 }
 0x44e   :  { %v1437_v49 = vadd.f32 %v1436_v50, %v1401_v5 }
 0x450   :  { %1446 = vadd.xlane.f32.xlu1 %v1437_v49 }
 0x451   :  { %4165 = shalt.err (!%p4162_p6)
}
 0x452   :  { %s4166_s21 = scalar_lea.hbm %s8284_s12, 32768 }
 0x453   :  { %p4167_p7 = scmp.ne.s32.totalorder %s8284_s12, %s4166_s21  ;;  %p4170_p8 = scmp.lt.u32.totalorder %s4166_s21, %s8284_s12 }
 0x455   :  { %p4172_p9 = pnand %p4170_p8, %p4167_p7 }
 0x457   :  { %4175 = shalt.err (!%p4172_p9)
}
 0x458   :  { %4049 = dma.vmem_to_hbm [thread:$0]  %s4044_s16, 32768, %s8284_s12, [#allocation11], %s4241_s18, %s4241_s18, %s4242_s19  }
 0x459   :  { %s4248_s1 = smov [#allocation9]   ;;  %s4249_s23 = smov [#allocation12]  }
 0x45a   :  { %s4031_s9 = sshll.u32 %s4248_s1, 4  ;;  %s4055_s28 = sshll.u32 %s4249_s23, 4  ;;  %s4032_s9 = int_to_ptr.vmem [resolvable:$true] %s4031_s9  ;;  %s8223_s28 = int_to_ptr.vmem [resolvable:$true] %s4055_s28 }
 0x45b   :  { %s4176_s5 = scalar_lea.vmem %s4032_s9, 2048  ;;  %p4181_p11 = scmp.lt.s32.totalorder %s4032_s9, %s4032_s9 }
 0x45c   :  { %p4177_p10 = scmp.ne.s32.totalorder %s4032_s9, %s4176_s5  ;;  %p4182_p12 = scmp.lt.s32.totalorder %s4176_s5, %s4176_s5 }
 0x45e   :  { %p4183_p13 = por %p4182_p12, %p4181_p11 }
 0x460   :  { %p4184_p0 = pnand %p4183_p13, %p4177_p10 }
 0x462   :  { %4187 = shalt.err (!%p4184_p0)
}
 0x463   :  { %s4188_s30 = scalar_lea.hbm %s8283_s11, 2048 }
 0x464   :  { %p4189_p1 = scmp.ne.s32.totalorder %s8283_s11, %s4188_s30  ;;  %p4192_p2 = scmp.lt.u32.totalorder %s4188_s30, %s8283_s11 }
 0x466   :  { %p4194_p3 = pnand %p4192_p2, %p4189_p1 }
 0x468   :  { %4197 = shalt.err (!%p4194_p3)
}
 0x469   :  { %4037 = dma.vmem_to_hbm [thread:$0]  %s4032_s9, 2048, %s8283_s11, [#allocation4], %s4244_s8, %s4244_s8, %s4245_s26  }
 0x46a   :  { %s4198_s7 = scalar_lea.vmem %s8223_s28, 32768  ;;  %p4203_p5 = scmp.lt.s32.totalorder %s8223_s28, %s8223_s28 }
 0x46b   :  { %p4199_p4 = scmp.ne.s32.totalorder %s8223_s28, %s4198_s7  ;;  %p4204_p6 = scmp.lt.s32.totalorder %s4198_s7, %s4198_s7 }
 0x46d   :  { %p4205_p7 = por %p4204_p6, %p4203_p5 }
 0x46f   :  { %p4206_p8 = pnand %p4205_p7, %p4199_p4 }
 0x471   :  { %4209 = shalt.err (!%p4206_p8)
}
 0x472   :  { %s4210_s3 = scalar_lea.hbm %s8285_s13, 32768 }
 0x473   :  { %p4211_p9 = scmp.ne.s32.totalorder %s8285_s13, %s4210_s3  ;;  %p4214_p10 = scmp.lt.u32.totalorder %s4210_s3, %s8285_s13 }
 0x475   :  { %p4216_p11 = pnand %p4214_p10, %p4211_p9 }
 0x477   :  { %4219 = shalt.err (!%p4216_p11)
}
 0x478   :  { %4061 = dma.vmem_to_hbm [thread:$0]  %s8223_s28, 32768, %s8285_s13, [#allocation11], %s4244_s8, %s4244_s8, %s4245_s26  }
 0x479   :  { %s4220_s9 = scalar_lea.hbm %s8282_s10, 16 }
 0x47a   :  { %p4221_p12 = scmp.ne.s32.totalorder %s8282_s10, %s4220_s9  ;;  %p4224_p13 = scmp.lt.u32.totalorder %s4220_s9, %s8282_s10 }
 0x47c   :  { %p4226_p0 = pnand %p4224_p13, %p4221_p12 }
 0x4dd   :  { %v1447_v51 = vpop.xlane.xlu1 %1446 }
 0x4de   :  { %v1448_v53 = vrot.slane %v1447_v51, 4 }
 0x4e0   :  { %v1449_v38 = vadd.f32 %v1448_v53, %v1447_v51 }
 0x4e2   :  { %v1450_v33 = vrot.slane %v1449_v38, 2 }
 0x4e4   :  { %v1451_v7 = vadd.f32 %v1450_v33, %v1449_v38 }
 0x4e6   :  { %v1452_v29 = vrot.slane %v1451_v7, 1 }
 0x4e8   :  { %v1453_v46 = vadd.f32 %v1452_v29, %v1451_v7 }
 0x4ea   :  { %4096 = vpush %v1453_v46 }
 0x51b   :  { %s4097_s27 = spop %4096 }
 0x51c   :  { %s1455_s4 = smul.f32 0.00012207031, %s4097_s27 }
 0x51e   :  { %1457 = sst [smem:[#allocation8]] %s1455_s4 }
 0x51f   :  { %4229 = shalt.err (!%p4226_p0)
}
 0x520   :  { %s4250_s26 = smov [#allocation8]  }
 0x521   :  { %4025 = dma.smem_to_hbm %s4250_s26, 16, %s8282_s10, [#allocation5]  }
 0x522   :  { %4234 = dma.done.wait [#allocation5], 16  }
 0x523   :  { %4235 = vsyncadd [#allocation5], 4294967280 }
 0x524   :  { %4236 = dma.done.wait [#allocation4], 2048  }
 0x525   :  { %4237 = vsyncadd [#allocation4], 4294965248 }
 0x526   :  { %4238 = dma.done.wait [#allocation11], 65536  }
 0x527   :  { %4239 = vsyncadd [#allocation11], 4294901760 }
 0x528   :  { %4074 = sfence }
 0x529   :  { %4075 = vsyncpa [#allocation3], 1 }
 0x52a   :  { %4076 = vsyncpa [#allocation7], 1 }
 0x52b   :  { %4077 = vsyncpa [#allocation4], 1 }
 0x52c   :  { %4078 = vsyncpa [#allocation11], 1 }
 0x52d   :  { %4079 = vsyncpa [#allocation5], 1 }

</bundles_post_ra>
